<compile_context>
chip_gen: v7x
topology: tpu7x:2x2x1
jax: 0.10.0
libtpu: 0.0.40
codegen_flags: <defaults>
</compile_context>

<pallas_src>
from math import sqrt

import jax
import jax.numpy as jnp
import numpy as np
from jax import lax
from jax.experimental import pallas as pl
from jax.experimental.pallas import tpu as pltpu

# Constants hard-coded by the module.
C_IN = 128
C_OUT = 128
KSIZE = 7
STRIDE = 3
PAD = 3
NEG_SLOPE = 0.01                     # nn.LeakyReLU() default negative_slope
AH_MAX = (KSIZE - 1) // STRIDE       # = 2 extra decomposed rows/cols needed per tile
TARGET_M = 256                       # target matmul M (rows) per MXU call


def conv_relu_kernel(x_ref, w_ref, o_ref, stage_ref):
    """One (batch, output-row-tile) grid step.

    x_ref:     (S, S, Hq, Wq, Cin)          bf16  stride-decomposed, zero-padded image:
               x_ref[h % S, w % S, h // S, w // S, c] == x_padded[h, w, c]
    w_ref:     (KH*KW*Cin, Cout)            bf16  im2col-ordered weight
    o_ref:     (tile_oh, Wo_pad, Cout)      f32
    stage_ref: (tile_oh*Wo_pad, KH*KW*Cin)  bf16  im2col staging buffer
    """
    tile_oh, wo, cout = o_ref.shape
    m = tile_oh * wo
    row0 = pl.program_id(1) * tile_oh          # first output row of this spatial tile

    # Stage the full im2col for this tile:
    #   stage[oh*wo + ow, (kh*KW+kw)*Cin + c] == x_padded[(row0+oh)*S + kh, ow*S + kw, c]
    for kh in range(KSIZE):
        ah, bh = kh // STRIDE, kh % STRIDE
        for kw in range(KSIZE):
            aw, bw = kw // STRIDE, kw % STRIDE
            tap = kh * KSIZE + kw
            patch = x_ref[bh, bw, pl.ds(row0 + ah, tile_oh), pl.ds(aw, wo), :]
            stage_ref[:, tap * C_IN:(tap + 1) * C_IN] = patch.reshape(m, C_IN)

    # One fat MXU call: (M, 49*Cin) x (49*Cin, Cout), f32 accumulation on the MXU.
    y = jnp.dot(stage_ref[...], w_ref[...], preferred_element_type=jnp.float32)

    # LeakyReLU epilogue in f32 (keeps it off bf16 VPU paths; v5e-friendly).
    y = jnp.where(y > 0, y, NEG_SLOPE * y)
    o_ref[...] = y.reshape(tile_oh, wo, cout).astype(o_ref.dtype)


def conv_relu_block7(x_nchw, w_oihw):
    """x_nchw: (N, 128, H, W) f32; w_oihw: (128, 128, 7, 7) f32 -> (N, 128, Ho, Wo) f32."""
    N, C, H, W = x_nchw.shape
    assert C == C_IN
    Ho = (H + 2 * PAD - KSIZE) // STRIDE + 1
    Wo = (W + 2 * PAD - KSIZE) // STRIDE + 1

    # ---- tiling parameters ----
    Wo_pad = -(-Wo // 8) * 8                       # sublane-friendly output width
    tile_target = max(1, -(-TARGET_M // Wo_pad))   # rows per tile so M ~= TARGET_M
    n_t = -(-Ho // tile_target)                    # number of spatial (output-row) tiles
    tile_oh = -(-Ho // n_t)                        # balanced tile height
    if (tile_oh * Wo_pad) % 16 and tile_oh < Ho:   # keep M a multiple of 16 (bf16 tiles)
        tile_oh += 1
    Ho_pad = n_t * tile_oh

    # Decomposed extents: must cover the zero-padded image and every tap window.
    Hq = max(-(-(H + 2 * PAD) // STRIDE), Ho_pad + AH_MAX)
    Wq = max(-(-(W + 2 * PAD) // STRIDE), Wo_pad + AH_MAX)

    # ---- glue: pad + reshape + single 6-D transpose + bf16 cast ----
    # NCHW -> (N, S, S, Hq, Wq, C) with x_dec[n, bh, bw, qh, qw, c] = x_pad[n, c, qh*S+bh, qw*S+bw]
    xp = jnp.pad(x_nchw, ((0, 0), (0, 0),
                          (PAD, STRIDE * Hq - H - PAD),
                          (PAD, STRIDE * Wq - W - PAD)))
    xp = xp.reshape(N, C, Hq, STRIDE, Wq, STRIDE)
    x_dec = jnp.transpose(xp, (0, 3, 5, 2, 4, 1)).astype(jnp.bfloat16)

    # (O, I, KH, KW) -> (KH*KW*I, O), bf16, matching the im2col column order above.
    w = jnp.transpose(w_oihw, (2, 3, 1, 0)).reshape(KSIZE * KSIZE * C_IN, C_OUT)
    w = w.astype(jnp.bfloat16)

    # ---- VMEM budget: double-buffered in/out blocks + weight + staging, with headroom ----
    m = tile_oh * Wo_pad
    in_block = STRIDE * STRIDE * Hq * Wq * C_IN * 2        # bf16 decomposed image block
    w_bytes = KSIZE * KSIZE * C_IN * C_OUT * 2             # bf16 im2col weight
    out_block = m * C_OUT * 4                              # f32 output tile
    stage = m * KSIZE * KSIZE * C_IN * 2                   # bf16 im2col staging
    footprint = 2 * (in_block + w_bytes + out_block) + stage
    vmem_limit = max(16 << 20, min(int(1.25 * footprint) + (2 << 20), 48 << 20))
    # TODO(synk): for very large H/W the Hq axis should additionally be windowed (overlapping
    # halo tiles via manual DMA) to keep the resident decomposed image under v7x's 64 MiB VMEM.

    out_nhwc = pl.pallas_call(
        conv_relu_kernel,
        out_shape=jax.ShapeDtypeStruct((N, Ho_pad, Wo_pad, C_OUT), jnp.float32),
        grid_spec=pltpu.PrefetchScalarGridSpec(
            num_scalar_prefetch=0,
            grid=(N, n_t),
            in_specs=[
                pl.BlockSpec((None, STRIDE, STRIDE, Hq, Wq, C_IN),
                             lambda n, t: (n, 0, 0, 0, 0, 0)),
                pl.BlockSpec((KSIZE * KSIZE * C_IN, C_OUT),
                             lambda n, t: (0, 0)),
            ],
            out_specs=pl.BlockSpec((None, tile_oh, Wo_pad, C_OUT),
                                   lambda n, t: (n, t, 0, 0)),
            scratch_shapes=[
                pltpu.VMEM((m, KSIZE * KSIZE * C_IN), jnp.bfloat16),  # im2col staging
            ],
        ),
        compiler_params=pltpu.CompilerParams(
            dimension_semantics=("parallel", "parallel"),
            vmem_limit_bytes=vmem_limit,
        ),
    )(x_dec, w)

    out_nhwc = out_nhwc[:, :Ho, :Wo, :]
    return jnp.transpose(out_nhwc, (0, 3, 1, 2))               # back to NCHW


def _reference_bf16(x, w):
    """Same math as the kernel: bf16 inputs, f32 accumulation, LeakyReLU(0.01)."""
    y = lax.conv_general_dilated(
        x.astype(jnp.bfloat16), w.astype(jnp.bfloat16),
        window_strides=(STRIDE, STRIDE),
        padding=((PAD, PAD), (PAD, PAD)),
        dimension_numbers=("NCHW", "OIHW", "NCHW"),
        preferred_element_type=jnp.float32)
    return jnp.where(y > 0, y, NEG_SLOPE * y)


if __name__ == "__main__":
    key = jax.random.PRNGKey(0)
    kx, kw = jax.random.split(key)
    # Deterministic kaiming-like init for nn.Conv2d weight (O, I, KH, KW), bias=False.
    w = jax.random.normal(kw, (C_OUT, C_IN, KSIZE, KSIZE), jnp.float32) * sqrt(
        2.0 / (C_IN * KSIZE * KSIZE))

    fn = jax.jit(conv_relu_block7)

    # Small shape + a non-aligned shape (exercises Wo/Ho padding and 2 spatial tiles).
    for (N, H, W) in [(2, 24, 24), (2, 52, 52)]:
        x = jax.random.normal(jax.random.fold_in(kx, H), (N, C_IN, H, W), jnp.float32)
        out = jax.block_until_ready(fn(x, w))

        Ho = (H + 2 * PAD - KSIZE) // STRIDE + 1
        Wo = (W + 2 * PAD - KSIZE) // STRIDE + 1
        assert out.shape == (N, C_OUT, Ho, Wo), out.shape

        # Tight check vs. reference with identical precision (bf16 in, f32 acc).
        ref = _reference_bf16(x, w)
        err = float(np.max(np.abs(np.asarray(out) - np.asarray(ref))))
        assert np.allclose(np.asarray(out), np.asarray(ref), rtol=1e-2, atol=1e-2), err

        # Loose sanity check vs. full-f32 conv (bf16 input rounding is the only diff).
        ref32 = lax.conv_general_dilated(
            x, w, window_strides=(STRIDE, STRIDE), padding=((PAD, PAD), (PAD, PAD)),
            dimension_numbers=("NCHW", "OIHW", "NCHW"))
        ref32 = jnp.where(ref32 > 0, ref32, NEG_SLOPE * ref32)
        assert np.allclose(np.asarray(out), np.asarray(ref32), rtol=1e-1, atol=1e-1)

    print("KERNEL_OK")
</pallas_src>

<mosaic_0001>
module attributes {stable_mosaic.version = 11 : i64} {
  func.func @conv_relu_kernel(%arg0: i32, %arg1: i32, %arg2: memref<1x3x3x10x10x128xbf16, #tpu.memory_space<vmem>>, %arg3: memref<6272x128xbf16, #tpu.memory_space<vmem>>, %arg4: memref<1x8x8x128xf32, #tpu.memory_space<vmem>>, %arg5: memref<64x6272xbf16, #tpu.memory_space<vmem>>) attributes {dimension_semantics = [#tpu.dimension_semantics<parallel>, #tpu.dimension_semantics<parallel>], iteration_bounds = array<i64: 2, 1>, scalar_prefetch = 0 : i64, scratch_operands = 1 : i64, tpu.core_type = #tpu.core_type<tc>, window_params = [{transform_indices = @transform_0, window_bounds = array<i64: 1, 3, 3, 10, 10, 128>}, {pipeline_mode = #tpu.pipeline_mode<synchronous>, transform_indices = @transform_1, window_bounds = array<i64: 6272, 128>}, {transform_indices = @transform_2, window_bounds = array<i64: 1, 8, 8, 128>}]} {
    %c8_i32 = arith.constant 8 : i32
    %0 = arith.muli %arg1, %c8_i32 : i32
    %c0_i32 = arith.constant 0 : i32
    %1 = arith.addi %0, %c0_i32 : i32
    %c0 = arith.constant 0 : index
    %c0_0 = arith.constant 0 : index
    %c0_1 = arith.constant 0 : index
    %2 = arith.index_cast %1 : i32 to index
    %c0_2 = arith.constant 0 : index
    %c0_3 = arith.constant 0 : index
    %3 = vector.load %arg2[%c0, %c0_0, %c0_1, %2, %c0_2, %c0_3] : memref<1x3x3x10x10x128xbf16, #tpu.memory_space<vmem>>, vector<1x1x1x8x8x128xbf16>
    %4 = vector.shape_cast %3 : vector<1x1x1x8x8x128xbf16> to vector<8x8x128xbf16>
    %5 = vector.shape_cast %4 : vector<8x8x128xbf16> to vector<64x128xbf16>
    %c0_4 = arith.constant 0 : index
    %c0_5 = arith.constant 0 : index
    %6 = vector.load %arg5[%c0_4, %c0_5] : memref<64x6272xbf16, #tpu.memory_space<vmem>>, vector<64x128xbf16>
    tpu.vector_store %arg5[%c0_4, %c0_5], %5 {strides = array<i32>} : memref<64x6272xbf16, #tpu.memory_space<vmem>>, vector<64x128xbf16>,
    %c0_i32_6 = arith.constant 0 : i32
    %7 = arith.addi %0, %c0_i32_6 : i32
    %c0_7 = arith.constant 0 : index
    %c0_8 = arith.constant 0 : index
    %c1 = arith.constant 1 : index
    %8 = arith.index_cast %7 : i32 to index
    %c0_9 = arith.constant 0 : index
    %c0_10 = arith.constant 0 : index
    %9 = vector.load %arg2[%c0_7, %c0_8, %c1, %8, %c0_9, %c0_10] : memref<1x3x3x10x10x128xbf16, #tpu.memory_space<vmem>>, vector<1x1x1x8x8x128xbf16>
    %10 = vector.shape_cast %9 : vector<1x1x1x8x8x128xbf16> to vector<8x8x128xbf16>
    %11 = vector.shape_cast %10 : vector<8x8x128xbf16> to vector<64x128xbf16>
    %c0_11 = arith.constant 0 : index
    %c128 = arith.constant 128 : index
    %12 = vector.load %arg5[%c0_11, %c128] : memref<64x6272xbf16, #tpu.memory_space<vmem>>, vector<64x128xbf16>
    tpu.vector_store %arg5[%c0_11, %c128], %11 {strides = array<i32>} : memref<64x6272xbf16, #tpu.memory_space<vmem>>, vector<64x128xbf16>,
    %c0_i32_12 = arith.constant 0 : i32
    %13 = arith.addi %0, %c0_i32_12 : i32
    %c0_13 = arith.constant 0 : index
    %c0_14 = arith.constant 0 : index
    %c2 = arith.constant 2 : index
    %14 = arith.index_cast %13 : i32 to index
    %c0_15 = arith.constant 0 : index
    %c0_16 = arith.constant 0 : index
    %15 = vector.load %arg2[%c0_13, %c0_14, %c2, %14, %c0_15, %c0_16] : memref<1x3x3x10x10x128xbf16, #tpu.memory_space<vmem>>, vector<1x1x1x8x8x128xbf16>
    %16 = vector.shape_cast %15 : vector<1x1x1x8x8x128xbf16> to vector<8x8x128xbf16>
    %17 = vector.shape_cast %16 : vector<8x8x128xbf16> to vector<64x128xbf16>
    %c0_17 = arith.constant 0 : index
    %c256 = arith.constant 256 : index
    %18 = vector.load %arg5[%c0_17, %c256] : memref<64x6272xbf16, #tpu.memory_space<vmem>>, vector<64x128xbf16>
    tpu.vector_store %arg5[%c0_17, %c256], %17 {strides = array<i32>} : memref<64x6272xbf16, #tpu.memory_space<vmem>>, vector<64x128xbf16>,
    %c0_i32_18 = arith.constant 0 : i32
    %19 = arith.addi %0, %c0_i32_18 : i32
    %c0_19 = arith.constant 0 : index
    %c0_20 = arith.constant 0 : index
    %c0_21 = arith.constant 0 : index
    %20 = arith.index_cast %19 : i32 to index
    %c1_22 = arith.constant 1 : index
    %c0_23 = arith.constant 0 : index
    %21 = vector.load %arg2[%c0_19, %c0_20, %c0_21, %20, %c1_22, %c0_23] : memref<1x3x3x10x10x128xbf16, #tpu.memory_space<vmem>>, vector<1x1x1x8x8x128xbf16>
    %22 = vector.shape_cast %21 : vector<1x1x1x8x8x128xbf16> to vector<8x8x128xbf16>
    %23 = vector.shape_cast %22 : vector<8x8x128xbf16> to vector<64x128xbf16>
    %c0_24 = arith.constant 0 : index
    %c384 = arith.constant 384 : index
    %24 = vector.load %arg5[%c0_24, %c384] : memref<64x6272xbf16, #tpu.memory_space<vmem>>, vector<64x128xbf16>
    tpu.vector_store %arg5[%c0_24, %c384], %23 {strides = array<i32>} : memref<64x6272xbf16, #tpu.memory_space<vmem>>, vector<64x128xbf16>,
    %c0_i32_25 = arith.constant 0 : i32
    %25 = arith.addi %0, %c0_i32_25 : i32
    %c0_26 = arith.constant 0 : index
    %c0_27 = arith.constant 0 : index
    %c1_28 = arith.constant 1 : index
    %26 = arith.index_cast %25 : i32 to index
    %c1_29 = arith.constant 1 : index
    %c0_30 = arith.constant 0 : index
    %27 = vector.load %arg2[%c0_26, %c0_27, %c1_28, %26, %c1_29, %c0_30] : memref<1x3x3x10x10x128xbf16, #tpu.memory_space<vmem>>, vector<1x1x1x8x8x128xbf16>
    %28 = vector.shape_cast %27 : vector<1x1x1x8x8x128xbf16> to vector<8x8x128xbf16>
    %29 = vector.shape_cast %28 : vector<8x8x128xbf16> to vector<64x128xbf16>
    %c0_31 = arith.constant 0 : index
    %c512 = arith.constant 512 : index
    %30 = vector.load %arg5[%c0_31, %c512] : memref<64x6272xbf16, #tpu.memory_space<vmem>>, vector<64x128xbf16>
    tpu.vector_store %arg5[%c0_31, %c512], %29 {strides = array<i32>} : memref<64x6272xbf16, #tpu.memory_space<vmem>>, vector<64x128xbf16>,
    %c0_i32_32 = arith.constant 0 : i32
    %31 = arith.addi %0, %c0_i32_32 : i32
    %c0_33 = arith.constant 0 : index
    %c0_34 = arith.constant 0 : index
    %c2_35 = arith.constant 2 : index
    %32 = arith.index_cast %31 : i32 to index
    %c1_36 = arith.constant 1 : index
    %c0_37 = arith.constant 0 : index
    %33 = vector.load %arg2[%c0_33, %c0_34, %c2_35, %32, %c1_36, %c0_37] : memref<1x3x3x10x10x128xbf16, #tpu.memory_space<vmem>>, vector<1x1x1x8x8x128xbf16>
    %34 = vector.shape_cast %33 : vector<1x1x1x8x8x128xbf16> to vector<8x8x128xbf16>
    %35 = vector.shape_cast %34 : vector<8x8x128xbf16> to vector<64x128xbf16>
    %c0_38 = arith.constant 0 : index
    %c640 = arith.constant 640 : index
    %36 = vector.load %arg5[%c0_38, %c640] : memref<64x6272xbf16, #tpu.memory_space<vmem>>, vector<64x128xbf16>
    tpu.vector_store %arg5[%c0_38, %c640], %35 {strides = array<i32>} : memref<64x6272xbf16, #tpu.memory_space<vmem>>, vector<64x128xbf16>,
    %c0_i32_39 = arith.constant 0 : i32
    %37 = arith.addi %0, %c0_i32_39 : i32
    %c0_40 = arith.constant 0 : index
    %c0_41 = arith.constant 0 : index
    %c0_42 = arith.constant 0 : index
    %38 = arith.index_cast %37 : i32 to index
    %c2_43 = arith.constant 2 : index
    %c0_44 = arith.constant 0 : index
    %39 = vector.load %arg2[%c0_40, %c0_41, %c0_42, %38, %c2_43, %c0_44] : memref<1x3x3x10x10x128xbf16, #tpu.memory_space<vmem>>, vector<1x1x1x8x8x128xbf16>
    %40 = vector.shape_cast %39 : vector<1x1x1x8x8x128xbf16> to vector<8x8x128xbf16>
    %41 = vector.shape_cast %40 : vector<8x8x128xbf16> to vector<64x128xbf16>
    %c0_45 = arith.constant 0 : index
    %c768 = arith.constant 768 : index
    %42 = vector.load %arg5[%c0_45, %c768] : memref<64x6272xbf16, #tpu.memory_space<vmem>>, vector<64x128xbf16>
    tpu.vector_store %arg5[%c0_45, %c768], %41 {strides = array<i32>} : memref<64x6272xbf16, #tpu.memory_space<vmem>>, vector<64x128xbf16>,
    %c0_i32_46 = arith.constant 0 : i32
    %43 = arith.addi %0, %c0_i32_46 : i32
    %c0_47 = arith.constant 0 : index
    %c1_48 = arith.constant 1 : index
    %c0_49 = arith.constant 0 : index
    %44 = arith.index_cast %43 : i32 to index
    %c0_50 = arith.constant 0 : index
    %c0_51 = arith.constant 0 : index
    %45 = vector.load %arg2[%c0_47, %c1_48, %c0_49, %44, %c0_50, %c0_51] : memref<1x3x3x10x10x128xbf16, #tpu.memory_space<vmem>>, vector<1x1x1x8x8x128xbf16>
    %46 = vector.shape_cast %45 : vector<1x1x1x8x8x128xbf16> to vector<8x8x128xbf16>
    %47 = vector.shape_cast %46 : vector<8x8x128xbf16> to vector<64x128xbf16>
    %c0_52 = arith.constant 0 : index
    %c896 = arith.constant 896 : index
    %48 = vector.load %arg5[%c0_52, %c896] : memref<64x6272xbf16, #tpu.memory_space<vmem>>, vector<64x128xbf16>
    tpu.vector_store %arg5[%c0_52, %c896], %47 {strides = array<i32>} : memref<64x6272xbf16, #tpu.memory_space<vmem>>, vector<64x128xbf16>,
    %c0_i32_53 = arith.constant 0 : i32
    %49 = arith.addi %0, %c0_i32_53 : i32
    %c0_54 = arith.constant 0 : index
    %c1_55 = arith.constant 1 : index
    %c1_56 = arith.constant 1 : index
    %50 = arith.index_cast %49 : i32 to index
    %c0_57 = arith.constant 0 : index
    %c0_58 = arith.constant 0 : index
    %51 = vector.load %arg2[%c0_54, %c1_55, %c1_56, %50, %c0_57, %c0_58] : memref<1x3x3x10x10x128xbf16, #tpu.memory_space<vmem>>, vector<1x1x1x8x8x128xbf16>
    %52 = vector.shape_cast %51 : vector<1x1x1x8x8x128xbf16> to vector<8x8x128xbf16>
    %53 = vector.shape_cast %52 : vector<8x8x128xbf16> to vector<64x128xbf16>
    %c0_59 = arith.constant 0 : index
    %c1024 = arith.constant 1024 : index
    %54 = vector.load %arg5[%c0_59, %c1024] : memref<64x6272xbf16, #tpu.memory_space<vmem>>, vector<64x128xbf16>
    tpu.vector_store %arg5[%c0_59, %c1024], %53 {strides = array<i32>} : memref<64x6272xbf16, #tpu.memory_space<vmem>>, vector<64x128xbf16>,
    %c0_i32_60 = arith.constant 0 : i32
    %55 = arith.addi %0, %c0_i32_60 : i32
    %c0_61 = arith.constant 0 : index
    %c1_62 = arith.constant 1 : index
    %c2_63 = arith.constant 2 : index
    %56 = arith.index_cast %55 : i32 to index
    %c0_64 = arith.constant 0 : index
    %c0_65 = arith.constant 0 : index
    %57 = vector.load %arg2[%c0_61, %c1_62, %c2_63, %56, %c0_64, %c0_65] : memref<1x3x3x10x10x128xbf16, #tpu.memory_space<vmem>>, vector<1x1x1x8x8x128xbf16>
    %58 = vector.shape_cast %57 : vector<1x1x1x8x8x128xbf16> to vector<8x8x128xbf16>
    %59 = vector.shape_cast %58 : vector<8x8x128xbf16> to vector<64x128xbf16>
    %c0_66 = arith.constant 0 : index
    %c1152 = arith.constant 1152 : index
    %60 = vector.load %arg5[%c0_66, %c1152] : memref<64x6272xbf16, #tpu.memory_space<vmem>>, vector<64x128xbf16>
    tpu.vector_store %arg5[%c0_66, %c1152], %59 {strides = array<i32>} : memref<64x6272xbf16, #tpu.memory_space<vmem>>, vector<64x128xbf16>,
    %c0_i32_67 = arith.constant 0 : i32
    %61 = arith.addi %0, %c0_i32_67 : i32
    %c0_68 = arith.constant 0 : index
    %c1_69 = arith.constant 1 : index
    %c0_70 = arith.constant 0 : index
    %62 = arith.index_cast %61 : i32 to index
    %c1_71 = arith.constant 1 : index
    %c0_72 = arith.constant 0 : index
    %63 = vector.load %arg2[%c0_68, %c1_69, %c0_70, %62, %c1_71, %c0_72] : memref<1x3x3x10x10x128xbf16, #tpu.memory_space<vmem>>, vector<1x1x1x8x8x128xbf16>
    %64 = vector.shape_cast %63 : vector<1x1x1x8x8x128xbf16> to vector<8x8x128xbf16>
    %65 = vector.shape_cast %64 : vector<8x8x128xbf16> to vector<64x128xbf16>
    %c0_73 = arith.constant 0 : index
    %c1280 = arith.constant 1280 : index
    %66 = vector.load %arg5[%c0_73, %c1280] : memref<64x6272xbf16, #tpu.memory_space<vmem>>, vector<64x128xbf16>
    tpu.vector_store %arg5[%c0_73, %c1280], %65 {strides = array<i32>} : memref<64x6272xbf16, #tpu.memory_space<vmem>>, vector<64x128xbf16>,
    %c0_i32_74 = arith.constant 0 : i32
    %67 = arith.addi %0, %c0_i32_74 : i32
    %c0_75 = arith.constant 0 : index
    %c1_76 = arith.constant 1 : index
    %c1_77 = arith.constant 1 : index
    %68 = arith.index_cast %67 : i32 to index
    %c1_78 = arith.constant 1 : index
    %c0_79 = arith.constant 0 : index
    %69 = vector.load %arg2[%c0_75, %c1_76, %c1_77, %68, %c1_78, %c0_79] : memref<1x3x3x10x10x128xbf16, #tpu.memory_space<vmem>>, vector<1x1x1x8x8x128xbf16>
    %70 = vector.shape_cast %69 : vector<1x1x1x8x8x128xbf16> to vector<8x8x128xbf16>
    %71 = vector.shape_cast %70 : vector<8x8x128xbf16> to vector<64x128xbf16>
    %c0_80 = arith.constant 0 : index
    %c1408 = arith.constant 1408 : index
    %72 = vector.load %arg5[%c0_80, %c1408] : memref<64x6272xbf16, #tpu.memory_space<vmem>>, vector<64x128xbf16>
    tpu.vector_store %arg5[%c0_80, %c1408], %71 {strides = array<i32>} : memref<64x6272xbf16, #tpu.memory_space<vmem>>, vector<64x128xbf16>,
    %c0_i32_81 = arith.constant 0 : i32
    %73 = arith.addi %0, %c0_i32_81 : i32
    %c0_82 = arith.constant 0 : index
    %c1_83 = arith.constant 1 : index
    %c2_84 = arith.constant 2 : index
    %74 = arith.index_cast %73 : i32 to index
    %c1_85 = arith.constant 1 : index
    %c0_86 = arith.constant 0 : index
    %75 = vector.load %arg2[%c0_82, %c1_83, %c2_84, %74, %c1_85, %c0_86] : memref<1x3x3x10x10x128xbf16, #tpu.memory_space<vmem>>, vector<1x1x1x8x8x128xbf16>
    %76 = vector.shape_cast %75 : vector<1x1x1x8x8x128xbf16> to vector<8x8x128xbf16>
    %77 = vector.shape_cast %76 : vector<8x8x128xbf16> to vector<64x128xbf16>
    %c0_87 = arith.constant 0 : index
    %c1536 = arith.constant 1536 : index
    %78 = vector.load %arg5[%c0_87, %c1536] : memref<64x6272xbf16, #tpu.memory_space<vmem>>, vector<64x128xbf16>
    tpu.vector_store %arg5[%c0_87, %c1536], %77 {strides = array<i32>} : memref<64x6272xbf16, #tpu.memory_space<vmem>>, vector<64x128xbf16>,
    %c0_i32_88 = arith.constant 0 : i32
    %79 = arith.addi %0, %c0_i32_88 : i32
    %c0_89 = arith.constant 0 : index
    %c1_90 = arith.constant 1 : index
    %c0_91 = arith.constant 0 : index
    %80 = arith.index_cast %79 : i32 to index
    %c2_92 = arith.constant 2 : index
    %c0_93 = arith.constant 0 : index
    %81 = vector.load %arg2[%c0_89, %c1_90, %c0_91, %80, %c2_92, %c0_93] : memref<1x3x3x10x10x128xbf16, #tpu.memory_space<vmem>>, vector<1x1x1x8x8x128xbf16>
    %82 = vector.shape_cast %81 : vector<1x1x1x8x8x128xbf16> to vector<8x8x128xbf16>
    %83 = vector.shape_cast %82 : vector<8x8x128xbf16> to vector<64x128xbf16>
    %c0_94 = arith.constant 0 : index
    %c1664 = arith.constant 1664 : index
    %84 = vector.load %arg5[%c0_94, %c1664] : memref<64x6272xbf16, #tpu.memory_space<vmem>>, vector<64x128xbf16>
    tpu.vector_store %arg5[%c0_94, %c1664], %83 {strides = array<i32>} : memref<64x6272xbf16, #tpu.memory_space<vmem>>, vector<64x128xbf16>,
    %c0_i32_95 = arith.constant 0 : i32
    %85 = arith.addi %0, %c0_i32_95 : i32
    %c0_96 = arith.constant 0 : index
    %c2_97 = arith.constant 2 : index
    %c0_98 = arith.constant 0 : index
    %86 = arith.index_cast %85 : i32 to index
    %c0_99 = arith.constant 0 : index
    %c0_100 = arith.constant 0 : index
    %87 = vector.load %arg2[%c0_96, %c2_97, %c0_98, %86, %c0_99, %c0_100] : memref<1x3x3x10x10x128xbf16, #tpu.memory_space<vmem>>, vector<1x1x1x8x8x128xbf16>
    %88 = vector.shape_cast %87 : vector<1x1x1x8x8x128xbf16> to vector<8x8x128xbf16>
    %89 = vector.shape_cast %88 : vector<8x8x128xbf16> to vector<64x128xbf16>
    %c0_101 = arith.constant 0 : index
    %c1792 = arith.constant 1792 : index
    %90 = vector.load %arg5[%c0_101, %c1792] : memref<64x6272xbf16, #tpu.memory_space<vmem>>, vector<64x128xbf16>
    tpu.vector_store %arg5[%c0_101, %c1792], %89 {strides = array<i32>} : memref<64x6272xbf16, #tpu.memory_space<vmem>>, vector<64x128xbf16>,
    %c0_i32_102 = arith.constant 0 : i32
    %91 = arith.addi %0, %c0_i32_102 : i32
    %c0_103 = arith.constant 0 : index
    %c2_104 = arith.constant 2 : index
    %c1_105 = arith.constant 1 : index
    %92 = arith.index_cast %91 : i32 to index
    %c0_106 = arith.constant 0 : index
    %c0_107 = arith.constant 0 : index
    %93 = vector.load %arg2[%c0_103, %c2_104, %c1_105, %92, %c0_106, %c0_107] : memref<1x3x3x10x10x128xbf16, #tpu.memory_space<vmem>>, vector<1x1x1x8x8x128xbf16>
    %94 = vector.shape_cast %93 : vector<1x1x1x8x8x128xbf16> to vector<8x8x128xbf16>
    %95 = vector.shape_cast %94 : vector<8x8x128xbf16> to vector<64x128xbf16>
    %c0_108 = arith.constant 0 : index
    %c1920 = arith.constant 1920 : index
    %96 = vector.load %arg5[%c0_108, %c1920] : memref<64x6272xbf16, #tpu.memory_space<vmem>>, vector<64x128xbf16>
    tpu.vector_store %arg5[%c0_108, %c1920], %95 {strides = array<i32>} : memref<64x6272xbf16, #tpu.memory_space<vmem>>, vector<64x128xbf16>,
    %c0_i32_109 = arith.constant 0 : i32
    %97 = arith.addi %0, %c0_i32_109 : i32
    %c0_110 = arith.constant 0 : index
    %c2_111 = arith.constant 2 : index
    %c2_112 = arith.constant 2 : index
    %98 = arith.index_cast %97 : i32 to index
    %c0_113 = arith.constant 0 : index
    %c0_114 = arith.constant 0 : index
    %99 = vector.load %arg2[%c0_110, %c2_111, %c2_112, %98, %c0_113, %c0_114] : memref<1x3x3x10x10x128xbf16, #tpu.memory_space<vmem>>, vector<1x1x1x8x8x128xbf16>
    %100 = vector.shape_cast %99 : vector<1x1x1x8x8x128xbf16> to vector<8x8x128xbf16>
    %101 = vector.shape_cast %100 : vector<8x8x128xbf16> to vector<64x128xbf16>
    %c0_115 = arith.constant 0 : index
    %c2048 = arith.constant 2048 : index
    %102 = vector.load %arg5[%c0_115, %c2048] : memref<64x6272xbf16, #tpu.memory_space<vmem>>, vector<64x128xbf16>
    tpu.vector_store %arg5[%c0_115, %c2048], %101 {strides = array<i32>} : memref<64x6272xbf16, #tpu.memory_space<vmem>>, vector<64x128xbf16>,
    %c0_i32_116 = arith.constant 0 : i32
    %103 = arith.addi %0, %c0_i32_116 : i32
    %c0_117 = arith.constant 0 : index
    %c2_118 = arith.constant 2 : index
    %c0_119 = arith.constant 0 : index
    %104 = arith.index_cast %103 : i32 to index
    %c1_120 = arith.constant 1 : index
    %c0_121 = arith.constant 0 : index
    %105 = vector.load %arg2[%c0_117, %c2_118, %c0_119, %104, %c1_120, %c0_121] : memref<1x3x3x10x10x128xbf16, #tpu.memory_space<vmem>>, vector<1x1x1x8x8x128xbf16>
    %106 = vector.shape_cast %105 : vector<1x1x1x8x8x128xbf16> to vector<8x8x128xbf16>
    %107 = vector.shape_cast %106 : vector<8x8x128xbf16> to vector<64x128xbf16>
    %c0_122 = arith.constant 0 : index
    %c2176 = arith.constant 2176 : index
    %108 = vector.load %arg5[%c0_122, %c2176] : memref<64x6272xbf16, #tpu.memory_space<vmem>>, vector<64x128xbf16>
    tpu.vector_store %arg5[%c0_122, %c2176], %107 {strides = array<i32>} : memref<64x6272xbf16, #tpu.memory_space<vmem>>, vector<64x128xbf16>,
    %c0_i32_123 = arith.constant 0 : i32
    %109 = arith.addi %0, %c0_i32_123 : i32
    %c0_124 = arith.constant 0 : index
    %c2_125 = arith.constant 2 : index
    %c1_126 = arith.constant 1 : index
    %110 = arith.index_cast %109 : i32 to index
    %c1_127 = arith.constant 1 : index
    %c0_128 = arith.constant 0 : index
    %111 = vector.load %arg2[%c0_124, %c2_125, %c1_126, %110, %c1_127, %c0_128] : memref<1x3x3x10x10x128xbf16, #tpu.memory_space<vmem>>, vector<1x1x1x8x8x128xbf16>
    %112 = vector.shape_cast %111 : vector<1x1x1x8x8x128xbf16> to vector<8x8x128xbf16>
    %113 = vector.shape_cast %112 : vector<8x8x128xbf16> to vector<64x128xbf16>
    %c0_129 = arith.constant 0 : index
    %c2304 = arith.constant 2304 : index
    %114 = vector.load %arg5[%c0_129, %c2304] : memref<64x6272xbf16, #tpu.memory_space<vmem>>, vector<64x128xbf16>
    tpu.vector_store %arg5[%c0_129, %c2304], %113 {strides = array<i32>} : memref<64x6272xbf16, #tpu.memory_space<vmem>>, vector<64x128xbf16>,
    %c0_i32_130 = arith.constant 0 : i32
    %115 = arith.addi %0, %c0_i32_130 : i32
    %c0_131 = arith.constant 0 : index
    %c2_132 = arith.constant 2 : index
    %c2_133 = arith.constant 2 : index
    %116 = arith.index_cast %115 : i32 to index
    %c1_134 = arith.constant 1 : index
    %c0_135 = arith.constant 0 : index
    %117 = vector.load %arg2[%c0_131, %c2_132, %c2_133, %116, %c1_134, %c0_135] : memref<1x3x3x10x10x128xbf16, #tpu.memory_space<vmem>>, vector<1x1x1x8x8x128xbf16>
    %118 = vector.shape_cast %117 : vector<1x1x1x8x8x128xbf16> to vector<8x8x128xbf16>
    %119 = vector.shape_cast %118 : vector<8x8x128xbf16> to vector<64x128xbf16>
    %c0_136 = arith.constant 0 : index
    %c2432 = arith.constant 2432 : index
    %120 = vector.load %arg5[%c0_136, %c2432] : memref<64x6272xbf16, #tpu.memory_space<vmem>>, vector<64x128xbf16>
    tpu.vector_store %arg5[%c0_136, %c2432], %119 {strides = array<i32>} : memref<64x6272xbf16, #tpu.memory_space<vmem>>, vector<64x128xbf16>,
    %c0_i32_137 = arith.constant 0 : i32
    %121 = arith.addi %0, %c0_i32_137 : i32
    %c0_138 = arith.constant 0 : index
    %c2_139 = arith.constant 2 : index
    %c0_140 = arith.constant 0 : index
    %122 = arith.index_cast %121 : i32 to index
    %c2_141 = arith.constant 2 : index
    %c0_142 = arith.constant 0 : index
    %123 = vector.load %arg2[%c0_138, %c2_139, %c0_140, %122, %c2_141, %c0_142] : memref<1x3x3x10x10x128xbf16, #tpu.memory_space<vmem>>, vector<1x1x1x8x8x128xbf16>
    %124 = vector.shape_cast %123 : vector<1x1x1x8x8x128xbf16> to vector<8x8x128xbf16>
    %125 = vector.shape_cast %124 : vector<8x8x128xbf16> to vector<64x128xbf16>
    %c0_143 = arith.constant 0 : index
    %c2560 = arith.constant 2560 : index
    %126 = vector.load %arg5[%c0_143, %c2560] : memref<64x6272xbf16, #tpu.memory_space<vmem>>, vector<64x128xbf16>
    tpu.vector_store %arg5[%c0_143, %c2560], %125 {strides = array<i32>} : memref<64x6272xbf16, #tpu.memory_space<vmem>>, vector<64x128xbf16>,
    %c1_i32 = arith.constant 1 : i32
    %127 = arith.addi %0, %c1_i32 : i32
    %c0_144 = arith.constant 0 : index
    %c0_145 = arith.constant 0 : index
    %c0_146 = arith.constant 0 : index
    %128 = arith.index_cast %127 : i32 to index
    %c0_147 = arith.constant 0 : index
    %c0_148 = arith.constant 0 : index
    %129 = vector.load %arg2[%c0_144, %c0_145, %c0_146, %128, %c0_147, %c0_148] : memref<1x3x3x10x10x128xbf16, #tpu.memory_space<vmem>>, vector<1x1x1x8x8x128xbf16>
    %130 = vector.shape_cast %129 : vector<1x1x1x8x8x128xbf16> to vector<8x8x128xbf16>
    %131 = vector.shape_cast %130 : vector<8x8x128xbf16> to vector<64x128xbf16>
    %c0_149 = arith.constant 0 : index
    %c2688 = arith.constant 2688 : index
    %132 = vector.load %arg5[%c0_149, %c2688] : memref<64x6272xbf16, #tpu.memory_space<vmem>>, vector<64x128xbf16>
    tpu.vector_store %arg5[%c0_149, %c2688], %131 {strides = array<i32>} : memref<64x6272xbf16, #tpu.memory_space<vmem>>, vector<64x128xbf16>,
    %c1_i32_150 = arith.constant 1 : i32
    %133 = arith.addi %0, %c1_i32_150 : i32
    %c0_151 = arith.constant 0 : index
    %c0_152 = arith.constant 0 : index
    %c1_153 = arith.constant 1 : index
    %134 = arith.index_cast %133 : i32 to index
    %c0_154 = arith.constant 0 : index
    %c0_155 = arith.constant 0 : index
    %135 = vector.load %arg2[%c0_151, %c0_152, %c1_153, %134, %c0_154, %c0_155] : memref<1x3x3x10x10x128xbf16, #tpu.memory_space<vmem>>, vector<1x1x1x8x8x128xbf16>
    %136 = vector.shape_cast %135 : vector<1x1x1x8x8x128xbf16> to vector<8x8x128xbf16>
    %137 = vector.shape_cast %136 : vector<8x8x128xbf16> to vector<64x128xbf16>
    %c0_156 = arith.constant 0 : index
    %c2816 = arith.constant 2816 : index
    %138 = vector.load %arg5[%c0_156, %c2816] : memref<64x6272xbf16, #tpu.memory_space<vmem>>, vector<64x128xbf16>
    tpu.vector_store %arg5[%c0_156, %c2816], %137 {strides = array<i32>} : memref<64x6272xbf16, #tpu.memory_space<vmem>>, vector<64x128xbf16>,
    %c1_i32_157 = arith.constant 1 : i32
    %139 = arith.addi %0, %c1_i32_157 : i32
    %c0_158 = arith.constant 0 : index
    %c0_159 = arith.constant 0 : index
    %c2_160 = arith.constant 2 : index
    %140 = arith.index_cast %139 : i32 to index
    %c0_161 = arith.constant 0 : index
    %c0_162 = arith.constant 0 : index
    %141 = vector.load %arg2[%c0_158, %c0_159, %c2_160, %140, %c0_161, %c0_162] : memref<1x3x3x10x10x128xbf16, #tpu.memory_space<vmem>>, vector<1x1x1x8x8x128xbf16>
    %142 = vector.shape_cast %141 : vector<1x1x1x8x8x128xbf16> to vector<8x8x128xbf16>
    %143 = vector.shape_cast %142 : vector<8x8x128xbf16> to vector<64x128xbf16>
    %c0_163 = arith.constant 0 : index
    %c2944 = arith.constant 2944 : index
    %144 = vector.load %arg5[%c0_163, %c2944] : memref<64x6272xbf16, #tpu.memory_space<vmem>>, vector<64x128xbf16>
    tpu.vector_store %arg5[%c0_163, %c2944], %143 {strides = array<i32>} : memref<64x6272xbf16, #tpu.memory_space<vmem>>, vector<64x128xbf16>,
    %c1_i32_164 = arith.constant 1 : i32
    %145 = arith.addi %0, %c1_i32_164 : i32
    %c0_165 = arith.constant 0 : index
    %c0_166 = arith.constant 0 : index
    %c0_167 = arith.constant 0 : index
    %146 = arith.index_cast %145 : i32 to index
    %c1_168 = arith.constant 1 : index
    %c0_169 = arith.constant 0 : index
    %147 = vector.load %arg2[%c0_165, %c0_166, %c0_167, %146, %c1_168, %c0_169] : memref<1x3x3x10x10x128xbf16, #tpu.memory_space<vmem>>, vector<1x1x1x8x8x128xbf16>
    %148 = vector.shape_cast %147 : vector<1x1x1x8x8x128xbf16> to vector<8x8x128xbf16>
    %149 = vector.shape_cast %148 : vector<8x8x128xbf16> to vector<64x128xbf16>
    %c0_170 = arith.constant 0 : index
    %c3072 = arith.constant 3072 : index
    %150 = vector.load %arg5[%c0_170, %c3072] : memref<64x6272xbf16, #tpu.memory_space<vmem>>, vector<64x128xbf16>
    tpu.vector_store %arg5[%c0_170, %c3072], %149 {strides = array<i32>} : memref<64x6272xbf16, #tpu.memory_space<vmem>>, vector<64x128xbf16>,
    %c1_i32_171 = arith.constant 1 : i32
    %151 = arith.addi %0, %c1_i32_171 : i32
    %c0_172 = arith.constant 0 : index
    %c0_173 = arith.constant 0 : index
    %c1_174 = arith.constant 1 : index
    %152 = arith.index_cast %151 : i32 to index
    %c1_175 = arith.constant 1 : index
    %c0_176 = arith.constant 0 : index
    %153 = vector.load %arg2[%c0_172, %c0_173, %c1_174, %152, %c1_175, %c0_176] : memref<1x3x3x10x10x128xbf16, #tpu.memory_space<vmem>>, vector<1x1x1x8x8x128xbf16>
    %154 = vector.shape_cast %153 : vector<1x1x1x8x8x128xbf16> to vector<8x8x128xbf16>
    %155 = vector.shape_cast %154 : vector<8x8x128xbf16> to vector<64x128xbf16>
    %c0_177 = arith.constant 0 : index
    %c3200 = arith.constant 3200 : index
    %156 = vector.load %arg5[%c0_177, %c3200] : memref<64x6272xbf16, #tpu.memory_space<vmem>>, vector<64x128xbf16>
    tpu.vector_store %arg5[%c0_177, %c3200], %155 {strides = array<i32>} : memref<64x6272xbf16, #tpu.memory_space<vmem>>, vector<64x128xbf16>,
    %c1_i32_178 = arith.constant 1 : i32
    %157 = arith.addi %0, %c1_i32_178 : i32
    %c0_179 = arith.constant 0 : index
    %c0_180 = arith.constant 0 : index
    %c2_181 = arith.constant 2 : index
    %158 = arith.index_cast %157 : i32 to index
    %c1_182 = arith.constant 1 : index
    %c0_183 = arith.constant 0 : index
    %159 = vector.load %arg2[%c0_179, %c0_180, %c2_181, %158, %c1_182, %c0_183] : memref<1x3x3x10x10x128xbf16, #tpu.memory_space<vmem>>, vector<1x1x1x8x8x128xbf16>
    %160 = vector.shape_cast %159 : vector<1x1x1x8x8x128xbf16> to vector<8x8x128xbf16>
    %161 = vector.shape_cast %160 : vector<8x8x128xbf16> to vector<64x128xbf16>
    %c0_184 = arith.constant 0 : index
    %c3328 = arith.constant 3328 : index
    %162 = vector.load %arg5[%c0_184, %c3328] : memref<64x6272xbf16, #tpu.memory_space<vmem>>, vector<64x128xbf16>
    tpu.vector_store %arg5[%c0_184, %c3328], %161 {strides = array<i32>} : memref<64x6272xbf16, #tpu.memory_space<vmem>>, vector<64x128xbf16>,
    %c1_i32_185 = arith.constant 1 : i32
    %163 = arith.addi %0, %c1_i32_185 : i32
    %c0_186 = arith.constant 0 : index
    %c0_187 = arith.constant 0 : index
    %c0_188 = arith.constant 0 : index
    %164 = arith.index_cast %163 : i32 to index
    %c2_189 = arith.constant 2 : index
    %c0_190 = arith.constant 0 : index
    %165 = vector.load %arg2[%c0_186, %c0_187, %c0_188, %164, %c2_189, %c0_190] : memref<1x3x3x10x10x128xbf16, #tpu.memory_space<vmem>>, vector<1x1x1x8x8x128xbf16>
    %166 = vector.shape_cast %165 : vector<1x1x1x8x8x128xbf16> to vector<8x8x128xbf16>
    %167 = vector.shape_cast %166 : vector<8x8x128xbf16> to vector<64x128xbf16>
    %c0_191 = arith.constant 0 : index
    %c3456 = arith.constant 3456 : index
    %168 = vector.load %arg5[%c0_191, %c3456] : memref<64x6272xbf16, #tpu.memory_space<vmem>>, vector<64x128xbf16>
    tpu.vector_store %arg5[%c0_191, %c3456], %167 {strides = array<i32>} : memref<64x6272xbf16, #tpu.memory_space<vmem>>, vector<64x128xbf16>,
    %c1_i32_192 = arith.constant 1 : i32
    %169 = arith.addi %0, %c1_i32_192 : i32
    %c0_193 = arith.constant 0 : index
    %c1_194 = arith.constant 1 : index
    %c0_195 = arith.constant 0 : index
    %170 = arith.index_cast %169 : i32 to index
    %c0_196 = arith.constant 0 : index
    %c0_197 = arith.constant 0 : index
    %171 = vector.load %arg2[%c0_193, %c1_194, %c0_195, %170, %c0_196, %c0_197] : memref<1x3x3x10x10x128xbf16, #tpu.memory_space<vmem>>, vector<1x1x1x8x8x128xbf16>
    %172 = vector.shape_cast %171 : vector<1x1x1x8x8x128xbf16> to vector<8x8x128xbf16>
    %173 = vector.shape_cast %172 : vector<8x8x128xbf16> to vector<64x128xbf16>
    %c0_198 = arith.constant 0 : index
    %c3584 = arith.constant 3584 : index
    %174 = vector.load %arg5[%c0_198, %c3584] : memref<64x6272xbf16, #tpu.memory_space<vmem>>, vector<64x128xbf16>
    tpu.vector_store %arg5[%c0_198, %c3584], %173 {strides = array<i32>} : memref<64x6272xbf16, #tpu.memory_space<vmem>>, vector<64x128xbf16>,
    %c1_i32_199 = arith.constant 1 : i32
    %175 = arith.addi %0, %c1_i32_199 : i32
    %c0_200 = arith.constant 0 : index
    %c1_201 = arith.constant 1 : index
    %c1_202 = arith.constant 1 : index
    %176 = arith.index_cast %175 : i32 to index
    %c0_203 = arith.constant 0 : index
    %c0_204 = arith.constant 0 : index
    %177 = vector.load %arg2[%c0_200, %c1_201, %c1_202, %176, %c0_203, %c0_204] : memref<1x3x3x10x10x128xbf16, #tpu.memory_space<vmem>>, vector<1x1x1x8x8x128xbf16>
    %178 = vector.shape_cast %177 : vector<1x1x1x8x8x128xbf16> to vector<8x8x128xbf16>
    %179 = vector.shape_cast %178 : vector<8x8x128xbf16> to vector<64x128xbf16>
    %c0_205 = arith.constant 0 : index
    %c3712 = arith.constant 3712 : index
    %180 = vector.load %arg5[%c0_205, %c3712] : memref<64x6272xbf16, #tpu.memory_space<vmem>>, vector<64x128xbf16>
    tpu.vector_store %arg5[%c0_205, %c3712], %179 {strides = array<i32>} : memref<64x6272xbf16, #tpu.memory_space<vmem>>, vector<64x128xbf16>,
    %c1_i32_206 = arith.constant 1 : i32
    %181 = arith.addi %0, %c1_i32_206 : i32
    %c0_207 = arith.constant 0 : index
    %c1_208 = arith.constant 1 : index
    %c2_209 = arith.constant 2 : index
    %182 = arith.index_cast %181 : i32 to index
    %c0_210 = arith.constant 0 : index
    %c0_211 = arith.constant 0 : index
    %183 = vector.load %arg2[%c0_207, %c1_208, %c2_209, %182, %c0_210, %c0_211] : memref<1x3x3x10x10x128xbf16, #tpu.memory_space<vmem>>, vector<1x1x1x8x8x128xbf16>
    %184 = vector.shape_cast %183 : vector<1x1x1x8x8x128xbf16> to vector<8x8x128xbf16>
    %185 = vector.shape_cast %184 : vector<8x8x128xbf16> to vector<64x128xbf16>
    %c0_212 = arith.constant 0 : index
    %c3840 = arith.constant 3840 : index
    %186 = vector.load %arg5[%c0_212, %c3840] : memref<64x6272xbf16, #tpu.memory_space<vmem>>, vector<64x128xbf16>
    tpu.vector_store %arg5[%c0_212, %c3840], %185 {strides = array<i32>} : memref<64x6272xbf16, #tpu.memory_space<vmem>>, vector<64x128xbf16>,
    %c1_i32_213 = arith.constant 1 : i32
    %187 = arith.addi %0, %c1_i32_213 : i32
    %c0_214 = arith.constant 0 : index
    %c1_215 = arith.constant 1 : index
    %c0_216 = arith.constant 0 : index
    %188 = arith.index_cast %187 : i32 to index
    %c1_217 = arith.constant 1 : index
    %c0_218 = arith.constant 0 : index
    %189 = vector.load %arg2[%c0_214, %c1_215, %c0_216, %188, %c1_217, %c0_218] : memref<1x3x3x10x10x128xbf16, #tpu.memory_space<vmem>>, vector<1x1x1x8x8x128xbf16>
    %190 = vector.shape_cast %189 : vector<1x1x1x8x8x128xbf16> to vector<8x8x128xbf16>
    %191 = vector.shape_cast %190 : vector<8x8x128xbf16> to vector<64x128xbf16>
    %c0_219 = arith.constant 0 : index
    %c3968 = arith.constant 3968 : index
    %192 = vector.load %arg5[%c0_219, %c3968] : memref<64x6272xbf16, #tpu.memory_space<vmem>>, vector<64x128xbf16>
    tpu.vector_store %arg5[%c0_219, %c3968], %191 {strides = array<i32>} : memref<64x6272xbf16, #tpu.memory_space<vmem>>, vector<64x128xbf16>,
    %c1_i32_220 = arith.constant 1 : i32
    %193 = arith.addi %0, %c1_i32_220 : i32
    %c0_221 = arith.constant 0 : index
    %c1_222 = arith.constant 1 : index
    %c1_223 = arith.constant 1 : index
    %194 = arith.index_cast %193 : i32 to index
    %c1_224 = arith.constant 1 : index
    %c0_225 = arith.constant 0 : index
    %195 = vector.load %arg2[%c0_221, %c1_222, %c1_223, %194, %c1_224, %c0_225] : memref<1x3x3x10x10x128xbf16, #tpu.memory_space<vmem>>, vector<1x1x1x8x8x128xbf16>
    %196 = vector.shape_cast %195 : vector<1x1x1x8x8x128xbf16> to vector<8x8x128xbf16>
    %197 = vector.shape_cast %196 : vector<8x8x128xbf16> to vector<64x128xbf16>
    %c0_226 = arith.constant 0 : index
    %c4096 = arith.constant 4096 : index
    %198 = vector.load %arg5[%c0_226, %c4096] : memref<64x6272xbf16, #tpu.memory_space<vmem>>, vector<64x128xbf16>
    tpu.vector_store %arg5[%c0_226, %c4096], %197 {strides = array<i32>} : memref<64x6272xbf16, #tpu.memory_space<vmem>>, vector<64x128xbf16>,
    %c1_i32_227 = arith.constant 1 : i32
    %199 = arith.addi %0, %c1_i32_227 : i32
    %c0_228 = arith.constant 0 : index
    %c1_229 = arith.constant 1 : index
    %c2_230 = arith.constant 2 : index
    %200 = arith.index_cast %199 : i32 to index
    %c1_231 = arith.constant 1 : index
    %c0_232 = arith.constant 0 : index
    %201 = vector.load %arg2[%c0_228, %c1_229, %c2_230, %200, %c1_231, %c0_232] : memref<1x3x3x10x10x128xbf16, #tpu.memory_space<vmem>>, vector<1x1x1x8x8x128xbf16>
    %202 = vector.shape_cast %201 : vector<1x1x1x8x8x128xbf16> to vector<8x8x128xbf16>
    %203 = vector.shape_cast %202 : vector<8x8x128xbf16> to vector<64x128xbf16>
    %c0_233 = arith.constant 0 : index
    %c4224 = arith.constant 4224 : index
    %204 = vector.load %arg5[%c0_233, %c4224] : memref<64x6272xbf16, #tpu.memory_space<vmem>>, vector<64x128xbf16>
    tpu.vector_store %arg5[%c0_233, %c4224], %203 {strides = array<i32>} : memref<64x6272xbf16, #tpu.memory_space<vmem>>, vector<64x128xbf16>,
    %c1_i32_234 = arith.constant 1 : i32
    %205 = arith.addi %0, %c1_i32_234 : i32
    %c0_235 = arith.constant 0 : index
    %c1_236 = arith.constant 1 : index
    %c0_237 = arith.constant 0 : index
    %206 = arith.index_cast %205 : i32 to index
    %c2_238 = arith.constant 2 : index
    %c0_239 = arith.constant 0 : index
    %207 = vector.load %arg2[%c0_235, %c1_236, %c0_237, %206, %c2_238, %c0_239] : memref<1x3x3x10x10x128xbf16, #tpu.memory_space<vmem>>, vector<1x1x1x8x8x128xbf16>
    %208 = vector.shape_cast %207 : vector<1x1x1x8x8x128xbf16> to vector<8x8x128xbf16>
    %209 = vector.shape_cast %208 : vector<8x8x128xbf16> to vector<64x128xbf16>
    %c0_240 = arith.constant 0 : index
    %c4352 = arith.constant 4352 : index
    %210 = vector.load %arg5[%c0_240, %c4352] : memref<64x6272xbf16, #tpu.memory_space<vmem>>, vector<64x128xbf16>
    tpu.vector_store %arg5[%c0_240, %c4352], %209 {strides = array<i32>} : memref<64x6272xbf16, #tpu.memory_space<vmem>>, vector<64x128xbf16>,
    %c1_i32_241 = arith.constant 1 : i32
    %211 = arith.addi %0, %c1_i32_241 : i32
    %c0_242 = arith.constant 0 : index
    %c2_243 = arith.constant 2 : index
    %c0_244 = arith.constant 0 : index
    %212 = arith.index_cast %211 : i32 to index
    %c0_245 = arith.constant 0 : index
    %c0_246 = arith.constant 0 : index
    %213 = vector.load %arg2[%c0_242, %c2_243, %c0_244, %212, %c0_245, %c0_246] : memref<1x3x3x10x10x128xbf16, #tpu.memory_space<vmem>>, vector<1x1x1x8x8x128xbf16>
    %214 = vector.shape_cast %213 : vector<1x1x1x8x8x128xbf16> to vector<8x8x128xbf16>
    %215 = vector.shape_cast %214 : vector<8x8x128xbf16> to vector<64x128xbf16>
    %c0_247 = arith.constant 0 : index
    %c4480 = arith.constant 4480 : index
    %216 = vector.load %arg5[%c0_247, %c4480] : memref<64x6272xbf16, #tpu.memory_space<vmem>>, vector<64x128xbf16>
    tpu.vector_store %arg5[%c0_247, %c4480], %215 {strides = array<i32>} : memref<64x6272xbf16, #tpu.memory_space<vmem>>, vector<64x128xbf16>,
    %c1_i32_248 = arith.constant 1 : i32
    %217 = arith.addi %0, %c1_i32_248 : i32
    %c0_249 = arith.constant 0 : index
    %c2_250 = arith.constant 2 : index
    %c1_251 = arith.constant 1 : index
    %218 = arith.index_cast %217 : i32 to index
    %c0_252 = arith.constant 0 : index
    %c0_253 = arith.constant 0 : index
    %219 = vector.load %arg2[%c0_249, %c2_250, %c1_251, %218, %c0_252, %c0_253] : memref<1x3x3x10x10x128xbf16, #tpu.memory_space<vmem>>, vector<1x1x1x8x8x128xbf16>
    %220 = vector.shape_cast %219 : vector<1x1x1x8x8x128xbf16> to vector<8x8x128xbf16>
    %221 = vector.shape_cast %220 : vector<8x8x128xbf16> to vector<64x128xbf16>
    %c0_254 = arith.constant 0 : index
    %c4608 = arith.constant 4608 : index
    %222 = vector.load %arg5[%c0_254, %c4608] : memref<64x6272xbf16, #tpu.memory_space<vmem>>, vector<64x128xbf16>
    tpu.vector_store %arg5[%c0_254, %c4608], %221 {strides = array<i32>} : memref<64x6272xbf16, #tpu.memory_space<vmem>>, vector<64x128xbf16>,
    %c1_i32_255 = arith.constant 1 : i32
    %223 = arith.addi %0, %c1_i32_255 : i32
    %c0_256 = arith.constant 0 : index
    %c2_257 = arith.constant 2 : index
    %c2_258 = arith.constant 2 : index
    %224 = arith.index_cast %223 : i32 to index
    %c0_259 = arith.constant 0 : index
    %c0_260 = arith.constant 0 : index
    %225 = vector.load %arg2[%c0_256, %c2_257, %c2_258, %224, %c0_259, %c0_260] : memref<1x3x3x10x10x128xbf16, #tpu.memory_space<vmem>>, vector<1x1x1x8x8x128xbf16>
    %226 = vector.shape_cast %225 : vector<1x1x1x8x8x128xbf16> to vector<8x8x128xbf16>
    %227 = vector.shape_cast %226 : vector<8x8x128xbf16> to vector<64x128xbf16>
    %c0_261 = arith.constant 0 : index
    %c4736 = arith.constant 4736 : index
    %228 = vector.load %arg5[%c0_261, %c4736] : memref<64x6272xbf16, #tpu.memory_space<vmem>>, vector<64x128xbf16>
    tpu.vector_store %arg5[%c0_261, %c4736], %227 {strides = array<i32>} : memref<64x6272xbf16, #tpu.memory_space<vmem>>, vector<64x128xbf16>,
    %c1_i32_262 = arith.constant 1 : i32
    %229 = arith.addi %0, %c1_i32_262 : i32
    %c0_263 = arith.constant 0 : index
    %c2_264 = arith.constant 2 : index
    %c0_265 = arith.constant 0 : index
    %230 = arith.index_cast %229 : i32 to index
    %c1_266 = arith.constant 1 : index
    %c0_267 = arith.constant 0 : index
    %231 = vector.load %arg2[%c0_263, %c2_264, %c0_265, %230, %c1_266, %c0_267] : memref<1x3x3x10x10x128xbf16, #tpu.memory_space<vmem>>, vector<1x1x1x8x8x128xbf16>
    %232 = vector.shape_cast %231 : vector<1x1x1x8x8x128xbf16> to vector<8x8x128xbf16>
    %233 = vector.shape_cast %232 : vector<8x8x128xbf16> to vector<64x128xbf16>
    %c0_268 = arith.constant 0 : index
    %c4864 = arith.constant 4864 : index
    %234 = vector.load %arg5[%c0_268, %c4864] : memref<64x6272xbf16, #tpu.memory_space<vmem>>, vector<64x128xbf16>
    tpu.vector_store %arg5[%c0_268, %c4864], %233 {strides = array<i32>} : memref<64x6272xbf16, #tpu.memory_space<vmem>>, vector<64x128xbf16>,
    %c1_i32_269 = arith.constant 1 : i32
    %235 = arith.addi %0, %c1_i32_269 : i32
    %c0_270 = arith.constant 0 : index
    %c2_271 = arith.constant 2 : index
    %c1_272 = arith.constant 1 : index
    %236 = arith.index_cast %235 : i32 to index
    %c1_273 = arith.constant 1 : index
    %c0_274 = arith.constant 0 : index
    %237 = vector.load %arg2[%c0_270, %c2_271, %c1_272, %236, %c1_273, %c0_274] : memref<1x3x3x10x10x128xbf16, #tpu.memory_space<vmem>>, vector<1x1x1x8x8x128xbf16>
    %238 = vector.shape_cast %237 : vector<1x1x1x8x8x128xbf16> to vector<8x8x128xbf16>
    %239 = vector.shape_cast %238 : vector<8x8x128xbf16> to vector<64x128xbf16>
    %c0_275 = arith.constant 0 : index
    %c4992 = arith.constant 4992 : index
    %240 = vector.load %arg5[%c0_275, %c4992] : memref<64x6272xbf16, #tpu.memory_space<vmem>>, vector<64x128xbf16>
    tpu.vector_store %arg5[%c0_275, %c4992], %239 {strides = array<i32>} : memref<64x6272xbf16, #tpu.memory_space<vmem>>, vector<64x128xbf16>,
    %c1_i32_276 = arith.constant 1 : i32
    %241 = arith.addi %0, %c1_i32_276 : i32
    %c0_277 = arith.constant 0 : index
    %c2_278 = arith.constant 2 : index
    %c2_279 = arith.constant 2 : index
    %242 = arith.index_cast %241 : i32 to index
    %c1_280 = arith.constant 1 : index
    %c0_281 = arith.constant 0 : index
    %243 = vector.load %arg2[%c0_277, %c2_278, %c2_279, %242, %c1_280, %c0_281] : memref<1x3x3x10x10x128xbf16, #tpu.memory_space<vmem>>, vector<1x1x1x8x8x128xbf16>
    %244 = vector.shape_cast %243 : vector<1x1x1x8x8x128xbf16> to vector<8x8x128xbf16>
    %245 = vector.shape_cast %244 : vector<8x8x128xbf16> to vector<64x128xbf16>
    %c0_282 = arith.constant 0 : index
    %c5120 = arith.constant 5120 : index
    %246 = vector.load %arg5[%c0_282, %c5120] : memref<64x6272xbf16, #tpu.memory_space<vmem>>, vector<64x128xbf16>
    tpu.vector_store %arg5[%c0_282, %c5120], %245 {strides = array<i32>} : memref<64x6272xbf16, #tpu.memory_space<vmem>>, vector<64x128xbf16>,
    %c1_i32_283 = arith.constant 1 : i32
    %247 = arith.addi %0, %c1_i32_283 : i32
    %c0_284 = arith.constant 0 : index
    %c2_285 = arith.constant 2 : index
    %c0_286 = arith.constant 0 : index
    %248 = arith.index_cast %247 : i32 to index
    %c2_287 = arith.constant 2 : index
    %c0_288 = arith.constant 0 : index
    %249 = vector.load %arg2[%c0_284, %c2_285, %c0_286, %248, %c2_287, %c0_288] : memref<1x3x3x10x10x128xbf16, #tpu.memory_space<vmem>>, vector<1x1x1x8x8x128xbf16>
    %250 = vector.shape_cast %249 : vector<1x1x1x8x8x128xbf16> to vector<8x8x128xbf16>
    %251 = vector.shape_cast %250 : vector<8x8x128xbf16> to vector<64x128xbf16>
    %c0_289 = arith.constant 0 : index
    %c5248 = arith.constant 5248 : index
    %252 = vector.load %arg5[%c0_289, %c5248] : memref<64x6272xbf16, #tpu.memory_space<vmem>>, vector<64x128xbf16>
    tpu.vector_store %arg5[%c0_289, %c5248], %251 {strides = array<i32>} : memref<64x6272xbf16, #tpu.memory_space<vmem>>, vector<64x128xbf16>,
    %c2_i32 = arith.constant 2 : i32
    %253 = arith.addi %0, %c2_i32 : i32
    %c0_290 = arith.constant 0 : index
    %c0_291 = arith.constant 0 : index
    %c0_292 = arith.constant 0 : index
    %254 = arith.index_cast %253 : i32 to index
    %c0_293 = arith.constant 0 : index
    %c0_294 = arith.constant 0 : index
    %255 = vector.load %arg2[%c0_290, %c0_291, %c0_292, %254, %c0_293, %c0_294] : memref<1x3x3x10x10x128xbf16, #tpu.memory_space<vmem>>, vector<1x1x1x8x8x128xbf16>
    %256 = vector.shape_cast %255 : vector<1x1x1x8x8x128xbf16> to vector<8x8x128xbf16>
    %257 = vector.shape_cast %256 : vector<8x8x128xbf16> to vector<64x128xbf16>
    %c0_295 = arith.constant 0 : index
    %c5376 = arith.constant 5376 : index
    %258 = vector.load %arg5[%c0_295, %c5376] : memref<64x6272xbf16, #tpu.memory_space<vmem>>, vector<64x128xbf16>
    tpu.vector_store %arg5[%c0_295, %c5376], %257 {strides = array<i32>} : memref<64x6272xbf16, #tpu.memory_space<vmem>>, vector<64x128xbf16>,
    %c2_i32_296 = arith.constant 2 : i32
    %259 = arith.addi %0, %c2_i32_296 : i32
    %c0_297 = arith.constant 0 : index
    %c0_298 = arith.constant 0 : index
    %c1_299 = arith.constant 1 : index
    %260 = arith.index_cast %259 : i32 to index
    %c0_300 = arith.constant 0 : index
    %c0_301 = arith.constant 0 : index
    %261 = vector.load %arg2[%c0_297, %c0_298, %c1_299, %260, %c0_300, %c0_301] : memref<1x3x3x10x10x128xbf16, #tpu.memory_space<vmem>>, vector<1x1x1x8x8x128xbf16>
    %262 = vector.shape_cast %261 : vector<1x1x1x8x8x128xbf16> to vector<8x8x128xbf16>
    %263 = vector.shape_cast %262 : vector<8x8x128xbf16> to vector<64x128xbf16>
    %c0_302 = arith.constant 0 : index
    %c5504 = arith.constant 5504 : index
    %264 = vector.load %arg5[%c0_302, %c5504] : memref<64x6272xbf16, #tpu.memory_space<vmem>>, vector<64x128xbf16>
    tpu.vector_store %arg5[%c0_302, %c5504], %263 {strides = array<i32>} : memref<64x6272xbf16, #tpu.memory_space<vmem>>, vector<64x128xbf16>,
    %c2_i32_303 = arith.constant 2 : i32
    %265 = arith.addi %0, %c2_i32_303 : i32
    %c0_304 = arith.constant 0 : index
    %c0_305 = arith.constant 0 : index
    %c2_306 = arith.constant 2 : index
    %266 = arith.index_cast %265 : i32 to index
    %c0_307 = arith.constant 0 : index
    %c0_308 = arith.constant 0 : index
    %267 = vector.load %arg2[%c0_304, %c0_305, %c2_306, %266, %c0_307, %c0_308] : memref<1x3x3x10x10x128xbf16, #tpu.memory_space<vmem>>, vector<1x1x1x8x8x128xbf16>
    %268 = vector.shape_cast %267 : vector<1x1x1x8x8x128xbf16> to vector<8x8x128xbf16>
    %269 = vector.shape_cast %268 : vector<8x8x128xbf16> to vector<64x128xbf16>
    %c0_309 = arith.constant 0 : index
    %c5632 = arith.constant 5632 : index
    %270 = vector.load %arg5[%c0_309, %c5632] : memref<64x6272xbf16, #tpu.memory_space<vmem>>, vector<64x128xbf16>
    tpu.vector_store %arg5[%c0_309, %c5632], %269 {strides = array<i32>} : memref<64x6272xbf16, #tpu.memory_space<vmem>>, vector<64x128xbf16>,
    %c2_i32_310 = arith.constant 2 : i32
    %271 = arith.addi %0, %c2_i32_310 : i32
    %c0_311 = arith.constant 0 : index
    %c0_312 = arith.constant 0 : index
    %c0_313 = arith.constant 0 : index
    %272 = arith.index_cast %271 : i32 to index
    %c1_314 = arith.constant 1 : index
    %c0_315 = arith.constant 0 : index
    %273 = vector.load %arg2[%c0_311, %c0_312, %c0_313, %272, %c1_314, %c0_315] : memref<1x3x3x10x10x128xbf16, #tpu.memory_space<vmem>>, vector<1x1x1x8x8x128xbf16>
    %274 = vector.shape_cast %273 : vector<1x1x1x8x8x128xbf16> to vector<8x8x128xbf16>
    %275 = vector.shape_cast %274 : vector<8x8x128xbf16> to vector<64x128xbf16>
    %c0_316 = arith.constant 0 : index
    %c5760 = arith.constant 5760 : index
    %276 = vector.load %arg5[%c0_316, %c5760] : memref<64x6272xbf16, #tpu.memory_space<vmem>>, vector<64x128xbf16>
    tpu.vector_store %arg5[%c0_316, %c5760], %275 {strides = array<i32>} : memref<64x6272xbf16, #tpu.memory_space<vmem>>, vector<64x128xbf16>,
    %c2_i32_317 = arith.constant 2 : i32
    %277 = arith.addi %0, %c2_i32_317 : i32
    %c0_318 = arith.constant 0 : index
    %c0_319 = arith.constant 0 : index
    %c1_320 = arith.constant 1 : index
    %278 = arith.index_cast %277 : i32 to index
    %c1_321 = arith.constant 1 : index
    %c0_322 = arith.constant 0 : index
    %279 = vector.load %arg2[%c0_318, %c0_319, %c1_320, %278, %c1_321, %c0_322] : memref<1x3x3x10x10x128xbf16, #tpu.memory_space<vmem>>, vector<1x1x1x8x8x128xbf16>
    %280 = vector.shape_cast %279 : vector<1x1x1x8x8x128xbf16> to vector<8x8x128xbf16>
    %281 = vector.shape_cast %280 : vector<8x8x128xbf16> to vector<64x128xbf16>
    %c0_323 = arith.constant 0 : index
    %c5888 = arith.constant 5888 : index
    %282 = vector.load %arg5[%c0_323, %c5888] : memref<64x6272xbf16, #tpu.memory_space<vmem>>, vector<64x128xbf16>
    tpu.vector_store %arg5[%c0_323, %c5888], %281 {strides = array<i32>} : memref<64x6272xbf16, #tpu.memory_space<vmem>>, vector<64x128xbf16>,
    %c2_i32_324 = arith.constant 2 : i32
    %283 = arith.addi %0, %c2_i32_324 : i32
    %c0_325 = arith.constant 0 : index
    %c0_326 = arith.constant 0 : index
    %c2_327 = arith.constant 2 : index
    %284 = arith.index_cast %283 : i32 to index
    %c1_328 = arith.constant 1 : index
    %c0_329 = arith.constant 0 : index
    %285 = vector.load %arg2[%c0_325, %c0_326, %c2_327, %284, %c1_328, %c0_329] : memref<1x3x3x10x10x128xbf16, #tpu.memory_space<vmem>>, vector<1x1x1x8x8x128xbf16>
    %286 = vector.shape_cast %285 : vector<1x1x1x8x8x128xbf16> to vector<8x8x128xbf16>
    %287 = vector.shape_cast %286 : vector<8x8x128xbf16> to vector<64x128xbf16>
    %c0_330 = arith.constant 0 : index
    %c6016 = arith.constant 6016 : index
    %288 = vector.load %arg5[%c0_330, %c6016] : memref<64x6272xbf16, #tpu.memory_space<vmem>>, vector<64x128xbf16>
    tpu.vector_store %arg5[%c0_330, %c6016], %287 {strides = array<i32>} : memref<64x6272xbf16, #tpu.memory_space<vmem>>, vector<64x128xbf16>,
    %c2_i32_331 = arith.constant 2 : i32
    %289 = arith.addi %0, %c2_i32_331 : i32
    %c0_332 = arith.constant 0 : index
    %c0_333 = arith.constant 0 : index
    %c0_334 = arith.constant 0 : index
    %290 = arith.index_cast %289 : i32 to index
    %c2_335 = arith.constant 2 : index
    %c0_336 = arith.constant 0 : index
    %291 = vector.load %arg2[%c0_332, %c0_333, %c0_334, %290, %c2_335, %c0_336] : memref<1x3x3x10x10x128xbf16, #tpu.memory_space<vmem>>, vector<1x1x1x8x8x128xbf16>
    %292 = vector.shape_cast %291 : vector<1x1x1x8x8x128xbf16> to vector<8x8x128xbf16>
    %293 = vector.shape_cast %292 : vector<8x8x128xbf16> to vector<64x128xbf16>
    %c0_337 = arith.constant 0 : index
    %c6144 = arith.constant 6144 : index
    %294 = vector.load %arg5[%c0_337, %c6144] : memref<64x6272xbf16, #tpu.memory_space<vmem>>, vector<64x128xbf16>
    tpu.vector_store %arg5[%c0_337, %c6144], %293 {strides = array<i32>} : memref<64x6272xbf16, #tpu.memory_space<vmem>>, vector<64x128xbf16>,
    %c0_338 = arith.constant 0 : index
    %c0_339 = arith.constant 0 : index
    %295 = vector.load %arg5[%c0_338, %c0_339] : memref<64x6272xbf16, #tpu.memory_space<vmem>>, vector<64x6272xbf16>
    %c0_340 = arith.constant 0 : index
    %c0_341 = arith.constant 0 : index
    %296 = vector.load %arg3[%c0_340, %c0_341] : memref<6272x128xbf16, #tpu.memory_space<vmem>>, vector<6272x128xbf16>
    %cst = arith.constant dense<0.000000e+00> : vector<64x128xf32>
    %297 = tpu.matmul %295, %296, %cst {dimension_numbers = #tpu.dot_dimension_numbers<[1], [0], [0], [1], [0, 0, 1, 1], [], []>} : vector<64x6272xbf16>, vector<6272x128xbf16>, vector<64x128xf32> -> vector<64x128xf32>
    %cst_342 = arith.constant 0.000000e+00 : f32
    %298 = vector.broadcast %cst_342 : f32 to vector<64x128xf32>
    %299 = arith.cmpf ogt, %297, %298 : vector<64x128xf32>
    %cst_343 = arith.constant 0.00999999977 : f32
    %300 = vector.broadcast %cst_343 : f32 to vector<64x128xf32>
    %301 = arith.mulf %300, %297 : vector<64x128xf32>
    %302 = arith.select %299, %297, %301 : vector<64x128xi1>, vector<64x128xf32>
    %303 = vector.shape_cast %302 : vector<64x128xf32> to vector<8x8x128xf32>
    %c0_344 = arith.constant 0 : index
    %c0_345 = arith.constant 0 : index
    %c0_346 = arith.constant 0 : index
    %c0_347 = arith.constant 0 : index
    %304 = vector.load %arg4[%c0_344, %c0_345, %c0_346, %c0_347] : memref<1x8x8x128xf32, #tpu.memory_space<vmem>>, vector<1x8x8x128xf32>
    %305 = vector.shape_cast %304 : vector<1x8x8x128xf32> to vector<8x8x128xf32>
    %306 = vector.shape_cast %303 : vector<8x8x128xf32> to vector<1x8x8x128xf32>
    tpu.vector_store %arg4[%c0_344, %c0_345, %c0_346, %c0_347], %306 {strides = array<i32>} : memref<1x8x8x128xf32, #tpu.memory_space<vmem>>, vector<1x8x8x128xf32>,
    return
  }
  func.func @transform_0(%arg0: i32, %arg1: i32) -> (i32, i32, i32, i32, i32, i32) {
    %c0_i32 = arith.constant 0 : i32
    %c0_i32_0 = arith.constant 0 : i32
    %c0_i32_1 = arith.constant 0 : i32
    %c0_i32_2 = arith.constant 0 : i32
    %c0_i32_3 = arith.constant 0 : i32
    %c0_i32_4 = arith.constant 0 : i32
    return %arg0, %c0_i32, %c0_i32_0, %c0_i32_1, %c0_i32_2, %c0_i32_3 : i32, i32, i32, i32, i32, i32
  }
  func.func @transform_1(%arg0: i32, %arg1: i32) -> (i32, i32) {
    %c0_i32 = arith.constant 0 : i32
    %c0_i32_0 = arith.constant 0 : i32
    %c0_i32_1 = arith.constant 0 : i32
    return %c0_i32, %c0_i32_0 : i32, i32
  }
  func.func @transform_2(%arg0: i32, %arg1: i32) -> (i32, i32, i32, i32) {
    %c0_i32 = arith.constant 0 : i32
    %c0_i32_0 = arith.constant 0 : i32
    %c0_i32_1 = arith.constant 0 : i32
    return %arg0, %arg1, %c0_i32, %c0_i32_0 : i32, i32, i32, i32
  }
}

</mosaic_0001>

<bundles_post_ra>
// kernel: conv_relu_block7.1
= control target key start
LH: loop header
LB: loop body
LE: loop exit
PB: predicated region body
PF: predicated region fallthrough
CT: control target
= control target key end

     0   :  { %7 = vsyncpa [#allocation4], 0  ;;  %s15252_s0 = inlined_call_operand.vmem [shape: bf16[2,3,3,10,10,128], index: 0, kind: input, shape index: {}]   ;;  %s15253_s1 = inlined_call_operand.vmem [shape: bf16[6272,128], index: 1, kind: input, shape index: {}]   ;;  %s15254_s2 = inlined_call_operand.hbm [shape: f32[2,8,8,128], index: 2, kind: output, shape index: {}]  }
   0x1   :  { %9 = vsyncpa [#allocation4 + $0x1], 0  ;;  %s12729_s9 = smov 0   ;;  %s12731_s10 = smov 0  }
   0x2   :  { %s12733_s11 = smov 0   ;;  %s12735_s12 = smov 0  }
   0x3   :  { %s12737_s13 = smov 0   ;;  %s12739_s14 = smov 0  }
   0x4 LB: > { %s9852_s15 = sadd.s32 4294967295, %s12709_s14   ;;  %s9853_s16 = sadd.s32 4294967294, %s12709_s14   ;;  %s12709_s14 = sphi %s12739_s14, %s15_s14   ;;  %s12705_s13 = sphi %s12737_s13, %s15265_s13   ;;  %s12701_s12 = sphi %s12735_s12, %s15264_s12   ;;  %s12697_s11 = sphi %s12733_s11, %s15263_s11   ;;  %s12693_s10 = sphi %s12731_s10, %s15262_s10   ;;  %s12689_s9 = sphi %s12729_s9, %s15261_s9  }
   0x5   : > { %s27_s17 = sadd.s32 1, %s12705_s13  ;;  %s83_s18 = sadd.s32 1, %s12697_s11 }
   0x6   : > { %p29_p0 = scmp.ge.s32.totalorder %s27_s17, 2  ;;  %p93_p1 = scmp.ne.s32.totalorder %s12697_s11, %s12693_s10 }
   0x7   : > { %p94_p2 = scmp.eq.s32.totalorder %s9852_s15, 1  ;;  %p99_p3 = scmp.ne.s32.totalorder %s12693_s10, %s12689_s9 }
   0x8   : > { %s15267_s17 = smov (%p29_p0, %s27_s17), 0  ;;  %p100_p5 = scmp.eq.s32.totalorder %s9853_s16, 1 }
   0x9   : > { %p12769_p4 = por %p94_p2, %p93_p1  ;;  %s78_s20 = ssub.s32 %s12705_s13, %s15267_s17 }
   0xa   : > { %p9856_p6 = scmp.ge.s32.totalorder %s12709_s14, 1  ;;  %p81_p7 = scmp.eq.s32.totalorder %s78_s20, 0 }
   0xb   : > { %p12776_p8 = por %p100_p5, %p99_p3  ;;  %p129_p9 = scmp.lt.s32.totalorder %s12709_s14, 3 }
   0xc   : > { %s12782_s22 = scalar_select %p81_p7, %s12697_s11, %s83_s18  }
   0xd   : > { %p130_p10 = pnand %p9856_p6, %p129_p9 }
   0xe   : > { %v12155_v0 = vld [vmem:[%s15253_s1 + $0x40] sm:$0xff] (!%p130_p10)   ;;  %v12159_v4 = vld [vmem:[%s15253_s1 + $0x48] sm:$0xff] (!%p130_p10)   ;;  %v12163_v8 = vld [vmem:[%s15253_s1 + $0x50] sm:$0xff] (!%p130_p10)   ;;  %p151_p11 = scmp.lt.s32.totalorder (!%p130_p10), %s12701_s12, 1  ;;  %vm292_vm0 = vsmask.f32 (!%p130_p10), 3328 }
   0xf   : > { %133 = sbr.rel (%p130_p10) target bundleno = 816 (0x330), region = 28  ;;  %v12156_v1 = vld [vmem:[%s15253_s1 + $0xc0] sm:$0xff] (!%p130_p10)   ;;  %11085 = vmatprep.subr.bf16.mxu0 (!%p130_p10), %v12155_v0  ;;  %v12160_v5 = vld [vmem:[%s15253_s1 + $0xc8] sm:$0xff] (!%p130_p10)   ;;  %v12164_v9 = vld [vmem:[%s15253_s1 + $0xd0] sm:$0xff] (!%p130_p10)   ;;  %vm293_vm1 = vsmask.f32 (!%p130_p10), 7440 }
  0x10   : > { %v12157_v2 = vld [vmem:[%s15253_s1] sm:$0xff] (!%p130_p10)   ;;  %11125 = vmatprep.subr.bf16.mxu1 (!%p130_p10), %v12156_v1  ;;  %v12161_v6 = vld [vmem:[%s15253_s1 + $0x8] sm:$0xff] (!%p130_p10)   ;;  %v12165_v10 = vld [vmem:[%s15253_s1 + $0x10] sm:$0xff] (!%p130_p10)   ;;  %vm755_vm3 = vcmask (!%p130_p10), 1042432   ;;  %vm756_vm4 = vcmask (!%p130_p10), 1046532   ;;  %s11084_s28 = sshll.u32 (!%p130_p10), %s12701_s12, 10 }
  0x11   : > { %v12158_v3 = vld [vmem:[%s15253_s1 + $0x80] sm:$0xff] (!%p130_p10)   ;;  %11086 = vmatpush3.bf16.msra.mxu0 (!%p130_p10), %v12157_v2  ;;  %v12162_v7 = vld [vmem:[%s15253_s1 + $0x88] sm:$0xff] (!%p130_p10)   ;;  %v12166_v11 = vld [vmem:[%s15253_s1 + $0x90] sm:$0xff] (!%p130_p10)   ;;  %s15197_s3 = scalar_lea.hbm (!%p130_p10), %s15254_s2, %s11084_s28  ;;  %s12711_s6 = smov (!%p130_p10), [#allocation3]  }
  0x12   : > { %11126 = vmatpush3.bf16.msra.mxu1 (!%p130_p10), %v12158_v3  ;;  %11087 = vmatprep.subr.bf16.mxu0 (!%p130_p10), %v12159_v4  ;;  %v12167_v12 = vld [vmem:[%s15253_s1 + $0x58] sm:$0xff] (!%p130_p10)   ;;  %v12171_v16 = vld [vmem:[%s15253_s1 + $0x60] sm:$0xff] (!%p130_p10)   ;;  %v12175_v20 = vld [vmem:[%s15253_s1 + $0x68] sm:$0xff] (!%p130_p10)   ;;  %s12635_s8 = sshll.u32 (!%p130_p10), %s12711_s6, 4  ;;  %s12636_s8 = int_to_ptr.vmem [resolvable:$false] %s12635_s8 }
  0x13   : > { %11127 = vmatprep.subr.bf16.mxu1 (!%p130_p10), %v12160_v5  ;;  %v12168_v13 = vld [vmem:[%s15253_s1 + $0xd8] sm:$0xff] (!%p130_p10)   ;;  %v12172_v17 = vld [vmem:[%s15253_s1 + $0xe0] sm:$0xff] (!%p130_p10)   ;;  %v12176_v21 = vld [vmem:[%s15253_s1 + $0xe8] sm:$0xff] (!%p130_p10)   ;;  %s12637_s15 = scalar_lea.vmem (!%p130_p10), %s12636_s8, 2048 }
  0x14   : > { %v12169_v14 = vld [vmem:[%s15253_s1 + $0x18] sm:$0xff] (!%p130_p10)   ;;  %v12173_v18 = vld [vmem:[%s15253_s1 + $0x20] sm:$0xff] (!%p130_p10)   ;;  %v12177_v22 = vld [vmem:[%s15253_s1 + $0x28] sm:$0xff] (!%p130_p10)  }
  0x15   : > { %11088 = vmatpush3.bf16.msra.mxu0 (!%p130_p10), %v12161_v6  ;;  %v12170_v15 = vld [vmem:[%s15253_s1 + $0x98] sm:$0xff] (!%p130_p10)   ;;  %v12174_v19 = vld [vmem:[%s15253_s1 + $0xa0] sm:$0xff] (!%p130_p10)   ;;  %v12178_v23 = vld [vmem:[%s15253_s1 + $0xa8] sm:$0xff] (!%p130_p10)  }
  0x16   : > { %11128 = vmatpush3.bf16.msra.mxu1 %v12162_v7  ;;  %11089 = vmatprep.subr.bf16.mxu0 %v12163_v8  ;;  %s152_s5 = scalar_select %p151_p11, %s12701_s12, 1  ;;  %v12179_v24 = vld [vmem:[%s15253_s1 + $0x70] sm:$0xff]   ;;  %v12183_v28 = vld [vmem:[%s15253_s1 + $0x78] sm:$0xff]   ;;  %vm12893_vm2 = vmor %vm292_vm0, %vm293_vm1 }
  0x17   : > { %11129 = vmatprep.subr.bf16.mxu1 %v12164_v9  ;;  %v12180_v25 = vld [vmem:[%s15253_s1 + $0xf0] sm:$0xff]   ;;  %v12184_v29 = vld [vmem:[%s15253_s1 + $0xf8] sm:$0xff]   ;;  %v12190_v51 = vld [vmem:[%s15253_s1 + $0x140] sm:$0xff]  }
  0x18   : > { %v12181_v26 = vld [vmem:[%s15253_s1 + $0x30] sm:$0xff]   ;;  %s12097_s24 = smul.u32 720, %s152_s5  ;;  %v12185_v30 = vld [vmem:[%s15253_s1 + $0x38] sm:$0xff]   ;;  %v12191_v54 = vld [vmem:[%s15253_s1 + $0x1c0] sm:$0xff]  }
  0x19   : > { %11090 = vmatpush3.bf16.msra.mxu0 %v12165_v10  ;;  %v12182_v27 = vld [vmem:[%s15253_s1 + $0xb0] sm:$0xff]   ;;  %v12186_v31 = vld [vmem:[%s15253_s1 + $0xb8] sm:$0xff]   ;;  %v12192_v56 = vld [vmem:[%s15253_s1 + $0x100] sm:$0xff]  }
  0x1a   : > { %11130 = vmatpush3.bf16.msra.mxu1 %v12166_v11  ;;  %11091 = vmatprep.subr.bf16.mxu0 %v12167_v12  ;;  %s12882_s7 = scalar_lea.vmem %s15252_s0, %s12097_s24  ;;  %v12194_v60 = vld [vmem:[%s15253_s1 + $0x148] sm:$0xff]   ;;  %v12193_v62 = vld [vmem:[%s15253_s1 + $0x180] sm:$0xff]   ;;  %vm13051_vm5 = vmor %vm755_vm3, %vm756_vm4 }
  0x1b   : > { %11131 = vmatprep.subr.bf16.mxu1 %v12168_v13  ;;  %v12187_v32 = vld [vmem:[%s12882_s7 + $0x50] ss:$8 sps:$4 sm:$0xff]   ;;  %v276_v33 = vld [vmem:[%s12882_s7] sm:$0xf]  ;;  %v277_v34 = vld [vmem:[%s12882_s7 + $0x4] sm:$0x1] }
  0x1c   : > { %v278_v35 = vld [vmem:[%s12882_s7 + $0x8] sm:$0xf]  ;;  %8046 = vmatprep.mubr.bf16.mxu0 %v12187_v32  ;;  %v279_v36 = vld [vmem:[%s12882_s7 + $0xc] sm:$0x1]  ;;  %v296_v37 = vshrl.u32 %v276_v33, 16  ;;  %v299_v38 = vshll.u32 %v276_v33, 16 }
  0x1d   : > { %11092 = vmatpush3.bf16.msra.mxu0 %v12169_v14  ;;  %v305_v39 = vshll.u32 %v277_v34, 16  ;;  %v310_v40 = vshrl.u32 %v278_v35, 16  ;;  %v313_v41 = vshll.u32 %v278_v35, 16  ;;  %v319_v42 = vshll.u32 %v279_v36, 16  ;;  %v12188_v43 = vld [vmem:[%s12882_s7] ss:$8 sps:$4 sm:$0xff]  }
  0x1e   : > { %11132 = vmatpush3.bf16.msra.mxu1 %v12170_v15  ;;  %11093 = vmatprep.subr.bf16.mxu0 %v12171_v16  ;;  %v298_v44 = vrot.slane %v296_v37, 4  ;;  %v301_v45 = vrot.slane %v299_v38, 5  ;;  %v12189_v58 = vld [vmem:[%s12882_s7 + $0xa0] ss:$8 sps:$4 sm:$0xff]   ;;  %v280_v4 = vld [vmem:[%s12882_s7 + $0x10] sm:$0xf] }
  0x1f   : > { %11133 = vmatprep.subr.bf16.mxu1 %v12172_v17  ;;  %v312_v46 = vrot.slane %v310_v40, 4  ;;  %v315_v48 = vrot.slane %v313_v41, 5  ;;  %v307_v50 = vrot.slane %v305_v39, 5  ;;  %v321_v53 = vrot.slane %v319_v42, 5  ;;  %v12196_v0 = vld [vmem:[%s15253_s1 + $0x108] sm:$0xff]   ;;  %v12205_v32 = vld [vmem:[%s15253_s1 + $0x158] sm:$0xff]  }
  0x20   : > { %v302_v49 = vor.u32 %v301_v45, %v298_v44  ;;  %v12195_v1 = vld [vmem:[%s15253_s1 + $0x1c8] sm:$0xff]   ;;  %v281_v5 = vld [vmem:[%s12882_s7 + $0x14] sm:$0x1]  ;;  %v282_v6 = vld [vmem:[%s12882_s7 + $0x18] sm:$0xf]  ;;  %v324_v8 = vshrl.u32 %v280_v4, 16 }
  0x21   : > { %11094 = vmatpush3.bf16.msra.mxu0 %v12173_v18  ;;  %v316_v52 = vor.u32 %v315_v48, %v312_v46  ;;  %v12197_v2 = vld [vmem:[%s15253_s1 + $0x188] sm:$0xff]   ;;  %v283_v7 = vld [vmem:[%s12882_s7 + $0x1c] sm:$0x1]  ;;  %v327_v9 = vshll.u32 %v280_v4, 16  ;;  %v333_v10 = vshll.u32 %v281_v5, 16  ;;  %v338_v11 = vshrl.u32 %v282_v6, 16 }
  0x22   : > { %11134 = vmatpush3.bf16.msra.mxu1 %v12174_v19  ;;  %11095 = vmatprep.subr.bf16.mxu0 %v12175_v20  ;;  %v303_v55 = vrot.slane %v302_v49, 4  ;;  %v12198_v3 = vld [vmem:[%s12882_s7 + $0x60] ss:$8 sps:$4 sm:$0xff]   ;;  %v341_v12 = vshll.u32 %v282_v6, 16  ;;  %v347_v13 = vshll.u32 %v283_v7, 16  ;;  %v326_v14 = vrot.slane %v324_v8, 4 }
  0x23   : > { %11135 = vmatprep.subr.bf16.mxu1 %v12176_v21  ;;  %v317_v57 = vrot.slane %v316_v52, 4  ;;  %v329_v15 = vrot.slane %v327_v9, 5  ;;  %v340_v16 = vrot.slane %v338_v11, 4  ;;  %v12199_v17 = vld [vmem:[%s12882_s7 + $0x10] ss:$8 sps:$4 sm:$0xff]   ;;  %v335_v20 = vrot.slane %v333_v10, 5 }
  0x24   : > { %v308_v59 = vsel %vm12893_vm2, %v303_v55, %v307_v50  ;;  %v343_v18 = vrot.slane %v341_v12, 5  ;;  %v12206_v34 = vld [vmem:[%s15253_s1 + $0x1d8] sm:$0xff]   ;;  %v284_v38 = vld [vmem:[%s12882_s7 + $0x20] sm:$0xf]  ;;  %v285_v39 = vld [vmem:[%s12882_s7 + $0x24] sm:$0x1] }
  0x25   : > { %11096 = vmatpush3.bf16.msra.mxu0 %v12177_v22  ;;  %v322_v61 = vsel %vm12893_vm2, %v317_v57, %v321_v53  ;;  %v330_v19 = vor.u32 %v329_v15, %v326_v14  ;;  %v349_v22 = vrot.slane %v347_v13, 5  ;;  %v12207_v35 = vld [vmem:[%s15253_s1 + $0x118] sm:$0xff]   ;;  %v286_v40 = vld [vmem:[%s12882_s7 + $0x28] sm:$0xf]  ;;  %v287_v41 = vld [vmem:[%s12882_s7 + $0x2c] sm:$0x1] }
  0x26   : > { %11136 = vmatpush3.bf16.msra.mxu1 %v12178_v23  ;;  %11097 = vmatprep.subr.bf16.mxu0 %v12179_v24  ;;  %v9887_v63 = vcombine.low %v308_v59, %v322_v61  ;;  %v344_v21 = vor.u32 %v343_v18, %v340_v16  ;;  %v12201_v23 = vld [vmem:[%s15253_s1 + $0x150] sm:$0xff]   ;;  %v12208_v36 = vld [vmem:[%s15253_s1 + $0x198] sm:$0xff]   ;;  %v352_v42 = vshrl.u32 %v284_v38, 16  ;;  %v361_v44 = vshll.u32 %v285_v39, 16  ;;  %v12217_v5 = vld [vmem:[%s15253_s1 + $0x1e8] sm:$0xff]  }
  0x27   : > { %11137 = vmatprep.subr.bf16.mxu1 %v12180_v25  ;;  %v331_v24 = vrot.slane %v330_v19, 4  ;;  %v12202_v25 = vld [vmem:[%s15253_s1 + $0x1d0] sm:$0xff]   ;;  %v366_v45 = vshrl.u32 %v286_v40, 16  ;;  %v369_v46 = vshll.u32 %v286_v40, 16  ;;  %v375_v48 = vshll.u32 %v287_v41, 16  ;;  %v12218_v6 = vld [vmem:[%s15253_s1 + $0x128] sm:$0xff]  }
  0x28   : > { %8111 = vmatprep.mubr.bf16.mxu1 %v9887_v63  ;;  %v12209_v37 = vld [vmem:[%s12882_s7 + $0x70] ss:$8 sps:$4 sm:$0xff]   ;;  %v354_v49 = vrot.slane %v352_v42, 4  ;;  %v363_v55 = vrot.slane %v361_v44, 5  ;;  %v12214_v63 = vld [vmem:[%s15253_s1 + $0x120] sm:$0xff]   ;;  %v12219_v7 = vld [vmem:[%s15253_s1 + $0x1a8] sm:$0xff]  }
  0x29   : > { %11098 = vmatpush3.bf16.msra.mxu0 %v12181_v26  ;;  %v345_v26 = vrot.slane %v344_v21, 4  ;;  %v368_v52 = vrot.slane %v366_v45, 4  ;;  %v371_v53 = vrot.slane %v369_v46, 5  ;;  %v377_v57 = vrot.slane %v375_v48, 5  ;;  %v12220_v8 = vld [vmem:[%s12882_s7 + $0x80] ss:$8 sps:$4 sm:$0xff]  }
  0x2a   : > { %11138 = vmatpush3.bf16.msra.mxu1 %v12182_v27  ;;  %11099 = vmatprep.subr.bf16.mxu0 %v12183_v28  ;;  %v12200_v27 = vld [vmem:[%s12882_s7 + $0xb0] ss:$8 sps:$4 sm:$0xff]   ;;  %v289_v10 = vld [vmem:[%s12882_s7 + $0x34] sm:$0x1]  ;;  %v291_v12 = vld [vmem:[%s12882_s7 + $0x3c] sm:$0x1] }
  0x2b   : > { %11139 = vmatprep.subr.bf16.mxu1 %v12184_v29  ;;  %v12203_v28 = vld [vmem:[%s15253_s1 + $0x110] sm:$0xff]   ;;  %v336_v29 = vsel %vm12893_vm2, %v331_v24, %v335_v20  ;;  %v290_v11 = vld [vmem:[%s12882_s7 + $0x38] sm:$0xf]  ;;  %v389_v15 = vshll.u32 %v289_v10, 16  ;;  %v403_v18 = vshll.u32 %v291_v12, 16 }
  0x2c   : > { %v288_v9 = vld [vmem:[%s12882_s7 + $0x30] sm:$0xf]  ;;  %v394_v16 = vshrl.u32 %v290_v11, 16  ;;  %v12229_v40 = vld [vmem:[%s15253_s1 + $0x138] sm:$0xff]   ;;  %v9911_v42 = vld [vmem:[%s12882_s7 + $0xa0] sm:$0xf] }
  0x2d   : > { %11100 = vmatpush3.bf16.msra.mxu0 %v12185_v30  ;;  %v12204_v30 = vld [vmem:[%s15253_s1 + $0x190] sm:$0xff]   ;;  %v380_v13 = vshrl.u32 %v288_v9, 16  ;;  %v383_v14 = vshll.u32 %v288_v9, 16  ;;  %v12230_v41 = vld [vmem:[%s15253_s1 + $0x1b8] sm:$0xff]   ;;  %v9913_v44 = vld [vmem:[%s12882_s7 + $0xa8] sm:$0xf] }
  0x2e   : > { %11140 = vmatpush3.bf16.msra.mxu1 %v12186_v31  ;;  %11165 = vmatprep.subr.bf16.mxu0 %v12190_v51  ;;  %v350_v31 = vsel %vm12893_vm2, %v345_v26, %v349_v22  ;;  %v12210_v51 = vld [vmem:[%s12882_s7 + $0x20] ss:$8 sps:$4 sm:$0xff]   ;;  %v12221_v19 = vld [vmem:[%s12882_s7 + $0x30] ss:$8 sps:$4 sm:$0xff]   ;;  %v396_v22 = vrot.slane %v394_v16, 4  ;;  %v592_v46 = vshrl.u32 %v9911_v42, 16 }
  0x2f   : > { %11205 = vmatprep.subr.bf16.mxu1 %v12191_v54  ;;  %v9888_v33 = vcombine.low %v336_v29, %v350_v31  ;;  %v382_v20 = vrot.slane %v380_v13, 4  ;;  %v385_v21 = vrot.slane %v383_v14, 5  ;;  %v12223_v26 = vld [vmem:[%s15253_s1 + $0x170] sm:$0xff]   ;;  %v9914_v45 = vld [vmem:[%s12882_s7 + $0xac] sm:$0x1]  ;;  %v595_v48 = vshll.u32 %v9911_v42, 16 }
  0x30   : > { %8047 = vmatmul.mubr.bf16.vlgmr.msra.gmra.mrb[0].mxu0 %v12188_v43  ;;  %v355_v43 = vshll.u32 %v284_v38, 16  ;;  %v12224_v29 = vld [vmem:[%s15253_s1 + $0x1f0] sm:$0xff]   ;;  %v12228_v38 = vld [vmem:[%s15253_s1 + $0x1f8] sm:$0xff]   ;;  %v724_v13 = vld [vmem:[%s12882_s7 + $0x4] sm:$0x1] }
  0x31   : > { %11166 = vmatpush3.bf16.msra.mxu0 %v12192_v56  ;;  %8112 = vmatmul.mubr.bf16.vlgmr.msra.gmra.mrb[0].mxu1 %v12189_v58  ;;  %v372_v56 = vor.u32 %v371_v53, %v368_v52  ;;  %v12212_v58 = vld [vmem:[%s15253_s1 + $0x160] sm:$0xff]   ;;  %v386_v24 = vor.u32 %v385_v21, %v382_v20  ;;  %v12225_v31 = vld [vmem:[%s15253_s1 + $0x130] sm:$0xff]   ;;  %v615_v52 = vshll.u32 %v9914_v45, 16  ;;  %v594_v53 = vrot.slane %v592_v46, 4  ;;  %v12239_v45 = vld [vmem:[%s15253_s1 + $0x288] sm:$0xff]  }
  0x32   : > { %11167 = vmatprep.subr.bf16.mxu0 %v12194_v60  ;;  %11206 = vmatpush3.bf16.msra.mxu1 %v12193_v62  ;;  %v357_v50 = vrot.slane %v355_v43, 5  ;;  %v12213_v60 = vld [vmem:[%s15253_s1 + $0x1e0] sm:$0xff]   ;;  %v9915_v46 = vld [vmem:[%s12882_s7 + $0xb0] sm:$0xf] }
  0x33   : > { %8054 = vmatprep.mubr.bf16.mxu0 %v12198_v3  ;;  %11207 = vmatprep.subr.bf16.mxu1 %v12195_v1  ;;  %v373_v61 = vrot.slane %v372_v56, 4  ;;  %v12211_v62 = vld [vmem:[%s12882_s7 + $0xc0] ss:$8 sps:$4 sm:$0xff]   ;;  %v9912_v43 = vld [vmem:[%s12882_s7 + $0xa4] sm:$0x1] }
  0x34   : > { %8119 = vmatprep.mubr.bf16.mxu1 %v9888_v33  ;;  %v358_v54 = vor.u32 %v357_v50, %v354_v49  ;;  %v12215_v1 = vld [vmem:[%s15253_s1 + $0x1a0] sm:$0xff]   ;;  %v12216_v3 = vld [vmem:[%s15253_s1 + $0x168] sm:$0xff]   ;;  %v12222_v33 = vld [vmem:[%s12882_s7 + $0xd0] ss:$8 sps:$4 sm:$0xff]   ;;  %v601_v49 = vshll.u32 %v9912_v43, 16  ;;  %v606_v50 = vshrl.u32 %v9913_v44, 16 }
  0x35   : > { %11168 = vmatpush3.bf16.msra.mxu0 %v12196_v0  ;;  %v12237_v43 = vld [vmem:[%s15253_s1 + $0x2c8] sm:$0xff]  }
  0x36   : > { %11208 = vmatpush3.bf16.msra.mxu1 %v12197_v2  ;;  %11169 = vmatprep.subr.bf16.mxu0 %v12201_v23  ;;  %v359_v59 = vrot.slane %v358_v54, 4  ;;  %v378_v2 = vsel %vm12893_vm2, %v373_v61, %v377_v57  ;;  %v597_v54 = vrot.slane %v595_v48, 5  ;;  %v608_v56 = vrot.slane %v606_v50, 4  ;;  %v12231_v57 = vld [vmem:[%s12882_s7 + $0xf0] ss:$8 sps:$4 sm:$0xff]  }
  0x37   : > { %11209 = vmatprep.subr.bf16.mxu1 %v12202_v25  ;;  %v391_v25 = vrot.slane %v389_v15, 5  ;;  %v9892_v61 = vld [vmem:[%s12882_s7 + $0x54] sm:$0x1]  ;;  %v9918_v50 = vld [vmem:[%s12882_s7 + $0xbc] sm:$0x1] }
  0x38   : > { %8055 = vmatmul.mubr.bf16.gmra.mrb[4].mxu0 %v12199_v17  ;;  %v364_v0 = vsel %vm12893_vm2, %v359_v59, %v363_v55  ;;  %v397_v17 = vshll.u32 %v290_v11, 16  ;;  %v603_v55 = vrot.slane %v601_v49, 5  ;;  %v617_v59 = vrot.slane %v615_v52, 5  ;;  %v9916_v48 = vld [vmem:[%s12882_s7 + $0xb4] sm:$0x1] }
  0x39   : > { %11170 = vmatpush3.bf16.msra.mxu0 %v12203_v28  ;;  %8120 = vmatmul.mubr.bf16.gmra.mrb[4].mxu1 %v12200_v27  ;;  %v9889_v4 = vcombine.low %v364_v0, %v378_v2  ;;  %v405_v28 = vrot.slane %v403_v18, 5  ;;  %v9894_v0 = vld [vmem:[%s12882_s7 + $0x5c] sm:$0x1]  ;;  %v725_v18 = vld [vmem:[%s12882_s7 + $0x8] sm:$0xe]  ;;  %v623_v52 = vshll.u32 %v9915_v46, 16 }
  0x3a   : > { %11210 = vmatpush3.bf16.msra.mxu1 %v12204_v30  ;;  %11171 = vmatprep.subr.bf16.mxu0 %v12205_v32  ;;  %v399_v23 = vrot.slane %v397_v17, 5  ;;  %v387_v30 = vrot.slane %v386_v24, 4  ;;  %v467_v12 = vshll.u32 %v9894_v0, 16  ;;  %v9917_v49 = vld [vmem:[%s12882_s7 + $0xb8] sm:$0xf] }
  0x3b   : > { %11211 = vmatprep.subr.bf16.mxu1 %v12206_v34  ;;  %8062 = vmatprep.mubr.bf16.mxu0 %v12209_v37  ;;  %v12226_v34 = vld [vmem:[%s15253_s1 + $0x1b0] sm:$0xff]  }
  0x3c   : > { %8127 = vmatprep.mubr.bf16.mxu1 %v9889_v4  ;;  %v400_v27 = vor.u32 %v399_v23, %v396_v22  ;;  %v453_v4 = vshll.u32 %v9892_v61, 16  ;;  %v469_v21 = vrot.slane %v467_v12, 5  ;;  %v726_v22 = vld [vmem:[%s12882_s7 + $0xc] sm:$0x1] }
  0x3d   : > { %11172 = vmatpush3.bf16.msra.mxu0 %v12207_v35  ;;  %v392_v35 = vsel %vm12893_vm2, %v387_v30, %v391_v25 }
  0x3e   : > { %11212 = vmatpush3.bf16.msra.mxu1 %v12208_v36  ;;  %11173 = vmatprep.subr.bf16.mxu0 %v12212_v58  ;;  %v401_v32 = vrot.slane %v400_v27, 4  ;;  %v12227_v36 = vld [vmem:[%s15253_s1 + $0x178] sm:$0xff]   ;;  %v455_v15 = vrot.slane %v453_v4, 5  ;;  %v760_v27 = vrot.slane %v724_v13, 5  ;;  %v9898_v4 = vld [vmem:[%s12882_s7 + $0x6c] sm:$0x1] }
  0x3f   : > { %11213 = vmatprep.subr.bf16.mxu1 %v12213_v60  ;;  %v9891_v60 = vld [vmem:[%s12882_s7 + $0x50] sm:$0xf]  ;;  %v495_v12 = vshll.u32 %v9898_v4, 16 }
  0x40   : > { %8063 = vmatmul.mubr.bf16.gmra.mrb[8].mxu0 %v12210_v51  ;;  %v406_v37 = vsel %vm12893_vm2, %v401_v32, %v405_v28  ;;  %v609_v51 = vshll.u32 %v9913_v44, 16  ;;  %v447_v2 = vshll.u32 %v9891_v60, 16  ;;  %v9932_v28 = vrot.slane %v725_v18, 9  ;;  %v12233_v32 = vld [vmem:[%s15253_s1 + $0x2c0] sm:$0xff]   ;;  %v12238_v44 = vld [vmem:[%s15253_s1 + $0x208] sm:$0xff]  }
  0x41   : > { %11174 = vmatpush3.bf16.msra.mxu0 %v12214_v63  ;;  %8128 = vmatmul.mubr.bf16.gmra.mrb[8].mxu1 %v12211_v62  ;;  %v9890_v39 = vcombine.low %v392_v35, %v406_v37  ;;  %v598_v62 = vor.u32 %v597_v54, %v594_v53  ;;  %v9893_v63 = vld [vmem:[%s12882_s7 + $0x58] sm:$0xf]  ;;  %v12234_v35 = vld [vmem:[%s15253_s1 + $0x200] sm:$0xff]   ;;  %v629_v53 = vshll.u32 %v9916_v48, 16  ;;  %v634_v54 = vshrl.u32 %v9917_v49, 16 }
  0x42   : > { %11214 = vmatpush3.bf16.msra.mxu1 %v12215_v1  ;;  %11175 = vmatprep.subr.bf16.mxu0 %v12216_v3  ;;  %v611_v58 = vrot.slane %v609_v51, 5  ;;  %v444_v1 = vshrl.u32 %v9891_v60, 16  ;;  %v449_v11 = vrot.slane %v447_v2, 5  ;;  %v620_v51 = vshrl.u32 %v9915_v46, 16  ;;  %v9897_v2 = vld [vmem:[%s12882_s7 + $0x68] sm:$0xf] }
  0x43   : > { %11215 = vmatprep.subr.bf16.mxu1 %v12217_v5  ;;  %8070 = vmatprep.mubr.bf16.mxu0 %v12220_v8  ;;  %v458_v5 = vshrl.u32 %v9893_v63, 16  ;;  %v12232_v8 = vld [vmem:[%s15253_s1 + $0x240] sm:$0xff]   ;;  %v599_v9 = vrot.slane %v598_v62, 4  ;;  %v631_v60 = vrot.slane %v629_v53, 5  ;;  %v636_v61 = vrot.slane %v634_v54, 4  ;;  %v12246_v48 = vld [vmem:[%s15253_s1 + $0x2d8] sm:$0xff]  }
  0x44   : > { %8135 = vmatprep.mubr.bf16.mxu1 %v9890_v39  ;;  %v612_v3 = vor.u32 %v611_v58, %v608_v56  ;;  %v446_v10 = vrot.slane %v444_v1, 4  ;;  %v643_v56 = vshll.u32 %v9918_v50, 16  ;;  %v622_v58 = vrot.slane %v620_v51, 4  ;;  %v9895_v62 = vld [vmem:[%s12882_s7 + $0x60] sm:$0xf]  ;;  %v12248_v50 = vld [vmem:[%s15253_s1 + $0x298] sm:$0xff]  }
  0x45   : > { %11176 = vmatpush3.bf16.msra.mxu0 %v12218_v6  ;;  %v461_v6 = vshll.u32 %v9893_v63, 16  ;;  %v460_v16 = vrot.slane %v458_v5, 4  ;;  %v9896_v1 = vld [vmem:[%s12882_s7 + $0x64] sm:$0x1]  ;;  %v472_v5 = vshrl.u32 %v9895_v62, 16 }
  0x46   : > { %11216 = vmatpush3.bf16.msra.mxu1 %v12219_v7  ;;  %11177 = vmatprep.subr.bf16.mxu0 %v12223_v26  ;;  %v723_v7 = vld [vmem:[%s12882_s7] sm:$0xe]  ;;  %v613_v14 = vrot.slane %v612_v3, 4  ;;  %v450_v20 = vor.u32 %v449_v11, %v446_v10  ;;  %v645_v0 = vrot.slane %v643_v56, 5  ;;  %v486_v10 = vshrl.u32 %v9897_v2, 16 }
  0x47   : > { %11217 = vmatprep.subr.bf16.mxu1 %v12224_v29  ;;  %v463_v17 = vrot.slane %v461_v6, 5  ;;  %v9931_v24 = vrot.slane %v723_v7, 9  ;;  %v475_v6 = vshll.u32 %v9895_v62, 16  ;;  %v481_v7 = vshll.u32 %v9896_v1, 16  ;;  %v727_v13 = vld [vmem:[%s12882_s7 + $0x10] sm:$0xe] }
  0x48   : > { %8071 = vmatmul.mubr.bf16.gmra.mrb[12].mxu0 %v12221_v19  ;;  %v604_v19 = vsel %vm12893_vm2, %v599_v9, %v603_v55  ;;  %v618_v25 = vsel %vm12893_vm2, %v613_v14, %v617_v59  ;;  %v451_v30 = vrot.slane %v450_v20, 4  ;;  %v637_v55 = vshll.u32 %v9917_v49, 16  ;;  %v12242_v14 = vld [vmem:[%s15253_s1 + $0x2d0] sm:$0xff]   ;;  %v12247_v49 = vld [vmem:[%s15253_s1 + $0x218] sm:$0xff]   ;;  %v9919_v51 = vld [vmem:[%s12882_s7 + $0xc0] sm:$0xf] }
  0x49   : > { %11178 = vmatpush3.bf16.msra.mxu0 %v12225_v31  ;;  %8136 = vmatmul.mubr.bf16.gmra.mrb[12].mxu1 %v12222_v33  ;;  %v464_v26 = vor.u32 %v463_v17, %v460_v16  ;;  %v9927_v29 = vcombine.low %v604_v19, %v618_v25  ;;  %v764_v31 = vrot.slane %v726_v22, 5  ;;  %v625_v59 = vrot.slane %v623_v52, 5  ;;  %v728_v19 = vld [vmem:[%s12882_s7 + $0x14] sm:$0x1]  ;;  %v729_v25 = vld [vmem:[%s12882_s7 + $0x18] sm:$0xe] }
  0x4a   : > { %11218 = vmatpush3.bf16.msra.mxu1 %v12226_v34  ;;  %11179 = vmatprep.subr.bf16.mxu0 %v12227_v36  ;;  %v761_v34 = vsel %vm13051_vm5, %v9931_v24, %v760_v27  ;;  %v12235_v36 = vld [vmem:[%s15253_s1 + $0x280] sm:$0xff]   ;;  %v456_v37 = vsel %vm12893_vm2, %v451_v30, %v455_v15  ;;  %v639_v63 = vrot.slane %v637_v55, 5  ;;  %v489_v11 = vshll.u32 %v9897_v2, 16  ;;  %v9921_v53 = vld [vmem:[%s12882_s7 + $0xc8] sm:$0xf] }
  0x4b   : > { %11219 = vmatprep.subr.bf16.mxu1 %v12228_v38  ;;  %8241 = vmatprep.mubr.bf16.mxu1 %v12231_v57  ;;  %v465_v33 = vrot.slane %v464_v26, 4  ;;  %v765_v38 = vsel %vm13051_vm5, %v9932_v28, %v764_v31  ;;  %v12240_v57 = vld [vmem:[%s12882_s7 + $0x100] ss:$8 sps:$4 sm:$0xff]   ;;  %v626_v3 = vor.u32 %v625_v59, %v622_v58  ;;  %v474_v16 = vrot.slane %v472_v5, 4  ;;  %v730_v28 = vld [vmem:[%s12882_s7 + $0x1c] sm:$0x1] }
  0x4c   : > { %8176 = vmatprep.mubr.bf16.mxu0 %v9927_v29  ;;  %v640_v9 = vor.u32 %v639_v63, %v636_v61  ;;  %v477_v17 = vrot.slane %v475_v6, 5  ;;  %v483_v18 = vrot.slane %v481_v7, 5  ;;  %v491_v22 = vrot.slane %v489_v11, 5  ;;  %v9920_v52 = vld [vmem:[%s12882_s7 + $0xc4] sm:$0x1] }
  0x4d   : > { %11180 = vmatpush3.bf16.msra.mxu0 %v12229_v40  ;;  %v470_v39 = vsel %vm12893_vm2, %v465_v33, %v469_v21  ;;  %v9939_v40 = vcombine.low %v761_v34, %v765_v38  ;;  %v627_v15 = vrot.slane %v626_v3, 4  ;;  %v488_v21 = vrot.slane %v486_v10, 4  ;;  %v12243_v38 = vld [vmem:[%s15253_s1 + $0x210] sm:$0xff]   ;;  %v9922_v54 = vld [vmem:[%s12882_s7 + $0xcc] sm:$0x1] }
  0x4e   : > { %11220 = vmatpush3.bf16.msra.mxu1 %v12230_v41  ;;  %11245 = vmatprep.subr.bf16.mxu0 %v12232_v8  ;;  %v12236_v41 = vld [vmem:[%s15253_s1 + $0x248] sm:$0xff]   ;;  %v9907_v42 = vcombine.low %v456_v37, %v470_v39  ;;  %v12241_v8 = vld [vmem:[%s15253_s1 + $0x250] sm:$0xff]   ;;  %v641_v20 = vrot.slane %v640_v9, 4  ;;  %v497_v24 = vrot.slane %v495_v12, 5  ;;  %v478_v27 = vor.u32 %v477_v17, %v474_v16  ;;  %v9901_v7 = vld [vmem:[%s12882_s7 + $0x78] sm:$0xf] }
  0x4f   : > { %11285 = vmatprep.subr.bf16.mxu1 %v12233_v32  ;;  %v632_v26 = vsel %vm12893_vm2, %v627_v15, %v631_v60  ;;  %v9933_v29 = vrot.slane %v727_v13, 9  ;;  %v768_v30 = vrot.slane %v728_v19, 5  ;;  %v492_v32 = vor.u32 %v491_v22, %v488_v21  ;;  %v12249_v63 = vld [vmem:[%s12882_s7 + $0x110] ss:$8 sps:$4 sm:$0xff]   ;;  %v9900_v6 = vld [vmem:[%s12882_s7 + $0x74] sm:$0x1] }
  0x50   : > { %8177 = vmatmul.mubr.bf16.vlgmr.msra.gmra.mrb[16].mxu0 %v9907_v42  ;;  %v646_v31 = vsel %vm12893_vm2, %v641_v20, %v645_v0  ;;  %v9934_v33 = vrot.slane %v729_v25, 9  ;;  %v772_v34 = vrot.slane %v730_v28, 5  ;;  %v648_v55 = vshrl.u32 %v9919_v51, 16  ;;  %v9899_v4 = vld [vmem:[%s12882_s7 + $0x70] sm:$0xf] }
  0x51   : > { %8242 = vmatmul.mubr.bf16.vlgmr.msra.gmra.mrb[16].mxu1 %v9939_v40  ;;  %11246 = vmatpush3.bf16.msra.mxu0 %v12234_v35  ;;  %v9928_v35 = vcombine.low %v632_v26, %v646_v31  ;;  %v769_v37 = vsel %vm13051_vm5, %v9933_v29, %v768_v30  ;;  %v493_v39 = vrot.slane %v492_v32, 4  ;;  %v651_v56 = vshll.u32 %v9919_v51, 16  ;;  %v731_v13 = vld [vmem:[%s12882_s7 + $0x20] sm:$0xe]  ;;  %v732_v19 = vld [vmem:[%s12882_s7 + $0x24] sm:$0x1] }
  0x52   : > { %11286 = vmatpush3.bf16.msra.mxu1 %v12235_v36  ;;  %11247 = vmatprep.subr.bf16.mxu0 %v12236_v41  ;;  %v479_v36 = vrot.slane %v478_v27, 4  ;;  %v773_v40 = vsel %vm13051_vm5, %v9934_v33, %v772_v34  ;;  %v12244_v41 = vld [vmem:[%s15253_s1 + $0x290] sm:$0xff]   ;;  %v662_v58 = vshrl.u32 %v9921_v53, 16  ;;  %v665_v59 = vshll.u32 %v9921_v53, 16  ;;  %v733_v25 = vld [vmem:[%s12882_s7 + $0x28] sm:$0xe] }
  0x53   : > { %11287 = vmatprep.subr.bf16.mxu1 %v12237_v43  ;;  %8249 = vmatprep.mubr.bf16.mxu1 %v12240_v57  ;;  %v9940_v43 = vcombine.low %v769_v37, %v773_v40  ;;  %v657_v57 = vshll.u32 %v9920_v52, 16  ;;  %v671_v60 = vshll.u32 %v9922_v54, 16  ;;  %v650_v61 = vrot.slane %v648_v55, 4  ;;  %v734_v30 = vld [vmem:[%s12882_s7 + $0x2c] sm:$0x1]  ;;  %v12251_v31 = vld [vmem:[%s15253_s1 + $0x2e0] sm:$0xff]  }
  0x54   : > { %8184 = vmatprep.mubr.bf16.mxu0 %v9928_v35  ;;  %v484_v42 = vsel %vm12893_vm2, %v479_v36, %v483_v18  ;;  %v653_v62 = vrot.slane %v651_v56, 5  ;;  %v664_v1 = vrot.slane %v662_v58, 4  ;;  %v667_v2 = vrot.slane %v665_v59, 5  ;;  %v12255_v51 = vld [vmem:[%s15253_s1 + $0x2e8] sm:$0xff]   ;;  %v9923_v55 = vld [vmem:[%s12882_s7 + $0xd0] sm:$0xf] }
  0x55   : > { %11248 = vmatpush3.bf16.msra.mxu0 %v12238_v44  ;;  %v498_v44 = vsel %vm12893_vm2, %v493_v39, %v497_v24  ;;  %v659_v0 = vrot.slane %v657_v57, 5  ;;  %v673_v3 = vrot.slane %v671_v60, 5  ;;  %v500_v10 = vshrl.u32 %v9899_v4, 16  ;;  %v12256_v53 = vld [vmem:[%s15253_s1 + $0x228] sm:$0xff]   ;;  %v9924_v56 = vld [vmem:[%s12882_s7 + $0xd4] sm:$0x1] }
  0x56   : > { %11288 = vmatpush3.bf16.msra.mxu1 %v12239_v45  ;;  %11249 = vmatprep.subr.bf16.mxu0 %v12241_v8  ;;  %v12245_v45 = vld [vmem:[%s15253_s1 + $0x258] sm:$0xff]   ;;  %v9908_v46 = vcombine.low %v484_v42, %v498_v44  ;;  %v654_v5 = vor.u32 %v653_v62, %v650_v61  ;;  %v668_v9 = vor.u32 %v667_v2, %v664_v1  ;;  %v503_v11 = vshll.u32 %v9899_v4, 16  ;;  %v12252_v42 = vld [vmem:[%s15253_s1 + $0x220] sm:$0xff]   ;;  %v12257_v54 = vld [vmem:[%s15253_s1 + $0x2a8] sm:$0xff]  }
  0x57   : > { %11289 = vmatprep.subr.bf16.mxu1 %v12242_v14  ;;  %v9902_v8 = vld [vmem:[%s12882_s7 + $0x7c] sm:$0x1]  ;;  %v509_v12 = vshll.u32 %v9900_v6, 16  ;;  %v12250_v14 = vld [vmem:[%s15253_s1 + $0x260] sm:$0xff]   ;;  %v514_v16 = vshrl.u32 %v9901_v7, 16  ;;  %v517_v17 = vshll.u32 %v9901_v7, 16 }
  0x58   : > { %8185 = vmatmul.mubr.bf16.gmra.mrb[20].mxu0 %v9908_v46  ;;  %v655_v15 = vrot.slane %v654_v5, 4  ;;  %v523_v18 = vshll.u32 %v9902_v8, 16  ;;  %v669_v20 = vrot.slane %v668_v9, 4  ;;  %v502_v21 = vrot.slane %v500_v10, 4  ;;  %v9925_v57 = vld [vmem:[%s12882_s7 + $0xd8] sm:$0xf] }
  0x59   : > { %11250 = vmatpush3.bf16.msra.mxu0 %v12243_v38  ;;  %8250 = vmatmul.mubr.bf16.gmra.mrb[20].mxu1 %v9940_v43  ;;  %v505_v22 = vrot.slane %v503_v11, 5  ;;  %v511_v24 = vrot.slane %v509_v12, 5  ;;  %v516_v27 = vrot.slane %v514_v16, 4  ;;  %v519_v28 = vrot.slane %v517_v17, 5  ;;  %v9926_v58 = vld [vmem:[%s12882_s7 + $0xdc] sm:$0x1] }
  0x5a   : > { %11290 = vmatpush3.bf16.msra.mxu1 %v12244_v41  ;;  %11251 = vmatprep.subr.bf16.mxu0 %v12245_v45  ;;  %v660_v26 = vsel %vm12893_vm2, %v655_v15, %v659_v0  ;;  %v525_v29 = vrot.slane %v523_v18, 5  ;;  %v674_v32 = vsel %vm12893_vm2, %v669_v20, %v673_v3  ;;  %v9935_v34 = vrot.slane %v731_v13, 9  ;;  %v12253_v45 = vld [vmem:[%s15253_s1 + $0x2a0] sm:$0xff]   ;;  %v9905_v11 = vld [vmem:[%s12882_s7 + $0x88] sm:$0xf]  ;;  %v12259_v20 = vld [vmem:[%s15253_s1 + $0x270] sm:$0xff]  }
  0x5b   : > { %11291 = vmatprep.subr.bf16.mxu1 %v12246_v48  ;;  %8257 = vmatprep.mubr.bf16.mxu1 %v12249_v63  ;;  %v506_v33 = vor.u32 %v505_v22, %v502_v21  ;;  %v776_v35 = vrot.slane %v732_v19, 5  ;;  %v9929_v36 = vcombine.low %v660_v26, %v674_v32  ;;  %v520_v37 = vor.u32 %v519_v28, %v516_v27  ;;  %v12258_v5 = vld [vmem:[%s12882_s7 + $0x120] ss:$8 sps:$4 sm:$0xff]   ;;  %v9904_v9 = vld [vmem:[%s12882_s7 + $0x84] sm:$0x1] }
  0x5c   : > { %v9936_v38 = vrot.slane %v733_v25, 9  ;;  %v780_v39 = vrot.slane %v734_v30, 5  ;;  %v676_v59 = vshrl.u32 %v9923_v55, 16  ;;  %v679_v60 = vshll.u32 %v9923_v55, 16  ;;  %v9903_v8 = vld [vmem:[%s12882_s7 + $0x80] sm:$0xf] }
  0x5d   : > { %11252 = vmatpush3.bf16.msra.mxu0 %v12247_v49  ;;  %v507_v40 = vrot.slane %v506_v33, 4  ;;  %v777_v41 = vsel %vm13051_vm5, %v9935_v34, %v776_v35  ;;  %8192 = vmatprep.mubr.bf16.mxu0 %v9929_v36  ;;  %v521_v43 = vrot.slane %v520_v37, 4  ;;  %v12254_v49 = vld [vmem:[%s15253_s1 + $0x268] sm:$0xff]   ;;  %v685_v61 = vshll.u32 %v9924_v56, 16  ;;  %v735_v19 = vld [vmem:[%s12882_s7 + $0x30] sm:$0xe] }
  0x5e   : > { %11292 = vmatpush3.bf16.msra.mxu1 %v12248_v50  ;;  %11253 = vmatprep.subr.bf16.mxu0 %v12250_v14  ;;  %v781_v44 = vsel %vm13051_vm5, %v9936_v38, %v780_v39  ;;  %v690_v62 = vshrl.u32 %v9925_v57, 16  ;;  %v693_v63 = vshll.u32 %v9925_v57, 16  ;;  %v699_v0 = vshll.u32 %v9926_v58, 16  ;;  %v9906_v12 = vld [vmem:[%s12882_s7 + $0x8c] sm:$0x1]  ;;  %v12264_v56 = vld [vmem:[%s15253_s1 + $0x2f8] sm:$0xff]  }
  0x5f   : > { %11293 = vmatprep.subr.bf16.mxu1 %v12251_v31  ;;  %v512_v46 = vsel %vm12893_vm2, %v507_v40, %v511_v24  ;;  %v9941_v48 = vcombine.low %v777_v41, %v781_v44  ;;  %v526_v50 = vsel %vm12893_vm2, %v521_v43, %v525_v29  ;;  %v678_v1 = vrot.slane %v676_v59, 4  ;;  %v736_v26 = vld [vmem:[%s12882_s7 + $0x34] sm:$0x1]  ;;  %v737_v31 = vld [vmem:[%s12882_s7 + $0x38] sm:$0xe] }
  0x60   : > { %v9909_v52 = vcombine.low %v512_v46, %v526_v50  ;;  %v681_v2 = vrot.slane %v679_v60, 5  ;;  %v687_v3 = vrot.slane %v685_v61, 5  ;;  %v692_v4 = vrot.slane %v690_v62, 4  ;;  %v738_v35 = vld [vmem:[%s12882_s7 + $0x3c] sm:$0x1]  ;;  %v12260_v44 = vld [vmem:[%s15253_s1 + $0x2f0] sm:$0xff]  }
  0x61   : > { %11254 = vmatpush3.bf16.msra.mxu0 %v12252_v42  ;;  %8258 = vmatmul.mubr.bf16.gmra.mrb[24].mxu1 %v9941_v48  ;;  %v695_v6 = vrot.slane %v693_v63, 5  ;;  %v701_v7 = vrot.slane %v699_v0, 5  ;;  %v528_v13 = vshrl.u32 %v9903_v8, 16  ;;  %v531_v14 = vshll.u32 %v9903_v8, 16  ;;  %v12265_v57 = vld [vmem:[%s15253_s1 + $0x238] sm:$0xff]  }
  0x62   : > { %11294 = vmatpush3.bf16.msra.mxu1 %v12253_v45  ;;  %11255 = vmatprep.subr.bf16.mxu0 %v12254_v49  ;;  %v682_v10 = vor.u32 %v681_v2, %v678_v1  ;;  %v537_v16 = vshll.u32 %v9904_v9, 16  ;;  %v542_v17 = vshrl.u32 %v9905_v11, 16  ;;  %v545_v18 = vshll.u32 %v9905_v11, 16  ;;  %v12261_v45 = vld [vmem:[%s15253_s1 + $0x230] sm:$0xff]   ;;  %v12266_v58 = vld [vmem:[%s15253_s1 + $0x2b8] sm:$0xff]  }
  0x63   : > { %11295 = vmatprep.subr.bf16.mxu1 %v12255_v51  ;;  %8193 = vmatmul.mubr.bf16.gmra.mrb[24].mxu0 %v9909_v52  ;;  %v696_v15 = vor.u32 %v695_v6, %v692_v4  ;;  %v530_v22 = vrot.slane %v528_v13, 4  ;;  %v533_v24 = vrot.slane %v531_v14, 5  ;;  %v551_v25 = vshll.u32 %v9906_v12, 16  ;;  %v12262_v49 = vld [vmem:[%s15253_s1 + $0x2b0] sm:$0xff]   ;;  %v9999_v60 = vld [vmem:[%s12882_s7 + $0x140] sm:$0xf] }
  0x64   : > { %8265 = vmatprep.mubr.bf16.mxu1 %v12258_v5  ;;  %v683_v21 = vrot.slane %v682_v10, 4  ;;  %v539_v28 = vrot.slane %v537_v16, 5  ;;  %v544_v29 = vrot.slane %v542_v17, 4  ;;  %v547_v30 = vrot.slane %v545_v18, 5  ;;  %v12267_v59 = vld [vmem:[%s12882_s7 + $0x190] ss:$8 sps:$4 sm:$0xff]  }
  0x65   : > { %11256 = vmatpush3.bf16.msra.mxu0 %v12256_v53  ;;  %v697_v27 = vrot.slane %v696_v15, 4  ;;  %v534_v33 = vor.u32 %v533_v24, %v530_v22  ;;  %v553_v34 = vrot.slane %v551_v25, 5  ;;  %v9937_v36 = vrot.slane %v735_v19, 9  ;;  %v10000_v61 = vld [vmem:[%s12882_s7 + $0x144] sm:$0x1] }
  0x66   : > { %11296 = vmatpush3.bf16.msra.mxu1 %v12257_v54  ;;  %11257 = vmatprep.subr.bf16.mxu0 %v12259_v20  ;;  %v688_v32 = vsel %vm12893_vm2, %v683_v21, %v687_v3  ;;  %v548_v38 = vor.u32 %v547_v30, %v544_v29  ;;  %v784_v39 = vrot.slane %v736_v26, 5  ;;  %v9938_v40 = vrot.slane %v737_v31, 9  ;;  %v12263_v54 = vld [vmem:[%s15253_s1 + $0x278] sm:$0xff]   ;;  %v10001_v62 = vld [vmem:[%s12882_s7 + $0x148] sm:$0xf]  ;;  %v12269_v21 = vld [vmem:[%s15253_s1 + $0x340] sm:$0xff]  }
  0x67   : > { %v702_v37 = vsel %vm12893_vm2, %v697_v27, %v701_v7  ;;  %v535_v42 = vrot.slane %v534_v33, 4  ;;  %v788_v43 = vrot.slane %v738_v35, 5  ;;  %11297 = vmatprep.subr.bf16.mxu1 %v12260_v44  ;;  %v10002_v63 = vld [vmem:[%s12882_s7 + $0x14c] sm:$0x1]  ;;  %v1092_v0 = vshrl.u32 %v9999_v60, 16  ;;  %v12270_v27 = vld [vmem:[%s15253_s1 + $0x3c0] sm:$0xff]  }
  0x68   : > { %v9930_v41 = vcombine.low %v688_v32, %v702_v37  ;;  %v549_v46 = vrot.slane %v548_v38, 4  ;;  %v785_v48 = vsel %vm13051_vm5, %v9937_v36, %v784_v39  ;;  %v1095_v1 = vshll.u32 %v9999_v60, 16  ;;  %v12268_v6 = vld [vmem:[%s12882_s7 + $0x140] ss:$8 sps:$4 sm:$0xff]   ;;  %v9979_v11 = vld [vmem:[%s12882_s7 + $0xf0] sm:$0xf] }
  0x69   : > { %v540_v50 = vsel %vm12893_vm2, %v535_v42, %v539_v28  ;;  %v789_v51 = vsel %vm13051_vm5, %v9938_v40, %v788_v43  ;;  %11258 = vmatpush3.bf16.msra.mxu0 %v12261_v45  ;;  %v1101_v2 = vshll.u32 %v10000_v61, 16  ;;  %v1106_v3 = vshrl.u32 %v10001_v62, 16  ;;  %v9980_v14 = vld [vmem:[%s12882_s7 + $0xf4] sm:$0x1]  ;;  %v9981_v15 = vld [vmem:[%s12882_s7 + $0xf8] sm:$0xf] }
  0x6a   : > { %8200 = vmatprep.mubr.bf16.mxu0 %v9930_v41  ;;  %v554_v52 = vsel %vm12893_vm2, %v549_v46, %v553_v34  ;;  %v9942_v53 = vcombine.low %v785_v48, %v789_v51  ;;  %11298 = vmatpush3.bf16.msra.mxu1 %v12262_v49  ;;  %v1109_v4 = vshll.u32 %v10001_v62, 16  ;;  %v1115_v5 = vshll.u32 %v10002_v63, 16  ;;  %v9982_v17 = vld [vmem:[%s12882_s7 + $0xfc] sm:$0x1]  ;;  %v12271_v40 = vld [vmem:[%s15253_s1 + $0x300] sm:$0xff]   ;;  %v12273_v44 = vld [vmem:[%s15253_s1 + $0x348] sm:$0xff]  }
  0x6b   : > { %v9910_v55 = vcombine.low %v540_v50, %v554_v52  ;;  %11259 = vmatprep.subr.bf16.mxu0 %v12263_v54  ;;  %11299 = vmatprep.subr.bf16.mxu1 %v12264_v56  ;;  %v1094_v7 = vrot.slane %v1092_v0, 4  ;;  %v1097_v8 = vrot.slane %v1095_v1, 5  ;;  %v1103_v9 = vrot.slane %v1101_v2, 5  ;;  %v12272_v46 = vld [vmem:[%s15253_s1 + $0x380] sm:$0xff]   ;;  %v12275_v49 = vld [vmem:[%s15253_s1 + $0x308] sm:$0xff]  }
  0x6c   : > { %8266 = vmatmul.mubr.bf16.gmra.mrb[28].mxu1 %v9942_v53  ;;  %v1108_v10 = vrot.slane %v1106_v3, 4  ;;  %v1111_v12 = vrot.slane %v1109_v4, 5  ;;  %v1117_v13 = vrot.slane %v1115_v5, 5  ;;  %v944_v18 = vshrl.u32 %v9979_v11, 16  ;;  %v12274_v51 = vld [vmem:[%s15253_s1 + $0x3c8] sm:$0xff]  }
  0x6d   : > { %8201 = vmatmul.mubr.bf16.gmra.mrb[28].mxu0 %v9910_v55  ;;  %v1098_v16 = vor.u32 %v1097_v8, %v1094_v7  ;;  %v947_v19 = vshll.u32 %v9979_v11, 16  ;;  %v953_v20 = vshll.u32 %v9980_v14, 16  ;;  %v958_v24 = vshrl.u32 %v9981_v15, 16  ;;  %v12276_v52 = vld [vmem:[%s15253_s1 + $0x388] sm:$0xff]   ;;  %v10003_v54 = vld [vmem:[%s12882_s7 + $0x150] sm:$0xf] }
  0x6e   : > { %11260 = vmatpush3.bf16.msra.mxu0 %v12265_v57  ;;  %11300 = vmatpush3.bf16.msra.mxu1 %v12266_v58  ;;  %v1112_v22 = vor.u32 %v1111_v12, %v1108_v10  ;;  %v961_v25 = vshll.u32 %v9981_v15, 16  ;;  %v967_v26 = vshll.u32 %v9982_v17, 16  ;;  %v946_v29 = vrot.slane %v944_v18, 4  ;;  %v12277_v53 = vld [vmem:[%s12882_s7 + $0x1a0] ss:$8 sps:$4 sm:$0xff]  }
  0x6f   : > { %8306 = vmatprep.mubr.bf16.mxu0 %v12267_v59  ;;  %v1099_v28 = vrot.slane %v1098_v16, 4  ;;  %v949_v30 = vrot.slane %v947_v19, 5  ;;  %11325 = vmatprep.subr.bf16.mxu0 %v12269_v21  ;;  %v955_v32 = vrot.slane %v953_v20, 5  ;;  %v960_v33 = vrot.slane %v958_v24, 4  ;;  %v10004_v55 = vld [vmem:[%s12882_s7 + $0x154] sm:$0x1] }
  0x70   : > { %v1113_v31 = vrot.slane %v1112_v22, 4  ;;  %v963_v34 = vrot.slane %v961_v25, 5  ;;  %11365 = vmatprep.subr.bf16.mxu1 %v12270_v27  ;;  %v969_v39 = vrot.slane %v967_v26, 5  ;;  %v10005_v56 = vld [vmem:[%s12882_s7 + $0x158] sm:$0xf]  ;;  %v1120_v58 = vshrl.u32 %v10003_v54, 16 }
  0x71   : > { %v1104_v35 = vsel %vm12893_vm2, %v1099_v28, %v1103_v9  ;;  %v950_v36 = vor.u32 %v949_v30, %v946_v29  ;;  %v10006_v57 = vld [vmem:[%s12882_s7 + $0x15c] sm:$0x1]  ;;  %v1123_v59 = vshll.u32 %v10003_v54, 16  ;;  %v1129_v60 = vshll.u32 %v10004_v55, 16  ;;  %v12278_v2 = vld [vmem:[%s12882_s7 + $0x150] ss:$8 sps:$4 sm:$0xff]  }
  0x72   : > { %v1118_v37 = vsel %vm12893_vm2, %v1113_v31, %v1117_v13  ;;  %v964_v38 = vor.u32 %v963_v34, %v960_v33  ;;  %v1134_v61 = vshrl.u32 %v10005_v56, 16  ;;  %v1137_v62 = vshll.u32 %v10005_v56, 16  ;;  %v9983_v7 = vld [vmem:[%s12882_s7 + $0x100] sm:$0xf]  ;;  %v9984_v9 = vld [vmem:[%s12882_s7 + $0x104] sm:$0x1] }
  0x73   : > { %v10015_v41 = vcombine.low %v1104_v35, %v1118_v37  ;;  %v951_v42 = vrot.slane %v950_v36, 4  ;;  %v1143_v63 = vshll.u32 %v10006_v57, 16  ;;  %v1122_v0 = vrot.slane %v1120_v58, 4  ;;  %v9985_v10 = vld [vmem:[%s12882_s7 + $0x108] sm:$0xf]  ;;  %v12279_v16 = vld [vmem:[%s15253_s1 + $0x350] sm:$0xff]  }
  0x74   : > { %v965_v43 = vrot.slane %v964_v38, 4  ;;  %v1125_v1 = vrot.slane %v1123_v59, 5  ;;  %v1131_v3 = vrot.slane %v1129_v60, 5  ;;  %v1136_v4 = vrot.slane %v1134_v61, 4  ;;  %v9986_v11 = vld [vmem:[%s12882_s7 + $0x10c] sm:$0x1] }
  0x75   : > { %8307 = vmatmul.mubr.bf16.vlgmr.msra.gmra.mrb[32].mxu0 %v12268_v6  ;;  %8371 = vmatprep.mubr.bf16.mxu1 %v10015_v41  ;;  %v956_v45 = vsel %vm12893_vm2, %v951_v42, %v955_v32  ;;  %v1139_v5 = vrot.slane %v1137_v62, 5  ;;  %v1145_v6 = vrot.slane %v1143_v63, 5  ;;  %v972_v13 = vshrl.u32 %v9983_v7, 16  ;;  %v12280_v28 = vld [vmem:[%s15253_s1 + $0x3d0] sm:$0xff]   ;;  %v12283_v38 = vld [vmem:[%s15253_s1 + $0x358] sm:$0xff]  }
  0x76   : > { %11326 = vmatpush3.bf16.msra.mxu0 %v12271_v40  ;;  %v970_v48 = vsel %vm12893_vm2, %v965_v43, %v969_v39  ;;  %8314 = vmatprep.mubr.bf16.mxu0 %v12277_v53  ;;  %v1126_v8 = vor.u32 %v1125_v1, %v1122_v0  ;;  %v975_v14 = vshll.u32 %v9983_v7, 16  ;;  %v981_v15 = vshll.u32 %v9984_v9, 16  ;;  %v12281_v32 = vld [vmem:[%s15253_s1 + $0x310] sm:$0xff]   ;;  %v12284_v40 = vld [vmem:[%s15253_s1 + $0x3d8] sm:$0xff]   ;;  %v12288_v62 = vld [vmem:[%s12882_s7 + $0x160] ss:$8 sps:$4 sm:$0xff]  }
  0x77   : > { %11327 = vmatprep.subr.bf16.mxu0 %v12273_v44  ;;  %v9995_v50 = vcombine.low %v956_v45, %v970_v48  ;;  %v1140_v12 = vor.u32 %v1139_v5, %v1136_v4  ;;  %v986_v18 = vshrl.u32 %v9985_v10, 16  ;;  %v989_v19 = vshll.u32 %v9985_v10, 16  ;;  %v12282_v36 = vld [vmem:[%s15253_s1 + $0x390] sm:$0xff]   ;;  %v12285_v42 = vld [vmem:[%s15253_s1 + $0x318] sm:$0xff]   ;;  %v10007_v48 = vld [vmem:[%s12882_s7 + $0x160] sm:$0xf] }
  0x78   : > { %v1127_v17 = vrot.slane %v1126_v8, 4  ;;  %v995_v20 = vshll.u32 %v9986_v11, 16  ;;  %v974_v22 = vrot.slane %v972_v13, 4  ;;  %v977_v24 = vrot.slane %v975_v14, 5  ;;  %v12286_v44 = vld [vmem:[%s15253_s1 + $0x398] sm:$0xff]  }
  0x79   : > { %8372 = vmatmul.mubr.bf16.vlgmr.msra.gmra.mrb[32].mxu1 %v9995_v50  ;;  %v1141_v21 = vrot.slane %v1140_v12, 4  ;;  %v988_v26 = vrot.slane %v986_v18, 4  ;;  %v991_v27 = vrot.slane %v989_v19, 5  ;;  %v983_v31 = vrot.slane %v981_v15, 5  ;;  %v10009_v50 = vld [vmem:[%s12882_s7 + $0x168] sm:$0xf] }
  0x7a   : > { %11328 = vmatpush3.bf16.msra.mxu0 %v12275_v49  ;;  %11366 = vmatpush3.bf16.msra.mxu1 %v12272_v46  ;;  %v1132_v25 = vsel %vm12893_vm2, %v1127_v17, %v1131_v3  ;;  %v978_v30 = vor.u32 %v977_v24, %v974_v22  ;;  %v997_v35 = vrot.slane %v995_v20, 5  ;;  %v12287_v46 = vld [vmem:[%s12882_s7 + $0x1b0] ss:$8 sps:$4 sm:$0xff]   ;;  %v10008_v49 = vld [vmem:[%s12882_s7 + $0x164] sm:$0x1]  ;;  %v1151_v53 = vshll.u32 %v10007_v48, 16 }
  0x7b   : > { %11367 = vmatprep.subr.bf16.mxu1 %v12274_v51  ;;  %11329 = vmatprep.subr.bf16.mxu0 %v12279_v16  ;;  %v1146_v29 = vsel %vm12893_vm2, %v1141_v21, %v1145_v6  ;;  %v992_v34 = vor.u32 %v991_v27, %v988_v26  ;;  %v10010_v51 = vld [vmem:[%s12882_s7 + $0x16c] sm:$0x1]  ;;  %v1157_v54 = vshll.u32 %v10008_v49, 16  ;;  %v1162_v55 = vshrl.u32 %v10009_v50, 16  ;;  %v9987_v1 = vld [vmem:[%s12882_s7 + $0x110] sm:$0xf] }
  0x7c   : > { %v10016_v33 = vcombine.low %v1132_v25, %v1146_v29  ;;  %v979_v37 = vrot.slane %v978_v30, 4  ;;  %v1165_v56 = vshll.u32 %v10009_v50, 16  ;;  %v1171_v57 = vshll.u32 %v10010_v51, 16  ;;  %v9989_v4 = vld [vmem:[%s12882_s7 + $0x118] sm:$0xf]  ;;  %v12289_v12 = vld [vmem:[%s15253_s1 + $0x360] sm:$0xff]  }
  0x7d   : > { %8315 = vmatmul.mubr.bf16.gmra.mrb[36].mxu0 %v12278_v2  ;;  %v993_v39 = vrot.slane %v992_v34, 4  ;;  %v1153_v59 = vrot.slane %v1151_v53, 5  ;;  %v1159_v60 = vrot.slane %v1157_v54, 5  ;;  %v1164_v61 = vrot.slane %v1162_v55, 4  ;;  %v9988_v2 = vld [vmem:[%s12882_s7 + $0x114] sm:$0x1] }
  0x7e   : > { %11368 = vmatpush3.bf16.msra.mxu1 %v12276_v52  ;;  %11330 = vmatpush3.bf16.msra.mxu0 %v12281_v32  ;;  %v984_v41 = vsel %vm12893_vm2, %v979_v37, %v983_v31  ;;  %v1148_v52 = vshrl.u32 %v10007_v48, 16  ;;  %v1167_v63 = vrot.slane %v1165_v56, 5  ;;  %v1173_v0 = vrot.slane %v1171_v57, 5  ;;  %v9990_v5 = vld [vmem:[%s12882_s7 + $0x11c] sm:$0x1]  ;;  %v12290_v24 = vld [vmem:[%s15253_s1 + $0x3e0] sm:$0xff]  }
  0x7f   : > { %11369 = vmatprep.subr.bf16.mxu1 %v12280_v28  ;;  %8379 = vmatprep.mubr.bf16.mxu1 %v10016_v33  ;;  %v998_v43 = vsel %vm12893_vm2, %v993_v39, %v997_v35  ;;  %v1000_v6 = vshrl.u32 %v9987_v1, 16  ;;  %v1003_v7 = vshll.u32 %v9987_v1, 16  ;;  %v1009_v9 = vshll.u32 %v9988_v2, 16  ;;  %v12291_v28 = vld [vmem:[%s15253_s1 + $0x320] sm:$0xff]   ;;  %v12293_v33 = vld [vmem:[%s15253_s1 + $0x368] sm:$0xff]  }
  0x80   : > { %11331 = vmatprep.subr.bf16.mxu0 %v12283_v38  ;;  %v9996_v45 = vcombine.low %v984_v41, %v998_v43  ;;  %8322 = vmatprep.mubr.bf16.mxu0 %v12287_v46  ;;  %v1150_v58 = vrot.slane %v1148_v52, 4  ;;  %v1168_v8 = vor.u32 %v1167_v63, %v1164_v61  ;;  %v1014_v10 = vshrl.u32 %v9989_v4, 16  ;;  %v12292_v31 = vld [vmem:[%s15253_s1 + $0x3a0] sm:$0xff]   ;;  %v12294_v35 = vld [vmem:[%s15253_s1 + $0x3e8] sm:$0xff]   ;;  %v10011_v41 = vld [vmem:[%s12882_s7 + $0x170] sm:$0xf] }
  0x81   : > { %v1017_v11 = vshll.u32 %v9989_v4, 16  ;;  %v1002_v14 = vrot.slane %v1000_v6, 4  ;;  %v1005_v15 = vrot.slane %v1003_v7, 5  ;;  %v1023_v16 = vshll.u32 %v9990_v5, 16  ;;  %v12295_v37 = vld [vmem:[%s15253_s1 + $0x328] sm:$0xff]  }
  0x82   : > { %11370 = vmatpush3.bf16.msra.mxu1 %v12282_v36  ;;  %11332 = vmatpush3.bf16.msra.mxu0 %v12285_v42  ;;  %v1154_v3 = vor.u32 %v1153_v59, %v1150_v58  ;;  %v1169_v17 = vrot.slane %v1168_v8, 4  ;;  %v1016_v18 = vrot.slane %v1014_v10, 4  ;;  %v1011_v22 = vrot.slane %v1009_v9, 5  ;;  %v12296_v39 = vld [vmem:[%s15253_s1 + $0x3a8] sm:$0xff]   ;;  %v10012_v42 = vld [vmem:[%s12882_s7 + $0x174] sm:$0x1] }
  0x83   : > { %11371 = vmatprep.subr.bf16.mxu1 %v12284_v40  ;;  %8380 = vmatmul.mubr.bf16.gmra.mrb[36].mxu1 %v9996_v45  ;;  %v1019_v19 = vrot.slane %v1017_v11, 5  ;;  %v1006_v21 = vor.u32 %v1005_v15, %v1002_v14  ;;  %v1025_v27 = vrot.slane %v1023_v16, 5  ;;  %v12297_v40 = vld [vmem:[%s12882_s7 + $0x1c0] ss:$8 sps:$4 sm:$0xff]   ;;  %v10013_v43 = vld [vmem:[%s12882_s7 + $0x178] sm:$0xf] }
  0x84   : > { %v1155_v13 = vrot.slane %v1154_v3, 4  ;;  %11333 = vmatprep.subr.bf16.mxu0 %v12289_v12  ;;  %v1174_v25 = vsel %vm12893_vm2, %v1169_v17, %v1173_v0  ;;  %v1176_v45 = vshrl.u32 %v10011_v41, 16  ;;  %v1179_v46 = vshll.u32 %v10011_v41, 16  ;;  %v12298_v52 = vld [vmem:[%s12882_s7 + $0x170] ss:$8 sps:$4 sm:$0xff]  }
  0x85   : > { %8323 = vmatmul.mubr.bf16.gmra.mrb[40].mxu0 %v12288_v62  ;;  %v1020_v26 = vor.u32 %v1019_v19, %v1016_v18  ;;  %v1007_v30 = vrot.slane %v1006_v21, 4  ;;  %v1185_v48 = vshll.u32 %v10012_v42, 16  ;;  %v1190_v49 = vshrl.u32 %v10013_v43, 16  ;;  %v9991_v57 = vld [vmem:[%s12882_s7 + $0x120] sm:$0xf]  ;;  %v12299_v3 = vld [vmem:[%s15253_s1 + $0x370] sm:$0xff]  }
  0x86   : > { %11372 = vmatpush3.bf16.msra.mxu1 %v12286_v44  ;;  %v1160_v20 = vsel %vm12893_vm2, %v1155_v13, %v1159_v60  ;;  %11334 = vmatpush3.bf16.msra.mxu0 %v12291_v28  ;;  %v10014_v44 = vld [vmem:[%s12882_s7 + $0x17c] sm:$0x1]  ;;  %v1193_v50 = vshll.u32 %v10013_v43, 16  ;;  %v1178_v53 = vrot.slane %v1176_v45, 4  ;;  %v1181_v54 = vrot.slane %v1179_v46, 5  ;;  %v12300_v8 = vld [vmem:[%s15253_s1 + $0x3f0] sm:$0xff]  }
  0x87   : > { %v10017_v29 = vcombine.low %v1160_v20, %v1174_v25  ;;  %11373 = vmatprep.subr.bf16.mxu1 %v12290_v24  ;;  %v1021_v32 = vrot.slane %v1020_v26, 4  ;;  %v1012_v34 = vsel %vm12893_vm2, %v1007_v30, %v1011_v22  ;;  %11335 = vmatprep.subr.bf16.mxu0 %v12293_v33  ;;  %v1199_v51 = vshll.u32 %v10014_v44, 16  ;;  %v9992_v60 = vld [vmem:[%s12882_s7 + $0x124] sm:$0x1]  ;;  %v9993_v61 = vld [vmem:[%s12882_s7 + $0x128] sm:$0xf] }
  0x88   : > { %8330 = vmatprep.mubr.bf16.mxu0 %v12297_v40  ;;  %v1187_v55 = vrot.slane %v1185_v48, 5  ;;  %v1192_v56 = vrot.slane %v1190_v49, 4  ;;  %v1195_v58 = vrot.slane %v1193_v50, 5  ;;  %v1182_v62 = vor.u32 %v1181_v54, %v1178_v53  ;;  %v9994_v63 = vld [vmem:[%s12882_s7 + $0x12c] sm:$0x1]  ;;  %v12301_v21 = vld [vmem:[%s15253_s1 + $0x330] sm:$0xff]  }
  0x89   : > { %8387 = vmatprep.mubr.bf16.mxu1 %v10017_v29  ;;  %v1026_v36 = vsel %vm12893_vm2, %v1021_v32, %v1025_v27  ;;  %v1201_v59 = vrot.slane %v1199_v51, 5  ;;  %v1028_v0 = vshrl.u32 %v9991_v57, 16  ;;  %v1031_v1 = vshll.u32 %v9991_v57, 16  ;;  %v12302_v25 = vld [vmem:[%s15253_s1 + $0x3b0] sm:$0xff]   ;;  %v12303_v27 = vld [vmem:[%s15253_s1 + $0x378] sm:$0xff]  }
  0x8a   : > { %11374 = vmatpush3.bf16.msra.mxu1 %v12292_v31  ;;  %v9997_v38 = vcombine.low %v1012_v34, %v1026_v36  ;;  %11336 = vmatpush3.bf16.msra.mxu0 %v12295_v37  ;;  %v1037_v2 = vshll.u32 %v9992_v60, 16  ;;  %v1196_v4 = vor.u32 %v1195_v58, %v1192_v56  ;;  %v1042_v5 = vshrl.u32 %v9993_v61, 16  ;;  %v12304_v29 = vld [vmem:[%s15253_s1 + $0x3f8] sm:$0xff]   ;;  %v10039_v34 = vld [vmem:[%s12882_s7 + $0xf0] sm:$0xe]  ;;  %v12309_v56 = vld [vmem:[%s15253_s1 + $0x440] sm:$0xff]  }
  0x8b   : > { %11375 = vmatprep.subr.bf16.mxu1 %v12294_v35  ;;  %v1045_v6 = vshll.u32 %v9993_v61, 16  ;;  %v1051_v7 = vshll.u32 %v9994_v63, 16  ;;  %v1183_v9 = vrot.slane %v1182_v62, 4  ;;  %v1030_v10 = vrot.slane %v1028_v0, 4  ;;  %11337 = vmatprep.subr.bf16.mxu0 %v12299_v3  ;;  %v12305_v31 = vld [vmem:[%s15253_s1 + $0x338] sm:$0xff]   ;;  %v12310_v60 = vld [vmem:[%s15253_s1 + $0x4c0] sm:$0xff]  }
  0x8c   : > { %8388 = vmatmul.mubr.bf16.gmra.mrb[40].mxu1 %v9997_v38  ;;  %v1033_v11 = vrot.slane %v1031_v1, 5  ;;  %v1197_v12 = vrot.slane %v1196_v4, 4  ;;  %v1039_v13 = vrot.slane %v1037_v2, 5  ;;  %v1044_v14 = vrot.slane %v1042_v5, 4  ;;  %v12306_v33 = vld [vmem:[%s15253_s1 + $0x3b8] sm:$0xff]   ;;  %v12312_v3 = vld [vmem:[%s15253_s1 + $0x480] sm:$0xff]  }
  0x8d   : > { %8331 = vmatmul.mubr.bf16.gmra.mrb[44].mxu0 %v12298_v52  ;;  %v1047_v15 = vrot.slane %v1045_v6, 5  ;;  %v1188_v16 = vsel %vm12893_vm2, %v1183_v9, %v1187_v55  ;;  %v1053_v20 = vrot.slane %v1051_v7, 5  ;;  %v10040_v35 = vld [vmem:[%s12882_s7 + $0xf4] sm:$0x1]  ;;  %v10041_v36 = vld [vmem:[%s12882_s7 + $0xf8] sm:$0xe] }
  0x8e   : > { %11376 = vmatpush3.bf16.msra.mxu1 %v12296_v39  ;;  %v1034_v17 = vor.u32 %v1033_v11, %v1030_v10  ;;  %v1202_v18 = vsel %vm12893_vm2, %v1197_v12, %v1201_v59  ;;  %11338 = vmatpush3.bf16.msra.mxu0 %v12301_v21  ;;  %v10042_v37 = vld [vmem:[%s12882_s7 + $0xfc] sm:$0x1]  ;;  %v10055_v38 = vrot.slane %v10039_v34, 9  ;;  %v1405_v39 = vrot.slane %v10040_v35, 5  ;;  %v12307_v43 = vld [vmem:[%s12882_s7 + $0x230] ss:$8 sps:$4 sm:$0xff]  }
  0x8f   : > { %11377 = vmatprep.subr.bf16.mxu1 %v12300_v8  ;;  %v1048_v19 = vor.u32 %v1047_v15, %v1044_v14  ;;  %v10018_v22 = vcombine.low %v1188_v16, %v1202_v18  ;;  %11339 = vmatprep.subr.bf16.mxu0 %v12303_v27  ;;  %v10056_v40 = vrot.slane %v10041_v36, 9  ;;  %v1409_v41 = vrot.slane %v10042_v37, 5  ;;  %v10019_v44 = vld [vmem:[%s12882_s7 + $0x190] sm:$0xf]  ;;  %v10020_v45 = vld [vmem:[%s12882_s7 + $0x194] sm:$0x1] }
  0x90   : > { %v1035_v24 = vrot.slane %v1034_v17, 4  ;;  %v1406_v42 = vsel %vm13051_vm5, %v10055_v38, %v1405_v39  ;;  %v10021_v48 = vld [vmem:[%s12882_s7 + $0x198] sm:$0xf]  ;;  %v10022_v49 = vld [vmem:[%s12882_s7 + $0x19c] sm:$0x1]  ;;  %v1240_v50 = vshrl.u32 %v10019_v44, 16 }
  0x91   : > { %v1049_v26 = vrot.slane %v1048_v19, 4  ;;  %8395 = vmatprep.mubr.bf16.mxu1 %v10018_v22  ;;  %v1410_v46 = vsel %vm13051_vm5, %v10056_v40, %v1409_v41  ;;  %v1243_v51 = vshll.u32 %v10019_v44, 16  ;;  %v1249_v53 = vshll.u32 %v10020_v45, 16  ;;  %v12308_v0 = vld [vmem:[%s12882_s7 + $0x1e0] ss:$8 sps:$4 sm:$0xff]   ;;  %v12319_v22 = vld [vmem:[%s15253_s1 + $0x450] sm:$0xff]  }
  0x92   : > { %v1040_v28 = vsel %vm12893_vm2, %v1035_v24, %v1039_v13  ;;  %11378 = vmatpush3.bf16.msra.mxu1 %v12302_v25  ;;  %11340 = vmatpush3.bf16.msra.mxu0 %v12305_v31  ;;  %v10063_v52 = vcombine.low %v1406_v42, %v1410_v46  ;;  %v1254_v54 = vshrl.u32 %v10021_v48, 16  ;;  %v1257_v55 = vshll.u32 %v10021_v48, 16  ;;  %v12311_v7 = vld [vmem:[%s15253_s1 + $0x400] sm:$0xff]   ;;  %v12314_v8 = vld [vmem:[%s15253_s1 + $0x4c8] sm:$0xff]   ;;  %v12320_v25 = vld [vmem:[%s15253_s1 + $0x4d0] sm:$0xff]  }
  0x93   : > { %v1054_v30 = vsel %vm12893_vm2, %v1049_v26, %v1053_v20  ;;  %11379 = vmatprep.subr.bf16.mxu1 %v12304_v29  ;;  %v1242_v57 = vrot.slane %v1240_v50, 4  ;;  %v1245_v58 = vrot.slane %v1243_v51, 5  ;;  %v1263_v59 = vshll.u32 %v10022_v49, 16  ;;  %11405 = vmatprep.subr.bf16.mxu0 %v12309_v56  ;;  %v12313_v11 = vld [vmem:[%s15253_s1 + $0x448] sm:$0xff]   ;;  %v10043_v15 = vld [vmem:[%s12882_s7 + $0x100] sm:$0xe] }
  0x94   : > { %v9998_v32 = vcombine.low %v1040_v28, %v1054_v30  ;;  %8436 = vmatprep.mubr.bf16.mxu0 %v10063_v52  ;;  %v1251_v61 = vrot.slane %v1249_v53, 5  ;;  %v1256_v62 = vrot.slane %v1254_v54, 4  ;;  %v1259_v63 = vrot.slane %v1257_v55, 5  ;;  %v12316_v13 = vld [vmem:[%s15253_s1 + $0x488] sm:$0xff]   ;;  %v10044_v16 = vld [vmem:[%s12882_s7 + $0x104] sm:$0x1] }
  0x95   : > { %v1246_v1 = vor.u32 %v1245_v58, %v1242_v57  ;;  %v1265_v2 = vrot.slane %v1263_v59, 5  ;;  %v12315_v14 = vld [vmem:[%s15253_s1 + $0x408] sm:$0xff]   ;;  %v10057_v19 = vrot.slane %v10043_v15, 9  ;;  %v1413_v20 = vrot.slane %v10044_v16, 5  ;;  %v10023_v28 = vld [vmem:[%s12882_s7 + $0x1a0] sm:$0xf] }
  0x96   : > { %8396 = vmatmul.mubr.bf16.gmra.mrb[44].mxu1 %v9998_v32  ;;  %v1260_v4 = vor.u32 %v1259_v63, %v1256_v62  ;;  %v10045_v17 = vld [vmem:[%s12882_s7 + $0x108] sm:$0xe]  ;;  %v10046_v18 = vld [vmem:[%s12882_s7 + $0x10c] sm:$0x1]  ;;  %v10024_v29 = vld [vmem:[%s12882_s7 + $0x1a4] sm:$0x1] }
  0x97   : > { %11380 = vmatpush3.bf16.msra.mxu1 %v12306_v33  ;;  %8501 = vmatprep.mubr.bf16.mxu1 %v12307_v43  ;;  %v1247_v5 = vrot.slane %v1246_v1, 4  ;;  %v10058_v21 = vrot.slane %v10045_v17, 9  ;;  %v1417_v24 = vrot.slane %v10046_v18, 5  ;;  %v1414_v26 = vsel %vm13051_vm5, %v10057_v19, %v1413_v20  ;;  %v12317_v27 = vld [vmem:[%s12882_s7 + $0x240] ss:$8 sps:$4 sm:$0xff]   ;;  %v12321_v39 = vld [vmem:[%s15253_s1 + $0x410] sm:$0xff]  }
  0x98   : > { %11445 = vmatprep.subr.bf16.mxu1 %v12310_v60  ;;  %v1261_v6 = vrot.slane %v1260_v4, 4  ;;  %v10025_v31 = vld [vmem:[%s12882_s7 + $0x1a8] sm:$0xf]  ;;  %v10026_v32 = vld [vmem:[%s12882_s7 + $0x1ac] sm:$0x1]  ;;  %v1268_v33 = vshrl.u32 %v10023_v28, 16 }
  0x99   : > { %v1252_v9 = vsel %vm12893_vm2, %v1247_v5, %v1251_v61  ;;  %v1418_v30 = vsel %vm13051_vm5, %v10058_v21, %v1417_v24  ;;  %v1271_v34 = vshll.u32 %v10023_v28, 16  ;;  %v1277_v36 = vshll.u32 %v10024_v29, 16  ;;  %v12322_v43 = vld [vmem:[%s15253_s1 + $0x490] sm:$0xff]   ;;  %v12323_v49 = vld [vmem:[%s15253_s1 + $0x458] sm:$0xff]   ;;  %v12329_v18 = vld [vmem:[%s15253_s1 + $0x460] sm:$0xff]  }
  0x9a   : > { %v1266_v10 = vsel %vm12893_vm2, %v1261_v6, %v1265_v2  ;;  %v10064_v35 = vcombine.low %v1414_v26, %v1418_v30  ;;  %v1282_v37 = vshrl.u32 %v10025_v31, 16  ;;  %v1285_v38 = vshll.u32 %v10025_v31, 16  ;;  %v12318_v48 = vld [vmem:[%s12882_s7 + $0x1f0] ss:$8 sps:$4 sm:$0xff]   ;;  %v10048_v62 = vld [vmem:[%s12882_s7 + $0x114] sm:$0x1] }
  0x9b   : > { %v10035_v12 = vcombine.low %v1252_v9, %v1266_v10  ;;  %v1270_v40 = vrot.slane %v1268_v33, 4  ;;  %v1273_v41 = vrot.slane %v1271_v34, 5  ;;  %v1291_v42 = vshll.u32 %v10026_v32, 16  ;;  %v12324_v52 = vld [vmem:[%s15253_s1 + $0x4d8] sm:$0xff]   ;;  %v10047_v61 = vld [vmem:[%s12882_s7 + $0x110] sm:$0xe] }
  0x9c   : > { %v1279_v44 = vrot.slane %v1277_v36, 5  ;;  %v1284_v45 = vrot.slane %v1282_v37, 4  ;;  %v1287_v46 = vrot.slane %v1285_v38, 5  ;;  %v12325_v55 = vld [vmem:[%s15253_s1 + $0x418] sm:$0xff]   ;;  %v10059_v1 = vrot.slane %v10047_v61, 9  ;;  %v12331_v28 = vld [vmem:[%s15253_s1 + $0x420] sm:$0xff]  }
  0x9d   : > { %8437 = vmatmul.mubr.bf16.vlgmr.msra.gmra.mrb[48].mxu0 %v10035_v12  ;;  %v1274_v50 = vor.u32 %v1273_v41, %v1270_v40  ;;  %v1293_v51 = vrot.slane %v1291_v42, 5  ;;  %v12326_v57 = vld [vmem:[%s15253_s1 + $0x498] sm:$0xff]   ;;  %v1421_v2 = vrot.slane %v10048_v62, 5  ;;  %v12332_v31 = vld [vmem:[%s15253_s1 + $0x4a0] sm:$0xff]   ;;  %v12333_v34 = vld [vmem:[%s15253_s1 + $0x468] sm:$0xff]  }
  0x9e   : > { %8502 = vmatmul.mubr.bf16.vlgmr.msra.gmra.mrb[48].mxu1 %v12308_v0  ;;  %11406 = vmatpush3.bf16.msra.mxu0 %v12311_v7  ;;  %v1288_v53 = vor.u32 %v1287_v46, %v1284_v45  ;;  %v10049_v63 = vld [vmem:[%s12882_s7 + $0x118] sm:$0xe]  ;;  %v10050_v0 = vld [vmem:[%s12882_s7 + $0x11c] sm:$0x1]  ;;  %v10027_v7 = vld [vmem:[%s12882_s7 + $0x1b0] sm:$0xf] }
  0x9f   : > { %11446 = vmatpush3.bf16.msra.mxu1 %v12312_v3  ;;  %11407 = vmatprep.subr.bf16.mxu0 %v12313_v11  ;;  %v1275_v54 = vrot.slane %v1274_v50, 4  ;;  %v10060_v3 = vrot.slane %v10049_v63, 9  ;;  %v1425_v4 = vrot.slane %v10050_v0, 5  ;;  %v1422_v5 = vsel %vm13051_vm5, %v10059_v1, %v1421_v2  ;;  %v12327_v6 = vld [vmem:[%s12882_s7 + $0x250] ss:$8 sps:$4 sm:$0xff]   ;;  %v12334_v36 = vld [vmem:[%s15253_s1 + $0x4e8] sm:$0xff]  }
  0xa0   : > { %11447 = vmatprep.subr.bf16.mxu1 %v12314_v8  ;;  %8509 = vmatprep.mubr.bf16.mxu1 %v12317_v27  ;;  %v1289_v56 = vrot.slane %v1288_v53, 4  ;;  %v10028_v8 = vld [vmem:[%s12882_s7 + $0x1b4] sm:$0x1]  ;;  %v10029_v10 = vld [vmem:[%s12882_s7 + $0x1b8] sm:$0xf]  ;;  %v1296_v12 = vshrl.u32 %v10027_v7, 16 }
  0xa1   : > { %8444 = vmatprep.mubr.bf16.mxu0 %v10064_v35  ;;  %v1280_v58 = vsel %vm12893_vm2, %v1275_v54, %v1279_v44  ;;  %v1426_v9 = vsel %vm13051_vm5, %v10060_v3, %v1425_v4  ;;  %v10030_v11 = vld [vmem:[%s12882_s7 + $0x1bc] sm:$0x1]  ;;  %v1305_v15 = vshll.u32 %v10028_v8, 16  ;;  %v1310_v16 = vshrl.u32 %v10029_v10, 16  ;;  %v12328_v27 = vld [vmem:[%s12882_s7 + $0x200] ss:$8 sps:$4 sm:$0xff]  }
  0xa2   : > { %11408 = vmatpush3.bf16.msra.mxu0 %v12315_v14  ;;  %v1294_v59 = vsel %vm12893_vm2, %v1289_v56, %v1293_v51  ;;  %v10065_v14 = vcombine.low %v1422_v5, %v1426_v9  ;;  %v1313_v17 = vshll.u32 %v10029_v10, 16  ;;  %v1298_v19 = vrot.slane %v1296_v12, 4  ;;  %v12336_v41 = vld [vmem:[%s15253_s1 + $0x4a8] sm:$0xff]   ;;  %v10051_v42 = vld [vmem:[%s12882_s7 + $0x120] sm:$0xe]  ;;  %v12339_v50 = vld [vmem:[%s15253_s1 + $0x470] sm:$0xff]  }
  0xa3   : > { %11448 = vmatpush3.bf16.msra.mxu1 %v12316_v13  ;;  %11409 = vmatprep.subr.bf16.mxu0 %v12319_v22  ;;  %v10036_v60 = vcombine.low %v1280_v58, %v1294_v59  ;;  %v1299_v13 = vshll.u32 %v10027_v7, 16  ;;  %v1319_v21 = vshll.u32 %v10030_v11, 16  ;;  %v12330_v22 = vld [vmem:[%s15253_s1 + $0x4e0] sm:$0xff]   ;;  %v1307_v24 = vrot.slane %v1305_v15, 5  ;;  %v10053_v44 = vld [vmem:[%s12882_s7 + $0x128] sm:$0xe] }
  0xa4   : > { %11449 = vmatprep.subr.bf16.mxu1 %v12320_v25  ;;  %v1312_v25 = vrot.slane %v1310_v16, 4  ;;  %v1315_v26 = vrot.slane %v1313_v17, 5  ;;  %v10054_v45 = vld [vmem:[%s12882_s7 + $0x12c] sm:$0x1]  ;;  %v10061_v46 = vrot.slane %v10051_v42, 9  ;;  %v12341_v2 = vld [vmem:[%s15253_s1 + $0x430] sm:$0xff]  }
  0xa5   : > { %8445 = vmatmul.mubr.bf16.gmra.mrb[52].mxu0 %v10036_v60  ;;  %v1301_v20 = vrot.slane %v1299_v13, 5  ;;  %v1321_v30 = vrot.slane %v1319_v21, 5  ;;  %v1433_v51 = vrot.slane %v10054_v45, 5  ;;  %v12337_v54 = vld [vmem:[%s12882_s7 + $0x260] ss:$8 sps:$4 sm:$0xff]   ;;  %v12343_v11 = vld [vmem:[%s15253_s1 + $0x478] sm:$0xff]  }
  0xa6   : > { %8510 = vmatmul.mubr.bf16.gmra.mrb[52].mxu1 %v12318_v48  ;;  %11410 = vmatpush3.bf16.msra.mxu0 %v12321_v39  ;;  %v1316_v32 = vor.u32 %v1315_v26, %v1312_v25  ;;  %v12335_v39 = vld [vmem:[%s15253_s1 + $0x428] sm:$0xff]   ;;  %v10032_v56 = vld [vmem:[%s12882_s7 + $0x1c4] sm:$0x1]  ;;  %v12338_v10 = vld [vmem:[%s12882_s7 + $0x210] ss:$8 sps:$4 sm:$0xff]  }
  0xa7   : > { %11450 = vmatpush3.bf16.msra.mxu1 %v12322_v43  ;;  %11411 = vmatprep.subr.bf16.mxu0 %v12323_v49  ;;  %v1302_v29 = vor.u32 %v1301_v20, %v1298_v19  ;;  %v10052_v43 = vld [vmem:[%s12882_s7 + $0x124] sm:$0x1]  ;;  %v10062_v49 = vrot.slane %v10053_v44, 9  ;;  %v10033_v58 = vld [vmem:[%s12882_s7 + $0x1c8] sm:$0xf]  ;;  %v1333_v63 = vshll.u32 %v10032_v56, 16 }
  0xa8   : > { %11451 = vmatprep.subr.bf16.mxu1 %v12324_v52  ;;  %8517 = vmatprep.mubr.bf16.mxu1 %v12327_v6  ;;  %v1317_v35 = vrot.slane %v1316_v32, 4  ;;  %v1429_v48 = vrot.slane %v10052_v43, 5  ;;  %v12340_v52 = vld [vmem:[%s15253_s1 + $0x4f0] sm:$0xff]   ;;  %v10034_v59 = vld [vmem:[%s12882_s7 + $0x1cc] sm:$0x1]  ;;  %v1338_v0 = vshrl.u32 %v10033_v58, 16 }
  0xa9   : > { %8452 = vmatprep.mubr.bf16.mxu0 %v10065_v14  ;;  %v1303_v33 = vrot.slane %v1302_v29, 4  ;;  %v1341_v1 = vshll.u32 %v10033_v58, 16  ;;  %v1347_v5 = vshll.u32 %v10034_v59, 16  ;;  %v12342_v6 = vld [vmem:[%s15253_s1 + $0x4b0] sm:$0xff]   ;;  %v1335_v7 = vrot.slane %v1333_v63, 5  ;;  %v12344_v14 = vld [vmem:[%s15253_s1 + $0x4f8] sm:$0xff]  }
  0xaa   : > { %11412 = vmatpush3.bf16.msra.mxu0 %v12325_v55  ;;  %v1322_v38 = vsel %vm12893_vm2, %v1317_v35, %v1321_v30  ;;  %v1430_v53 = vsel %vm13051_vm5, %v10061_v46, %v1429_v48  ;;  %v10031_v55 = vld [vmem:[%s12882_s7 + $0x1c0] sm:$0xf]  ;;  %v1340_v8 = vrot.slane %v1338_v0, 4  ;;  %v12345_v17 = vld [vmem:[%s15253_s1 + $0x438] sm:$0xff]   ;;  %v10104_v25 = vld [vmem:[%s12882_s7 + $0x1e4] sm:$0x1] }
  0xab   : > { %11452 = vmatpush3.bf16.msra.mxu1 %v12326_v57  ;;  %11413 = vmatprep.subr.bf16.mxu0 %v12329_v18  ;;  %v1308_v37 = vsel %vm12893_vm2, %v1303_v33, %v1307_v24  ;;  %v1434_v57 = vsel %vm13051_vm5, %v10062_v49, %v1433_v51  ;;  %v1324_v60 = vshrl.u32 %v10031_v55, 16  ;;  %v1327_v61 = vshll.u32 %v10031_v55, 16  ;;  %v12346_v19 = vld [vmem:[%s15253_s1 + $0x4b8] sm:$0xff]   ;;  %v10103_v24 = vld [vmem:[%s12882_s7 + $0x1e0] sm:$0xf] }
  0xac   : > { %11453 = vmatprep.subr.bf16.mxu1 %v12330_v22  ;;  %v10037_v40 = vcombine.low %v1308_v37, %v1322_v38  ;;  %v10066_v62 = vcombine.low %v1430_v53, %v1434_v57  ;;  %v1343_v9 = vrot.slane %v1341_v1, 5  ;;  %v1349_v13 = vrot.slane %v1347_v5, 5  ;;  %v10105_v26 = vld [vmem:[%s12882_s7 + $0x1e8] sm:$0xf]  ;;  %v10144_v37 = vld [vmem:[%s12882_s7 + $0x284] sm:$0x1] }
  0xad   : > { %v1326_v3 = vrot.slane %v1324_v60, 4  ;;  %v1329_v4 = vrot.slane %v1327_v61, 5  ;;  %v1592_v29 = vshll.u32 %v10103_v24, 16  ;;  %v1598_v30 = vshll.u32 %v10104_v25, 16  ;;  %v10145_v38 = vld [vmem:[%s12882_s7 + $0x288] sm:$0xf] }
  0xae   : > { %8518 = vmatmul.mubr.bf16.gmra.mrb[56].mxu1 %v12328_v27  ;;  %11414 = vmatpush3.bf16.msra.mxu0 %v12331_v28  ;;  %v1344_v15 = vor.u32 %v1343_v9, %v1340_v8  ;;  %v10106_v27 = vld [vmem:[%s12882_s7 + $0x1ec] sm:$0x1]  ;;  %v1589_v28 = vshrl.u32 %v10103_v24, 16  ;;  %v1606_v32 = vshll.u32 %v10105_v26, 16  ;;  %v1894_v48 = vshll.u32 %v10144_v37, 16  ;;  %v12348_v49 = vld [vmem:[%s15253_s1 + $0x540] sm:$0xff]  }
  0xaf   : > { %11454 = vmatpush3.bf16.msra.mxu1 %v12332_v31  ;;  %11415 = vmatprep.subr.bf16.mxu0 %v12333_v34  ;;  %v1330_v12 = vor.u32 %v1329_v4, %v1326_v3  ;;  %v1603_v31 = vshrl.u32 %v10105_v26, 16  ;;  %v1612_v33 = vshll.u32 %v10106_v27, 16  ;;  %v10143_v34 = vld [vmem:[%s12882_s7 + $0x280] sm:$0xf]  ;;  %v10146_v43 = vld [vmem:[%s12882_s7 + $0x28c] sm:$0x1] }
  0xb0   : > { %11455 = vmatprep.subr.bf16.mxu1 %v12334_v36  ;;  %8453 = vmatmul.mubr.bf16.gmra.mrb[56].mxu0 %v10037_v40  ;;  %v1345_v18 = vrot.slane %v1344_v15, 4  ;;  %v1591_v35 = vrot.slane %v1589_v28, 4  ;;  %v1594_v36 = vrot.slane %v1592_v29, 5  ;;  %v1885_v45 = vshrl.u32 %v10143_v34, 16  ;;  %v12347_v63 = vld [vmem:[%s12882_s7 + $0x280] ss:$8 sps:$4 sm:$0xff]  }
  0xb1   : > { %8525 = vmatprep.mubr.bf16.mxu1 %v12337_v54  ;;  %8460 = vmatprep.mubr.bf16.mxu0 %v10066_v62  ;;  %v1331_v16 = vrot.slane %v1330_v12, 4  ;;  %v1605_v40 = vrot.slane %v1603_v31, 4  ;;  %v1614_v42 = vrot.slane %v1612_v33, 5  ;;  %v1888_v46 = vshll.u32 %v10143_v34, 16  ;;  %v12349_v54 = vld [vmem:[%s15253_s1 + $0x5c0] sm:$0xff]   ;;  %v12352_v27 = vld [vmem:[%s15253_s1 + $0x548] sm:$0xff]  }
  0xb2   : > { %11416 = vmatpush3.bf16.msra.mxu0 %v12335_v39  ;;  %v1350_v21 = vsel %vm12893_vm2, %v1345_v18, %v1349_v13  ;;  %v1600_v39 = vrot.slane %v1598_v30, 5  ;;  %v1595_v44 = vor.u32 %v1594_v36, %v1591_v35  ;;  %v1899_v51 = vshrl.u32 %v10145_v38, 16  ;;  %v10123_v0 = vld [vmem:[%s12882_s7 + $0x230] sm:$0xf]  ;;  %v10124_v3 = vld [vmem:[%s12882_s7 + $0x234] sm:$0x1] }
  0xb3   : > { %11456 = vmatpush3.bf16.msra.mxu1 %v12336_v41  ;;  %11417 = vmatprep.subr.bf16.mxu0 %v12339_v50  ;;  %v1336_v20 = vsel %vm12893_vm2, %v1331_v16, %v1335_v7  ;;  %v1608_v41 = vrot.slane %v1606_v32, 5  ;;  %v1908_v53 = vshll.u32 %v10146_v43, 16  ;;  %v1887_v56 = vrot.slane %v1885_v45, 4  ;;  %v10125_v4 = vld [vmem:[%s12882_s7 + $0x238] sm:$0xf]  ;;  %v12354_v32 = vld [vmem:[%s15253_s1 + $0x508] sm:$0xff]  }
  0xb4   : > { %11457 = vmatprep.subr.bf16.mxu1 %v12340_v52  ;;  %v10038_v22 = vcombine.low %v1336_v20, %v1350_v21  ;;  %v1902_v52 = vshll.u32 %v10145_v38, 16  ;;  %v1596_v55 = vrot.slane %v1595_v44, 4  ;;  %v1890_v57 = vrot.slane %v1888_v46, 5  ;;  %v10126_v5 = vld [vmem:[%s12882_s7 + $0x23c] sm:$0x1]  ;;  %v12351_v35 = vld [vmem:[%s15253_s1 + $0x580] sm:$0xff]  }
  0xb5   : > { %v1609_v50 = vor.u32 %v1608_v41, %v1605_v40  ;;  %v1896_v58 = vrot.slane %v1894_v48, 5  ;;  %v1901_v60 = vrot.slane %v1899_v51, 4  ;;  %v1910_v62 = vrot.slane %v1908_v53, 5  ;;  %v10107_v36 = vld [vmem:[%s12882_s7 + $0x1f0] sm:$0xf]  ;;  %v12353_v46 = vld [vmem:[%s15253_s1 + $0x5c8] sm:$0xff]  }
  0xb6   : > { %11418 = vmatpush3.bf16.msra.mxu0 %v12341_v2  ;;  %8526 = vmatmul.mubr.bf16.gmra.mrb[60].mxu1 %v12338_v10  ;;  %v1904_v61 = vrot.slane %v1902_v52, 5  ;;  %v1601_v1 = vsel %vm12893_vm2, %v1596_v55, %v1600_v39  ;;  %v1891_v2 = vor.u32 %v1890_v57, %v1887_v56  ;;  %v1737_v8 = vshrl.u32 %v10123_v0, 16  ;;  %v10108_v37 = vld [vmem:[%s12882_s7 + $0x1f4] sm:$0x1]  ;;  %v10109_v38 = vld [vmem:[%s12882_s7 + $0x1f8] sm:$0xf] }
  0xb7   : > { %11458 = vmatpush3.bf16.msra.mxu1 %v12342_v6  ;;  %11419 = vmatprep.subr.bf16.mxu0 %v12343_v11  ;;  %v1610_v59 = vrot.slane %v1609_v50, 4  ;;  %v1740_v9 = vshll.u32 %v10123_v0, 16  ;;  %v1746_v12 = vshll.u32 %v10124_v3, 16  ;;  %v1751_v13 = vshrl.u32 %v10125_v4, 16  ;;  %v10110_v40 = vld [vmem:[%s12882_s7 + $0x1fc] sm:$0x1] }
  0xb8   : > { %11459 = vmatprep.subr.bf16.mxu1 %v12344_v14  ;;  %8461 = vmatmul.mubr.bf16.gmra.mrb[60].mxu0 %v10038_v22  ;;  %v1905_v7 = vor.u32 %v1904_v61, %v1901_v60  ;;  %v1892_v11 = vrot.slane %v1891_v2, 4  ;;  %v12350_v14 = vld [vmem:[%s15253_s1 + $0x500] sm:$0xff]   ;;  %v1739_v16 = vrot.slane %v1737_v8, 4  ;;  %v1754_v18 = vshll.u32 %v10125_v4, 16  ;;  %v12357_v44 = vld [vmem:[%s15253_s1 + $0x550] sm:$0xff]   ;;  %v12355_v52 = vld [vmem:[%s15253_s1 + $0x588] sm:$0xff]  }
  0xb9   : > { %v1615_v6 = vsel %vm12893_vm2, %v1610_v59, %v1614_v42  ;;  %v1748_v20 = vrot.slane %v1746_v12, 5  ;;  %v1753_v21 = vrot.slane %v1751_v13, 4  ;;  %v1760_v22 = vshll.u32 %v10126_v5, 16  ;;  %v10147_v51 = vld [vmem:[%s12882_s7 + $0x290] sm:$0xf] }
  0xba   : > { %11420 = vmatpush3.bf16.msra.mxu0 %v12345_v17  ;;  %v10119_v10 = vcombine.low %v1601_v1, %v1615_v6  ;;  %v1906_v15 = vrot.slane %v1905_v7, 4  ;;  %v1742_v17 = vrot.slane %v1740_v9, 5  ;;  %v1756_v26 = vrot.slane %v1754_v18, 5  ;;  %v10148_v56 = vld [vmem:[%s12882_s7 + $0x294] sm:$0x1] }
  0xbb   : > { %11460 = vmatpush3.bf16.msra.mxu1 %v12346_v19  ;;  %11485 = vmatprep.subr.bf16.mxu0 %v12348_v49  ;;  %v1897_v19 = vsel %vm12893_vm2, %v1892_v11, %v1896_v58  ;;  %v1762_v29 = vrot.slane %v1760_v22, 5  ;;  %v1617_v41 = vshrl.u32 %v10107_v36, 16  ;;  %v1620_v42 = vshll.u32 %v10107_v36, 16  ;;  %v10149_v61 = vld [vmem:[%s12882_s7 + $0x298] sm:$0xf]  ;;  %v12359_v4 = vld [vmem:[%s15253_s1 + $0x510] sm:$0xff]  }
  0xbc   : > { %11525 = vmatprep.subr.bf16.mxu1 %v12349_v54  ;;  %8566 = vmatprep.mubr.bf16.mxu0 %v10119_v10  ;;  %v1911_v24 = vsel %vm12893_vm2, %v1906_v15, %v1910_v62  ;;  %v1743_v25 = vor.u32 %v1742_v17, %v1739_v16  ;;  %v1757_v31 = vor.u32 %v1756_v26, %v1753_v21  ;;  %v1626_v43 = vshll.u32 %v10108_v37, 16  ;;  %v10150_v0 = vld [vmem:[%s12882_s7 + $0x29c] sm:$0x1]  ;;  %v12358_v9 = vld [vmem:[%s15253_s1 + $0x5d0] sm:$0xff]   ;;  %v10127_v22 = vld [vmem:[%s12882_s7 + $0x240] sm:$0xf] }
  0xbd   : > { %v10159_v28 = vcombine.low %v1897_v19, %v1911_v24  ;;  %v1631_v48 = vshrl.u32 %v10109_v38, 16  ;;  %v1634_v49 = vshll.u32 %v10109_v38, 16  ;;  %v1640_v50 = vshll.u32 %v10110_v40, 16  ;;  %v12360_v13 = vld [vmem:[%s15253_s1 + $0x590] sm:$0xff]   ;;  %v10128_v24 = vld [vmem:[%s12882_s7 + $0x244] sm:$0x1] }
  0xbe   : > { %v1744_v30 = vrot.slane %v1743_v25, 4  ;;  %v1758_v34 = vrot.slane %v1757_v31, 4  ;;  %v1619_v53 = vrot.slane %v1617_v41, 4  ;;  %v1622_v54 = vrot.slane %v1620_v42, 5  ;;  %v12356_v19 = vld [vmem:[%s12882_s7 + $0x290] ss:$8 sps:$4 sm:$0xff]  }
  0xbf   : > { %8631 = vmatprep.mubr.bf16.mxu1 %v10159_v28  ;;  %v1628_v55 = vrot.slane %v1626_v43, 5  ;;  %v1913_v57 = vshrl.u32 %v10147_v51, 16  ;;  %v1633_v58 = vrot.slane %v1631_v48, 4  ;;  %v1636_v59 = vrot.slane %v1634_v49, 5  ;;  %v10129_v25 = vld [vmem:[%s12882_s7 + $0x248] sm:$0xf] }
  0xc0   : > { %8567 = vmatmul.mubr.bf16.vlgmr.msra.gmra.mrb[64].mxu0 %v12347_v63  ;;  %v1749_v33 = vsel %vm12893_vm2, %v1744_v30, %v1748_v20  ;;  %v1763_v39 = vsel %vm12893_vm2, %v1758_v34, %v1762_v29  ;;  %v1642_v60 = vrot.slane %v1640_v50, 5  ;;  %v1916_v62 = vshll.u32 %v10147_v51, 16  ;;  %v12362_v20 = vld [vmem:[%s15253_s1 + $0x5d8] sm:$0xff]   ;;  %v10130_v29 = vld [vmem:[%s12882_s7 + $0x24c] sm:$0x1]  ;;  %v12366_v48 = vld [vmem:[%s15253_s1 + $0x560] sm:$0xff]  }
  0xc1   : > { %11486 = vmatpush3.bf16.msra.mxu0 %v12350_v14  ;;  %v10139_v45 = vcombine.low %v1749_v33, %v1763_v39  ;;  %v1623_v63 = vor.u32 %v1622_v54, %v1619_v53  ;;  %v1915_v1 = vrot.slane %v1913_v57, 4  ;;  %v1922_v2 = vshll.u32 %v10148_v56, 16  ;;  %v12361_v14 = vld [vmem:[%s15253_s1 + $0x558] sm:$0xff]   ;;  %v12369_v57 = vld [vmem:[%s15253_s1 + $0x5a0] sm:$0xff]  }
  0xc2   : > { %11487 = vmatprep.subr.bf16.mxu0 %v12352_v27  ;;  %v1927_v3 = vshrl.u32 %v10149_v61, 16  ;;  %v1637_v5 = vor.u32 %v1636_v59, %v1633_v58  ;;  %v1918_v6 = vrot.slane %v1916_v62, 5  ;;  %v1930_v7 = vshll.u32 %v10149_v61, 16  ;;  %v12364_v40 = vld [vmem:[%s15253_s1 + $0x598] sm:$0xff]   ;;  %v10111_v59 = vld [vmem:[%s12882_s7 + $0x200] sm:$0xf] }
  0xc3   : > { %8632 = vmatmul.mubr.bf16.vlgmr.msra.gmra.mrb[64].mxu1 %v10139_v45  ;;  %v1936_v8 = vshll.u32 %v10150_v0, 16  ;;  %v1624_v10 = vrot.slane %v1623_v63, 4  ;;  %v1924_v11 = vrot.slane %v1922_v2, 5  ;;  %v1765_v30 = vshrl.u32 %v10127_v22, 16  ;;  %v10113_v62 = vld [vmem:[%s12882_s7 + $0x208] sm:$0xf] }
  0xc4   : > { %11526 = vmatpush3.bf16.msra.mxu1 %v12351_v35  ;;  %v1929_v12 = vrot.slane %v1927_v3, 4  ;;  %v1638_v15 = vrot.slane %v1637_v5, 4  ;;  %v1919_v16 = vor.u32 %v1918_v6, %v1915_v1  ;;  %v1932_v17 = vrot.slane %v1930_v7, 5  ;;  %v12363_v35 = vld [vmem:[%s15253_s1 + $0x518] sm:$0xff]   ;;  %v10114_v63 = vld [vmem:[%s12882_s7 + $0x20c] sm:$0x1] }
  0xc5   : > { %11488 = vmatpush3.bf16.msra.mxu0 %v12354_v32  ;;  %11527 = vmatprep.subr.bf16.mxu1 %v12353_v46  ;;  %v1938_v18 = vrot.slane %v1936_v8, 5  ;;  %v1629_v21 = vsel %vm12893_vm2, %v1624_v10, %v1628_v55  ;;  %v1768_v32 = vshll.u32 %v10127_v22, 16  ;;  %v1774_v33 = vshll.u32 %v10128_v24, 16  ;;  %v12368_v55 = vld [vmem:[%s15253_s1 + $0x520] sm:$0xff]   ;;  %v12370_v7 = vld [vmem:[%s15253_s1 + $0x568] sm:$0xff]  }
  0xc6   : > { %11489 = vmatprep.subr.bf16.mxu0 %v12357_v44  ;;  %v1643_v26 = vsel %vm12893_vm2, %v1638_v15, %v1642_v60  ;;  %v1920_v27 = vrot.slane %v1919_v16, 4  ;;  %v1933_v28 = vor.u32 %v1932_v17, %v1929_v12  ;;  %v1779_v34 = vshrl.u32 %v10129_v25, 16  ;;  %v10112_v60 = vld [vmem:[%s12882_s7 + $0x204] sm:$0x1]  ;;  %v10151_v6 = vld [vmem:[%s12882_s7 + $0x2a0] sm:$0xf] }
  0xc7   : > { %v10120_v31 = vcombine.low %v1629_v21, %v1643_v26  ;;  %v1767_v38 = vrot.slane %v1765_v30, 4  ;;  %v1782_v39 = vshll.u32 %v10129_v25, 16  ;;  %v1770_v41 = vrot.slane %v1768_v32, 5  ;;  %v10153_v16 = vld [vmem:[%s12882_s7 + $0x2a8] sm:$0xf] }
  0xc8   : > { %11528 = vmatpush3.bf16.msra.mxu1 %v12355_v52  ;;  %v1925_v36 = vsel %vm12893_vm2, %v1920_v27, %v1924_v11  ;;  %v1934_v37 = vrot.slane %v1933_v28, 4  ;;  %v1776_v42 = vrot.slane %v1774_v33, 5  ;;  %v1781_v43 = vrot.slane %v1779_v34, 4  ;;  %v12367_v52 = vld [vmem:[%s15253_s1 + $0x5e0] sm:$0xff]   ;;  %v12371_v24 = vld [vmem:[%s15253_s1 + $0x5e8] sm:$0xff]  }
  0xc9   : > { %11490 = vmatpush3.bf16.msra.mxu0 %v12359_v4  ;;  %11529 = vmatprep.subr.bf16.mxu1 %v12358_v9  ;;  %v1788_v44 = vshll.u32 %v10130_v29, 16  ;;  %v1784_v46 = vrot.slane %v1782_v39, 5  ;;  %v1771_v50 = vor.u32 %v1770_v41, %v1767_v38  ;;  %v1645_v0 = vshrl.u32 %v10111_v59, 16  ;;  %v10152_v11 = vld [vmem:[%s12882_s7 + $0x2a4] sm:$0x1]  ;;  %v12372_v29 = vld [vmem:[%s15253_s1 + $0x528] sm:$0xff]  }
  0xca   : > { %11491 = vmatprep.subr.bf16.mxu0 %v12361_v14  ;;  %8574 = vmatprep.mubr.bf16.mxu0 %v10120_v31  ;;  %v1939_v45 = vsel %vm12893_vm2, %v1934_v37, %v1938_v18  ;;  %v1648_v1 = vshll.u32 %v10111_v59, 16  ;;  %v1654_v3 = vshll.u32 %v10112_v60, 16  ;;  %v1659_v4 = vshrl.u32 %v10113_v62, 16  ;;  %v12373_v33 = vld [vmem:[%s15253_s1 + $0x5a8] sm:$0xff]   ;;  %v12375_v39 = vld [vmem:[%s15253_s1 + $0x570] sm:$0xff]  }
  0xcb   : > { %8575 = vmatmul.mubr.bf16.gmra.mrb[68].mxu0 %v12356_v19  ;;  %v10160_v49 = vcombine.low %v1925_v36, %v1939_v45  ;;  %v1790_v51 = vrot.slane %v1788_v44, 5  ;;  %v1785_v53 = vor.u32 %v1784_v46, %v1781_v43  ;;  %v1772_v54 = vrot.slane %v1771_v50, 4  ;;  %v12365_v38 = vld [vmem:[%s12882_s7 + $0x2a0] ss:$8 sps:$4 sm:$0xff]   ;;  %v10132_v43 = vld [vmem:[%s12882_s7 + $0x254] sm:$0x1] }
  0xcc   : > { %11530 = vmatpush3.bf16.msra.mxu1 %v12360_v13  ;;  %v1662_v5 = vshll.u32 %v10113_v62, 16  ;;  %v1647_v8 = vrot.slane %v1645_v0, 4  ;;  %v1650_v9 = vrot.slane %v1648_v1, 5  ;;  %v1668_v10 = vshll.u32 %v10114_v63, 16  ;;  %v12376_v44 = vld [vmem:[%s15253_s1 + $0x5f0] sm:$0xff]  }
  0xcd   : > { %11531 = vmatprep.subr.bf16.mxu1 %v12362_v20  ;;  %11492 = vmatpush3.bf16.msra.mxu0 %v12363_v35  ;;  %v1786_v56 = vrot.slane %v1785_v53, 4  ;;  %v1777_v58 = vsel %vm12893_vm2, %v1772_v54, %v1776_v42  ;;  %v1941_v12 = vshrl.u32 %v10151_v6, 16  ;;  %v1656_v13 = vrot.slane %v1654_v3, 5  ;;  %v10154_v20 = vld [vmem:[%s12882_s7 + $0x2ac] sm:$0x1] }
  0xce   : > { %11493 = vmatprep.subr.bf16.mxu0 %v12366_v48  ;;  %8639 = vmatprep.mubr.bf16.mxu1 %v10160_v49  ;;  %v1661_v14 = vrot.slane %v1659_v4, 4  ;;  %v1664_v15 = vrot.slane %v1662_v5, 5  ;;  %v1944_v17 = vshll.u32 %v10151_v6, 16  ;;  %v1651_v18 = vor.u32 %v1650_v9, %v1647_v8  ;;  %v10131_v42 = vld [vmem:[%s12882_s7 + $0x250] sm:$0xf]  ;;  %v12379_v4 = vld [vmem:[%s15253_s1 + $0x578] sm:$0xff]  }
  0xcf   : > { %v1791_v61 = vsel %vm12893_vm2, %v1786_v56, %v1790_v51  ;;  %v1670_v19 = vrot.slane %v1668_v10, 5  ;;  %v1943_v21 = vrot.slane %v1941_v12, 4  ;;  %v1950_v22 = vshll.u32 %v10152_v11, 16  ;;  %v10133_v49 = vld [vmem:[%s12882_s7 + $0x258] sm:$0xf]  ;;  %v12377_v56 = vld [vmem:[%s15253_s1 + $0x530] sm:$0xff]  }
  0xd0   : > { %11532 = vmatpush3.bf16.msra.mxu1 %v12364_v40  ;;  %v10140_v2 = vcombine.low %v1777_v58, %v1791_v61  ;;  %v1665_v25 = vor.u32 %v1664_v15, %v1661_v14  ;;  %v1946_v26 = vrot.slane %v1944_v17, 5  ;;  %v1955_v27 = vshrl.u32 %v10153_v16, 16  ;;  %v10134_v50 = vld [vmem:[%s12882_s7 + $0x25c] sm:$0x1]  ;;  %v12378_v61 = vld [vmem:[%s15253_s1 + $0x5b0] sm:$0xff]  }
  0xd1   : > { %11533 = vmatprep.subr.bf16.mxu1 %v12367_v52  ;;  %11494 = vmatpush3.bf16.msra.mxu0 %v12368_v55  ;;  %v1958_v28 = vshll.u32 %v10153_v16, 16  ;;  %v1652_v30 = vrot.slane %v1651_v18, 4  ;;  %v1952_v31 = vrot.slane %v1950_v22, 5  ;;  %v1964_v32 = vshll.u32 %v10154_v20, 16  ;;  %v12380_v8 = vld [vmem:[%s15253_s1 + $0x5f8] sm:$0xff]  }
  0xd2   : > { %8640 = vmatmul.mubr.bf16.gmra.mrb[68].mxu1 %v10140_v2  ;;  %11495 = vmatprep.subr.bf16.mxu0 %v12370_v7  ;;  %v1666_v34 = vrot.slane %v1665_v25, 4  ;;  %v1947_v35 = vor.u32 %v1946_v26, %v1943_v21  ;;  %v1957_v36 = vrot.slane %v1955_v27, 4  ;;  %v1793_v51 = vshrl.u32 %v10131_v42, 16  ;;  %v12381_v11 = vld [vmem:[%s15253_s1 + $0x538] sm:$0xff]   ;;  %v10115_v15 = vld [vmem:[%s12882_s7 + $0x210] sm:$0xf] }
  0xd3   : > { %v1960_v37 = vrot.slane %v1958_v28, 5  ;;  %v1657_v40 = vsel %vm12893_vm2, %v1652_v30, %v1656_v13  ;;  %v1966_v41 = vrot.slane %v1964_v32, 5  ;;  %v1796_v53 = vshll.u32 %v10131_v42, 16  ;;  %v12382_v13 = vld [vmem:[%s15253_s1 + $0x5b8] sm:$0xff]   ;;  %v10116_v17 = vld [vmem:[%s12882_s7 + $0x214] sm:$0x1] }
  0xd4   : > { %11534 = vmatpush3.bf16.msra.mxu1 %v12369_v57  ;;  %v1671_v45 = vsel %vm12893_vm2, %v1666_v34, %v1670_v19  ;;  %v1948_v46 = vrot.slane %v1947_v35, 4  ;;  %v1802_v54 = vshll.u32 %v10132_v43, 16  ;;  %v1807_v55 = vshrl.u32 %v10133_v49, 16  ;;  %v10117_v18 = vld [vmem:[%s12882_s7 + $0x218] sm:$0xf]  ;;  %v12386_v26 = vld [vmem:[%s15253_s1 + $0x640] sm:$0xff]  }
  0xd5   : > { %11535 = vmatprep.subr.bf16.mxu1 %v12371_v24  ;;  %11496 = vmatpush3.bf16.msra.mxu0 %v12372_v29  ;;  %v1961_v48 = vor.u32 %v1960_v37, %v1957_v36  ;;  %v10121_v52 = vcombine.low %v1657_v40, %v1671_v45  ;;  %v1795_v59 = vrot.slane %v1793_v51, 4  ;;  %v1810_v60 = vshll.u32 %v10133_v49, 16  ;;  %v10118_v19 = vld [vmem:[%s12882_s7 + $0x21c] sm:$0x1]  ;;  %v10155_v25 = vld [vmem:[%s12882_s7 + $0x2b0] sm:$0xf] }
  0xd6   : > { %11497 = vmatprep.subr.bf16.mxu0 %v12375_v39  ;;  %v1953_v57 = vsel %vm12893_vm2, %v1948_v46, %v1952_v31  ;;  %v1798_v62 = vrot.slane %v1796_v53, 5  ;;  %v1804_v63 = vrot.slane %v1802_v54, 5  ;;  %v1809_v0 = vrot.slane %v1807_v55, 4  ;;  %v10156_v30 = vld [vmem:[%s12882_s7 + $0x2b4] sm:$0x1]  ;;  %v12387_v45 = vld [vmem:[%s15253_s1 + $0x6c0] sm:$0xff]  }
  0xd7   : > { %v1962_v58 = vrot.slane %v1961_v48, 4  ;;  %8582 = vmatprep.mubr.bf16.mxu0 %v10121_v52  ;;  %v1816_v1 = vshll.u32 %v10134_v50, 16  ;;  %v1812_v3 = vrot.slane %v1810_v60, 5  ;;  %v1673_v21 = vshrl.u32 %v10115_v15, 16  ;;  %v10157_v34 = vld [vmem:[%s12882_s7 + $0x2b8] sm:$0xf] }
  0xd8   : > { %11536 = vmatpush3.bf16.msra.mxu1 %v12373_v33  ;;  %8583 = vmatmul.mubr.bf16.gmra.mrb[72].mxu0 %v12365_v38  ;;  %v1799_v6 = vor.u32 %v1798_v62, %v1795_v59  ;;  %v1676_v22 = vshll.u32 %v10115_v15, 16  ;;  %v1682_v24 = vshll.u32 %v10116_v17, 16  ;;  %v1687_v27 = vshrl.u32 %v10117_v18, 16  ;;  %v10158_v39 = vld [vmem:[%s12882_s7 + $0x2bc] sm:$0x1] }
  0xd9   : > { %11537 = vmatprep.subr.bf16.mxu1 %v12376_v44  ;;  %11498 = vmatpush3.bf16.msra.mxu0 %v12377_v56  ;;  %v1967_v2 = vsel %vm12893_vm2, %v1962_v58, %v1966_v41  ;;  %v1818_v7 = vrot.slane %v1816_v1, 5  ;;  %v1813_v9 = vor.u32 %v1812_v3, %v1809_v0  ;;  %v1690_v28 = vshll.u32 %v10117_v18, 16  ;;  %v10135_v55 = vld [vmem:[%s12882_s7 + $0x260] sm:$0xf]  ;;  %v12374_v59 = vld [vmem:[%s12882_s7 + $0x2b0] ss:$8 sps:$4 sm:$0xff]  }
  0xda   : > { %v10161_v5 = vcombine.low %v1953_v57, %v1967_v2  ;;  %11499 = vmatprep.subr.bf16.mxu0 %v12379_v4  ;;  %v1800_v10 = vrot.slane %v1799_v6, 4  ;;  %v1696_v29 = vshll.u32 %v10118_v19, 16  ;;  %v1969_v31 = vshrl.u32 %v10155_v25, 16  ;;  %v10136_v60 = vld [vmem:[%s12882_s7 + $0x264] sm:$0x1] }
  0xdb   : > { %v1814_v12 = vrot.slane %v1813_v9, 4  ;;  %v1675_v32 = vrot.slane %v1673_v21, 4  ;;  %v1678_v33 = vrot.slane %v1676_v22, 5  ;;  %v1972_v35 = vshll.u32 %v10155_v25, 16  ;;  %v10137_v0 = vld [vmem:[%s12882_s7 + $0x268] sm:$0xf] }
  0xdc   : > { %11538 = vmatpush3.bf16.msra.mxu1 %v12378_v61  ;;  %8647 = vmatprep.mubr.bf16.mxu1 %v10161_v5  ;;  %v1805_v14 = vsel %vm12893_vm2, %v1800_v10, %v1804_v63  ;;  %v1684_v36 = vrot.slane %v1682_v24, 5  ;;  %v1689_v37 = vrot.slane %v1687_v27, 4  ;;  %v1692_v38 = vrot.slane %v1690_v28, 5  ;;  %v10138_v1 = vld [vmem:[%s12882_s7 + $0x26c] sm:$0x1] }
  0xdd   : > { %11539 = vmatprep.subr.bf16.mxu1 %v12380_v8  ;;  %11500 = vmatpush3.bf16.msra.mxu0 %v12381_v11  ;;  %v1819_v16 = vsel %vm12893_vm2, %v1814_v12, %v1818_v7  ;;  %v1971_v40 = vrot.slane %v1969_v31, 4  ;;  %v1679_v41 = vor.u32 %v1678_v33, %v1675_v32  ;;  %v1974_v42 = vrot.slane %v1972_v35, 5  ;;  %v12384_v27 = vld [vmem:[%s12882_s7 + $0xa8] ss:$8 sps:$4 sm:$0xff]   ;;  %v10166_v33 = vld [vmem:[%s12882_s7 + $0x1ec] sm:$0x1] }
  0xde   : > { %v10141_v20 = vcombine.low %v1805_v14, %v1819_v16  ;;  %11565 = vmatprep.subr.bf16.mxu0 %v12386_v26  ;;  %v1978_v43 = vshll.u32 %v10156_v30, 16  ;;  %v1983_v44 = vshrl.u32 %v10157_v34, 16  ;;  %v1693_v46 = vor.u32 %v1692_v38, %v1689_v37  ;;  %v12383_v26 = vld [vmem:[%s12882_s7 + $0x8] ss:$8 sps:$4 sm:$0xff]   ;;  %v10164_v30 = vld [vmem:[%s12882_s7 + $0x1e4] sm:$0x1] }
  0xdf   : > { %v1698_v48 = vrot.slane %v1696_v29, 5  ;;  %v1986_v49 = vshll.u32 %v10157_v34, 16  ;;  %v1992_v50 = vshll.u32 %v10158_v39, 16  ;;  %v1680_v51 = vrot.slane %v1679_v41, 4  ;;  %v10163_v29 = vld [vmem:[%s12882_s7 + $0x1e0] sm:$0xe] }
  0xe0   : > { %11540 = vmatpush3.bf16.msra.mxu1 %v12382_v13  ;;  %v1975_v52 = vor.u32 %v1974_v42, %v1971_v40  ;;  %v1980_v53 = vrot.slane %v1978_v43, 5  ;;  %v1985_v54 = vrot.slane %v1983_v44, 4  ;;  %v1694_v56 = vrot.slane %v1693_v46, 4  ;;  %v10165_v31 = vld [vmem:[%s12882_s7 + $0x1e8] sm:$0xe]  ;;  %v12388_v38 = vld [vmem:[%s15253_s1 + $0x600] sm:$0xff]  }
  0xe1   : > { %8648 = vmatmul.mubr.bf16.gmra.mrb[72].mxu1 %v10141_v20  ;;  %11605 = vmatprep.subr.bf16.mxu1 %v12387_v45  ;;  %v1988_v57 = vrot.slane %v1986_v49, 5  ;;  %v1994_v58 = vrot.slane %v1992_v50, 5  ;;  %v1821_v61 = vshrl.u32 %v10135_v55, 16  ;;  %v1685_v62 = vsel %vm12893_vm2, %v1680_v51, %v1684_v36  ;;  %v12390_v40 = vld [vmem:[%s15253_s1 + $0x648] sm:$0xff]   ;;  %v12385_v43 = vld [vmem:[%s12882_s7 + $0x58] ss:$8 sps:$4 sm:$0xff]  }
  0xe2   : > { %v1976_v63 = vrot.slane %v1975_v52, 4  ;;  %v1824_v2 = vshll.u32 %v10135_v55, 16  ;;  %v1699_v3 = vsel %vm12893_vm2, %v1694_v56, %v1698_v48  ;;  %v1830_v6 = vshll.u32 %v10136_v60, 16  ;;  %v12389_v44 = vld [vmem:[%s15253_s1 + $0x680] sm:$0xff]   ;;  %v12392_v45 = vld [vmem:[%s15253_s1 + $0x608] sm:$0xff]  }
  0xe3   : > { %v1989_v4 = vor.u32 %v1988_v57, %v1985_v54  ;;  %v1823_v5 = vrot.slane %v1821_v61, 4  ;;  %v10122_v7 = vcombine.low %v1685_v62, %v1699_v3  ;;  %v1835_v9 = vshrl.u32 %v10137_v0, 16  ;;  %v12391_v46 = vld [vmem:[%s15253_s1 + $0x6c8] sm:$0xff]   ;;  %v12394_v48 = vld [vmem:[%s12882_s7 + $0x18] ss:$8 sps:$4 sm:$0xff]   ;;  %v12397_v62 = vld [vmem:[%s15253_s1 + $0x650] sm:$0xff]  }
  0xe4   : > { %v1826_v8 = vrot.slane %v1824_v2, 5  ;;  %v1981_v10 = vsel %vm12893_vm2, %v1976_v63, %v1980_v53  ;;  %v1838_v12 = vshll.u32 %v10137_v0, 16  ;;  %v1844_v13 = vshll.u32 %v10138_v1, 16  ;;  %v12393_v49 = vld [vmem:[%s15253_s1 + $0x688] sm:$0xff]   ;;  %v12395_v50 = vld [vmem:[%s12882_s7 + $0xb8] ss:$8 sps:$4 sm:$0xff]  }
  0xe5   : > { %v1990_v11 = vrot.slane %v1989_v4, 4  ;;  %8590 = vmatprep.mubr.bf16.mxu0 %v10122_v7  ;;  %v1837_v15 = vrot.slane %v1835_v9, 4  ;;  %v1832_v17 = vrot.slane %v1830_v6, 5  ;;  %v10179_v34 = vrot.slane %v10163_v29, 9  ;;  %v10167_v51 = vld [vmem:[%s12882_s7 + $0x1f0] sm:$0xe] }
  0xe6   : > { %v1827_v14 = vor.u32 %v1826_v8, %v1823_v5  ;;  %8591 = vmatmul.mubr.bf16.gmra.mrb[76].mxu0 %v12374_v59  ;;  %v1840_v18 = vrot.slane %v1838_v12, 5  ;;  %v1846_v21 = vrot.slane %v1844_v13, 5  ;;  %v2050_v35 = vrot.slane %v10164_v30, 5  ;;  %v10168_v52 = vld [vmem:[%s12882_s7 + $0x1f4] sm:$0x1]  ;;  %v12401_v8 = vld [vmem:[%s15253_s1 + $0x658] sm:$0xff]  }
  0xe7   : > { %v1995_v16 = vsel %vm12893_vm2, %v1990_v11, %v1994_v58  ;;  %8696 = vmatprep.mubr.bf16.mxu0 %v12383_v26  ;;  %v10180_v36 = vrot.slane %v10165_v31, 9  ;;  %v2054_v37 = vrot.slane %v10166_v33, 5  ;;  %v10169_v53 = vld [vmem:[%s12882_s7 + $0x1f8] sm:$0xe]  ;;  %v10170_v54 = vld [vmem:[%s12882_s7 + $0x1fc] sm:$0x1] }
  0xe8   : > { %v10162_v19 = vcombine.low %v1981_v10, %v1995_v16  ;;  %v1828_v20 = vrot.slane %v1827_v14, 4  ;;  %v1841_v22 = vor.u32 %v1840_v18, %v1837_v15  ;;  %v2051_v39 = vsel %vm13051_vm5, %v10179_v34, %v2050_v35  ;;  %v12396_v59 = vld [vmem:[%s12882_s7 + $0x68] ss:$8 sps:$4 sm:$0xff]   ;;  %v12402_v11 = vld [vmem:[%s15253_s1 + $0x6d8] sm:$0xff]   ;;  %v10174_v26 = vld [vmem:[%s12882_s7 + $0x20c] sm:$0x1] }
  0xe9   : > { %v2055_v41 = vsel %vm13051_vm5, %v10180_v36, %v2054_v37  ;;  %v10181_v55 = vrot.slane %v10167_v51, 9  ;;  %v2058_v56 = vrot.slane %v10168_v52, 5  ;;  %v10182_v57 = vrot.slane %v10169_v53, 9  ;;  %v12398_v1 = vld [vmem:[%s15253_s1 + $0x6d0] sm:$0xff]   ;;  %v12403_v13 = vld [vmem:[%s15253_s1 + $0x618] sm:$0xff]   ;;  %v12408_v35 = vld [vmem:[%s15253_s1 + $0x660] sm:$0xff]  }
  0xea   : > { %8655 = vmatprep.mubr.bf16.mxu1 %v10162_v19  ;;  %v1833_v24 = vsel %vm12893_vm2, %v1828_v20, %v1832_v17  ;;  %v1842_v25 = vrot.slane %v1841_v22, 4  ;;  %v10187_v42 = vcombine.low %v2051_v39, %v2055_v41  ;;  %v2062_v58 = vrot.slane %v10170_v54, 5  ;;  %v12399_v3 = vld [vmem:[%s15253_s1 + $0x610] sm:$0xff]   ;;  %v12404_v16 = vld [vmem:[%s15253_s1 + $0x698] sm:$0xff]   ;;  %v10171_v22 = vld [vmem:[%s12882_s7 + $0x200] sm:$0xe] }
  0xeb   : > { %v2059_v60 = vsel %vm13051_vm5, %v10181_v55, %v2058_v56  ;;  %v12400_v5 = vld [vmem:[%s15253_s1 + $0x690] sm:$0xff]   ;;  %v2070_v31 = vrot.slane %v10174_v26, 5  ;;  %v12414_v51 = vld [vmem:[%s15253_s1 + $0x628] sm:$0xff]  }
  0xec   : > { %v1847_v28 = vsel %vm12893_vm2, %v1842_v25, %v1846_v21  ;;  %v2063_v61 = vsel %vm13051_vm5, %v10182_v57, %v2062_v58  ;;  %v12405_v19 = vld [vmem:[%s12882_s7 + $0x28] ss:$8 sps:$4 sm:$0xff]   ;;  %v12416_v57 = vld [vmem:[%s12882_s7 + $0x38] ss:$8 sps:$4 sm:$0xff]  }
  0xed   : > { %v10142_v32 = vcombine.low %v1833_v24, %v1847_v28  ;;  %v10188_v0 = vcombine.low %v2059_v60, %v2063_v61  ;;  %v12406_v21 = vld [vmem:[%s12882_s7 + $0xc8] ss:$8 sps:$4 sm:$0xff]   ;;  %v10172_v24 = vld [vmem:[%s12882_s7 + $0x204] sm:$0x1]  ;;  %v10183_v28 = vrot.slane %v10171_v22, 9  ;;  %v12424_v22 = vld [vmem:[%s15253_s1 + $0x6f8] sm:$0xff]  }
  0xee   : > { %8697 = vmatmul.mubr.bf16.vlgmr.msra.gmra.mrb[80].mxu0 %v10187_v42  ;;  %v10173_v25 = vld [vmem:[%s12882_s7 + $0x208] sm:$0xe]  ;;  %v2066_v29 = vrot.slane %v10172_v24, 5  ;;  %v12411_v42 = vld [vmem:[%s15253_s1 + $0x6a0] sm:$0xff]   ;;  %v10175_v60 = vld [vmem:[%s12882_s7 + $0x210] sm:$0xe] }
  0xef   : > { %8656 = vmatmul.mubr.bf16.gmra.mrb[76].mxu1 %v10142_v32  ;;  %11566 = vmatpush3.bf16.msra.mxu0 %v12388_v38  ;;  %v10184_v30 = vrot.slane %v10173_v25, 9  ;;  %v12407_v32 = vld [vmem:[%s12882_s7 + $0x78] ss:$8 sps:$4 sm:$0xff]   ;;  %v12415_v54 = vld [vmem:[%s15253_s1 + $0x6a8] sm:$0xff]   ;;  %v10176_v61 = vld [vmem:[%s12882_s7 + $0x214] sm:$0x1] }
  0xf0   : > { %8761 = vmatprep.mubr.bf16.mxu1 %v12384_v27  ;;  %11567 = vmatprep.subr.bf16.mxu0 %v12390_v40  ;;  %v2067_v33 = vsel %vm13051_vm5, %v10183_v28, %v2066_v29  ;;  %v12409_v38 = vld [vmem:[%s15253_s1 + $0x6e0] sm:$0xff]   ;;  %v12425_v25 = vld [vmem:[%s15253_s1 + $0x638] sm:$0xff]  }
  0xf1   : > { %8704 = vmatprep.mubr.bf16.mxu0 %v12394_v48  ;;  %v2071_v34 = vsel %vm13051_vm5, %v10184_v30, %v2070_v31  ;;  %v12410_v40 = vld [vmem:[%s15253_s1 + $0x620] sm:$0xff]   ;;  %v12426_v29 = vld [vmem:[%s15253_s1 + $0x6b8] sm:$0xff]  }
  0xf2   : > { %v10189_v37 = vcombine.low %v2067_v33, %v2071_v34  ;;  %v10247_v30 = vld [vmem:[%s12882_s7 + $0x58] sm:$0xf]  ;;  %v10248_v33 = vld [vmem:[%s12882_s7 + $0x5c] sm:$0x1]  ;;  %v10249_v34 = vld [vmem:[%s12882_s7 + $0x60] sm:$0xf] }
  0xf3   : > { %11568 = vmatpush3.bf16.msra.mxu0 %v12392_v45  ;;  %v12412_v45 = vld [vmem:[%s15253_s1 + $0x668] sm:$0xff]  }
  0xf4   : > { %11569 = vmatprep.subr.bf16.mxu0 %v12397_v62  ;;  %v10177_v62 = vld [vmem:[%s12882_s7 + $0x218] sm:$0xe] }
  0xf6   : > { %8705 = vmatmul.mubr.bf16.gmra.mrb[84].mxu0 %v10188_v0 }
  0xf7   : > { %8762 = vmatmul.mubr.bf16.vlgmr.msra.gmra.mrb[80].mxu1 %v12385_v43  ;;  %11570 = vmatpush3.bf16.msra.mxu0 %v12399_v3  ;;  %v10186_v3 = vrot.slane %v10177_v62, 9  ;;  %v10228_v62 = vld [vmem:[%s12882_s7 + $0xc] sm:$0x1] }
  0xf8   : > { %11606 = vmatpush3.bf16.msra.mxu1 %v12389_v44  ;;  %8769 = vmatprep.mubr.bf16.mxu1 %v12395_v50 }
  0xf9   : > { %11607 = vmatprep.subr.bf16.mxu1 %v12391_v46  ;;  %11571 = vmatprep.subr.bf16.mxu0 %v12401_v8  ;;  %v12419_v8 = vld [vmem:[%s15253_s1 + $0x670] sm:$0xff]  }
  0xfa   : > { %8712 = vmatprep.mubr.bf16.mxu0 %v12405_v19  ;;  %v12423_v19 = vld [vmem:[%s15253_s1 + $0x678] sm:$0xff]  }
  0xfb   : > { %11572 = vmatpush3.bf16.msra.mxu0 %v12403_v13  ;;  %v12421_v13 = vld [vmem:[%s15253_s1 + $0x630] sm:$0xff]  }
  0xfc   : > { %11608 = vmatpush3.bf16.msra.mxu1 %v12393_v49  ;;  %11573 = vmatprep.subr.bf16.mxu0 %v12408_v35  ;;  %v12413_v49 = vld [vmem:[%s15253_s1 + $0x6e8] sm:$0xff]   ;;  %v10250_v35 = vld [vmem:[%s12882_s7 + $0x64] sm:$0x1] }
  0xfd   : > { %11609 = vmatprep.subr.bf16.mxu1 %v12398_v1  ;;  %v10185_v1 = vrot.slane %v10175_v60, 9 }
  0xfe   : > { %8713 = vmatmul.mubr.bf16.gmra.mrb[88].mxu0 %v10189_v37  ;;  %v2383_v37 = vshrl.u32 %v10247_v30, 16 }
  0xff   : > { %8770 = vmatmul.mubr.bf16.gmra.mrb[84].mxu1 %v12396_v59  ;;  %11574 = vmatpush3.bf16.msra.mxu0 %v12410_v40  ;;  %v12417_v59 = vld [vmem:[%s12882_s7 + $0xd8] ss:$8 sps:$4 sm:$0xff]   ;;  %v2397_v40 = vshrl.u32 %v10249_v34, 16 }
 0x100   : > { %11610 = vmatpush3.bf16.msra.mxu1 %v12400_v5  ;;  %8777 = vmatprep.mubr.bf16.mxu1 %v12406_v21  ;;  %v12418_v5 = vld [vmem:[%s12882_s7 + $0x88] ss:$8 sps:$4 sm:$0xff]  }
 0x101   : > { %11611 = vmatprep.subr.bf16.mxu1 %v12402_v11  ;;  %11575 = vmatprep.subr.bf16.mxu0 %v12412_v45  ;;  %v12420_v11 = vld [vmem:[%s15253_s1 + $0x6f0] sm:$0xff]  }
 0x102   : > { %8720 = vmatprep.mubr.bf16.mxu0 %v12416_v57  ;;  %v10289_v45 = vld [vmem:[%s12882_s7 + $0x10] sm:$0xe] }
 0x103   : > { %v11101_v63 = vpop.f32.mrb[0].mxu0  ;;  %11576 = vmatpush3.bf16.msra.mxu0 %v12414_v51  ;;  %v2399_v51 = vrot.slane %v2397_v40, 4  ;;  %v10304_v60 = vrot.slane %v10289_v45, 9 }
 0x104   : > { %v11141_v2 = vpop.f32.mrb[0].mxu1  ;;  %v11102_v4 = vpop.f32.mrb[1].mxu0  ;;  %11612 = vmatpush3.bf16.msra.mxu1 %v12404_v16  ;;  %11577 = vmatprep.subr.bf16.mxu0 %v12419_v8  ;;  %v12422_v16 = vld [vmem:[%s15253_s1 + $0x6b0] sm:$0xff]  }
 0x105   : > { %v11103_v6 = vadd.f32 %v11102_v4, %v11101_v63  ;;  %v11142_v7 = vpop.f32.mrb[1].mxu1  ;;  %v11104_v10 = vpop.f32.mrb[2].mxu0  ;;  %11613 = vmatprep.subr.bf16.mxu1 %v12409_v38  ;;  %v10178_v63 = vld [vmem:[%s12882_s7 + $0x21c] sm:$0x1]  ;;  %v2386_v38 = vshll.u32 %v10247_v30, 16 }
 0x106   : > { %v11143_v9 = vadd.f32 %v11142_v7, %v11141_v2  ;;  %v11144_v12 = vpop.f32.mrb[2].mxu1  ;;  %v11105_v15 = vpop.f32.mrb[3].mxu0  ;;  %v2074_v2 = vrot.slane %v10176_v61, 5  ;;  %v2078_v4 = vrot.slane %v10178_v63, 5  ;;  %v10229_v63 = vld [vmem:[%s12882_s7 + $0x10] sm:$0xf] }
 0x107   : > { %v11106_v17 = vadd.f32 %v11105_v15, %v11104_v10  ;;  %v11145_v18 = vpop.f32.mrb[3].mxu1  ;;  %8778 = vmatmul.mubr.bf16.gmra.mrb[88].mxu1 %v12407_v32  ;;  %11578 = vmatpush3.bf16.msra.mxu0 %v12421_v13 }
 0x108   : > { %v13832_v14 = vadd.f32 %v11143_v9, %v11103_v6  ;;  %v11146_v20 = vadd.f32 %v11145_v18, %v11144_v12  ;;  %11614 = vmatpush3.bf16.msra.mxu1 %v12411_v42  ;;  %8785 = vmatprep.mubr.bf16.mxu1 %v12417_v59  ;;  %v2075_v6 = vsel %vm13051_vm5, %v10185_v1, %v2074_v2  ;;  %v2400_v42 = vshll.u32 %v10249_v34, 16 }
 0x109   : > { %11615 = vmatprep.subr.bf16.mxu1 %v12413_v49  ;;  %v2079_v7 = vsel %vm13051_vm5, %v10186_v3, %v2078_v4  ;;  %11579 = vmatprep.subr.bf16.mxu0 %v12423_v19  ;;  %v2388_v49 = vrot.slane %v2386_v38, 5  ;;  %v10230_v3 = vld [vmem:[%s12882_s7 + $0x14] sm:$0x1]  ;;  %v12428_v19 = vld [vmem:[%s15253_s1 + $0x7c0] sm:$0xff]  }
 0x10a   : > { %v13843_v27 = vadd.f32 %v11146_v20, %v11106_v17  ;;  %v10190_v10 = vcombine.low %v2075_v6, %v2079_v7  ;;  %v10267_v6 = vld [vmem:[%s12882_s7 + $0xa8] sm:$0xf]  ;;  %v2258_v30 = vshll.u32 %v10230_v3, 16  ;;  %v10253_v3 = vld [vmem:[%s12882_s7 + $0x70] sm:$0xf] }
 0x10b   : > { %v11107_v36 = vpop.f32.mrb[4].mxu0  ;;  %11580 = vmatpush3.bf16.msra.mxu0 %v12425_v25  ;;  %v10270_v25 = vld [vmem:[%s12882_s7 + $0xb4] sm:$0x1]  ;;  %v2534_v34 = vshll.u32 %v10267_v6, 16 }
 0x10c   : > { %v11147_v39 = vpop.f32.mrb[4].mxu1  ;;  %v11108_v41 = vpop.f32.mrb[5].mxu0  ;;  %11616 = vmatpush3.bf16.msra.mxu1 %v12415_v54  ;;  %8721 = vmatmul.mubr.bf16.gmra.mrb[92].mxu0 %v10190_v10  ;;  %v2402_v54 = vrot.slane %v2400_v42, 5  ;;  %v2249_v10 = vshrl.u32 %v10229_v63, 16  ;;  %v2554_v45 = vshll.u32 %v10270_v25, 16 }
 0x10d   : > { %v11109_v43 = vadd.f32 %v11108_v41, %v11107_v36  ;;  %v11148_v44 = vpop.f32.mrb[5].mxu1  ;;  %v11110_v48 = vpop.f32.mrb[6].mxu0  ;;  %11617 = vmatprep.subr.bf16.mxu1 %v12420_v11  ;;  %v10287_v41 = vld [vmem:[%s12882_s7 + $0x8] sm:$0xe]  ;;  %v10268_v11 = vld [vmem:[%s12882_s7 + $0xac] sm:$0x1] }
 0x10e   : > { %v11149_v46 = vadd.f32 %v11148_v44, %v11147_v39  ;;  %v11150_v50 = vpop.f32.mrb[6].mxu1  ;;  %v11111_v53 = vpop.f32.mrb[7].mxu0  ;;  %v2392_v39 = vshll.u32 %v10248_v33, 16  ;;  %v10288_v44 = vld [vmem:[%s12882_s7 + $0xc] sm:$0x1]  ;;  %v2403_v1 = vor.u32 %v2402_v54, %v2399_v51 }
 0x10f   : > { %v11112_v55 = vadd.f32 %v11111_v53, %v11110_v48  ;;  %v11151_v56 = vpop.f32.mrb[7].mxu1  ;;  %8786 = vmatmul.mubr.bf16.gmra.mrb[92].mxu1 %v12418_v5  ;;  %v2385_v48 = vrot.slane %v2383_v37, 4  ;;  %v10290_v53 = vld [vmem:[%s12882_s7 + $0x14] sm:$0x1]  ;;  %v2696_v57 = vrot.slane %v10288_v44, 5  ;;  %v2260_v37 = vrot.slane %v2258_v30, 5 }
 0x110   : > { %v13871_v52 = vadd.f32 %v11149_v46, %v11109_v43  ;;  %v11152_v58 = vadd.f32 %v11151_v56, %v11150_v50  ;;  %11618 = vmatpush3.bf16.msra.mxu1 %v12422_v16  ;;  %v2406_v43 = vshll.u32 %v10250_v35, 16  ;;  %v2394_v50 = vrot.slane %v2392_v39, 5  ;;  %v12431_v54 = vld [vmem:[%s15253_s1 + $0x748] sm:$0xff]   ;;  %v10293_v25 = vld [vmem:[%s12882_s7 + $0x20] sm:$0xe] }
 0x111   : > { %11619 = vmatprep.subr.bf16.mxu1 %v12424_v22  ;;  %v10303_v56 = vrot.slane %v10287_v41, 9  ;;  %v2389_v59 = vor.u32 %v2388_v49, %v2385_v48  ;;  %v2700_v61 = vrot.slane %v10290_v53, 5  ;;  %v2404_v13 = vrot.slane %v2403_v1, 4  ;;  %v12429_v53 = vld [vmem:[%s15253_s1 + $0x700] sm:$0xff]   ;;  %v10252_v1 = vld [vmem:[%s12882_s7 + $0x6c] sm:$0x1] }
 0x112   : > { %v13882_v0 = vadd.f32 %v11152_v58, %v11112_v55  ;;  %v2408_v55 = vrot.slane %v2406_v43, 5  ;;  %v10227_v58 = vld [vmem:[%s12882_s7 + $0x8] sm:$0xf]  ;;  %v2251_v22 = vrot.slane %v2249_v10, 4  ;;  %v2540_v35 = vshll.u32 %v10268_v11, 16 }
 0x113   : > { %v11113_v9 = vpop.f32.mrb[8].mxu0  ;;  %v2697_v2 = vsel %vm13051_vm5, %v10303_v56, %v2696_v57  ;;  %v2235_v4 = vshrl.u32 %v10227_v58, 16  ;;  %v2238_v5 = vshll.u32 %v10227_v58, 16  ;;  %v2390_v7 = vrot.slane %v2389_v59, 4 }
 0x114   : > { %v11153_v12 = vpop.f32.mrb[8].mxu1  ;;  %v11114_v15 = vpop.f32.mrb[9].mxu0  ;;  %11620 = vmatpush3.bf16.msra.mxu1 %v12426_v29  ;;  %v2701_v8 = vsel %vm13051_vm5, %v10304_v60, %v2700_v61  ;;  %v2536_v41 = vrot.slane %v2534_v34, 5  ;;  %v2542_v42 = vrot.slane %v2540_v35, 5  ;;  %v2556_v58 = vrot.slane %v2554_v45, 5  ;;  %v12436_v34 = vld [vmem:[%s15253_s1 + $0x7d0] sm:$0xff]  }
 0x115   : > { %v11115_v17 = vadd.f32 %v11114_v15, %v11113_v9  ;;  %v11154_v18 = vpop.f32.mrb[9].mxu1  ;;  %v11116_v21 = vpop.f32.mrb[10].mxu0  ;;  %v2244_v9 = vshll.u32 %v10228_v62, 16  ;;  %v10311_v15 = vcombine.low %v2697_v2, %v2701_v8  ;;  %v2237_v16 = vrot.slane %v2235_v4, 4  ;;  %11685 = vmatprep.subr.bf16.mxu1 %v12428_v19  ;;  %v12430_v62 = vld [vmem:[%s15253_s1 + $0x780] sm:$0xff]   ;;  %v12432_v2 = vld [vmem:[%s15253_s1 + $0x7c8] sm:$0xff]  }
 0x116   : > { %v11155_v20 = vadd.f32 %v11154_v18, %v11153_v12  ;;  %v11156_v24 = vpop.f32.mrb[10].mxu1  ;;  %v11117_v28 = vpop.f32.mrb[11].mxu0  ;;  %v12427_v12 = vld [vmem:[%s15253_s1 + $0x740] sm:$0xff]   ;;  %v10269_v18 = vld [vmem:[%s12882_s7 + $0xb0] sm:$0xf]  ;;  %v12433_v8 = vld [vmem:[%s15253_s1 + $0x708] sm:$0xff]  }
 0x117   : > { %v11118_v31 = vadd.f32 %v11117_v28, %v11116_v21  ;;  %v11157_v32 = vpop.f32.mrb[11].mxu1  ;;  %v2246_v21 = vrot.slane %v2244_v9, 5  ;;  %11645 = vmatprep.subr.bf16.mxu0 %v12427_v12  ;;  %v2409_v28 = vsel %vm12893_vm2, %v2404_v13, %v2408_v55  ;;  %8891 = vmatprep.mubr.bf16.mxu1 %v10311_v15  ;;  %v2545_v39 = vshrl.u32 %v10269_v18, 16  ;;  %v10254_v4 = vld [vmem:[%s12882_s7 + $0x74] sm:$0x1] }
 0x118   : > { %v13910_v26 = vadd.f32 %v11155_v20, %v11115_v17  ;;  %v11158_v36 = vadd.f32 %v11157_v32, %v11156_v24  ;;  %v2240_v17 = vrot.slane %v2238_v5, 5  ;;  %v2395_v20 = vsel %vm12893_vm2, %v2390_v7, %v2394_v50  ;;  %v10291_v12 = vld [vmem:[%s12882_s7 + $0x18] sm:$0xe]  ;;  %v12435_v19 = vld [vmem:[%s15253_s1 + $0x750] sm:$0xff]  }
 0x119   : > { %v2252_v24 = vshll.u32 %v10229_v63, 16  ;;  %v10263_v32 = vcombine.low %v2395_v20, %v2409_v28  ;;  %v2548_v43 = vshll.u32 %v10269_v18, 16  ;;  %v2547_v44 = vrot.slane %v2545_v39, 4  ;;  %v10251_v63 = vld [vmem:[%s12882_s7 + $0x68] sm:$0xf]  ;;  %v12437_v39 = vld [vmem:[%s15253_s1 + $0x710] sm:$0xff]  }
 0x11a   : > { %v13922_v46 = vadd.f32 %v11158_v36, %v11118_v31  ;;  %v2241_v29 = vor.u32 %v2240_v17, %v2237_v16  ;;  %v2531_v31 = vshrl.u32 %v10267_v6, 16  ;;  %v2411_v5 = vshrl.u32 %v10251_v63, 16  ;;  %v10292_v18 = vld [vmem:[%s12882_s7 + $0x1c] sm:$0x1]  ;;  %v12434_v20 = vld [vmem:[%s15253_s1 + $0x788] sm:$0xff]  }
 0x11b   : > { %v2254_v33 = vrot.slane %v2252_v24, 5  ;;  %8826 = vmatprep.mubr.bf16.mxu0 %v10263_v32  ;;  %v2550_v51 = vrot.slane %v2548_v43, 5  ;;  %v2414_v6 = vshll.u32 %v10251_v63, 16  ;;  %v2420_v9 = vshll.u32 %v10252_v1, 16  ;;  %v10234_v43 = vld [vmem:[%s12882_s7 + $0x24] sm:$0x1] }
 0x11c   : > { %v2242_v36 = vrot.slane %v2241_v29, 4  ;;  %v2533_v38 = vrot.slane %v2531_v31, 4  ;;  %v2425_v10 = vshrl.u32 %v10253_v3, 16  ;;  %v2428_v11 = vshll.u32 %v10253_v3, 16  ;;  %v10294_v31 = vld [vmem:[%s12882_s7 + $0x24] sm:$0x1] }
 0x11d   : > { %v2255_v40 = vor.u32 %v2254_v33, %v2251_v22  ;;  %v2551_v57 = vor.u32 %v2550_v51, %v2547_v44  ;;  %v2413_v15 = vrot.slane %v2411_v5, 4  ;;  %v2416_v16 = vrot.slane %v2414_v6, 5  ;;  %v10271_v51 = vld [vmem:[%s12882_s7 + $0xb8] sm:$0xf] }
 0x11e   : > { %v2247_v48 = vsel %vm12893_vm2, %v2242_v36, %v2246_v21  ;;  %v2537_v50 = vor.u32 %v2536_v41, %v2533_v38  ;;  %v2434_v17 = vshll.u32 %v10254_v4, 16  ;;  %v2422_v21 = vrot.slane %v2420_v9, 5  ;;  %v10232_v38 = vld [vmem:[%s12882_s7 + $0x1c] sm:$0x1] }
 0x11f   : > { %v2256_v49 = vrot.slane %v2255_v40, 4  ;;  %v2552_v61 = vrot.slane %v2551_v57, 4  ;;  %v2427_v22 = vrot.slane %v2425_v10, 4  ;;  %v2430_v24 = vrot.slane %v2428_v11, 5  ;;  %v12440_v3 = vld [vmem:[%s15253_s1 + $0x7d8] sm:$0xff]  }
 0x120   : > { %v2538_v56 = vrot.slane %v2537_v50, 4  ;;  %v10305_v28 = vrot.slane %v10291_v12, 9  ;;  %v2417_v29 = vor.u32 %v2416_v16, %v2413_v15  ;;  %v2436_v30 = vrot.slane %v2434_v17, 5 }
 0x121   : > { %v2261_v55 = vsel %vm12893_vm2, %v2256_v49, %v2260_v37  ;;  %v2557_v7 = vsel %vm12893_vm2, %v2552_v61, %v2556_v58  ;;  %v2704_v32 = vrot.slane %v10292_v18, 5  ;;  %v10306_v33 = vrot.slane %v10293_v25, 9  ;;  %v10231_v37 = vld [vmem:[%s12882_s7 + $0x18] sm:$0xf] }
 0x122   : > { %v10243_v59 = vcombine.low %v2247_v48, %v2261_v55  ;;  %v2543_v60 = vsel %vm12893_vm2, %v2538_v56, %v2542_v42  ;;  %v2431_v35 = vor.u32 %v2430_v24, %v2427_v22  ;;  %v2708_v36 = vrot.slane %v10294_v31, 5  ;;  %v10233_v42 = vld [vmem:[%s12882_s7 + $0x20] sm:$0xf] }
 0x123   : > { %v10283_v13 = vcombine.low %v2543_v60, %v2557_v7  ;;  %v2418_v40 = vrot.slane %v2417_v29, 4  ;;  %v2705_v41 = vsel %vm13051_vm5, %v10305_v28, %v2704_v32  ;;  %v2263_v44 = vshrl.u32 %v10231_v37, 16  ;;  %v10273_v60 = vld [vmem:[%s12882_s7 + $0xc0] sm:$0xf] }
 0x124   : > { %8827 = vmatmul.mubr.bf16.vlgmr.msra.gmra.mrb[96].mxu0 %v10243_v59  ;;  %v2432_v45 = vrot.slane %v2431_v35, 4  ;;  %v2709_v48 = vsel %vm13051_vm5, %v10306_v33, %v2708_v36  ;;  %v2266_v49 = vshll.u32 %v10231_v37, 16  ;;  %v2272_v50 = vshll.u32 %v10232_v38, 16  ;;  %v10272_v59 = vld [vmem:[%s12882_s7 + $0xbc] sm:$0x1]  ;;  %v12443_v24 = vld [vmem:[%s15253_s1 + $0x760] sm:$0xff]  }
 0x125   : > { %11646 = vmatpush3.bf16.msra.mxu0 %v12429_v53  ;;  %8892 = vmatmul.mubr.bf16.vlgmr.msra.gmra.mrb[96].mxu1 %v10283_v13  ;;  %v12438_v53 = vld [vmem:[%s15253_s1 + $0x790] sm:$0xff]   ;;  %v2423_v55 = vsel %vm12893_vm2, %v2418_v40, %v2422_v21  ;;  %v10312_v56 = vcombine.low %v2705_v41, %v2709_v48  ;;  %v2265_v57 = vrot.slane %v2263_v44, 4  ;;  %v2277_v58 = vshrl.u32 %v10233_v42, 16  ;;  %v12442_v13 = vld [vmem:[%s15253_s1 + $0x798] sm:$0xff]   ;;  %v12446_v37 = vld [vmem:[%s15253_s1 + $0x7a0] sm:$0xff]  }
 0x126   : > { %11647 = vmatprep.subr.bf16.mxu0 %v12431_v54  ;;  %11686 = vmatpush3.bf16.msra.mxu1 %v12430_v62  ;;  %v12439_v54 = vld [vmem:[%s15253_s1 + $0x758] sm:$0xff]   ;;  %v2437_v61 = vsel %vm12893_vm2, %v2432_v45, %v2436_v30  ;;  %v2268_v62 = vrot.slane %v2266_v49, 5  ;;  %v2274_v63 = vrot.slane %v2272_v50, 5  ;;  %v2280_v1 = vshll.u32 %v10233_v42, 16  ;;  %v12444_v30 = vld [vmem:[%s15253_s1 + $0x7e0] sm:$0xff]   ;;  %v12447_v40 = vld [vmem:[%s15253_s1 + $0x768] sm:$0xff]  }
 0x127   : > { %11687 = vmatprep.subr.bf16.mxu1 %v12432_v2  ;;  %v10274_v2 = vld [vmem:[%s12882_s7 + $0xc4] sm:$0x1]  ;;  %v10264_v4 = vcombine.low %v2423_v55, %v2437_v61  ;;  %8899 = vmatprep.mubr.bf16.mxu1 %v10312_v56  ;;  %v2279_v5 = vrot.slane %v2277_v58, 4  ;;  %v2286_v6 = vshll.u32 %v10234_v43, 16  ;;  %v2559_v7 = vshrl.u32 %v10271_v51, 16  ;;  %v12448_v43 = vld [vmem:[%s15253_s1 + $0x7e8] sm:$0xff]  }
 0x128   : > { %v2269_v9 = vor.u32 %v2268_v62, %v2265_v57  ;;  %v2282_v10 = vrot.slane %v2280_v1, 5  ;;  %v2562_v11 = vshll.u32 %v10271_v51, 16  ;;  %v2568_v12 = vshll.u32 %v10272_v59, 16  ;;  %v10255_v48 = vld [vmem:[%s12882_s7 + $0x78] sm:$0xf]  ;;  %v12449_v57 = vld [vmem:[%s15253_s1 + $0x728] sm:$0xff]  }
 0x129   : > { %11648 = vmatpush3.bf16.msra.mxu0 %v12433_v8  ;;  %v12441_v8 = vld [vmem:[%s15253_s1 + $0x718] sm:$0xff]   ;;  %8834 = vmatprep.mubr.bf16.mxu0 %v10264_v4  ;;  %v2288_v15 = vrot.slane %v2286_v6, 5  ;;  %v2561_v16 = vrot.slane %v2559_v7, 4  ;;  %v2573_v17 = vshrl.u32 %v10273_v60, 16  ;;  %v2576_v18 = vshll.u32 %v10273_v60, 16  ;;  %v12450_v62 = vld [vmem:[%s15253_s1 + $0x7a8] sm:$0xff]  }
 0x12a   : > { %11649 = vmatprep.subr.bf16.mxu0 %v12435_v19  ;;  %11688 = vmatpush3.bf16.msra.mxu1 %v12434_v20  ;;  %v2270_v19 = vrot.slane %v2269_v9, 4  ;;  %v2283_v20 = vor.u32 %v2282_v10, %v2279_v5  ;;  %v2564_v21 = vrot.slane %v2562_v11, 5  ;;  %v2570_v22 = vrot.slane %v2568_v12, 5  ;;  %v10256_v49 = vld [vmem:[%s12882_s7 + $0x7c] sm:$0x1] }
 0x12b   : > { %11689 = vmatprep.subr.bf16.mxu1 %v12436_v34  ;;  %v2575_v25 = vrot.slane %v2573_v17, 4  ;;  %v2578_v28 = vrot.slane %v2576_v18, 5  ;;  %v2582_v29 = vshll.u32 %v10274_v2, 16  ;;  %v12445_v34 = vld [vmem:[%s15253_s1 + $0x720] sm:$0xff]   ;;  %v2442_v55 = vshll.u32 %v10255_v48, 16 }
 0x12c   : > { %v2275_v31 = vsel %vm12893_vm2, %v2270_v19, %v2274_v63  ;;  %v2284_v32 = vrot.slane %v2283_v20, 4  ;;  %v2565_v33 = vor.u32 %v2564_v21, %v2561_v16  ;;  %v10257_v50 = vld [vmem:[%s12882_s7 + $0x80] sm:$0xf]  ;;  %v2448_v56 = vshll.u32 %v10256_v49, 16  ;;  %v10295_v61 = vld [vmem:[%s12882_s7 + $0x28] sm:$0xe] }
 0x12d   : > { %11650 = vmatpush3.bf16.msra.mxu0 %v12437_v39  ;;  %v2579_v35 = vor.u32 %v2578_v28, %v2575_v25  ;;  %v2584_v36 = vrot.slane %v2582_v29, 5  ;;  %v2453_v58 = vshrl.u32 %v10257_v50, 16  ;;  %v2456_v59 = vshll.u32 %v10257_v50, 16  ;;  %v10298_v11 = vld [vmem:[%s12882_s7 + $0x34] sm:$0x1] }
 0x12e   : > { %11651 = vmatprep.subr.bf16.mxu0 %v12439_v54  ;;  %11690 = vmatpush3.bf16.msra.mxu1 %v12438_v53  ;;  %v2289_v38 = vsel %vm12893_vm2, %v2284_v32, %v2288_v15  ;;  %v2566_v39 = vrot.slane %v2565_v33, 4  ;;  %v10258_v53 = vld [vmem:[%s12882_s7 + $0x84] sm:$0x1]  ;;  %v2439_v54 = vshrl.u32 %v10255_v48, 16  ;;  %v2444_v1 = vrot.slane %v2442_v55, 5  ;;  %v12451_v15 = vld [vmem:[%s15253_s1 + $0x770] sm:$0xff]  }
 0x12f   : > { %11691 = vmatprep.subr.bf16.mxu1 %v12440_v3  ;;  %v10244_v41 = vcombine.low %v2275_v31, %v2289_v38  ;;  %v2580_v42 = vrot.slane %v2579_v35, 4  ;;  %v2462_v60 = vshll.u32 %v10258_v53, 16  ;;  %v2450_v2 = vrot.slane %v2448_v56, 5  ;;  %v10296_v3 = vld [vmem:[%s12882_s7 + $0x2c] sm:$0x1]  ;;  %v12452_v35 = vld [vmem:[%s15253_s1 + $0x7f0] sm:$0xff]  }
 0x130   : > { %v2571_v44 = vsel %vm12893_vm2, %v2566_v39, %v2570_v22  ;;  %v2441_v63 = vrot.slane %v2439_v54, 4  ;;  %v10307_v4 = vrot.slane %v10295_v61, 9  ;;  %v2455_v5 = vrot.slane %v2453_v58, 4  ;;  %v10236_v19 = vld [vmem:[%s12882_s7 + $0x2c] sm:$0x1]  ;;  %v12453_v49 = vld [vmem:[%s15253_s1 + $0x730] sm:$0xff]  }
 0x131   : > { %11652 = vmatpush3.bf16.msra.mxu0 %v12441_v8  ;;  %v2585_v45 = vsel %vm12893_vm2, %v2580_v42, %v2584_v36  ;;  %v2458_v6 = vrot.slane %v2456_v59, 5  ;;  %v2464_v7 = vrot.slane %v2462_v60, 5  ;;  %v10297_v8 = vld [vmem:[%s12882_s7 + $0x30] sm:$0xe]  ;;  %v2712_v9 = vrot.slane %v10296_v3, 5 }
 0x132   : > { %11653 = vmatprep.subr.bf16.mxu0 %v12443_v24  ;;  %11692 = vmatpush3.bf16.msra.mxu1 %v12442_v13  ;;  %v10284_v51 = vcombine.low %v2571_v44, %v2585_v45  ;;  %v2445_v10 = vor.u32 %v2444_v1, %v2441_v63  ;;  %v10308_v12 = vrot.slane %v10297_v8, 9  ;;  %v10235_v13 = vld [vmem:[%s12882_s7 + $0x28] sm:$0xf]  ;;  %v2716_v18 = vrot.slane %v10298_v11, 5  ;;  %v10237_v20 = vld [vmem:[%s12882_s7 + $0x30] sm:$0xf] }
 0x133   : > { %11693 = vmatprep.subr.bf16.mxu1 %v12444_v30  ;;  %8835 = vmatmul.mubr.bf16.gmra.mrb[100].mxu0 %v10244_v41  ;;  %v2459_v16 = vor.u32 %v2458_v6, %v2455_v5  ;;  %v2713_v17 = vsel %vm13051_vm5, %v10307_v4, %v2712_v9  ;;  %v2291_v21 = vshrl.u32 %v10235_v13, 16  ;;  %v10238_v24 = vld [vmem:[%s12882_s7 + $0x34] sm:$0x1]  ;;  %v2294_v25 = vshll.u32 %v10235_v13, 16  ;;  %v10277_v41 = vld [vmem:[%s12882_s7 + $0xd0] sm:$0xf] }
 0x134   : > { %8900 = vmatmul.mubr.bf16.gmra.mrb[100].mxu1 %v10284_v51  ;;  %v2446_v22 = vrot.slane %v2445_v10, 4  ;;  %v2300_v28 = vshll.u32 %v10236_v19, 16  ;;  %v2305_v29 = vshrl.u32 %v10237_v20, 16  ;;  %v2717_v31 = vsel %vm13051_vm5, %v10308_v12, %v2716_v18  ;;  %v10278_v48 = vld [vmem:[%s12882_s7 + $0xd4] sm:$0x1]  ;;  %v12455_v8 = vld [vmem:[%s15253_s1 + $0x778] sm:$0xff]  }
 0x135   : > { %11654 = vmatpush3.bf16.msra.mxu0 %v12445_v34  ;;  %v2460_v30 = vrot.slane %v2459_v16, 4  ;;  %v2293_v32 = vrot.slane %v2291_v21, 4  ;;  %v2308_v33 = vshll.u32 %v10237_v20, 16  ;;  %v10275_v34 = vld [vmem:[%s12882_s7 + $0xc8] sm:$0xf]  ;;  %v2296_v38 = vrot.slane %v2294_v25, 5 }
 0x136   : > { %11655 = vmatprep.subr.bf16.mxu0 %v12447_v40  ;;  %11694 = vmatpush3.bf16.msra.mxu1 %v12446_v37  ;;  %v2451_v36 = vsel %vm12893_vm2, %v2446_v22, %v2450_v2  ;;  %v10313_v37 = vcombine.low %v2713_v17, %v2717_v31  ;;  %v2302_v39 = vrot.slane %v2300_v28, 5  ;;  %v10276_v40 = vld [vmem:[%s12882_s7 + $0xcc] sm:$0x1]  ;;  %v2314_v45 = vshll.u32 %v10238_v24, 16  ;;  %v12454_v59 = vld [vmem:[%s15253_s1 + $0x7b0] sm:$0xff]   ;;  %v12456_v11 = vld [vmem:[%s15253_s1 + $0x7f8] sm:$0xff]  }
 0x137   : > { %11695 = vmatprep.subr.bf16.mxu1 %v12448_v43  ;;  %v2465_v42 = vsel %vm12893_vm2, %v2460_v30, %v2464_v7  ;;  %v2307_v43 = vrot.slane %v2305_v29, 4  ;;  %v2310_v44 = vrot.slane %v2308_v33, 5  ;;  %v2297_v51 = vor.u32 %v2296_v38, %v2293_v32  ;;  %v12457_v16 = vld [vmem:[%s15253_s1 + $0x738] sm:$0xff]   ;;  %v10259_v20 = vld [vmem:[%s12882_s7 + $0x88] sm:$0xf]  ;;  %v12462_v31 = vld [vmem:[%s15253_s1 + $0x840] sm:$0xff]  }
 0x138   : > { %v10265_v50 = vcombine.low %v2451_v36, %v2465_v42  ;;  %8907 = vmatprep.mubr.bf16.mxu1 %v10313_v37  ;;  %v2587_v53 = vshrl.u32 %v10275_v34, 16  ;;  %v2590_v54 = vshll.u32 %v10275_v34, 16  ;;  %v2316_v56 = vrot.slane %v2314_v45, 5  ;;  %v12458_v19 = vld [vmem:[%s15253_s1 + $0x7b8] sm:$0xff]   ;;  %v10260_v21 = vld [vmem:[%s12882_s7 + $0x8c] sm:$0x1] }
 0x139   : > { %11656 = vmatpush3.bf16.msra.mxu0 %v12449_v57  ;;  %v2311_v55 = vor.u32 %v2310_v44, %v2307_v43  ;;  %v2596_v57 = vshll.u32 %v10276_v40, 16  ;;  %v2601_v58 = vshrl.u32 %v10277_v41, 16  ;;  %v2298_v60 = vrot.slane %v2297_v51, 4  ;;  %v10261_v22 = vld [vmem:[%s12882_s7 + $0x90] sm:$0xf]  ;;  %v12463_v37 = vld [vmem:[%s15253_s1 + $0x8c0] sm:$0xff]  }
 0x13a   : > { %11696 = vmatpush3.bf16.msra.mxu1 %v12450_v62  ;;  %11657 = vmatprep.subr.bf16.mxu0 %v12451_v15  ;;  %v2589_v61 = vrot.slane %v2587_v53, 4  ;;  %v2592_v62 = vrot.slane %v2590_v54, 5  ;;  %v2604_v63 = vshll.u32 %v10277_v41, 16  ;;  %v2610_v4 = vshll.u32 %v10278_v48, 16  ;;  %v10262_v25 = vld [vmem:[%s12882_s7 + $0x94] sm:$0x1] }
 0x13b   : > { %11697 = vmatprep.subr.bf16.mxu1 %v12452_v35  ;;  %8842 = vmatprep.mubr.bf16.mxu0 %v10265_v50  ;;  %v2312_v1 = vrot.slane %v2311_v55, 4  ;;  %v2598_v2 = vrot.slane %v2596_v57, 5  ;;  %v2603_v3 = vrot.slane %v2601_v58, 4  ;;  %v2303_v5 = vsel %vm12893_vm2, %v2298_v60, %v2302_v39  ;;  %v10299_v36 = vld [vmem:[%s12882_s7 + $0x38] sm:$0xe] }
 0x13c   : > { %v2593_v6 = vor.u32 %v2592_v62, %v2589_v61  ;;  %v2606_v7 = vrot.slane %v2604_v63, 5  ;;  %v2612_v10 = vrot.slane %v2610_v4, 5  ;;  %v2467_v28 = vshrl.u32 %v10259_v20, 16  ;;  %v10300_v40 = vld [vmem:[%s12882_s7 + $0x3c] sm:$0x1] }
 0x13d   : > { %11658 = vmatpush3.bf16.msra.mxu0 %v12453_v49  ;;  %v2317_v9 = vsel %vm12893_vm2, %v2312_v1, %v2316_v56  ;;  %v2470_v29 = vshll.u32 %v10259_v20, 16  ;;  %v2476_v30 = vshll.u32 %v10260_v21, 16  ;;  %v2481_v33 = vshrl.u32 %v10261_v22, 16  ;;  %v10301_v45 = vld [vmem:[%s12882_s7 + $0x40] sm:$0xe] }
 0x13e   : > { %11698 = vmatpush3.bf16.msra.mxu1 %v12454_v59  ;;  %v10245_v12 = vcombine.low %v2303_v5, %v2317_v9  ;;  %v2594_v13 = vrot.slane %v2593_v6, 4  ;;  %v2607_v15 = vor.u32 %v2606_v7, %v2603_v3  ;;  %11659 = vmatprep.subr.bf16.mxu0 %v12455_v8  ;;  %v2484_v34 = vshll.u32 %v10261_v22, 16  ;;  %v10302_v51 = vld [vmem:[%s12882_s7 + $0x44] sm:$0x1]  ;;  %v10239_v54 = vld [vmem:[%s12882_s7 + $0x38] sm:$0xf] }
 0x13f   : > { %11699 = vmatprep.subr.bf16.mxu1 %v12456_v11  ;;  %v2490_v35 = vshll.u32 %v10262_v25, 16  ;;  %v2469_v38 = vrot.slane %v2467_v28, 4  ;;  %v2472_v39 = vrot.slane %v2470_v29, 5  ;;  %v10309_v41 = vrot.slane %v10299_v36, 9  ;;  %v10240_v58 = vld [vmem:[%s12882_s7 + $0x3c] sm:$0x1] }
 0x140   : > { %8843 = vmatmul.mubr.bf16.gmra.mrb[104].mxu0 %v10245_v12  ;;  %v2599_v17 = vsel %vm12893_vm2, %v2594_v13, %v2598_v2  ;;  %v2608_v18 = vrot.slane %v2607_v15, 4  ;;  %v2478_v42 = vrot.slane %v2476_v30, 5  ;;  %v2483_v43 = vrot.slane %v2481_v33, 4  ;;  %v10241_v59 = vld [vmem:[%s12882_s7 + $0x40] sm:$0xf] }
 0x141   : > { %11660 = vmatpush3.bf16.msra.mxu0 %v12457_v16  ;;  %v2486_v44 = vrot.slane %v2484_v34, 5  ;;  %v2720_v48 = vrot.slane %v10300_v40, 5  ;;  %v2473_v49 = vor.u32 %v2472_v39, %v2469_v38  ;;  %v2492_v50 = vrot.slane %v2490_v35, 5  ;;  %v10242_v62 = vld [vmem:[%s12882_s7 + $0x44] sm:$0x1] }
 0x142   : > { %v2613_v24 = vsel %vm12893_vm2, %v2608_v18, %v2612_v10  ;;  %11700 = vmatpush3.bf16.msra.mxu1 %v12458_v19  ;;  %11725 = vmatprep.subr.bf16.mxu0 %v12462_v31  ;;  %v10310_v53 = vrot.slane %v10301_v45, 9  ;;  %v2724_v57 = vrot.slane %v10302_v51, 5  ;;  %v2319_v60 = vshrl.u32 %v10239_v54, 16  ;;  %v10279_v7 = vld [vmem:[%s12882_s7 + $0xd8] sm:$0xf] }
 0x143   : > { %v10285_v32 = vcombine.low %v2599_v17, %v2613_v24  ;;  %11765 = vmatprep.subr.bf16.mxu1 %v12463_v37  ;;  %v2487_v55 = vor.u32 %v2486_v44, %v2483_v43  ;;  %v2721_v56 = vsel %vm13051_vm5, %v10309_v41, %v2720_v48  ;;  %v2474_v61 = vrot.slane %v2473_v49, 4  ;;  %v10280_v12 = vld [vmem:[%s12882_s7 + $0xdc] sm:$0x1]  ;;  %v10281_v13 = vld [vmem:[%s12882_s7 + $0xe0] sm:$0xf] }
 0x144   : > { %v2322_v63 = vshll.u32 %v10239_v54, 16  ;;  %v2328_v1 = vshll.u32 %v10240_v58, 16  ;;  %v2333_v2 = vshrl.u32 %v10241_v59, 16  ;;  %v2725_v4 = vsel %vm13051_vm5, %v10310_v53, %v2724_v57  ;;  %v10282_v19 = vld [vmem:[%s12882_s7 + $0xe4] sm:$0x1] }
 0x145   : > { %8908 = vmatmul.mubr.bf16.gmra.mrb[104].mxu1 %v10285_v32  ;;  %v2488_v3 = vrot.slane %v2487_v55, 4  ;;  %v2321_v5 = vrot.slane %v2319_v60, 4  ;;  %v2336_v6 = vshll.u32 %v10241_v59, 16  ;;  %v2479_v8 = vsel %vm12893_vm2, %v2474_v61, %v2478_v42  ;;  %v12459_v51 = vld [vmem:[%s12882_s7 + $0x148] ss:$8 sps:$4 sm:$0xff]  }
 0x146   : > { %v10314_v9 = vcombine.low %v2721_v56, %v2725_v4  ;;  %v2324_v10 = vrot.slane %v2322_v63, 5  ;;  %v2330_v11 = vrot.slane %v2328_v1, 5  ;;  %v2335_v16 = vrot.slane %v2333_v2, 4  ;;  %v10351_v54 = vld [vmem:[%s12882_s7 + $0xf8] sm:$0xf]  ;;  %v12464_v4 = vld [vmem:[%s15253_s1 + $0x800] sm:$0xff]  }
 0x147   : > { %v2493_v15 = vsel %vm12893_vm2, %v2488_v3, %v2492_v50  ;;  %v2338_v17 = vrot.slane %v2336_v6, 5  ;;  %v2342_v18 = vshll.u32 %v10242_v62, 16  ;;  %v2615_v22 = vshrl.u32 %v10279_v7, 16  ;;  %v10352_v55 = vld [vmem:[%s12882_s7 + $0xfc] sm:$0x1] }
 0x148   : > { %v10266_v20 = vcombine.low %v2479_v8, %v2493_v15  ;;  %8915 = vmatprep.mubr.bf16.mxu1 %v10314_v9  ;;  %v2325_v21 = vor.u32 %v2324_v10, %v2321_v5  ;;  %v2618_v24 = vshll.u32 %v10279_v7, 16  ;;  %v2624_v29 = vshll.u32 %v10280_v12, 16  ;;  %v10353_v56 = vld [vmem:[%s12882_s7 + $0x100] sm:$0xf]  ;;  %v10354_v58 = vld [vmem:[%s12882_s7 + $0x104] sm:$0x1] }
 0x149   : > { %v2339_v25 = vor.u32 %v2338_v17, %v2335_v16  ;;  %v2344_v28 = vrot.slane %v2342_v18, 5  ;;  %v2629_v30 = vshrl.u32 %v10281_v13, 16  ;;  %v2617_v32 = vrot.slane %v2615_v22, 4  ;;  %v11119_v5 = vpop.f32.mrb[12].mxu0  ;;  %v12460_v8 = vld [vmem:[%s12882_s7 + $0xf8] ss:$8 sps:$4 sm:$0xff]  }
 0x14a   : > { %8850 = vmatprep.mubr.bf16.mxu0 %v10266_v20  ;;  %v2326_v31 = vrot.slane %v2325_v21, 4  ;;  %v2620_v33 = vrot.slane %v2618_v24, 5  ;;  %v2632_v34 = vshll.u32 %v10281_v13, 16  ;;  %v2638_v37 = vshll.u32 %v10282_v19, 16  ;;  %v12466_v9 = vld [vmem:[%s15253_s1 + $0x848] sm:$0xff]   ;;  %v11159_v10 = vpop.f32.mrb[12].mxu1 }
 0x14b   : > { %v2340_v35 = vrot.slane %v2339_v25, 4  ;;  %v2631_v36 = vrot.slane %v2629_v30, 4  ;;  %v2626_v40 = vrot.slane %v2624_v29, 5  ;;  %v2880_v59 = vshrl.u32 %v10351_v54, 16  ;;  %v12468_v15 = vld [vmem:[%s15253_s1 + $0x808] sm:$0xff]   ;;  %v12473_v17 = vld [vmem:[%s15253_s1 + $0x850] sm:$0xff]  }
 0x14c   : > { %v2331_v38 = vsel %vm12893_vm2, %v2326_v31, %v2330_v11  ;;  %v2621_v39 = vor.u32 %v2620_v33, %v2617_v32  ;;  %v2634_v41 = vrot.slane %v2632_v34, 5  ;;  %v2640_v48 = vrot.slane %v2638_v37, 5  ;;  %v11120_v19 = vpop.f32.mrb[13].mxu0  ;;  %v12461_v21 = vld [vmem:[%s12882_s7 + $0x198] ss:$8 sps:$4 sm:$0xff]   ;;  %v11160_v24 = vpop.f32.mrb[13].mxu1 }
 0x14d   : > { %v2345_v42 = vsel %vm12893_vm2, %v2340_v35, %v2344_v28  ;;  %v2883_v60 = vshll.u32 %v10351_v54, 16  ;;  %v2889_v61 = vshll.u32 %v10352_v55, 16  ;;  %v2894_v62 = vshrl.u32 %v10353_v56, 16  ;;  %v12465_v28 = vld [vmem:[%s15253_s1 + $0x880] sm:$0xff]   ;;  %v12475_v29 = vld [vmem:[%s15253_s1 + $0x810] sm:$0xff]   ;;  %v12467_v32 = vld [vmem:[%s15253_s1 + $0x8c8] sm:$0xff]  }
 0x14e   : > { %v10246_v43 = vcombine.low %v2331_v38, %v2345_v42  ;;  %v2622_v44 = vrot.slane %v2621_v39, 4  ;;  %v2635_v45 = vor.u32 %v2634_v41, %v2631_v36  ;;  %v2897_v63 = vshll.u32 %v10353_v56, 16  ;;  %v12470_v35 = vld [vmem:[%s12882_s7 + $0x158] ss:$8 sps:$4 sm:$0xff]   ;;  %v12469_v36 = vld [vmem:[%s15253_s1 + $0x888] sm:$0xff]   ;;  %v12474_v54 = vld [vmem:[%s15253_s1 + $0x8d0] sm:$0xff]  }
 0x14f   : > { %v2903_v1 = vshll.u32 %v10354_v58, 16  ;;  %v2882_v2 = vrot.slane %v2880_v59, 4  ;;  %v2885_v3 = vrot.slane %v2883_v60, 5  ;;  %v2896_v6 = vrot.slane %v2894_v62, 4  ;;  %v10355_v37 = vld [vmem:[%s12882_s7 + $0x108] sm:$0xf] }
 0x150   : > { %8851 = vmatmul.mubr.bf16.gmra.mrb[108].mxu0 %v10246_v43  ;;  %v2627_v49 = vsel %vm12893_vm2, %v2622_v44, %v2626_v40  ;;  %v2636_v50 = vrot.slane %v2635_v45, 4  ;;  %v2899_v7 = vrot.slane %v2897_v63, 5  ;;  %v2891_v12 = vrot.slane %v2889_v61, 5  ;;  %v10356_v38 = vld [vmem:[%s12882_s7 + $0x10c] sm:$0x1]  ;;  %v12476_v56 = vld [vmem:[%s15253_s1 + $0x890] sm:$0xff]  }
 0x151   : > { %8956 = vmatprep.mubr.bf16.mxu0 %v12459_v51  ;;  %v2886_v11 = vor.u32 %v2885_v3, %v2882_v2  ;;  %v2905_v13 = vrot.slane %v2903_v1, 5  ;;  %v11121_v22 = vadd.f32 %v11120_v19, %v11119_v5  ;;  %v11161_v30 = vadd.f32 %v11160_v24, %v11159_v10  ;;  %v10357_v39 = vld [vmem:[%s12882_s7 + $0x110] sm:$0xf]  ;;  %v10358_v40 = vld [vmem:[%s12882_s7 + $0x114] sm:$0x1]  ;;  %v12477_v62 = vld [vmem:[%s15253_s1 + $0x858] sm:$0xff]  }
 0x152   : > { %v2641_v53 = vsel %vm12893_vm2, %v2636_v50, %v2640_v48  ;;  %v2900_v16 = vor.u32 %v2899_v7, %v2896_v6  ;;  %v2908_v41 = vshrl.u32 %v10355_v37, 16  ;;  %v2911_v42 = vshll.u32 %v10355_v37, 16  ;;  %v12472_v1 = vld [vmem:[%s12882_s7 + $0x1a8] ss:$8 sps:$4 sm:$0xff]   ;;  %v12478_v2 = vld [vmem:[%s15253_s1 + $0x8d8] sm:$0xff]   ;;  %v11122_v5 = vpop.f32.mrb[14].mxu0 }
 0x153   : > { %v10286_v57 = vcombine.low %v2627_v49, %v2641_v53  ;;  %v2887_v18 = vrot.slane %v2886_v11, 4  ;;  %v14179_v34 = vadd.f32 %v11161_v30, %v11121_v22  ;;  %v2917_v43 = vshll.u32 %v10356_v38, 16  ;;  %v12471_v53 = vld [vmem:[%s12882_s7 + $0x108] ss:$8 sps:$4 sm:$0xff]   ;;  %v11162_v6 = vpop.f32.mrb[14].mxu1  ;;  %v12480_v10 = vld [vmem:[%s15253_s1 + $0x898] sm:$0xff]  }
 0x154   : > { %v2901_v20 = vrot.slane %v2900_v16, 4  ;;  %v2922_v44 = vshrl.u32 %v10357_v39, 16  ;;  %v2925_v45 = vshll.u32 %v10357_v39, 16  ;;  %v2931_v48 = vshll.u32 %v10358_v40, 16  ;;  %v10359_v16 = vld [vmem:[%s12882_s7 + $0x118] sm:$0xf] }
 0x155   : > { %8916 = vmatmul.mubr.bf16.gmra.mrb[108].mxu1 %v10286_v57  ;;  %v2892_v25 = vsel %vm12893_vm2, %v2887_v18, %v2891_v12  ;;  %v2910_v49 = vrot.slane %v2908_v41, 4  ;;  %v2913_v50 = vrot.slane %v2911_v42, 5  ;;  %v2919_v58 = vrot.slane %v2917_v43, 5  ;;  %v11163_v12 = vpop.f32.mrb[15].mxu1  ;;  %v10361_v18 = vld [vmem:[%s12882_s7 + $0x120] sm:$0xf] }
 0x156   : > { %v2906_v31 = vsel %vm12893_vm2, %v2901_v20, %v2905_v13  ;;  %v2924_v51 = vrot.slane %v2922_v44, 4  ;;  %v2927_v55 = vrot.slane %v2925_v45, 5  ;;  %v2933_v59 = vrot.slane %v2931_v48, 5  ;;  %v10362_v19 = vld [vmem:[%s12882_s7 + $0x124] sm:$0x1] }
 0x157   : > { %v10367_v33 = vcombine.low %v2892_v25, %v2906_v31  ;;  %v2914_v57 = vor.u32 %v2913_v50, %v2910_v49  ;;  %v11164_v13 = vadd.f32 %v11163_v12, %v11162_v6  ;;  %v2936_v20 = vshrl.u32 %v10359_v16, 16  ;;  %v12482_v37 = vld [vmem:[%s12882_s7 + $0x118] ss:$8 sps:$4 sm:$0xff]   ;;  %v11221_v50 = vpop.f32.mrb[16].mxu1  ;;  %v10366_v12 = vld [vmem:[%s12882_s7 + $0x134] sm:$0x1] }
 0x158   : > { %8957 = vmatmul.mubr.bf16.vlgmr.msra.gmra.mrb[112].mxu0 %v12460_v8  ;;  %v2928_v60 = vor.u32 %v2927_v55, %v2924_v51  ;;  %v12479_v8 = vld [vmem:[%s15253_s1 + $0x818] sm:$0xff]   ;;  %v2950_v25 = vshrl.u32 %v10361_v18, 16  ;;  %v12486_v38 = vld [vmem:[%s15253_s1 + $0x820] sm:$0xff]  }
 0x159   : > { %11726 = vmatpush3.bf16.msra.mxu0 %v12464_v4  ;;  %9021 = vmatprep.mubr.bf16.mxu1 %v10367_v33  ;;  %v2915_v61 = vrot.slane %v2914_v57, 4  ;;  %v2938_v30 = vrot.slane %v2936_v20, 4  ;;  %v12485_v33 = vld [vmem:[%s15253_s1 + $0x8e0] sm:$0xff]   ;;  %v2987_v20 = vshll.u32 %v10366_v12, 16 }
 0x15a   : > { %11727 = vmatprep.subr.bf16.mxu0 %v12466_v9  ;;  %8964 = vmatprep.mubr.bf16.mxu0 %v12470_v35  ;;  %v2929_v63 = vrot.slane %v2928_v60, 4  ;;  %v11123_v9 = vpop.f32.mrb[15].mxu0  ;;  %v2952_v35 = vrot.slane %v2950_v25, 4  ;;  %v12487_v41 = vld [vmem:[%s15253_s1 + $0x8a0] sm:$0xff]  }
 0x15b   : > { %v2920_v3 = vsel %vm12893_vm2, %v2915_v61, %v2919_v58  ;;  %v11124_v11 = vadd.f32 %v11123_v9, %v11122_v5  ;;  %v11181_v45 = vpop.f32.mrb[16].mxu0  ;;  %v12483_v49 = vld [vmem:[%s12882_s7 + $0x1b8] ss:$8 sps:$4 sm:$0xff]   ;;  %v12488_v58 = vld [vmem:[%s15253_s1 + $0x868] sm:$0xff]  }
 0x15c   : > { %v2934_v4 = vsel %vm12893_vm2, %v2929_v63, %v2933_v59  ;;  %v12489_v61 = vld [vmem:[%s15253_s1 + $0x8e8] sm:$0xff]  }
 0x15d   : > { %11728 = vmatpush3.bf16.msra.mxu0 %v12468_v15  ;;  %9022 = vmatmul.mubr.bf16.vlgmr.msra.gmra.mrb[112].mxu1 %v12461_v21  ;;  %v10368_v7 = vcombine.low %v2920_v3, %v2934_v4  ;;  %v12481_v15 = vld [vmem:[%s12882_s7 + $0x168] ss:$8 sps:$4 sm:$0xff]   ;;  %v2939_v21 = vshll.u32 %v10359_v16, 16  ;;  %v14218_v22 = vadd.f32 %v11164_v13, %v11124_v11 }
 0x15e   : > { %11729 = vmatprep.subr.bf16.mxu0 %v12473_v17  ;;  %11766 = vmatpush3.bf16.msra.mxu1 %v12465_v28  ;;  %v10360_v17 = vld [vmem:[%s12882_s7 + $0x11c] sm:$0x1]  ;;  %v2953_v28 = vshll.u32 %v10361_v18, 16  ;;  %v12491_v3 = vld [vmem:[%s15253_s1 + $0x8a8] sm:$0xff]   ;;  %v10365_v11 = vld [vmem:[%s12882_s7 + $0x130] sm:$0xf] }
 0x15f   : > { %11767 = vmatprep.subr.bf16.mxu1 %v12467_v32  ;;  %9029 = vmatprep.mubr.bf16.mxu1 %v10368_v7  ;;  %v2945_v24 = vshll.u32 %v10360_v17, 16  ;;  %v2941_v31 = vrot.slane %v2939_v21, 5  ;;  %v2959_v32 = vshll.u32 %v10362_v19, 16  ;;  %v12492_v7 = vld [vmem:[%s12882_s7 + $0x178] ss:$8 sps:$4 sm:$0xff]   ;;  %v2978_v17 = vshrl.u32 %v10365_v11, 16 }
 0x160   : > { %8965 = vmatmul.mubr.bf16.gmra.mrb[116].mxu0 %v12471_v53  ;;  %v11182_v53 = vpop.f32.mrb[17].mxu0  ;;  %v10363_v9 = vld [vmem:[%s12882_s7 + $0x128] sm:$0xf]  ;;  %v2981_v19 = vshll.u32 %v10365_v11, 16 }
 0x161   : > { %11730 = vmatpush3.bf16.msra.mxu0 %v12475_v29  ;;  %8972 = vmatprep.mubr.bf16.mxu0 %v12481_v15  ;;  %v12484_v29 = vld [vmem:[%s15253_s1 + $0x860] sm:$0xff]   ;;  %v2942_v39 = vor.u32 %v2941_v31, %v2938_v30  ;;  %v2947_v40 = vrot.slane %v2945_v24, 5  ;;  %v2961_v43 = vrot.slane %v2959_v32, 5  ;;  %v11184_v59 = vpop.f32.mrb[18].mxu0  ;;  %v2964_v13 = vshrl.u32 %v10363_v9, 16 }
 0x162   : > { %11768 = vmatpush3.bf16.msra.mxu1 %v12469_v36  ;;  %11731 = vmatprep.subr.bf16.mxu0 %v12477_v62  ;;  %v2955_v36 = vrot.slane %v2953_v28, 5  ;;  %v2967_v15 = vshll.u32 %v10363_v9, 16  ;;  %v2980_v25 = vrot.slane %v2978_v17, 4  ;;  %v12493_v28 = vld [vmem:[%s12882_s7 + $0x128] ss:$8 sps:$4 sm:$0xff]   ;;  %v2989_v31 = vrot.slane %v2987_v20, 5 }
 0x163   : > { %11769 = vmatprep.subr.bf16.mxu1 %v12474_v54  ;;  %v2943_v44 = vrot.slane %v2942_v39, 4  ;;  %v11222_v54 = vpop.f32.mrb[17].mxu1  ;;  %v2966_v21 = vrot.slane %v2964_v13, 4  ;;  %v12494_v39 = vld [vmem:[%s12882_s7 + $0x1c8] ss:$8 sps:$4 sm:$0xff]   ;;  %v12504_v9 = vld [vmem:[%s15253_s1 + $0x940] sm:$0xff]  }
 0x164   : > { %v2956_v42 = vor.u32 %v2955_v36, %v2952_v35  ;;  %v11223_v57 = vadd.f32 %v11222_v54, %v11221_v50  ;;  %v11224_v62 = vpop.f32.mrb[18].mxu1  ;;  %v2969_v24 = vrot.slane %v2967_v15, 5  ;;  %v12505_v13 = vld [vmem:[%s15253_s1 + $0x9c0] sm:$0xff]   ;;  %v12503_v17 = vld [vmem:[%s12882_s7 + $0x1e8] ss:$8 sps:$4 sm:$0xff]  }
 0x165   : > { %11732 = vmatpush3.bf16.msra.mxu0 %v12479_v8  ;;  %9030 = vmatmul.mubr.bf16.gmra.mrb[116].mxu1 %v12472_v1  ;;  %v2948_v51 = vsel %vm12893_vm2, %v2943_v44, %v2947_v40  ;;  %v12490_v1 = vld [vmem:[%s15253_s1 + $0x828] sm:$0xff]   ;;  %v11225_v5 = vpop.f32.mrb[19].mxu1  ;;  %v12497_v40 = vld [vmem:[%s15253_s1 + $0x830] sm:$0xff]  }
 0x166   : > { %11770 = vmatpush3.bf16.msra.mxu1 %v12476_v56  ;;  %11733 = vmatprep.subr.bf16.mxu0 %v12484_v29  ;;  %v2957_v48 = vrot.slane %v2956_v42, 4  ;;  %v11183_v56 = vadd.f32 %v11182_v53, %v11181_v45  ;;  %v11226_v6 = vadd.f32 %v11225_v5, %v11224_v62  ;;  %v2970_v29 = vor.u32 %v2969_v24, %v2966_v21  ;;  %v12498_v42 = vld [vmem:[%s15253_s1 + $0x8b0] sm:$0xff]   ;;  %v12499_v45 = vld [vmem:[%s15253_s1 + $0x878] sm:$0xff]  }
 0x167   : > { %11771 = vmatprep.subr.bf16.mxu1 %v12478_v2  ;;  %v11185_v2 = vpop.f32.mrb[19].mxu0 }
 0x168   : > { %8973 = vmatmul.mubr.bf16.gmra.mrb[120].mxu0 %v12482_v37  ;;  %v2962_v55 = vsel %vm12893_vm2, %v2957_v48, %v2961_v43  ;;  %v8179_v63 = vadd.f32 %v11183_v56, %v13832_v14  ;;  %v11186_v4 = vadd.f32 %v11185_v2, %v11184_v59  ;;  %v11187_v35 = vpop.f32.mrb[20].mxu0  ;;  %v2971_v36 = vrot.slane %v2970_v29, 4  ;;  %v12496_v37 = vld [vmem:[%s15253_s1 + $0x8f0] sm:$0xff]   ;;  %v11227_v43 = vpop.f32.mrb[20].mxu1 }
 0x169   : > { %11734 = vmatpush3.bf16.msra.mxu0 %v12486_v38  ;;  %v10369_v60 = vcombine.low %v2948_v51, %v2962_v55  ;;  %8980 = vmatprep.mubr.bf16.mxu0 %v12492_v7  ;;  %v11188_v44 = vpop.f32.mrb[21].mxu0  ;;  %v11228_v50 = vpop.f32.mrb[21].mxu1  ;;  %v12500_v51 = vld [vmem:[%s15253_s1 + $0x8f8] sm:$0xff]   ;;  %v10373_v29 = vld [vmem:[%s12882_s7 + $0x150] sm:$0xf] }
 0x16a   : > { %11772 = vmatpush3.bf16.msra.mxu1 %v12480_v10  ;;  %11735 = vmatprep.subr.bf16.mxu0 %v12488_v58  ;;  %v14251_v14 = vadd.f32 %v11223_v57, %v8179_v63  ;;  %v8182_v8 = vadd.f32 %v11186_v4, %v13843_v27  ;;  %v10364_v10 = vld [vmem:[%s12882_s7 + $0x12c] sm:$0x1]  ;;  %v2983_v27 = vrot.slane %v2981_v19, 5  ;;  %v11229_v54 = vadd.f32 %v11228_v50, %v11227_v43  ;;  %v11190_v55 = vpop.f32.mrb[22].mxu0  ;;  %v11230_v56 = vpop.f32.mrb[22].mxu1  ;;  %v12501_v58 = vld [vmem:[%s15253_s1 + $0x838] sm:$0xff]  }
 0x16b   : > { %11773 = vmatprep.subr.bf16.mxu1 %v12485_v33  ;;  %9037 = vmatprep.mubr.bf16.mxu1 %v10369_v60  ;;  %v2973_v16 = vshll.u32 %v10364_v10, 16  ;;  %v12495_v33 = vld [vmem:[%s15253_s1 + $0x870] sm:$0xff]   ;;  %v11191_v59 = vpop.f32.mrb[23].mxu0  ;;  %v12502_v60 = vld [vmem:[%s15253_s1 + $0x8b8] sm:$0xff]   ;;  %v11231_v62 = vpop.f32.mrb[23].mxu1 }
 0x16c   : > { %v14259_v18 = vadd.f32 %v11226_v6, %v8182_v8  ;;  %v2984_v32 = vor.u32 %v2983_v27, %v2980_v25  ;;  %v10391_v63 = vld [vmem:[%s12882_s7 + $0x198] sm:$0xf]  ;;  %v11232_v2 = vadd.f32 %v11231_v62, %v11230_v56  ;;  %v10394_v4 = vld [vmem:[%s12882_s7 + $0x1a4] sm:$0x1]  ;;  %v10371_v25 = vld [vmem:[%s12882_s7 + $0x148] sm:$0xf] }
 0x16d   : > { %9038 = vmatmul.mubr.bf16.gmra.mrb[120].mxu1 %v12483_v49  ;;  %11736 = vmatpush3.bf16.msra.mxu0 %v12490_v1  ;;  %v2975_v30 = vrot.slane %v2973_v16, 5  ;;  %v11189_v49 = vadd.f32 %v11188_v44, %v11187_v35  ;;  %v3176_v6 = vshrl.u32 %v10391_v63, 16  ;;  %v3179_v7 = vshll.u32 %v10391_v63, 16  ;;  %v10372_v27 = vld [vmem:[%s12882_s7 + $0x14c] sm:$0x1]  ;;  %v11233_v56 = vpop.f32.mrb[24].mxu1 }
 0x16e   : > { %11774 = vmatpush3.bf16.msra.mxu1 %v12487_v41  ;;  %v2985_v38 = vrot.slane %v2984_v32, 4  ;;  %11737 = vmatprep.subr.bf16.mxu0 %v12495_v33  ;;  %v3199_v12 = vshll.u32 %v10394_v4, 16  ;;  %v3028_v32 = vshrl.u32 %v10371_v25, 16  ;;  %v3031_v33 = vshll.u32 %v10371_v25, 16 }
 0x16f   : > { %11775 = vmatprep.subr.bf16.mxu1 %v12489_v61  ;;  %v2976_v41 = vsel %vm12893_vm2, %v2971_v36, %v2975_v30  ;;  %v8187_v57 = vadd.f32 %v11189_v49, %v13871_v52  ;;  %v11192_v61 = vadd.f32 %v11191_v59, %v11190_v55  ;;  %v10392_v52 = vld [vmem:[%s12882_s7 + $0x19c] sm:$0x1]  ;;  %v3181_v16 = vrot.slane %v3179_v7, 5  ;;  %v10374_v30 = vld [vmem:[%s12882_s7 + $0x154] sm:$0x1] }
 0x170   : > { %8981 = vmatmul.mubr.bf16.gmra.mrb[124].mxu0 %v12493_v28  ;;  %v2990_v48 = vsel %vm12893_vm2, %v2985_v38, %v2989_v31  ;;  %v3185_v8 = vshll.u32 %v10392_v52, 16  ;;  %v3201_v24 = vrot.slane %v3199_v12, 5  ;;  %v3037_v35 = vshll.u32 %v10372_v27, 16  ;;  %v10411_v36 = vld [vmem:[%s12882_s7 + $0xf8] sm:$0xe]  ;;  %v12507_v52 = vld [vmem:[%s15253_s1 + $0x980] sm:$0xff]  }
 0x171   : > { %11738 = vmatpush3.bf16.msra.mxu0 %v12497_v40  ;;  %v10370_v53 = vcombine.low %v2976_v41, %v2990_v48  ;;  %v14293_v1 = vadd.f32 %v11229_v54, %v8187_v57  ;;  %v8190_v5 = vadd.f32 %v11192_v61, %v13882_v0  ;;  %v3178_v0 = vrot.slane %v3176_v6, 4  ;;  %v10413_v49 = vld [vmem:[%s12882_s7 + $0x100] sm:$0xe]  ;;  %v10414_v55 = vld [vmem:[%s12882_s7 + $0x104] sm:$0x1]  ;;  %v12511_v27 = vld [vmem:[%s15253_s1 + $0x988] sm:$0xff]  }
 0x172   : > { %11776 = vmatpush3.bf16.msra.mxu1 %v12491_v3  ;;  %11739 = vmatprep.subr.bf16.mxu0 %v12499_v45  ;;  %v10393_v3 = vld [vmem:[%s12882_s7 + $0x1a0] sm:$0xf]  ;;  %v3187_v19 = vrot.slane %v3185_v8, 5  ;;  %v3045_v40 = vshll.u32 %v10373_v29, 16  ;;  %v3051_v41 = vshll.u32 %v10374_v30, 16  ;;  %v3030_v44 = vrot.slane %v3028_v32, 4 }
 0x173   : > { %11777 = vmatprep.subr.bf16.mxu1 %v12496_v37  ;;  %9045 = vmatprep.mubr.bf16.mxu1 %v10370_v53  ;;  %v3190_v10 = vshrl.u32 %v10393_v3, 16  ;;  %v3193_v11 = vshll.u32 %v10393_v3, 16  ;;  %v14305_v15 = vadd.f32 %v11232_v2, %v8190_v5  ;;  %v3182_v28 = vor.u32 %v3181_v16, %v3178_v0  ;;  %v11193_v37 = vpop.f32.mrb[24].mxu0  ;;  %v12506_v12 = vld [vmem:[%s15253_s1 + $0x900] sm:$0xff]   ;;  %v10395_v32 = vld [vmem:[%s12882_s7 + $0x1a8] sm:$0xf] }
 0x174   : > { %v3033_v45 = vrot.slane %v3031_v33, 5  ;;  %v3039_v48 = vrot.slane %v3037_v35, 5  ;;  %v3047_v53 = vrot.slane %v3045_v40, 5  ;;  %v3053_v54 = vrot.slane %v3051_v41, 5  ;;  %v11194_v5 = vpop.f32.mrb[25].mxu0  ;;  %v12513_v41 = vld [vmem:[%s15253_s1 + $0x950] sm:$0xff]  }
 0x175   : > { %9046 = vmatmul.mubr.bf16.gmra.mrb[124].mxu1 %v12494_v39  ;;  %11740 = vmatpush3.bf16.msra.mxu0 %v12501_v58  ;;  %v3192_v20 = vrot.slane %v3190_v10, 4  ;;  %v3195_v21 = vrot.slane %v3193_v11, 5  ;;  %v3183_v38 = vrot.slane %v3182_v28, 4  ;;  %v3042_v39 = vshrl.u32 %v10373_v29, 16  ;;  %v11196_v0 = vpop.f32.mrb[26].mxu0 }
 0x176   : > { %11778 = vmatpush3.bf16.msra.mxu1 %v12498_v42  ;;  %11805 = vmatprep.subr.bf16.mxu0 %v12504_v9  ;;  %v10412_v42 = vld [vmem:[%s12882_s7 + $0xfc] sm:$0x1]  ;;  %v3034_v58 = vor.u32 %v3033_v45, %v3030_v44  ;;  %v10427_v59 = vrot.slane %v10411_v36, 9  ;;  %v10428_v63 = vrot.slane %v10413_v49, 9  ;;  %v3345_v2 = vrot.slane %v10414_v55, 5  ;;  %v11234_v9 = vpop.f32.mrb[25].mxu1 }
 0x177   : > { %11779 = vmatprep.subr.bf16.mxu1 %v12500_v51  ;;  %9151 = vmatprep.mubr.bf16.mxu1 %v12503_v17  ;;  %v3196_v31 = vor.u32 %v3195_v21, %v3192_v20  ;;  %v3188_v50 = vsel %vm12893_vm2, %v3183_v38, %v3187_v19  ;;  %v3044_v51 = vrot.slane %v3042_v39, 4  ;;  %v11195_v8 = vadd.f32 %v11194_v5, %v11193_v37  ;;  %v12509_v19 = vld [vmem:[%s15253_s1 + $0x9c8] sm:$0xff]   ;;  %v11236_v20 = vpop.f32.mrb[26].mxu1  ;;  %v11197_v25 = vpop.f32.mrb[27].mxu0  ;;  %v10397_v35 = vld [vmem:[%s12882_s7 + $0x1b0] sm:$0xf] }
 0x178   : > { %v3035_v3 = vrot.slane %v3034_v58, 4  ;;  %v3346_v7 = vsel %vm13051_vm5, %v10428_v63, %v3345_v2  ;;  %v11198_v29 = vadd.f32 %v11197_v25, %v11196_v0  ;;  %v11237_v30 = vpop.f32.mrb[27].mxu1  ;;  %v10396_v33 = vld [vmem:[%s12882_s7 + $0x1ac] sm:$0x1]  ;;  %v10398_v37 = vld [vmem:[%s12882_s7 + $0x1b4] sm:$0x1] }
 0x179   : > { %v3197_v43 = vrot.slane %v3196_v31, 4  ;;  %v3048_v62 = vor.u32 %v3047_v53, %v3044_v51  ;;  %v8195_v17 = vadd.f32 %v11195_v8, %v13910_v26  ;;  %v12510_v26 = vld [vmem:[%s15253_s1 + $0x908] sm:$0xff]   ;;  %v11238_v31 = vadd.f32 %v11237_v30, %v11236_v20  ;;  %v12514_v45 = vld [vmem:[%s15253_s1 + $0x9d0] sm:$0xff]   ;;  %v10378_v63 = vld [vmem:[%s12882_s7 + $0x164] sm:$0x1] }
 0x17a   : > { %11780 = vmatpush3.bf16.msra.mxu1 %v12502_v60  ;;  %v3341_v60 = vrot.slane %v10412_v42, 5  ;;  %v3040_v10 = vsel %vm12893_vm2, %v3035_v3, %v3039_v48  ;;  %v8198_v36 = vadd.f32 %v11198_v29, %v13922_v46  ;;  %v3204_v38 = vshrl.u32 %v10395_v32, 16  ;;  %v12515_v51 = vld [vmem:[%s15253_s1 + $0x910] sm:$0xff]   ;;  %v10416_v0 = vld [vmem:[%s12882_s7 + $0x10c] sm:$0x1] }
 0x17b   : > { %11845 = vmatprep.subr.bf16.mxu1 %v12505_v13  ;;  %v3202_v57 = vsel %vm12893_vm2, %v3197_v43, %v3201_v24  ;;  %v3049_v6 = vrot.slane %v3048_v62, 4  ;;  %v11235_v13 = vadd.f32 %v11234_v9, %v11233_v56  ;;  %v12508_v24 = vld [vmem:[%s15253_s1 + $0x948] sm:$0xff]   ;;  %v3207_v39 = vshll.u32 %v10395_v32, 16  ;;  %v12512_v56 = vld [vmem:[%s12882_s7 + $0x1f8] ss:$8 sps:$4 sm:$0xff]  }
 0x17c   : > { %v10407_v61 = vcombine.low %v3188_v50, %v3202_v57  ;;  %v3342_v4 = vsel %vm13051_vm5, %v10427_v59, %v3341_v60  ;;  %v3213_v40 = vshll.u32 %v10396_v33, 16  ;;  %v3218_v42 = vshrl.u32 %v10397_v35, 16  ;;  %v12516_v57 = vld [vmem:[%s15253_s1 + $0x990] sm:$0xff]   ;;  %v10375_v59 = vld [vmem:[%s12882_s7 + $0x158] sm:$0xf] }
 0x17d   : > { %v10435_v11 = vcombine.low %v3342_v4, %v3346_v7  ;;  %v3054_v16 = vsel %vm12893_vm2, %v3049_v6, %v3053_v54  ;;  %v14341_v28 = vadd.f32 %v11235_v13, %v8195_v17  ;;  %v3221_v43 = vshll.u32 %v10397_v35, 16  ;;  %v10376_v60 = vld [vmem:[%s12882_s7 + $0x15c] sm:$0x1]  ;;  %v11199_v4 = vpop.f32.mrb[28].mxu0  ;;  %v10415_v9 = vld [vmem:[%s12882_s7 + $0x108] sm:$0xe] }
 0x17e   : > { %9086 = vmatprep.mubr.bf16.mxu0 %v10407_v61  ;;  %v10387_v21 = vcombine.low %v3040_v10, %v3054_v16  ;;  %v3227_v44 = vshll.u32 %v10398_v37, 16  ;;  %v14360_v46 = vadd.f32 %v11238_v31, %v8198_v36  ;;  %v3206_v48 = vrot.slane %v3204_v38, 4  ;;  %v10377_v61 = vld [vmem:[%s12882_s7 + $0x160] sm:$0xf]  ;;  %v11200_v38 = vpop.f32.mrb[29].mxu0 }
 0x17f   : > { %9152 = vmatmul.mubr.bf16.vlgmr.msra.gmra.mrb[128].mxu1 %v10435_v11  ;;  %v3209_v49 = vrot.slane %v3207_v39, 5  ;;  %v3215_v50 = vrot.slane %v3213_v40, 5  ;;  %v3220_v53 = vrot.slane %v3218_v42, 4  ;;  %v3223_v54 = vrot.slane %v3221_v43, 5 }
 0x180   : > { %11846 = vmatpush3.bf16.msra.mxu1 %v12507_v52  ;;  %9087 = vmatmul.mubr.bf16.vlgmr.msra.gmra.mrb[128].mxu0 %v10387_v21  ;;  %v3229_v55 = vrot.slane %v3227_v44, 5  ;;  %v3056_v2 = vshrl.u32 %v10375_v59, 16  ;;  %v3059_v52 = vshll.u32 %v10375_v59, 16  ;;  %v3065_v3 = vshll.u32 %v10376_v60, 16  ;;  %v10417_v21 = vld [vmem:[%s12882_s7 + $0x110] sm:$0xe] }
 0x181   : > { %11847 = vmatprep.subr.bf16.mxu1 %v12509_v19  ;;  %11806 = vmatpush3.bf16.msra.mxu0 %v12506_v12  ;;  %v3210_v58 = vor.u32 %v3209_v49, %v3206_v48  ;;  %v3224_v62 = vor.u32 %v3223_v54, %v3220_v53  ;;  %v3070_v6 = vshrl.u32 %v10377_v61, 16  ;;  %v3073_v7 = vshll.u32 %v10377_v61, 16  ;;  %v12518_v54 = vld [vmem:[%s15253_s1 + $0x9d8] sm:$0xff]  }
 0x182   : > { %11807 = vmatprep.subr.bf16.mxu0 %v12508_v24  ;;  %9159 = vmatprep.mubr.bf16.mxu1 %v12512_v56  ;;  %v3079_v8 = vshll.u32 %v10378_v63, 16  ;;  %v3058_v11 = vrot.slane %v3056_v2, 4  ;;  %v3061_v12 = vrot.slane %v3059_v52, 5  ;;  %v3067_v13 = vrot.slane %v3065_v3, 5  ;;  %v11239_v24 = vpop.f32.mrb[28].mxu1 }
 0x183   : > { %v3211_v5 = vrot.slane %v3210_v58, 4  ;;  %v3225_v10 = vrot.slane %v3224_v62, 4  ;;  %v3072_v17 = vrot.slane %v3070_v6, 4  ;;  %v3075_v19 = vrot.slane %v3073_v7, 5  ;;  %v11240_v42 = vpop.f32.mrb[29].mxu1  ;;  %v12520_v58 = vld [vmem:[%s15253_s1 + $0x998] sm:$0xff]  }
 0x184   : > { %11848 = vmatpush3.bf16.msra.mxu1 %v12511_v27  ;;  %v3081_v20 = vrot.slane %v3079_v8, 5  ;;  %v10418_v27 = vld [vmem:[%s12882_s7 + $0x114] sm:$0x1]  ;;  %v10429_v29 = vrot.slane %v10415_v9, 9  ;;  %v3349_v30 = vrot.slane %v10416_v0, 5  ;;  %v10430_v33 = vrot.slane %v10417_v21, 9 }
 0x185   : > { %11849 = vmatprep.subr.bf16.mxu1 %v12514_v45  ;;  %11808 = vmatpush3.bf16.msra.mxu0 %v12510_v26  ;;  %v3216_v16 = vsel %vm12893_vm2, %v3211_v5, %v3215_v50  ;;  %v3230_v25 = vsel %vm12893_vm2, %v3225_v10, %v3229_v55  ;;  %v3062_v26 = vor.u32 %v3061_v12, %v3058_v11  ;;  %v3353_v35 = vrot.slane %v10418_v27, 5  ;;  %v12517_v50 = vld [vmem:[%s15253_s1 + $0x958] sm:$0xff]   ;;  %v11242_v55 = vpop.f32.mrb[30].mxu1  ;;  %v10401_v2 = vld [vmem:[%s12882_s7 + $0x1c0] sm:$0xf] }
 0x186   : > { %11809 = vmatprep.subr.bf16.mxu0 %v12513_v41  ;;  %v10408_v31 = vcombine.low %v3216_v16, %v3230_v25  ;;  %v3076_v32 = vor.u32 %v3075_v19, %v3072_v17  ;;  %v3350_v37 = vsel %vm13051_vm5, %v10429_v29, %v3349_v30  ;;  %v11201_v41 = vadd.f32 %v11200_v38, %v11199_v4  ;;  %v11243_v60 = vpop.f32.mrb[31].mxu1  ;;  %v10399_v61 = vld [vmem:[%s12882_s7 + $0x1b8] sm:$0xf]  ;;  %v10400_v62 = vld [vmem:[%s12882_s7 + $0x1bc] sm:$0x1]  ;;  %v12522_v9 = vld [vmem:[%s15253_s1 + $0x960] sm:$0xff]  }
 0x187   : > { %v3063_v36 = vrot.slane %v3062_v26, 4  ;;  %v3354_v40 = vsel %vm13051_vm5, %v10430_v33, %v3353_v35  ;;  %v11241_v45 = vadd.f32 %v11240_v42, %v11239_v24  ;;  %v11244_v63 = vadd.f32 %v11243_v60, %v11242_v55  ;;  %v10402_v52 = vld [vmem:[%s12882_s7 + $0x1c4] sm:$0x1]  ;;  %v12521_v19 = vld [vmem:[%s12882_s7 + $0x208] ss:$8 sps:$4 sm:$0xff]  }
 0x188   : > { %11850 = vmatpush3.bf16.msra.mxu1 %v12516_v57  ;;  %9094 = vmatprep.mubr.bf16.mxu0 %v10408_v31  ;;  %v3077_v39 = vrot.slane %v3076_v32, 4  ;;  %v10436_v44 = vcombine.low %v3350_v37, %v3354_v40  ;;  %v8203_v49 = vadd.f32 %v11201_v41, %v14179_v34  ;;  %v12519_v34 = vld [vmem:[%s15253_s1 + $0x918] sm:$0xff]   ;;  %v3232_v3 = vshrl.u32 %v10399_v61, 16  ;;  %v10379_v25 = vld [vmem:[%s12882_s7 + $0x168] sm:$0xf]  ;;  %v12525_v27 = vld [vmem:[%s15253_s1 + $0x9a0] sm:$0xff]  }
 0x189   : > { %11810 = vmatpush3.bf16.msra.mxu0 %v12515_v51  ;;  %v3068_v43 = vsel %vm12893_vm2, %v3063_v36, %v3067_v13  ;;  %v11202_v51 = vpop.f32.mrb[30].mxu0  ;;  %11851 = vmatprep.subr.bf16.mxu1 %v12518_v54  ;;  %v3235_v4 = vshll.u32 %v10399_v61, 16  ;;  %v3241_v6 = vshll.u32 %v10400_v62, 16  ;;  %v3246_v7 = vshrl.u32 %v10401_v2, 16  ;;  %v12523_v13 = vld [vmem:[%s15253_s1 + $0x9e0] sm:$0xff]  }
 0x18a   : > { %v3082_v48 = vsel %vm12893_vm2, %v3077_v39, %v3081_v20  ;;  %9160 = vmatmul.mubr.bf16.gmra.mrb[132].mxu1 %v10436_v44  ;;  %v14396_v56 = vadd.f32 %v11241_v45, %v8203_v49  ;;  %11811 = vmatprep.subr.bf16.mxu0 %v12517_v50  ;;  %v11203_v57 = vpop.f32.mrb[31].mxu0  ;;  %v3249_v8 = vshll.u32 %v10401_v2, 16  ;;  %v3234_v10 = vrot.slane %v3232_v3, 4  ;;  %v12524_v20 = vld [vmem:[%s15253_s1 + $0x920] sm:$0xff]   ;;  %v10380_v26 = vld [vmem:[%s12882_s7 + $0x16c] sm:$0x1] }
 0x18b   : > { %v10388_v53 = vcombine.low %v3068_v43, %v3082_v48  ;;  %v11204_v59 = vadd.f32 %v11203_v57, %v11202_v51  ;;  %v3237_v11 = vrot.slane %v3235_v4, 5  ;;  %v3255_v12 = vshll.u32 %v10402_v52, 16  ;;  %9167 = vmatprep.mubr.bf16.mxu1 %v12521_v19  ;;  %v10381_v30 = vld [vmem:[%s12882_s7 + $0x170] sm:$0xf]  ;;  %v10382_v31 = vld [vmem:[%s12882_s7 + $0x174] sm:$0x1] }
 0x18c   : > { %11852 = vmatpush3.bf16.msra.mxu1 %v12520_v58  ;;  %v3248_v16 = vrot.slane %v3246_v7, 4  ;;  %v3251_v17 = vrot.slane %v3249_v8, 5  ;;  %v3084_v32 = vshrl.u32 %v10379_v25, 16  ;;  %v3087_v33 = vshll.u32 %v10379_v25, 16  ;;  %v10419_v39 = vld [vmem:[%s12882_s7 + $0x118] sm:$0xe] }
 0x18d   : > { %9095 = vmatmul.mubr.bf16.gmra.mrb[132].mxu0 %v10388_v53  ;;  %v8206_v5 = vadd.f32 %v11204_v59, %v14218_v22  ;;  %v3243_v22 = vrot.slane %v3241_v6, 5  ;;  %v3238_v21 = vor.u32 %v3237_v11, %v3234_v10  ;;  %v3257_v24 = vrot.slane %v3255_v12, 5  ;;  %11853 = vmatprep.subr.bf16.mxu1 %v12523_v13  ;;  %v10420_v44 = vld [vmem:[%s12882_s7 + $0x11c] sm:$0x1]  ;;  %v10421_v51 = vld [vmem:[%s12882_s7 + $0x120] sm:$0xe] }
 0x18e   : > { %11812 = vmatpush3.bf16.msra.mxu0 %v12519_v34  ;;  %v3252_v29 = vor.u32 %v3251_v17, %v3248_v16  ;;  %v3093_v36 = vshll.u32 %v10380_v26, 16  ;;  %v3098_v37 = vshrl.u32 %v10381_v30, 16  ;;  %v3101_v38 = vshll.u32 %v10381_v30, 16  ;;  %v11261_v53 = vpop.f32.mrb[32].mxu0  ;;  %v10422_v57 = vld [vmem:[%s12882_s7 + $0x124] sm:$0x1] }
 0x18f   : > { %v14415_v0 = vadd.f32 %v11244_v63, %v8206_v5  ;;  %11813 = vmatprep.subr.bf16.mxu0 %v12522_v9  ;;  %v3239_v35 = vrot.slane %v3238_v21, 4  ;;  %v3086_v41 = vrot.slane %v3084_v32, 4  ;;  %v3089_v42 = vrot.slane %v3087_v33, 5  ;;  %v11301_v4 = vpop.f32.mrb[32].mxu1  ;;  %v11262_v7 = vpop.f32.mrb[33].mxu0  ;;  %v12526_v13 = vld [vmem:[%s15253_s1 + $0x968] sm:$0xff]  }
 0x190   : > { %11854 = vmatpush3.bf16.msra.mxu1 %v12525_v27  ;;  %v3253_v40 = vrot.slane %v3252_v29, 4  ;;  %v3107_v43 = vshll.u32 %v10382_v31, 16  ;;  %v3095_v48 = vrot.slane %v3093_v36, 5  ;;  %v3100_v49 = vrot.slane %v3098_v37, 4  ;;  %v11302_v8 = vpop.f32.mrb[33].mxu1  ;;  %v12527_v17 = vld [vmem:[%s15253_s1 + $0x9e8] sm:$0xff]  }
 0x191   : > { %v3244_v45 = vsel %vm12893_vm2, %v3239_v35, %v3243_v22  ;;  %v3103_v50 = vrot.slane %v3101_v38, 5  ;;  %v3090_v55 = vor.u32 %v3089_v42, %v3086_v41  ;;  %v10431_v58 = vrot.slane %v10419_v39, 9  ;;  %v11264_v22 = vpop.f32.mrb[34].mxu0  ;;  %v11304_v19 = vpop.f32.mrb[34].mxu1  ;;  %v12528_v21 = vld [vmem:[%s15253_s1 + $0x928] sm:$0xff]   ;;  %11855 = vmatprep.subr.bf16.mxu1 %v12527_v17  ;;  %v12531_v39 = vld [vmem:[%s15253_s1 + $0x970] sm:$0xff]  }
 0x192   : > { %11814 = vmatpush3.bf16.msra.mxu0 %v12524_v20  ;;  %v3258_v54 = vsel %vm12893_vm2, %v3253_v40, %v3257_v24  ;;  %v3109_v34 = vrot.slane %v3107_v43, 5  ;;  %v3357_v61 = vrot.slane %v10420_v44, 5  ;;  %v10432_v62 = vrot.slane %v10421_v51, 9  ;;  %v11265_v24 = vpop.f32.mrb[35].mxu0  ;;  %v12529_v25 = vld [vmem:[%s15253_s1 + $0x9a8] sm:$0xff]   ;;  %v11305_v27 = vpop.f32.mrb[35].mxu1 }
 0x193   : > { %v10409_v59 = vcombine.low %v3244_v45, %v3258_v54  ;;  %v3104_v60 = vor.u32 %v3103_v50, %v3100_v49  ;;  %v3091_v63 = vrot.slane %v3090_v55, 4  ;;  %v3361_v2 = vrot.slane %v10422_v57, 5  ;;  %11815 = vmatprep.subr.bf16.mxu0 %v12526_v13  ;;  %v10403_v29 = vld [vmem:[%s12882_s7 + $0x1c8] sm:$0xf]  ;;  %v10405_v32 = vld [vmem:[%s12882_s7 + $0x1d0] sm:$0xf] }
 0x194   : > { %v3358_v3 = vsel %vm13051_vm5, %v10431_v58, %v3357_v61  ;;  %v11263_v11 = vadd.f32 %v11262_v7, %v11261_v53  ;;  %v11303_v12 = vadd.f32 %v11302_v8, %v11301_v4  ;;  %v11266_v26 = vadd.f32 %v11265_v24, %v11264_v22  ;;  %v10406_v33 = vld [vmem:[%s12882_s7 + $0x1d4] sm:$0x1]  ;;  %11856 = vmatpush3.bf16.msra.mxu1 %v12529_v25  ;;  %v12530_v49 = vld [vmem:[%s12882_s7 + $0x218] ss:$8 sps:$4 sm:$0xff]   ;;  %v10384_v58 = vld [vmem:[%s12882_s7 + $0x17c] sm:$0x1] }
 0x195   : > { %9102 = vmatprep.mubr.bf16.mxu0 %v10409_v59  ;;  %v3105_v52 = vrot.slane %v3104_v60, 4  ;;  %v3096_v5 = vsel %vm12893_vm2, %v3091_v63, %v3095_v48  ;;  %v3362_v6 = vsel %vm13051_vm5, %v10432_v62, %v3361_v2  ;;  %v11306_v31 = vadd.f32 %v11305_v27, %v11304_v19  ;;  %v12532_v43 = vld [vmem:[%s15253_s1 + $0x9f0] sm:$0xff]   ;;  %v10383_v55 = vld [vmem:[%s12882_s7 + $0x178] sm:$0xf]  ;;  %v10385_v59 = vld [vmem:[%s12882_s7 + $0x180] sm:$0xf] }
 0x196   : > { %v10437_v10 = vcombine.low %v3358_v3, %v3362_v6  ;;  %v8309_v20 = vadd.f32 %v11263_v11, %v14251_v14  ;;  %11816 = vmatpush3.bf16.msra.mxu0 %v12528_v21  ;;  %v10404_v14 = vld [vmem:[%s12882_s7 + $0x1cc] sm:$0x1]  ;;  %v8312_v35 = vadd.f32 %v11266_v26, %v14259_v18  ;;  %v3260_v36 = vshrl.u32 %v10403_v29, 16  ;;  %v12533_v50 = vld [vmem:[%s15253_s1 + $0x930] sm:$0xff]   ;;  %11857 = vmatprep.subr.bf16.mxu1 %v12532_v43  ;;  %v10386_v60 = vld [vmem:[%s12882_s7 + $0x184] sm:$0x1] }
 0x197   : > { %v3110_v9 = vsel %vm12893_vm2, %v3105_v52, %v3109_v34  ;;  %v3263_v37 = vshll.u32 %v10403_v29, 16  ;;  %v3269_v38 = vshll.u32 %v10404_v14, 16  ;;  %v3274_v40 = vshrl.u32 %v10405_v32, 16  ;;  %11817 = vmatprep.subr.bf16.mxu0 %v12531_v39  ;;  %v12534_v34 = vld [vmem:[%s15253_s1 + $0x9b0] sm:$0xff]   ;;  %v10423_v52 = vld [vmem:[%s12882_s7 + $0x128] sm:$0xe] }
 0x198   : > { %v10389_v16 = vcombine.low %v3096_v5, %v3110_v9  ;;  %9168 = vmatmul.mubr.bf16.gmra.mrb[136].mxu1 %v10437_v10  ;;  %v14458_v30 = vadd.f32 %v11303_v12, %v8309_v20  ;;  %v3277_v41 = vshll.u32 %v10405_v32, 16  ;;  %v3283_v42 = vshll.u32 %v10406_v33, 16  ;;  %v11267_v3 = vpop.f32.mrb[36].mxu0  ;;  %v10424_v8 = vld [vmem:[%s12882_s7 + $0x12c] sm:$0x1]  ;;  %v11307_v21 = vpop.f32.mrb[36].mxu1 }
 0x199   : > { %v14470_v44 = vadd.f32 %v11306_v31, %v8312_v35  ;;  %v3262_v18 = vrot.slane %v3260_v36, 4  ;;  %v3265_v45 = vrot.slane %v3263_v37, 5  ;;  %v3271_v48 = vrot.slane %v3269_v38, 5  ;;  %9175 = vmatprep.mubr.bf16.mxu1 %v12530_v49  ;;  %11858 = vmatpush3.bf16.msra.mxu1 %v12534_v34  ;;  %v10425_v13 = vld [vmem:[%s12882_s7 + $0x130] sm:$0xe]  ;;  %v11268_v36 = vpop.f32.mrb[37].mxu0 }
 0x19a   : > { %9103 = vmatmul.mubr.bf16.gmra.mrb[136].mxu0 %v10389_v16  ;;  %v3276_v51 = vrot.slane %v3274_v40, 4  ;;  %v3279_v53 = vrot.slane %v3277_v41, 5  ;;  %v3285_v54 = vrot.slane %v3283_v42, 5  ;;  %v3112_v62 = vshrl.u32 %v10383_v55, 16  ;;  %v10426_v20 = vld [vmem:[%s12882_s7 + $0x134] sm:$0x1] }
 0x19b   : > { %v3266_v57 = vor.u32 %v3265_v45, %v3262_v18  ;;  %11818 = vmatpush3.bf16.msra.mxu0 %v12533_v50  ;;  %v3115_v63 = vshll.u32 %v10383_v55, 16  ;;  %v3121_v2 = vshll.u32 %v10384_v58, 16  ;;  %v3126_v5 = vshrl.u32 %v10385_v59, 16  ;;  %v11308_v40 = vpop.f32.mrb[37].mxu1  ;;  %v12535_v18 = vld [vmem:[%s15253_s1 + $0x978] sm:$0xff]   ;;  %v11270_v45 = vpop.f32.mrb[38].mxu0 }
 0x19c   : > { %v3280_v61 = vor.u32 %v3279_v53, %v3276_v51  ;;  %v3129_v6 = vshll.u32 %v10385_v59, 16  ;;  %v3135_v7 = vshll.u32 %v10386_v60, 16  ;;  %v3114_v10 = vrot.slane %v3112_v62, 4  ;;  %v12536_v50 = vld [vmem:[%s15253_s1 + $0x9f8] sm:$0xff]   ;;  %v11310_v51 = vpop.f32.mrb[38].mxu1  ;;  %11819 = vmatprep.subr.bf16.mxu0 %v12535_v18  ;;  %v11271_v55 = vpop.f32.mrb[39].mxu0 }
 0x19d   : > { %v3267_v4 = vrot.slane %v3266_v57, 4  ;;  %v3117_v11 = vrot.slane %v3115_v63, 5  ;;  %v3123_v12 = vrot.slane %v3121_v2, 5  ;;  %v3128_v16 = vrot.slane %v3126_v5, 4  ;;  %11859 = vmatprep.subr.bf16.mxu1 %v12536_v50  ;;  %v11311_v58 = vpop.f32.mrb[39].mxu1  ;;  %v12543_v50 = vld [vmem:[%s15253_s1 + $0xa00] sm:$0xff]  }
 0x19e   : > { %v3281_v9 = vrot.slane %v3280_v61, 4  ;;  %v3131_v17 = vrot.slane %v3129_v6, 5  ;;  %v3137_v19 = vrot.slane %v3135_v7, 5  ;;  %v10433_v26 = vrot.slane %v10423_v52, 9  ;;  %v12539_v60 = vld [vmem:[%s12882_s7 + $0x288] ss:$8 sps:$4 sm:$0xff]  }
 0x19f   : > { %v3272_v22 = vsel %vm12893_vm2, %v3267_v4, %v3271_v48  ;;  %v3118_v25 = vor.u32 %v3117_v11, %v3114_v10  ;;  %v3365_v27 = vrot.slane %v10424_v8, 5  ;;  %v10434_v14 = vrot.slane %v10425_v13, 9  ;;  %v10495_v62 = vld [vmem:[%s12882_s7 + $0x238] sm:$0xf]  ;;  %v10496_v63 = vld [vmem:[%s12882_s7 + $0x23c] sm:$0x1] }
 0x1a0   : > { %v3286_v24 = vsel %vm12893_vm2, %v3281_v9, %v3285_v54  ;;  %v3132_v31 = vor.u32 %v3131_v17, %v3128_v16  ;;  %v3369_v32 = vrot.slane %v10426_v20, 5  ;;  %v11269_v39 = vadd.f32 %v11268_v36, %v11267_v3  ;;  %v12537_v54 = vld [vmem:[%s15253_s1 + $0x938] sm:$0xff]   ;;  %v10497_v2 = vld [vmem:[%s12882_s7 + $0x240] sm:$0xf]  ;;  %v10498_v52 = vld [vmem:[%s12882_s7 + $0x244] sm:$0x1] }
 0x1a1   : > { %v10410_v29 = vcombine.low %v3272_v22, %v3286_v24  ;;  %v3119_v33 = vrot.slane %v3118_v25, 4  ;;  %v3366_v35 = vsel %vm13051_vm5, %v10433_v26, %v3365_v27  ;;  %v11309_v43 = vadd.f32 %v11308_v40, %v11307_v21  ;;  %11820 = vmatpush3.bf16.msra.mxu0 %v12537_v54  ;;  %v12540_v13 = vld [vmem:[%s12882_s7 + $0x238] ss:$8 sps:$4 sm:$0xff]   ;;  %v10475_v17 = vld [vmem:[%s12882_s7 + $0x1e8] sm:$0xf] }
 0x1a2   : > { %v3133_v37 = vrot.slane %v3132_v31, 4  ;;  %v3370_v38 = vsel %vm13051_vm5, %v10434_v14, %v3369_v32  ;;  %v8317_v49 = vadd.f32 %v11269_v39, %v14293_v1  ;;  %v12538_v1 = vld [vmem:[%s15253_s1 + $0x9b8] sm:$0xff]   ;;  %v11272_v57 = vadd.f32 %v11271_v55, %v11270_v45  ;;  %v10477_v21 = vld [vmem:[%s12882_s7 + $0x1f0] sm:$0xf]  ;;  %v10478_v24 = vld [vmem:[%s12882_s7 + $0x1f4] sm:$0x1] }
 0x1a3   : > { %9110 = vmatprep.mubr.bf16.mxu0 %v10410_v29  ;;  %v3124_v41 = vsel %vm12893_vm2, %v3119_v33, %v3123_v12  ;;  %v10438_v42 = vcombine.low %v3366_v35, %v3370_v38  ;;  %v11312_v59 = vadd.f32 %v11311_v58, %v11310_v51  ;;  %11860 = vmatpush3.bf16.msra.mxu1 %v12538_v1  ;;  %v3673_v3 = vshrl.u32 %v10495_v62, 16  ;;  %v12541_v32 = vld [vmem:[%s15253_s1 + $0xa40] sm:$0xff]   ;;  %v11273_v51 = vpop.f32.mrb[40].mxu0  ;;  %v11313_v55 = vpop.f32.mrb[40].mxu1 }
 0x1a4   : > { %v3138_v48 = vsel %vm12893_vm2, %v3133_v37, %v3137_v19  ;;  %v14509_v34 = vadd.f32 %v11309_v43, %v8317_v49  ;;  %v8320_v61 = vadd.f32 %v11272_v57, %v14305_v15  ;;  %v3676_v4 = vshll.u32 %v10495_v62, 16  ;;  %v10476_v19 = vld [vmem:[%s12882_s7 + $0x1ec] sm:$0x1]  ;;  %11885 = vmatprep.subr.bf16.mxu0 %v12541_v32  ;;  %v12542_v45 = vld [vmem:[%s15253_s1 + $0xac0] sm:$0xff]   ;;  %v11274_v1 = vpop.f32.mrb[41].mxu0 }
 0x1a5   : > { %v10390_v53 = vcombine.low %v3124_v41, %v3138_v48  ;;  %9176 = vmatmul.mubr.bf16.gmra.mrb[140].mxu1 %v10438_v42  ;;  %v3682_v5 = vshll.u32 %v10496_v63, 16  ;;  %v3687_v6 = vshrl.u32 %v10497_v2, 16  ;;  %v3690_v8 = vshll.u32 %v10497_v2, 16  ;;  %11925 = vmatprep.subr.bf16.mxu1 %v12542_v45  ;;  %v12544_v58 = vld [vmem:[%s15253_s1 + $0xa80] sm:$0xff]   ;;  %v12545_v63 = vld [vmem:[%s15253_s1 + $0xa48] sm:$0xff]   ;;  %v11276_v2 = vpop.f32.mrb[42].mxu0 }
 0x1a6   : > { %v14520_v7 = vadd.f32 %v11312_v59, %v8320_v61  ;;  %v3696_v9 = vshll.u32 %v10498_v52, 16  ;;  %v3675_v10 = vrot.slane %v3673_v3, 4  ;;  %v3678_v15 = vrot.slane %v3676_v4, 5  ;;  %v12546_v4 = vld [vmem:[%s15253_s1 + $0xac8] sm:$0xff]  }
 0x1a7   : > { %9111 = vmatmul.mubr.bf16.gmra.mrb[140].mxu0 %v10390_v53  ;;  %v3684_v11 = vrot.slane %v3682_v5, 5  ;;  %v3689_v12 = vrot.slane %v3687_v6, 4  ;;  %v3692_v22 = vrot.slane %v3690_v8, 5  ;;  %v3525_v25 = vshrl.u32 %v10475_v17, 16  ;;  %v12547_v8 = vld [vmem:[%s15253_s1 + $0xa08] sm:$0xff]  }
 0x1a8   : > { %9216 = vmatprep.mubr.bf16.mxu0 %v12539_v60  ;;  %v3698_v16 = vrot.slane %v3696_v9, 5  ;;  %v3679_v20 = vor.u32 %v3678_v15, %v3675_v10  ;;  %v3528_v26 = vshll.u32 %v10475_v17, 16  ;;  %v3534_v29 = vshll.u32 %v10476_v19, 16  ;;  %v11314_v60 = vpop.f32.mrb[41].mxu1  ;;  %v11277_v9 = vpop.f32.mrb[43].mxu0 }
 0x1a9   : > { %v3693_v27 = vor.u32 %v3692_v22, %v3689_v12  ;;  %v3539_v31 = vshrl.u32 %v10477_v21, 16  ;;  %v3542_v14 = vshll.u32 %v10477_v21, 16  ;;  %v3527_v35 = vrot.slane %v3525_v25, 4  ;;  %v11316_v5 = vpop.f32.mrb[42].mxu1  ;;  %v10499_v22 = vld [vmem:[%s12882_s7 + $0x248] sm:$0xf] }
 0x1aa   : > { %v3680_v33 = vrot.slane %v3679_v20, 4  ;;  %v3530_v36 = vrot.slane %v3528_v26, 5  ;;  %v3548_v37 = vshll.u32 %v10478_v24, 16  ;;  %v3536_v39 = vrot.slane %v3534_v29, 5  ;;  %v10501_v19 = vld [vmem:[%s12882_s7 + $0x250] sm:$0xf] }
 0x1ab   : > { %v3694_v38 = vrot.slane %v3693_v27, 4  ;;  %v3541_v40 = vrot.slane %v3539_v31, 4  ;;  %v3544_v41 = vrot.slane %v3542_v14, 5  ;;  %v11275_v59 = vadd.f32 %v11274_v1, %v11273_v51  ;;  %v10502_v20 = vld [vmem:[%s12882_s7 + $0x254] sm:$0x1] }
 0x1ac   : > { %v3685_v42 = vsel %vm12893_vm2, %v3680_v33, %v3684_v11  ;;  %v3531_v43 = vor.u32 %v3530_v36, %v3527_v35  ;;  %v3550_v18 = vrot.slane %v3548_v37, 5  ;;  %v11315_v62 = vadd.f32 %v11314_v60, %v11313_v55  ;;  %v11317_v11 = vpop.f32.mrb[43].mxu1  ;;  %v12550_v33 = vld [vmem:[%s12882_s7 + $0x248] ss:$8 sps:$4 sm:$0xff]  }
 0x1ad   : > { %v3699_v48 = vsel %vm12893_vm2, %v3694_v38, %v3698_v16  ;;  %v3545_v49 = vor.u32 %v3544_v41, %v3541_v40  ;;  %v8325_v3 = vadd.f32 %v11275_v59, %v14341_v28  ;;  %v12548_v28 = vld [vmem:[%s15253_s1 + $0xa88] sm:$0xff]   ;;  %v11278_v15 = vadd.f32 %v11277_v9, %v11276_v2  ;;  %v10479_v38 = vld [vmem:[%s12882_s7 + $0x1f8] sm:$0xf]  ;;  %v10480_v40 = vld [vmem:[%s12882_s7 + $0x1fc] sm:$0x1]  ;;  %v11319_v9 = vpop.f32.mrb[44].mxu1 }
 0x1ae   : > { %v10511_v53 = vcombine.low %v3685_v42, %v3699_v48  ;;  %v3532_v54 = vrot.slane %v3531_v43, 4  ;;  %v11318_v12 = vadd.f32 %v11317_v11, %v11316_v5  ;;  %v10500_v16 = vld [vmem:[%s12882_s7 + $0x24c] sm:$0x1]  ;;  %v3701_v21 = vshrl.u32 %v10499_v22, 16  ;;  %v10481_v41 = vld [vmem:[%s12882_s7 + $0x200] sm:$0xf] }
 0x1af   : > { %9217 = vmatmul.mubr.bf16.vlgmr.msra.gmra.mrb[144].mxu0 %v12540_v13  ;;  %v3546_v57 = vrot.slane %v3545_v49, 4  ;;  %v14557_v10 = vadd.f32 %v11315_v62, %v8325_v3  ;;  %v12549_v13 = vld [vmem:[%s12882_s7 + $0x298] ss:$8 sps:$4 sm:$0xff]   ;;  %v8328_v17 = vadd.f32 %v11278_v15, %v14360_v46  ;;  %v3704_v24 = vshll.u32 %v10499_v22, 16  ;;  %v10482_v42 = vld [vmem:[%s12882_s7 + $0x204] sm:$0x1] }
 0x1b0   : > { %11886 = vmatpush3.bf16.msra.mxu0 %v12543_v50  ;;  %9281 = vmatprep.mubr.bf16.mxu1 %v10511_v53  ;;  %v3537_v61 = vsel %vm12893_vm2, %v3532_v54, %v3536_v39  ;;  %v3710_v25 = vshll.u32 %v10500_v16, 16  ;;  %v3715_v26 = vshrl.u32 %v10501_v19, 16  ;;  %v3718_v27 = vshll.u32 %v10501_v19, 16  ;;  %v12551_v49 = vld [vmem:[%s15253_s1 + $0xa50] sm:$0xff]   ;;  %v11320_v11 = vpop.f32.mrb[45].mxu1 }
 0x1b1   : > { %v3551_v52 = vsel %vm12893_vm2, %v3546_v57, %v3550_v18  ;;  %11887 = vmatprep.subr.bf16.mxu0 %v12545_v63  ;;  %9224 = vmatprep.mubr.bf16.mxu0 %v12549_v13  ;;  %v3724_v29 = vshll.u32 %v10502_v20, 16  ;;  %v14568_v31 = vadd.f32 %v11318_v12, %v8328_v17  ;;  %v3703_v14 = vrot.slane %v3701_v21, 4  ;;  %v12552_v63 = vld [vmem:[%s15253_s1 + $0xad0] sm:$0xff]   ;;  %v12555_v12 = vld [vmem:[%s15253_s1 + $0xa58] sm:$0xff]   ;;  %v11322_v21 = vpop.f32.mrb[46].mxu1 }
 0x1b2   : > { %v10491_v6 = vcombine.low %v3537_v61, %v3551_v52  ;;  %v3706_v32 = vrot.slane %v3704_v24, 5  ;;  %v3712_v46 = vrot.slane %v3710_v25, 5  ;;  %v3717_v35 = vrot.slane %v3715_v26, 4  ;;  %v12553_v3 = vld [vmem:[%s15253_s1 + $0xa10] sm:$0xff]   ;;  %v12556_v17 = vld [vmem:[%s15253_s1 + $0xad8] sm:$0xff]  }
 0x1b3   : > { %v3720_v36 = vrot.slane %v3718_v27, 5  ;;  %v3726_v37 = vrot.slane %v3724_v29, 5  ;;  %v3553_v18 = vshrl.u32 %v10479_v38, 16  ;;  %v3556_v45 = vshll.u32 %v10479_v38, 16  ;;  %v12557_v26 = vld [vmem:[%s15253_s1 + $0xa18] sm:$0xff]  }
 0x1b4   : > { %9282 = vmatmul.mubr.bf16.vlgmr.msra.gmra.mrb[144].mxu1 %v10491_v6  ;;  %11888 = vmatpush3.bf16.msra.mxu0 %v12547_v8  ;;  %v3707_v39 = vor.u32 %v3706_v32, %v3703_v14  ;;  %v3562_v48 = vshll.u32 %v10480_v40, 16  ;;  %v3567_v51 = vshrl.u32 %v10481_v41, 16  ;;  %v3570_v53 = vshll.u32 %v10481_v41, 16  ;;  %v12554_v8 = vld [vmem:[%s15253_s1 + $0xa90] sm:$0xff]   ;;  %v12558_v14 = vld [vmem:[%s15253_s1 + $0xa98] sm:$0xff]  }
 0x1b5   : > { %11926 = vmatpush3.bf16.msra.mxu1 %v12544_v58  ;;  %v3721_v43 = vor.u32 %v3720_v36, %v3717_v35  ;;  %v3576_v54 = vshll.u32 %v10482_v42, 16  ;;  %v3555_v1 = vrot.slane %v3553_v18, 4  ;;  %v3558_v57 = vrot.slane %v3556_v45, 5  ;;  %11889 = vmatprep.subr.bf16.mxu0 %v12551_v49  ;;  %v10503_v36 = vld [vmem:[%s12882_s7 + $0x258] sm:$0xf] }
 0x1b6   : > { %11927 = vmatprep.subr.bf16.mxu1 %v12546_v4  ;;  %v3708_v50 = vrot.slane %v3707_v39, 4  ;;  %v3564_v58 = vrot.slane %v3562_v48, 5  ;;  %v3569_v60 = vrot.slane %v3567_v51, 4  ;;  %v3572_v61 = vrot.slane %v3570_v53, 5  ;;  %v11279_v4 = vpop.f32.mrb[44].mxu0 }
 0x1b7   : > { %9225 = vmatmul.mubr.bf16.gmra.mrb[148].mxu0 %v12550_v33  ;;  %v3722_v55 = vrot.slane %v3721_v43, 4  ;;  %v3578_v62 = vrot.slane %v3576_v54, 5  ;;  %v3559_v52 = vor.u32 %v3558_v57, %v3555_v1  ;;  %v11280_v15 = vpop.f32.mrb[45].mxu0  ;;  %v11321_v16 = vadd.f32 %v11320_v11, %v11319_v9  ;;  %v11323_v33 = vpop.f32.mrb[47].mxu1  ;;  %v10504_v38 = vld [vmem:[%s12882_s7 + $0x25c] sm:$0x1] }
 0x1b8   : > { %v3713_v59 = vsel %vm12893_vm2, %v3708_v50, %v3712_v46  ;;  %v3573_v6 = vor.u32 %v3572_v61, %v3569_v60  ;;  %11890 = vmatpush3.bf16.msra.mxu0 %v12553_v3  ;;  %v11281_v22 = vadd.f32 %v11280_v15, %v11279_v4  ;;  %v11282_v20 = vpop.f32.mrb[46].mxu0  ;;  %v11324_v35 = vadd.f32 %v11323_v33, %v11322_v21  ;;  %v10505_v39 = vld [vmem:[%s12882_s7 + $0x260] sm:$0xf]  ;;  %v10506_v40 = vld [vmem:[%s12882_s7 + $0x264] sm:$0x1] }
 0x1b9   : > { %11928 = vmatpush3.bf16.msra.mxu1 %v12548_v28  ;;  %v3727_v2 = vsel %vm12893_vm2, %v3722_v55, %v3726_v37  ;;  %v3560_v28 = vrot.slane %v3559_v52, 4  ;;  %11891 = vmatprep.subr.bf16.mxu0 %v12555_v12  ;;  %v11283_v27 = vpop.f32.mrb[47].mxu0  ;;  %v3729_v41 = vshrl.u32 %v10503_v36, 16  ;;  %v3732_v42 = vshll.u32 %v10503_v36, 16  ;;  %v12560_v50 = vld [vmem:[%s12882_s7 + $0x258] ss:$8 sps:$4 sm:$0xff]  }
 0x1ba   : > { %v10512_v5 = vcombine.low %v3713_v59, %v3727_v2  ;;  %11929 = vmatprep.subr.bf16.mxu1 %v12552_v63  ;;  %v3574_v13 = vrot.slane %v3573_v6, 4  ;;  %v8333_v25 = vadd.f32 %v11281_v22, %v14396_v56  ;;  %v11284_v32 = vadd.f32 %v11283_v27, %v11282_v20  ;;  %v12559_v56 = vld [vmem:[%s12882_s7 + $0x2a8] ss:$8 sps:$4 sm:$0xff]   ;;  %v10486_v61 = vld [vmem:[%s12882_s7 + $0x214] sm:$0x1]  ;;  %v12561_v52 = vld [vmem:[%s15253_s1 + $0xa60] sm:$0xff]  }
 0x1bb   : > { %v3565_v19 = vsel %vm12893_vm2, %v3560_v28, %v3564_v58  ;;  %9232 = vmatprep.mubr.bf16.mxu0 %v12559_v56  ;;  %v3738_v43 = vshll.u32 %v10504_v38, 16  ;;  %v3743_v18 = vshrl.u32 %v10505_v39, 16  ;;  %v3746_v48 = vshll.u32 %v10505_v39, 16  ;;  %v10483_v55 = vld [vmem:[%s12882_s7 + $0x208] sm:$0xf] }
 0x1bc   : > { %9289 = vmatprep.mubr.bf16.mxu1 %v10512_v5  ;;  %v3579_v24 = vsel %vm12893_vm2, %v3574_v13, %v3578_v62  ;;  %v14608_v46 = vadd.f32 %v11321_v16, %v8333_v25  ;;  %11892 = vmatpush3.bf16.msra.mxu0 %v12557_v26  ;;  %v8336_v37 = vadd.f32 %v11284_v32, %v14415_v0  ;;  %v3752_v49 = vshll.u32 %v10506_v40, 16  ;;  %v10484_v58 = vld [vmem:[%s12882_s7 + $0x20c] sm:$0x1]  ;;  %v10485_v59 = vld [vmem:[%s12882_s7 + $0x210] sm:$0xf]  ;;  %v11341_v25 = vpop.f32.mrb[48].mxu0 }
 0x1bd   : > { %11930 = vmatpush3.bf16.msra.mxu1 %v12554_v8  ;;  %v10492_v29 = vcombine.low %v3565_v19, %v3579_v24  ;;  %v3731_v51 = vrot.slane %v3729_v41, 4  ;;  %v3734_v0 = vrot.slane %v3732_v42, 5  ;;  %v3740_v53 = vrot.slane %v3738_v43, 5  ;;  %v12562_v8 = vld [vmem:[%s15253_s1 + $0xae0] sm:$0xff]   ;;  %11893 = vmatprep.subr.bf16.mxu0 %v12561_v52  ;;  %v11342_v32 = vpop.f32.mrb[49].mxu0  ;;  %v12565_v36 = vld [vmem:[%s15253_s1 + $0xa68] sm:$0xff]  }
 0x1be   : > { %11931 = vmatprep.subr.bf16.mxu1 %v12556_v17  ;;  %v14616_v45 = vadd.f32 %v11324_v35, %v8336_v37  ;;  %v3745_v54 = vrot.slane %v3743_v18, 4  ;;  %v3748_v1 = vrot.slane %v3746_v48, 5  ;;  %v3754_v57 = vrot.slane %v3752_v49, 5  ;;  %v12563_v24 = vld [vmem:[%s15253_s1 + $0xa20] sm:$0xff]   ;;  %v12566_v37 = vld [vmem:[%s15253_s1 + $0xae8] sm:$0xff]   ;;  %v11344_v40 = vpop.f32.mrb[50].mxu0 }
 0x1bf   : > { %9290 = vmatmul.mubr.bf16.gmra.mrb[148].mxu1 %v10492_v29  ;;  %9233 = vmatmul.mubr.bf16.gmra.mrb[152].mxu0 %v12560_v50  ;;  %v3735_v60 = vor.u32 %v3734_v0, %v3731_v51  ;;  %v3581_v62 = vshrl.u32 %v10483_v55, 16  ;;  %v3584_v63 = vshll.u32 %v10483_v55, 16  ;;  %v3590_v2 = vshll.u32 %v10484_v58, 16  ;;  %v12564_v29 = vld [vmem:[%s15253_s1 + $0xaa0] sm:$0xff]   ;;  %v12567_v18 = vld [vmem:[%s15253_s1 + $0xa28] sm:$0xff]   ;;  %v11345_v48 = vpop.f32.mrb[51].mxu0 }
 0x1c0   : > { %v3749_v3 = vor.u32 %v3748_v1, %v3745_v54  ;;  %v3595_v4 = vshrl.u32 %v10485_v59, 16  ;;  %v3598_v5 = vshll.u32 %v10485_v59, 16  ;;  %v3604_v6 = vshll.u32 %v10486_v61, 16  ;;  %11894 = vmatpush3.bf16.msra.mxu0 %v12563_v24  ;;  %v12568_v50 = vld [vmem:[%s15253_s1 + $0xaa8] sm:$0xff]   ;;  %v12569_v54 = vld [vmem:[%s12882_s7 + $0x2b8] ss:$8 sps:$4 sm:$0xff]  }
 0x1c1   : > { %11932 = vmatpush3.bf16.msra.mxu1 %v12558_v14  ;;  %v3736_v9 = vrot.slane %v3735_v60, 4  ;;  %v3583_v28 = vrot.slane %v3581_v62, 4  ;;  %v3586_v15 = vrot.slane %v3584_v63, 5  ;;  %v3592_v11 = vrot.slane %v3590_v2, 5  ;;  %v11381_v14 = vpop.f32.mrb[48].mxu1  ;;  %11895 = vmatprep.subr.bf16.mxu0 %v12565_v36 }
 0x1c2   : > { %v3750_v12 = vrot.slane %v3749_v3, 4  ;;  %v3597_v13 = vrot.slane %v3595_v4, 4  ;;  %v3600_v22 = vrot.slane %v3598_v5, 5  ;;  %v3606_v16 = vrot.slane %v3604_v6, 5  ;;  %11933 = vmatprep.subr.bf16.mxu1 %v12562_v8  ;;  %v11382_v56 = vpop.f32.mrb[49].mxu1  ;;  %9240 = vmatprep.mubr.bf16.mxu0 %v12569_v54 }
 0x1c3   : > { %v3741_v17 = vsel %vm12893_vm2, %v3736_v9, %v3740_v53  ;;  %v3587_v19 = vor.u32 %v3586_v15, %v3583_v28  ;;  %v11343_v35 = vadd.f32 %v11342_v32, %v11341_v25  ;;  %v11383_v39 = vadd.f32 %v11382_v56, %v11381_v14  ;;  %v11384_v41 = vpop.f32.mrb[50].mxu1  ;;  %v10507_v1 = vld [vmem:[%s12882_s7 + $0x268] sm:$0xf]  ;;  %v10509_v58 = vld [vmem:[%s12882_s7 + $0x270] sm:$0xf] }
 0x1c4   : > { %v3755_v20 = vsel %vm12893_vm2, %v3750_v12, %v3754_v57  ;;  %v3601_v21 = vor.u32 %v3600_v22, %v3597_v13  ;;  %v11346_v51 = vadd.f32 %v11345_v48, %v11344_v40  ;;  %v11385_v0 = vpop.f32.mrb[51].mxu1  ;;  %11896 = vmatpush3.bf16.msra.mxu0 %v12567_v18  ;;  %v10508_v57 = vld [vmem:[%s12882_s7 + $0x26c] sm:$0x1]  ;;  %v10510_v59 = vld [vmem:[%s12882_s7 + $0x274] sm:$0x1]  ;;  %v3757_v60 = vshrl.u32 %v10507_v1, 16 }
 0x1c5   : > { %v10513_v26 = vcombine.low %v3741_v17, %v3755_v20  ;;  %v3588_v27 = vrot.slane %v3587_v19, 4  ;;  %11934 = vmatpush3.bf16.msra.mxu1 %v12564_v29  ;;  %v8439_v43 = vadd.f32 %v11343_v35, %v14458_v30  ;;  %v11386_v30 = vadd.f32 %v11385_v0, %v11384_v41  ;;  %v12570_v8 = vld [vmem:[%s12882_s7 + $0x268] ss:$8 sps:$4 sm:$0xff]   ;;  %v10487_v15 = vld [vmem:[%s12882_s7 + $0x218] sm:$0xf] }
 0x1c6   : > { %v3602_v33 = vrot.slane %v3601_v21, 4  ;;  %11935 = vmatprep.subr.bf16.mxu1 %v12566_v37  ;;  %v8442_v55 = vadd.f32 %v11346_v51, %v14470_v44  ;;  %v3760_v61 = vshll.u32 %v10507_v1, 16  ;;  %v3766_v62 = vshll.u32 %v10508_v57, 16  ;;  %v10489_v13 = vld [vmem:[%s12882_s7 + $0x220] sm:$0xf]  ;;  %v12571_v25 = vld [vmem:[%s15253_s1 + $0xa70] sm:$0xff]  }
 0x1c7   : > { %9297 = vmatprep.mubr.bf16.mxu1 %v10513_v26  ;;  %v3593_v38 = vsel %vm12893_vm2, %v3588_v27, %v3592_v11  ;;  %v14656_v53 = vadd.f32 %v11383_v39, %v8439_v43  ;;  %v3771_v63 = vshrl.u32 %v10509_v58, 16  ;;  %v3774_v52 = vshll.u32 %v10509_v58, 16  ;;  %v10488_v11 = vld [vmem:[%s12882_s7 + $0x21c] sm:$0x1]  ;;  %9241 = vmatmul.mubr.bf16.gmra.mrb[156].mxu0 %v12570_v8  ;;  %v10490_v22 = vld [vmem:[%s12882_s7 + $0x224] sm:$0x1] }
 0x1c8   : > { %v3607_v42 = vsel %vm12893_vm2, %v3602_v33, %v3606_v16  ;;  %v14664_v2 = vadd.f32 %v11386_v30, %v8442_v55  ;;  %v3780_v3 = vshll.u32 %v10510_v59, 16  ;;  %v3759_v44 = vrot.slane %v3757_v60, 4  ;;  %11897 = vmatprep.subr.bf16.mxu0 %v12571_v25  ;;  %v12572_v39 = vld [vmem:[%s15253_s1 + $0xaf0] sm:$0xff]   ;;  %v11347_v43 = vpop.f32.mrb[52].mxu0  ;;  %v12575_v57 = vld [vmem:[%s15253_s1 + $0xa78] sm:$0xff]  }
 0x1c9   : > { %v10493_v49 = vcombine.low %v3593_v38, %v3607_v42  ;;  %11936 = vmatpush3.bf16.msra.mxu1 %v12568_v50  ;;  %v3762_v4 = vrot.slane %v3760_v61, 5  ;;  %v3768_v5 = vrot.slane %v3766_v62, 5  ;;  %v3773_v6 = vrot.slane %v3771_v63, 4  ;;  %v12573_v42 = vld [vmem:[%s15253_s1 + $0xa30] sm:$0xff]   ;;  %v11387_v50 = vpop.f32.mrb[52].mxu1  ;;  %v11348_v51 = vpop.f32.mrb[53].mxu0 }
 0x1ca   : > { %v3776_v9 = vrot.slane %v3774_v52, 5  ;;  %v3782_v28 = vrot.slane %v3780_v3, 5  ;;  %v3609_v16 = vshrl.u32 %v10487_v15, 16  ;;  %v3612_v17 = vshll.u32 %v10487_v15, 16  ;;  %11937 = vmatprep.subr.bf16.mxu1 %v12572_v39  ;;  %11898 = vmatpush3.bf16.msra.mxu0 %v12573_v42  ;;  %v11388_v54 = vpop.f32.mrb[53].mxu1  ;;  %v11350_v58 = vpop.f32.mrb[54].mxu0 }
 0x1cb   : > { %9298 = vmatmul.mubr.bf16.gmra.mrb[152].mxu1 %v10493_v49  ;;  %v3763_v12 = vor.u32 %v3762_v4, %v3759_v44  ;;  %v3618_v20 = vshll.u32 %v10488_v11, 16  ;;  %v3623_v21 = vshrl.u32 %v10489_v13, 16  ;;  %v3626_v24 = vshll.u32 %v10489_v13, 16  ;;  %v12574_v49 = vld [vmem:[%s15253_s1 + $0xab0] sm:$0xff]   ;;  %v12576_v61 = vld [vmem:[%s15253_s1 + $0xaf8] sm:$0xff]   ;;  %v11390_v62 = vpop.f32.mrb[54].mxu1  ;;  %11899 = vmatprep.subr.bf16.mxu0 %v12575_v57 }
 0x1cc   : > { %v3777_v19 = vor.u32 %v3776_v9, %v3773_v6  ;;  %v3611_v27 = vrot.slane %v3609_v16, 4  ;;  %v3614_v29 = vrot.slane %v3612_v17, 5  ;;  %v3632_v14 = vshll.u32 %v10490_v22, 16  ;;  %v12577_v52 = vld [vmem:[%s15253_s1 + $0xa38] sm:$0xff]   ;;  %v11351_v3 = vpop.f32.mrb[55].mxu0  ;;  %v12582_v39 = vld [vmem:[%s15253_s1 + $0xbc0] sm:$0xff]  }
 0x1cd   : > { %v3764_v26 = vrot.slane %v3763_v12, 4  ;;  %v3620_v33 = vrot.slane %v3618_v20, 5  ;;  %v3625_v35 = vrot.slane %v3623_v21, 4  ;;  %v3628_v56 = vrot.slane %v3626_v24, 5  ;;  %11938 = vmatpush3.bf16.msra.mxu1 %v12574_v49  ;;  %v10535_v6 = vld [vmem:[%s12882_s7 + $0x1e8] sm:$0xe] }
 0x1ce   : > { %v3778_v32 = vrot.slane %v3777_v19, 4  ;;  %v3615_v37 = vor.u32 %v3614_v29, %v3611_v27  ;;  %v3634_v38 = vrot.slane %v3632_v14, 5  ;;  %v11349_v30 = vadd.f32 %v11348_v51, %v11347_v43  ;;  %11939 = vmatprep.subr.bf16.mxu1 %v12576_v61  ;;  %v10536_v8 = vld [vmem:[%s12882_s7 + $0x1ec] sm:$0x1]  ;;  %11900 = vmatpush3.bf16.msra.mxu0 %v12577_v52  ;;  %v10538_v15 = vld [vmem:[%s12882_s7 + $0x1f4] sm:$0x1] }
 0x1cf   : > { %v3769_v36 = vsel %vm12893_vm2, %v3764_v26, %v3768_v5  ;;  %v3629_v41 = vor.u32 %v3628_v56, %v3625_v35  ;;  %v11389_v1 = vadd.f32 %v11388_v54, %v11387_v50  ;;  %v11352_v4 = vadd.f32 %v11351_v3, %v11350_v58  ;;  %v11391_v5 = vpop.f32.mrb[55].mxu1  ;;  %v12579_v19 = vld [vmem:[%s12882_s7 + $0x60] ss:$8 sps:$4 sm:$0xff]   ;;  %v10516_v21 = vld [vmem:[%s12882_s7 + $0x28c] sm:$0x1] }
 0x1d0   : > { %v3783_v40 = vsel %vm12893_vm2, %v3778_v32, %v3782_v28  ;;  %v3616_v48 = vrot.slane %v3615_v37, 4  ;;  %v8447_v60 = vadd.f32 %v11349_v30, %v14509_v34  ;;  %v12578_v34 = vld [vmem:[%s15253_s1 + $0xab8] sm:$0xff]   ;;  %v11392_v9 = vadd.f32 %v11391_v5, %v11390_v62  ;;  %v10537_v28 = vld [vmem:[%s12882_s7 + $0x1f0] sm:$0xe]  ;;  %v10515_v20 = vld [vmem:[%s12882_s7 + $0x288] sm:$0xf] }
 0x1d1   : > { %v10514_v18 = vcombine.low %v3769_v36, %v3783_v40  ;;  %v3630_v0 = vrot.slane %v3629_v41, 4  ;;  %v10551_v11 = vrot.slane %v10535_v6, 9  ;;  %v3986_v12 = vrot.slane %v10536_v8, 5  ;;  %11940 = vmatpush3.bf16.msra.mxu1 %v12578_v34  ;;  %v10517_v26 = vld [vmem:[%s12882_s7 + $0x290] sm:$0xf]  ;;  %v12581_v56 = vld [vmem:[%s15253_s1 + $0xb40] sm:$0xff]  }
 0x1d2   : > { %v3621_v55 = vsel %vm12893_vm2, %v3616_v48, %v3620_v33  ;;  %v14701_v44 = vadd.f32 %v11389_v1, %v8447_v60  ;;  %v8450_v13 = vadd.f32 %v11352_v4, %v14520_v7  ;;  %v10552_v22 = vrot.slane %v10537_v28, 9  ;;  %v10518_v27 = vld [vmem:[%s12882_s7 + $0x294] sm:$0x1]  ;;  %v12580_v43 = vld [vmem:[%s12882_s7 + $0x10] ss:$8 sps:$4 sm:$0xff]   ;;  %11965 = vmatprep.subr.bf16.mxu0 %v12581_v56  ;;  %12005 = vmatprep.subr.bf16.mxu1 %v12582_v39  ;;  %v12584_v49 = vld [vmem:[%s15253_s1 + $0xb80] sm:$0xff]  }
 0x1d3   : > { %9305 = vmatprep.mubr.bf16.mxu1 %v10514_v18  ;;  %v3635_v59 = vsel %vm12893_vm2, %v3630_v0, %v3634_v38  ;;  %v3990_v16 = vrot.slane %v10538_v15, 5  ;;  %v3987_v17 = vsel %vm13051_vm5, %v10551_v11, %v3986_v12  ;;  %v3821_v29 = vshrl.u32 %v10515_v20, 16  ;;  %v11353_v0 = vpop.f32.mrb[56].mxu0  ;;  %v12583_v54 = vld [vmem:[%s15253_s1 + $0xb00] sm:$0xff]   ;;  %v12586_v60 = vld [vmem:[%s15253_s1 + $0xbc8] sm:$0xff]  }
 0x1d4   : > { %v10494_v63 = vcombine.low %v3621_v55, %v3635_v59  ;;  %v14716_v24 = vadd.f32 %v11392_v9, %v8450_v13  ;;  %v3824_v14 = vshll.u32 %v10515_v20, 16  ;;  %v3830_v7 = vshll.u32 %v10516_v21, 16  ;;  %v11393_v55 = vpop.f32.mrb[56].mxu1  ;;  %v11354_v1 = vpop.f32.mrb[57].mxu0  ;;  %v12585_v4 = vld [vmem:[%s15253_s1 + $0xb48] sm:$0xff]   ;;  %v12591_v21 = vld [vmem:[%s15253_s1 + $0xb50] sm:$0xff]  }
 0x1d5   : > { %v3991_v25 = vsel %vm13051_vm5, %v10552_v22, %v3990_v16  ;;  %v3835_v33 = vshrl.u32 %v10517_v26, 16  ;;  %v3838_v35 = vshll.u32 %v10517_v26, 16  ;;  %v3823_v36 = vrot.slane %v3821_v29, 4  ;;  %v11394_v59 = vpop.f32.mrb[57].mxu1  ;;  %v12587_v6 = vld [vmem:[%s15253_s1 + $0xb08] sm:$0xff]   ;;  %v12592_v26 = vld [vmem:[%s15253_s1 + $0xbd0] sm:$0xff]  }
 0x1d6   : > { %9306 = vmatmul.mubr.bf16.gmra.mrb[156].mxu1 %v10494_v63  ;;  %v10559_v32 = vcombine.low %v3987_v17, %v3991_v25  ;;  %v3826_v37 = vrot.slane %v3824_v14, 5  ;;  %v3844_v38 = vshll.u32 %v10518_v27, 16  ;;  %v3832_v40 = vrot.slane %v3830_v7, 5  ;;  %v11356_v63 = vpop.f32.mrb[58].mxu0  ;;  %v11396_v52 = vpop.f32.mrb[58].mxu1  ;;  %v12588_v8 = vld [vmem:[%s15253_s1 + $0xb88] sm:$0xff]  }
 0x1d7   : > { %9411 = vmatprep.mubr.bf16.mxu1 %v12579_v19  ;;  %v3837_v41 = vrot.slane %v3835_v33, 4  ;;  %v3840_v42 = vrot.slane %v3838_v35, 5  ;;  %v11355_v58 = vadd.f32 %v11354_v1, %v11353_v0  ;;  %v11395_v62 = vadd.f32 %v11394_v59, %v11393_v55  ;;  %v11357_v5 = vpop.f32.mrb[59].mxu0  ;;  %v11397_v28 = vpop.f32.mrb[59].mxu1  ;;  %v10539_v11 = vld [vmem:[%s12882_s7 + $0x1f8] sm:$0xe] }
 0x1d8   : > { %9346 = vmatprep.mubr.bf16.mxu0 %v10559_v32  ;;  %v3827_v18 = vor.u32 %v3826_v37, %v3823_v36  ;;  %v3846_v48 = vrot.slane %v3844_v38, 5  ;;  %v11358_v9 = vadd.f32 %v11357_v5, %v11356_v63  ;;  %v10540_v12 = vld [vmem:[%s12882_s7 + $0x1fc] sm:$0x1]  ;;  %v10541_v13 = vld [vmem:[%s12882_s7 + $0x200] sm:$0xe]  ;;  %v10553_v17 = vrot.slane %v10539_v11, 9 }
 0x1d9   : > { %v3841_v50 = vor.u32 %v3840_v42, %v3837_v41  ;;  %v8455_v34 = vadd.f32 %v11355_v58, %v14557_v10  ;;  %v11398_v10 = vadd.f32 %v11397_v28, %v11396_v52  ;;  %v10542_v16 = vld [vmem:[%s12882_s7 + $0x204] sm:$0x1]  ;;  %v3994_v19 = vrot.slane %v10540_v12, 5  ;;  %v12589_v29 = vld [vmem:[%s12882_s7 + $0x70] ss:$8 sps:$4 sm:$0xff]   ;;  %v11399_v1 = vpop.f32.mrb[60].mxu1 }
 0x1da   : > { %v3828_v51 = vrot.slane %v3827_v18, 4  ;;  %v8458_v22 = vadd.f32 %v11358_v9, %v14568_v31  ;;  %v10554_v20 = vrot.slane %v10541_v13, 9  ;;  %v3998_v25 = vrot.slane %v10542_v16, 5  ;;  %v10519_v14 = vld [vmem:[%s12882_s7 + $0x298] sm:$0xf]  ;;  %v12593_v41 = vld [vmem:[%s15253_s1 + $0xb10] sm:$0xff]  }
 0x1db   : > { %v3842_v30 = vrot.slane %v3841_v50, 4  ;;  %v14752_v15 = vadd.f32 %v11395_v62, %v8455_v34  ;;  %v3995_v31 = vsel %vm13051_vm5, %v10553_v17, %v3994_v19  ;;  %v10520_v32 = vld [vmem:[%s12882_s7 + $0x29c] sm:$0x1]  ;;  %v10521_v33 = vld [vmem:[%s12882_s7 + $0x2a0] sm:$0xf]  ;;  %v3849_v56 = vshrl.u32 %v10519_v14, 16 }
 0x1dc   : > { %v3833_v57 = vsel %vm12893_vm2, %v3828_v51, %v3832_v40  ;;  %v14765_v27 = vadd.f32 %v11398_v10, %v8458_v22  ;;  %v3999_v7 = vsel %vm13051_vm5, %v10554_v20, %v3998_v25  ;;  %v10522_v35 = vld [vmem:[%s12882_s7 + $0x2a4] sm:$0x1]  ;;  %v3852_v36 = vshll.u32 %v10519_v14, 16  ;;  %v12590_v0 = vld [vmem:[%s12882_s7 + $0x20] ss:$8 sps:$4 sm:$0xff]   ;;  %v11400_v62 = vpop.f32.mrb[61].mxu1 }
 0x1dd   : > { %v3847_v61 = vsel %vm12893_vm2, %v3842_v30, %v3846_v48  ;;  %v10560_v37 = vcombine.low %v3995_v31, %v3999_v7  ;;  %v3858_v38 = vshll.u32 %v10520_v32, 16  ;;  %v3863_v39 = vshrl.u32 %v10521_v33, 16  ;;  %v12594_v48 = vld [vmem:[%s15253_s1 + $0xb90] sm:$0xff]   ;;  %v11359_v30 = vpop.f32.mrb[60].mxu0  ;;  %v12597_v28 = vld [vmem:[%s15253_s1 + $0xb18] sm:$0xff]   ;;  %v12602_v7 = vld [vmem:[%s15253_s1 + $0xbe0] sm:$0xff]  }
 0x1de   : > { %9412 = vmatmul.mubr.bf16.vlgmr.msra.gmra.mrb[160].mxu1 %v12580_v43  ;;  %v10531_v3 = vcombine.low %v3833_v57, %v3847_v61  ;;  %v3866_v40 = vshll.u32 %v10521_v33, 16  ;;  %v3851_v42 = vrot.slane %v3849_v56, 4  ;;  %v3854_v43 = vrot.slane %v3852_v36, 5  ;;  %v11360_v59 = vpop.f32.mrb[61].mxu0  ;;  %v10543_v22 = vld [vmem:[%s12882_s7 + $0x208] sm:$0xe] }
 0x1df   : > { %12006 = vmatpush3.bf16.msra.mxu1 %v12584_v49  ;;  %9419 = vmatprep.mubr.bf16.mxu1 %v12589_v29  ;;  %v3872_v18 = vshll.u32 %v10522_v35, 16  ;;  %v3860_v49 = vrot.slane %v3858_v38, 5  ;;  %v3865_v50 = vrot.slane %v3863_v39, 4  ;;  %v11361_v61 = vadd.f32 %v11360_v59, %v11359_v30  ;;  %v11362_v34 = vpop.f32.mrb[62].mxu0  ;;  %v10544_v17 = vld [vmem:[%s12882_s7 + $0x20c] sm:$0x1] }
 0x1e0   : > { %12007 = vmatprep.subr.bf16.mxu1 %v12586_v60  ;;  %9347 = vmatmul.mubr.bf16.vlgmr.msra.gmra.mrb[160].mxu0 %v10531_v3  ;;  %v3868_v51 = vrot.slane %v3866_v40, 5  ;;  %v11401_v52 = vadd.f32 %v11400_v62, %v11399_v1  ;;  %v12595_v3 = vld [vmem:[%s15253_s1 + $0xb58] sm:$0xff]   ;;  %v11363_v10 = vpop.f32.mrb[63].mxu0  ;;  %v10545_v19 = vld [vmem:[%s12882_s7 + $0x210] sm:$0xe]  ;;  %v10555_v25 = vrot.slane %v10543_v22, 9 }
 0x1e1   : > { %11966 = vmatpush3.bf16.msra.mxu0 %v12583_v54  ;;  %9354 = vmatprep.mubr.bf16.mxu0 %v10560_v37  ;;  %v3855_v54 = vor.u32 %v3854_v43, %v3851_v42  ;;  %v3874_v55 = vrot.slane %v3872_v18, 5  ;;  %v8463_v5 = vadd.f32 %v11361_v61, %v14608_v46  ;;  %v12598_v46 = vld [vmem:[%s15253_s1 + $0xb98] sm:$0xff]   ;;  %v11364_v12 = vadd.f32 %v11363_v10, %v11362_v34  ;;  %v10546_v20 = vld [vmem:[%s12882_s7 + $0x214] sm:$0x1]  ;;  %v12601_v29 = vld [vmem:[%s15253_s1 + $0xb60] sm:$0xff]  }
 0x1e2   : > { %11967 = vmatprep.subr.bf16.mxu0 %v12585_v4  ;;  %v3869_v57 = vor.u32 %v3868_v51, %v3865_v50  ;;  %v10556_v31 = vrot.slane %v10545_v19, 9  ;;  %v4006_v14 = vrot.slane %v10546_v20, 5  ;;  %v12599_v32 = vld [vmem:[%s12882_s7 + $0x80] ss:$8 sps:$4 sm:$0xff]   ;;  %v10524_v56 = vld [vmem:[%s12882_s7 + $0x2ac] sm:$0x1] }
 0x1e3   : > { %12008 = vmatpush3.bf16.msra.mxu1 %v12588_v8  ;;  %v3856_v58 = vrot.slane %v3855_v54, 4  ;;  %v11402_v8 = vpop.f32.mrb[62].mxu1  ;;  %v14797_v11 = vadd.f32 %v11401_v52, %v8463_v5  ;;  %v10525_v36 = vld [vmem:[%s12882_s7 + $0x2b0] sm:$0xf]  ;;  %v10526_v38 = vld [vmem:[%s12882_s7 + $0x2b4] sm:$0x1] }
 0x1e4   : > { %12009 = vmatprep.subr.bf16.mxu1 %v12592_v26  ;;  %v3870_v60 = vrot.slane %v3869_v57, 4  ;;  %v11403_v13 = vpop.f32.mrb[63].mxu1  ;;  %v4002_v26 = vrot.slane %v10544_v17, 5  ;;  %v4007_v37 = vsel %vm13051_vm5, %v10556_v31, %v4006_v14  ;;  %v12603_v42 = vld [vmem:[%s15253_s1 + $0xb20] sm:$0xff]   ;;  %v3891_v18 = vshrl.u32 %v10525_v36, 16  ;;  %v11421_v54 = vpop.f32.mrb[64].mxu0 }
 0x1e5   : > { %11968 = vmatpush3.bf16.msra.mxu0 %v12587_v6  ;;  %v3861_v63 = vsel %vm12893_vm2, %v3856_v58, %v3860_v49  ;;  %v12596_v6 = vld [vmem:[%s15253_s1 + $0xbd8] sm:$0xff]   ;;  %v11404_v16 = vadd.f32 %v11403_v13, %v11402_v8  ;;  %v3900_v49 = vshll.u32 %v10526_v38, 16  ;;  %v12604_v50 = vld [vmem:[%s15253_s1 + $0xba0] sm:$0xff]   ;;  %v11461_v59 = vpop.f32.mrb[64].mxu1  ;;  %v12606_v10 = vld [vmem:[%s15253_s1 + $0xbe8] sm:$0xff]  }
 0x1e6   : > { %11969 = vmatprep.subr.bf16.mxu0 %v12591_v21  ;;  %9420 = vmatmul.mubr.bf16.gmra.mrb[164].mxu1 %v12590_v0  ;;  %v3875_v4 = vsel %vm12893_vm2, %v3870_v60, %v3874_v55  ;;  %v8466_v21 = vadd.f32 %v11364_v12, %v14616_v45  ;;  %v4003_v35 = vsel %vm13051_vm5, %v10555_v25, %v4002_v26  ;;  %v10523_v45 = vld [vmem:[%s12882_s7 + $0x2a8] sm:$0xf]  ;;  %v3893_v55 = vrot.slane %v3891_v18, 4  ;;  %v12600_v58 = vld [vmem:[%s12882_s7 + $0x30] ss:$8 sps:$4 sm:$0xff]   ;;  %v11462_v34 = vpop.f32.mrb[65].mxu1 }
 0x1e7   : > { %12010 = vmatpush3.bf16.msra.mxu1 %v12594_v48  ;;  %v10532_v9 = vcombine.low %v3861_v63, %v3875_v4  ;;  %9427 = vmatprep.mubr.bf16.mxu1 %v12599_v32  ;;  %v3877_v39 = vshrl.u32 %v10523_v45, 16  ;;  %v3880_v40 = vshll.u32 %v10523_v45, 16  ;;  %v10561_v43 = vcombine.low %v4003_v35, %v4007_v37  ;;  %v11422_v63 = vpop.f32.mrb[65].mxu0  ;;  %v12607_v13 = vld [vmem:[%s15253_s1 + $0xb28] sm:$0xff]   ;;  %v10547_v20 = vld [vmem:[%s12882_s7 + $0x218] sm:$0xe] }
 0x1e8   : > { %12011 = vmatprep.subr.bf16.mxu1 %v12596_v6  ;;  %v14814_v33 = vadd.f32 %v11404_v16, %v8466_v21  ;;  %v3894_v48 = vshll.u32 %v10525_v36, 16  ;;  %v3902_v57 = vrot.slane %v3900_v49, 5  ;;  %v11463_v5 = vadd.f32 %v11462_v34, %v11461_v59  ;;  %v12605_v6 = vld [vmem:[%s15253_s1 + $0xb68] sm:$0xff]   ;;  %v11424_v8 = vpop.f32.mrb[66].mxu0  ;;  %v10548_v21 = vld [vmem:[%s12882_s7 + $0x21c] sm:$0x1] }
 0x1e9   : > { %11970 = vmatpush3.bf16.msra.mxu0 %v12593_v41  ;;  %v3886_v41 = vshll.u32 %v10524_v56, 16  ;;  %v3879_v51 = vrot.slane %v3877_v39, 4  ;;  %v3882_v0 = vrot.slane %v3880_v40, 5  ;;  %v11425_v22 = vpop.f32.mrb[67].mxu0  ;;  %v10549_v26 = vld [vmem:[%s12882_s7 + $0x220] sm:$0xe] }
 0x1ea   : > { %11971 = vmatprep.subr.bf16.mxu0 %v12595_v3  ;;  %9355 = vmatmul.mubr.bf16.gmra.mrb[164].mxu0 %v10532_v9  ;;  %v3896_v1 = vrot.slane %v3894_v48, 5  ;;  %v11423_v3 = vadd.f32 %v11422_v63, %v11421_v54  ;;  %v11426_v17 = vadd.f32 %v11425_v22, %v11424_v8  ;;  %v10550_v31 = vld [vmem:[%s12882_s7 + $0x224] sm:$0x1]  ;;  %v4010_v14 = vrot.slane %v10548_v21, 5  ;;  %v12609_v56 = vld [vmem:[%s12882_s7 + $0x90] ss:$8 sps:$4 sm:$0xff]  }
 0x1eb   : > { %12012 = vmatpush3.bf16.msra.mxu1 %v12598_v46  ;;  %v3888_v30 = vrot.slane %v3886_v41, 5  ;;  %9362 = vmatprep.mubr.bf16.mxu0 %v10561_v43  ;;  %v3883_v60 = vor.u32 %v3882_v0, %v3879_v51  ;;  %v11464_v46 = vpop.f32.mrb[66].mxu1  ;;  %v4014_v35 = vrot.slane %v10550_v31, 5  ;;  %v10527_v36 = vld [vmem:[%s12882_s7 + $0x2b8] sm:$0xf]  ;;  %v12612_v54 = vld [vmem:[%s15253_s1 + $0xbf0] sm:$0xff]  }
 0x1ec   : > { %12013 = vmatprep.subr.bf16.mxu1 %v12602_v7  ;;  %v3897_v61 = vor.u32 %v3896_v1, %v3893_v55  ;;  %v11465_v19 = vpop.f32.mrb[67].mxu1  ;;  %v8572_v32 = vadd.f32 %v11426_v17, %v14664_v2  ;;  %v10558_v7 = vrot.slane %v10549_v26, 9  ;;  %v10528_v37 = vld [vmem:[%s12882_s7 + $0x2bc] sm:$0x1]  ;;  %v10529_v40 = vld [vmem:[%s12882_s7 + $0x2c0] sm:$0xf] }
 0x1ed   : > { %11972 = vmatpush3.bf16.msra.mxu0 %v12597_v28  ;;  %v3884_v62 = vrot.slane %v3883_v60, 4  ;;  %v8569_v28 = vadd.f32 %v11423_v3, %v14656_v53  ;;  %v12608_v53 = vld [vmem:[%s15253_s1 + $0xba8] sm:$0xff]   ;;  %v11466_v25 = vadd.f32 %v11465_v19, %v11464_v46  ;;  %v10530_v41 = vld [vmem:[%s12882_s7 + $0x2c4] sm:$0x1]  ;;  %v3908_v43 = vshll.u32 %v10527_v36, 16  ;;  %v12613_v59 = vld [vmem:[%s15253_s1 + $0xb30] sm:$0xff]  }
 0x1ee   : > { %11973 = vmatprep.subr.bf16.mxu0 %v12601_v29  ;;  %9428 = vmatmul.mubr.bf16.gmra.mrb[168].mxu1 %v12600_v58  ;;  %v3898_v52 = vrot.slane %v3897_v61, 4  ;;  %v10557_v29 = vrot.slane %v10547_v20, 9  ;;  %v4015_v39 = vsel %vm13051_vm5, %v10558_v7, %v4014_v35  ;;  %v3914_v2 = vshll.u32 %v10528_v37, 16  ;;  %v12610_v58 = vld [vmem:[%s12882_s7 + $0x40] ss:$8 sps:$4 sm:$0xff]   ;;  %v11427_v3 = vpop.f32.mrb[68].mxu0 }
 0x1ef   : > { %12014 = vmatpush3.bf16.msra.mxu1 %v12604_v50  ;;  %v3889_v4 = vsel %vm12893_vm2, %v3884_v62, %v3888_v30  ;;  %v14845_v16 = vadd.f32 %v11463_v5, %v8569_v28  ;;  %v14860_v38 = vadd.f32 %v11466_v25, %v8572_v32  ;;  %9435 = vmatprep.mubr.bf16.mxu1 %v12609_v56  ;;  %v3919_v48 = vshrl.u32 %v10529_v40, 16  ;;  %v12611_v50 = vld [vmem:[%s15253_s1 + $0xb70] sm:$0xff]   ;;  %v11428_v5 = vpop.f32.mrb[69].mxu0  ;;  %v12617_v19 = vld [vmem:[%s15253_s1 + $0xb38] sm:$0xff]   ;;  %v14906_v37 = vld [vmem:[%s15253_s1 + $0xc00] sm:$0xff]  }
 0x1f0   : > { %v3903_v9 = vsel %vm12893_vm2, %v3898_v52, %v3902_v57  ;;  %12015 = vmatprep.subr.bf16.mxu1 %v12606_v10  ;;  %v4011_v45 = vsel %vm13051_vm5, %v10557_v29, %v4010_v14  ;;  %v3922_v49 = vshll.u32 %v10529_v40, 16  ;;  %v3910_v0 = vrot.slane %v3908_v43, 5  ;;  %v12614_v62 = vld [vmem:[%s15253_s1 + $0xbb0] sm:$0xff]   ;;  %v12616_v10 = vld [vmem:[%s15253_s1 + $0xbf8] sm:$0xff]  }
 0x1f1   : > { %11974 = vmatpush3.bf16.msra.mxu0 %v12603_v42  ;;  %v10533_v12 = vcombine.low %v3889_v4, %v3903_v9  ;;  %v3905_v42 = vshrl.u32 %v10527_v36, 16  ;;  %v10562_v18 = vcombine.low %v4011_v45, %v4015_v39  ;;  %v3928_v30 = vshll.u32 %v10530_v41, 16  ;;  %v11467_v4 = vpop.f32.mrb[68].mxu1  ;;  %v12618_v21 = vld [vmem:[%s15253_s1 + $0xbb8] sm:$0xff]   ;;  %v10599_v14 = vld [vmem:[%s12882_s7 + $0x10] sm:$0xf] }
 0x1f2   : > { %11975 = vmatprep.subr.bf16.mxu0 %v12605_v6  ;;  %v3916_v55 = vrot.slane %v3914_v2, 5  ;;  %v3921_v1 = vrot.slane %v3919_v48, 4  ;;  %v3924_v57 = vrot.slane %v3922_v49, 5  ;;  %v12615_v6 = vld [vmem:[%s15253_s1 + $0xb78] sm:$0xff]   ;;  %v11429_v9 = vadd.f32 %v11428_v5, %v11427_v3  ;;  %v11468_v28 = vpop.f32.mrb[69].mxu1 }
 0x1f3   : > { %9363 = vmatmul.mubr.bf16.gmra.mrb[168].mxu0 %v10533_v12  ;;  %12016 = vmatpush3.bf16.msra.mxu1 %v12608_v53  ;;  %v3907_v51 = vrot.slane %v3905_v42, 4  ;;  %v3930_v61 = vrot.slane %v3928_v30, 5  ;;  %v11469_v12 = vadd.f32 %v11468_v28, %v11467_v4  ;;  %v11470_v22 = vpop.f32.mrb[70].mxu1  ;;  %v10601_v32 = vld [vmem:[%s12882_s7 + $0x18] sm:$0xf]  ;;  %v4171_v45 = vshrl.u32 %v10599_v14, 16 }
 0x1f4   : > { %9370 = vmatprep.mubr.bf16.mxu0 %v10562_v18  ;;  %12017 = vmatprep.subr.bf16.mxu1 %v12612_v54  ;;  %v3925_v63 = vor.u32 %v3924_v57, %v3921_v1  ;;  %v8577_v17 = vadd.f32 %v11429_v9, %v14701_v44  ;;  %v11471_v26 = vpop.f32.mrb[71].mxu1  ;;  %v10600_v44 = vld [vmem:[%s12882_s7 + $0x14] sm:$0x1]  ;;  %v10602_v35 = vld [vmem:[%s12882_s7 + $0x1c] sm:$0x1]  ;;  %v4174_v56 = vshll.u32 %v10599_v14, 16 }
 0x1f5   : > { %11976 = vmatpush3.bf16.msra.mxu0 %v12607_v13  ;;  %v3911_v60 = vor.u32 %v3910_v0, %v3907_v51  ;;  %v11430_v13 = vpop.f32.mrb[70].mxu0  ;;  %v11472_v29 = vadd.f32 %v11471_v26, %v11470_v22  ;;  %v4180_v36 = vshll.u32 %v10600_v44, 16  ;;  %v4185_v39 = vshrl.u32 %v10601_v32, 16  ;;  %v10639_v42 = vld [vmem:[%s12882_s7 + $0xb0] sm:$0xf]  ;;  %v14928_v44 = vld [vmem:[%s15253_s1 + $0xc08] sm:$0xff]  }
 0x1f6   : > { %11977 = vmatprep.subr.bf16.mxu0 %v12611_v50  ;;  %9436 = vmatmul.mubr.bf16.gmra.mrb[172].mxu1 %v12610_v58  ;;  %v3926_v34 = vrot.slane %v3925_v63, 4  ;;  %v11431_v20 = vpop.f32.mrb[71].mxu0  ;;  %v14896_v31 = vadd.f32 %v11469_v12, %v8577_v17  ;;  %v4188_v40 = vshll.u32 %v10601_v32, 16  ;;  %v4194_v41 = vshll.u32 %v10602_v35, 16  ;;  %v10640_v49 = vld [vmem:[%s12882_s7 + $0xb4] sm:$0x1] }
 0x1f7   : > { %v3912_v52 = vrot.slane %v3911_v60, 4  ;;  %12018 = vmatpush3.bf16.msra.mxu1 %v12614_v62  ;;  %v11432_v25 = vadd.f32 %v11431_v20, %v11430_v13  ;;  %v11433_v43 = vpop.f32.mrb[72].mxu0  ;;  %v4173_v2 = vrot.slane %v4171_v45, 4  ;;  %v4182_v48 = vrot.slane %v4180_v36, 5  ;;  %v11473_v50 = vpop.f32.mrb[72].mxu1 }
 0x1f8   : > { %v3931_v46 = vsel %vm12893_vm2, %v3926_v34, %v3930_v61  ;;  %12019 = vmatprep.subr.bf16.mxu1 %v12616_v10  ;;  %v4187_v51 = vrot.slane %v4185_v39, 4  ;;  %v4190_v0 = vrot.slane %v4188_v40, 5  ;;  %v4196_v30 = vrot.slane %v4194_v41, 5  ;;  %v10641_v54 = vld [vmem:[%s12882_s7 + $0xb8] sm:$0xf]  ;;  %v11434_v61 = vpop.f32.mrb[73].mxu0 }
 0x1f9   : > { %11978 = vmatpush3.bf16.msra.mxu0 %v12613_v59  ;;  %v3917_v8 = vsel %vm12893_vm2, %v3912_v52, %v3916_v55  ;;  %v8580_v7 = vadd.f32 %v11432_v25, %v14716_v24  ;;  %v4176_v24 = vrot.slane %v4174_v56, 5  ;;  %v4467_v55 = vshrl.u32 %v10639_v42, 16  ;;  %v10642_v57 = vld [vmem:[%s12882_s7 + $0xbc] sm:$0x1]  ;;  %v11474_v34 = vpop.f32.mrb[73].mxu1  ;;  %v11436_v56 = vpop.f32.mrb[74].mxu0 }
 0x1fa   : > { %11979 = vmatprep.subr.bf16.mxu0 %v12615_v6  ;;  %v10534_v53 = vcombine.low %v3917_v8, %v3931_v46  ;;  %v4470_v58 = vshll.u32 %v10639_v42, 16  ;;  %v4476_v59 = vshll.u32 %v10640_v49, 16  ;;  %v4481_v60 = vshrl.u32 %v10641_v54, 16  ;;  %v12619_v46 = vld [vmem:[%s12882_s7 + $0xb0] ss:$8 sps:$4 sm:$0xff]  }
 0x1fb   : > { %12020 = vmatpush3.bf16.msra.mxu1 %v12618_v21  ;;  %v14909_v18 = vadd.f32 %v11472_v29, %v8580_v7  ;;  %v4177_v1 = vor.u32 %v4176_v24, %v4173_v2  ;;  %v4191_v62 = vor.u32 %v4190_v0, %v4187_v51  ;;  %v4469_v63 = vrot.slane %v4467_v55, 4  ;;  %v10620_v17 = vld [vmem:[%s12882_s7 + $0x64] sm:$0x1]  ;;  %v10622_v26 = vld [vmem:[%s12882_s7 + $0x6c] sm:$0x1] }
 0x1fc   : > { %9371 = vmatmul.mubr.bf16.gmra.mrb[172].mxu0 %v10534_v53  ;;  %12081 = vmatprep.subr.bf16.mxu1 %v14906_v37  ;;  %v4484_v52 = vshll.u32 %v10641_v54, 16  ;;  %v4490_v3 = vshll.u32 %v10642_v57, 16  ;;  %v4472_v5 = vrot.slane %v4470_v58, 5  ;;  %v4478_v6 = vrot.slane %v4476_v59, 5  ;;  %v10619_v53 = vld [vmem:[%s12882_s7 + $0x60] sm:$0xf] }
 0x1fd   : > { %11980 = vmatpush3.bf16.msra.mxu0 %v12617_v19  ;;  %v4178_v4 = vrot.slane %v4177_v1, 4  ;;  %v4483_v8 = vrot.slane %v4481_v60, 4  ;;  %v4192_v9 = vrot.slane %v4191_v62, 4  ;;  %v11435_v12 = vadd.f32 %v11434_v61, %v11433_v43  ;;  %v10621_v19 = vld [vmem:[%s12882_s7 + $0x68] sm:$0xf] }
 0x1fe   : > { %12057 = vmatprep.subr.bf16.mxu0 %v14906_v37  ;;  %v4486_v28 = vrot.slane %v4484_v52, 5  ;;  %v4492_v10 = vrot.slane %v4490_v3, 5  ;;  %v4473_v22 = vor.u32 %v4472_v5, %v4469_v63  ;;  %v11475_v20 = vadd.f32 %v11474_v34, %v11473_v50  ;;  %v10603_v55 = vld [vmem:[%s12882_s7 + $0x20] sm:$0xf]  ;;  %v10604_v60 = vld [vmem:[%s12882_s7 + $0x24] sm:$0x1] }
 0x1ff   : > { %v4183_v13 = vsel %vm12893_vm2, %v4178_v4, %v4182_v48  ;;  %v4197_v21 = vsel %vm12893_vm2, %v4192_v9, %v4196_v30  ;;  %v4319_v29 = vshrl.u32 %v10619_v53, 16  ;;  %v4322_v14 = vshll.u32 %v10619_v53, 16  ;;  %v11476_v48 = vpop.f32.mrb[74].mxu1  ;;  %v11437_v30 = vpop.f32.mrb[75].mxu0  ;;  %v10605_v61 = vld [vmem:[%s12882_s7 + $0x28] sm:$0xf] }
 0x200   : > { %v4487_v25 = vor.u32 %v4486_v28, %v4483_v8  ;;  %v10615_v32 = vcombine.low %v4183_v13, %v4197_v21  ;;  %v4474_v7 = vrot.slane %v4473_v22, 4  ;;  %v4328_v35 = vshll.u32 %v10620_v17, 16  ;;  %v11477_v54 = vpop.f32.mrb[75].mxu1  ;;  %v14939_v62 = vpop.f32.mrb[76].mxu0  ;;  %v14948_v4 = vld [vmem:[%s15253_s1 + $0xc10] sm:$0xff]  }
 0x201   : > { %v4333_v45 = vshrl.u32 %v10621_v19, 16  ;;  %v4321_v39 = vrot.slane %v4319_v29, 4  ;;  %v4324_v40 = vrot.slane %v4322_v14, 5  ;;  %v4336_v41 = vshll.u32 %v10621_v19, 16  ;;  %v10643_v28 = vld [vmem:[%s12882_s7 + $0xc0] sm:$0xf] }
 0x202   : > { %v4488_v36 = vrot.slane %v4487_v25, 4  ;;  %9476 = vmatprep.mubr.bf16.mxu0 %v10615_v32  ;;  %v4479_v42 = vsel %vm12893_vm2, %v4474_v7, %v4478_v6  ;;  %v4330_v43 = vrot.slane %v4328_v35, 5  ;;  %v4342_v24 = vshll.u32 %v10622_v26, 16  ;;  %v10644_v53 = vld [vmem:[%s12882_s7 + $0xc4] sm:$0x1]  ;;  %v14957_v17 = vpop.f32.mrb[77].mxu0 }
 0x203   : > { %v4335_v2 = vrot.slane %v4333_v45, 4  ;;  %v4325_v50 = vor.u32 %v4324_v40, %v4321_v39  ;;  %v4338_v51 = vrot.slane %v4336_v41, 5  ;;  %v8585_v0 = vadd.f32 %v11435_v12, %v14752_v15  ;;  %v10606_v15 = vld [vmem:[%s12882_s7 + $0x2c] sm:$0x1]  ;;  %v10645_v25 = vld [vmem:[%s12882_s7 + $0xc8] sm:$0xf] }
 0x204   : > { %v4493_v49 = vsel %vm12893_vm2, %v4488_v36, %v4492_v10  ;;  %9477 = vmatmul.mubr.bf16.vlgmr.msra.gmra.mrb[176].mxu0 %v12619_v46  ;;  %v4344_v57 = vrot.slane %v4342_v24, 5  ;;  %v11438_v58 = vadd.f32 %v11437_v30, %v11436_v56  ;;  %v11478_v59 = vadd.f32 %v11477_v54, %v11476_v48  ;;  %v14952_v10 = vpop.f32.mrb[76].mxu1  ;;  %v14971_v35 = vld [vmem:[%s15253_s1 + $0xc18] sm:$0xff]   ;;  %v10646_v36 = vld [vmem:[%s12882_s7 + $0xcc] sm:$0x1]  ;;  %v11442_v48 = vpop.f32.mrb[78].mxu0 }
 0x205   : > { %v10655_v1 = vcombine.low %v4479_v42, %v4493_v49  ;;  %12058 = vmatpush3.bf16.msra.mxu0 %v14906_v37  ;;  %v4326_v63 = vrot.slane %v4325_v50, 4  ;;  %v4339_v52 = vor.u32 %v4338_v51, %v4335_v2  ;;  %v14941_v3 = vadd.f32 %v11475_v20, %v8585_v0  ;;  %v14963_v26 = vpop.f32.mrb[77].mxu1  ;;  %v10623_v24 = vld [vmem:[%s12882_s7 + $0x70] sm:$0xf]  ;;  %v10624_v30 = vld [vmem:[%s12882_s7 + $0x74] sm:$0x1] }
 0x206   : > { %12059 = vmatprep.subr.bf16.mxu0 %v14928_v44  ;;  %v4199_v34 = vshrl.u32 %v10603_v55, 16  ;;  %v8588_v5 = vadd.f32 %v11438_v58, %v14765_v27  ;;  %v4202_v6 = vshll.u32 %v10603_v55, 16  ;;  %v4208_v8 = vshll.u32 %v10604_v60, 16  ;;  %v10625_v58 = vld [vmem:[%s12882_s7 + $0x78] sm:$0xf] }
 0x207   : > { %9541 = vmatprep.mubr.bf16.mxu1 %v10655_v1  ;;  %v4213_v9 = vshrl.u32 %v10605_v61, 16  ;;  %v4331_v46 = vsel %vm12893_vm2, %v4326_v63, %v4330_v43  ;;  %v4340_v12 = vrot.slane %v4339_v52, 4  ;;  %v4216_v22 = vshll.u32 %v10605_v61, 16  ;;  %v10626_v52 = vld [vmem:[%s12882_s7 + $0x7c] sm:$0x1] }
 0x208   : > { %v4201_v13 = vrot.slane %v4199_v34, 4  ;;  %v14960_v27 = vadd.f32 %v11478_v59, %v8588_v5  ;;  %v4204_v19 = vrot.slane %v4202_v6, 5  ;;  %v4210_v20 = vrot.slane %v4208_v8, 5  ;;  %v11482_v8 = vpop.f32.mrb[78].mxu1 }
 0x209   : > { %12060 = vmatpush3.bf16.msra.mxu0 %v14928_v44  ;;  %v4215_v21 = vrot.slane %v4213_v9, 4  ;;  %v4345_v29 = vsel %vm12893_vm2, %v4340_v12, %v4344_v57  ;;  %v4218_v14 = vrot.slane %v4216_v22, 5  ;;  %v4222_v32 = vshll.u32 %v10606_v15, 16  ;;  %v12622_v57 = vld [vmem:[%s12882_s7 + $0xc0] ss:$8 sps:$4 sm:$0xff]  }
 0x20a   : > { %v4495_v7 = vshrl.u32 %v10643_v28, 16  ;;  %12061 = vmatprep.subr.bf16.mxu0 %v14948_v4  ;;  %v10635_v45 = vcombine.low %v4331_v46, %v4345_v29  ;;  %v4205_v56 = vor.u32 %v4204_v19, %v4201_v13  ;;  %v4498_v39 = vshll.u32 %v10643_v28, 16 }
 0x20b   : > { %v4504_v40 = vshll.u32 %v10644_v53, 16  ;;  %v4219_v41 = vor.u32 %v4218_v14, %v4215_v21  ;;  %v4224_v42 = vrot.slane %v4222_v32, 5  ;;  %v4509_v2 = vshrl.u32 %v10645_v25, 16  ;;  %v11483_v21 = vpop.f32.mrb[79].mxu1  ;;  %v10607_v32 = vld [vmem:[%s12882_s7 + $0x30] sm:$0xf] }
 0x20c   : > { %v4497_v43 = vrot.slane %v4495_v7, 4  ;;  %9542 = vmatmul.mubr.bf16.vlgmr.msra.gmra.mrb[176].mxu1 %v10635_v45  ;;  %v4206_v49 = vrot.slane %v4205_v56, 4  ;;  %v4500_v50 = vrot.slane %v4498_v39, 5  ;;  %v4512_v0 = vshll.u32 %v10645_v25, 16  ;;  %v15000_v7 = vld [vmem:[%s15253_s1 + $0xc20] sm:$0xff]  }
 0x20d   : > { %v4506_v51 = vrot.slane %v4504_v40, 5  ;;  %12062 = vmatpush3.bf16.msra.mxu0 %v14948_v4  ;;  %12089 = vmatpush3.bf16.msra.mxu1 %v14906_v37  ;;  %v4220_v54 = vrot.slane %v4219_v41, 4  ;;  %v4511_v55 = vrot.slane %v4509_v2, 4  ;;  %v4518_v1 = vshll.u32 %v10646_v36, 16  ;;  %v10609_v2 = vld [vmem:[%s12882_s7 + $0x38] sm:$0xf] }
 0x20e   : > { %v4347_v59 = vshrl.u32 %v10623_v24, 16  ;;  %12063 = vmatprep.subr.bf16.mxu0 %v14971_v35  ;;  %12082 = vmatprep.subr.bf16.mxu1 %v14928_v44  ;;  %v4211_v60 = vsel %vm12893_vm2, %v4206_v49, %v4210_v20  ;;  %v4501_v61 = vor.u32 %v4500_v50, %v4497_v43  ;;  %v4514_v63 = vrot.slane %v4512_v0, 5  ;;  %v11443_v20 = vpop.f32.mrb[79].mxu0  ;;  %v10608_v43 = vld [vmem:[%s12882_s7 + $0x34] sm:$0x1] }
 0x20f   : > { %v4350_v15 = vshll.u32 %v10623_v24, 16  ;;  %v4225_v37 = vsel %vm12893_vm2, %v4220_v54, %v4224_v42  ;;  %v4520_v34 = vrot.slane %v4518_v1, 5  ;;  %v4356_v6 = vshll.u32 %v10624_v30, 16  ;;  %v15004_v40 = vpop.f32.mrb[80].mxu0  ;;  %v15012_v24 = vpop.f32.mrb[80].mxu1 }
 0x210   : > { %v4349_v5 = vrot.slane %v4347_v59, 4  ;;  %v10616_v9 = vcombine.low %v4211_v60, %v4225_v37  ;;  %v4502_v28 = vrot.slane %v4501_v61, 4  ;;  %v4515_v46 = vor.u32 %v4514_v63, %v4511_v55  ;;  %v10647_v0 = vld [vmem:[%s12882_s7 + $0xd0] sm:$0xf]  ;;  %v15018_v30 = vpop.f32.mrb[81].mxu0  ;;  %v15028_v1 = vpop.f32.mrb[81].mxu1 }
 0x211   : > { %v4352_v12 = vrot.slane %v4350_v15, 5  ;;  %12064 = vmatpush3.bf16.msra.mxu0 %v14971_v35  ;;  %12090 = vmatpush3.bf16.msra.mxu1 %v14928_v44  ;;  %v14989_v13 = vrot.slane %v4356_v6, 5  ;;  %v4361_v22 = vshrl.u32 %v10625_v58, 16  ;;  %v4364_v53 = vshll.u32 %v10625_v58, 16  ;;  %v10648_v55 = vld [vmem:[%s12882_s7 + $0xd4] sm:$0x1] }
 0x212   : > { %v4370_v19 = vshll.u32 %v10626_v52, 16  ;;  %9484 = vmatprep.mubr.bf16.mxu0 %v10616_v9  ;;  %v4507_v25 = vsel %vm12893_vm2, %v4502_v28, %v4506_v51  ;;  %v4516_v29 = vrot.slane %v4515_v46, 4  ;;  %12083 = vmatprep.subr.bf16.mxu1 %v14948_v4  ;;  %v11441_v44 = vadd.f32 %v14957_v17, %v14939_v62  ;;  %v10649_v37 = vld [vmem:[%s12882_s7 + $0xd8] sm:$0xf]  ;;  %v15040_v28 = vpop.f32.mrb[82].mxu0 }
 0x213   : > { %v4353_v14 = vor.u32 %v4352_v12, %v4349_v5  ;;  %9485 = vmatmul.mubr.bf16.gmra.mrb[180].mxu0 %v12622_v57  ;;  %v4363_v45 = vrot.slane %v4361_v22, 4  ;;  %v4366_v56 = vrot.slane %v4364_v53, 5  ;;  %v11481_v39 = vadd.f32 %v14963_v26, %v14952_v10  ;;  %12065 = vmatprep.subr.bf16.mxu0 %v15000_v7  ;;  %v10610_v26 = vld [vmem:[%s12882_s7 + $0x3c] sm:$0x1]  ;;  %v10627_v53 = vld [vmem:[%s12882_s7 + $0x80] sm:$0xf] }
 0x214   : > { %v4372_v36 = vrot.slane %v4370_v19, 5  ;;  %v4521_v62 = vsel %vm12893_vm2, %v4516_v29, %v4520_v34  ;;  %v8593_v41 = vadd.f32 %v11441_v44, %v14797_v11  ;;  %v11444_v42 = vadd.f32 %v11443_v20, %v11442_v48  ;;  %v10628_v19 = vld [vmem:[%s12882_s7 + $0x84] sm:$0x1]  ;;  %v10629_v29 = vld [vmem:[%s12882_s7 + $0x88] sm:$0xf] }
 0x215   : > { %v4354_v17 = vrot.slane %v4353_v14, 4  ;;  %v10656_v49 = vcombine.low %v4507_v25, %v4521_v62  ;;  %v4367_v50 = vor.u32 %v4366_v56, %v4363_v45  ;;  %12091 = vmatpush3.bf16.msra.mxu1 %v14948_v4  ;;  %v11484_v10 = vadd.f32 %v11483_v21, %v11482_v8  ;;  %12066 = vmatpush3.bf16.msra.mxu0 %v15000_v7  ;;  %v10650_v8 = vld [vmem:[%s12882_s7 + $0xdc] sm:$0x1]  ;;  %v11544_v56 = vpop.f32.mrb[82].mxu1 }
 0x216   : > { %v4227_v51 = vshrl.u32 %v10607_v32, 16  ;;  %v15023_v48 = vadd.f32 %v11481_v39, %v8593_v41  ;;  %12084 = vmatprep.subr.bf16.mxu1 %v14971_v35  ;;  %v8596_v54 = vadd.f32 %v11444_v42, %v14814_v33  ;;  %v4230_v4 = vshll.u32 %v10607_v32, 16  ;;  %v12627_v33 = vld [vmem:[%s15253_s1 + $0xc28] sm:$0xff]  }
 0x217   : > { %v4359_v11 = vsel %vm12893_vm2, %v4354_v17, %v14989_v13  ;;  %9549 = vmatprep.mubr.bf16.mxu1 %v10656_v49  ;;  %v4368_v57 = vrot.slane %v4367_v50, 4  ;;  %v4236_v59 = vshll.u32 %v10608_v43, 16  ;;  %v4241_v60 = vshrl.u32 %v10609_v2, 16  ;;  %12067 = vmatprep.subr.bf16.mxu0 %v12627_v33  ;;  %v10630_v17 = vld [vmem:[%s12882_s7 + $0x8c] sm:$0x1]  ;;  %v11505_v50 = vpop.f32.mrb[83].mxu0 }
 0x218   : > { %v4229_v58 = vrot.slane %v4227_v51, 4  ;;  %v15030_v61 = vadd.f32 %v11484_v10, %v8596_v54  ;;  %v4232_v63 = vrot.slane %v4230_v4, 5  ;;  %v4244_v52 = vshll.u32 %v10609_v2, 16 }
 0x219   : > { %v4250_v15 = vshll.u32 %v10610_v26, 16  ;;  %v4373_v34 = vsel %vm12893_vm2, %v4368_v57, %v4372_v36  ;;  %12092 = vmatpush3.bf16.msra.mxu1 %v14971_v35  ;;  %v4238_v5 = vrot.slane %v4236_v59, 5  ;;  %v4243_v6 = vrot.slane %v4241_v60, 4  ;;  %12068 = vmatpush3.bf16.msra.mxu0 %v12627_v33 }
 0x21a   : > { %v4523_v9 = vshrl.u32 %v10647_v0, 16  ;;  %v10636_v46 = vcombine.low %v4359_v11, %v4373_v34  ;;  %v4233_v12 = vor.u32 %v4232_v63, %v4229_v58  ;;  %v4246_v13 = vrot.slane %v4244_v52, 5  ;;  %12085 = vmatprep.subr.bf16.mxu1 %v15000_v7  ;;  %v11545_v11 = vpop.f32.mrb[83].mxu1  ;;  %v12629_v52 = vld [vmem:[%s15253_s1 + $0xc30] sm:$0xff]  }
 0x21b   : > { %v4252_v22 = vrot.slane %v4250_v15, 5  ;;  %v4526_v21 = vshll.u32 %v10647_v0, 16  ;;  %v4532_v35 = vshll.u32 %v10648_v55, 16  ;;  %v4537_v25 = vshrl.u32 %v10649_v37, 16  ;;  %v12625_v55 = vld [vmem:[%s12882_s7 + $0xd0] ss:$8 sps:$4 sm:$0xff]   ;;  %12069 = vmatprep.subr.bf16.mxu0 %v12629_v52 }
 0x21c   : > { %v4525_v20 = vrot.slane %v4523_v9, 4  ;;  %9550 = vmatmul.mubr.bf16.gmra.mrb[180].mxu1 %v10636_v46  ;;  %v4234_v14 = vrot.slane %v4233_v12, 4  ;;  %v4247_v44 = vor.u32 %v4246_v13, %v4243_v6  ;;  %v4540_v32 = vshll.u32 %v10649_v37, 16  ;;  %v10611_v46 = vld [vmem:[%s12882_s7 + $0x40] sm:$0xf] }
 0x21d   : > { %v4546_v45 = vshll.u32 %v10650_v8, 16  ;;  %v4528_v36 = vrot.slane %v4526_v21, 5  ;;  %v4534_v39 = vrot.slane %v4532_v35, 5  ;;  %v4539_v62 = vrot.slane %v4537_v25, 4  ;;  %12093 = vmatpush3.bf16.msra.mxu1 %v15000_v7  ;;  %v10612_v12 = vld [vmem:[%s12882_s7 + $0x44] sm:$0x1]  ;;  %12070 = vmatpush3.bf16.msra.mxu0 %v12629_v52 }
 0x21e   : > { %v4375_v41 = vshrl.u32 %v10627_v53, 16  ;;  %v4239_v42 = vsel %vm12893_vm2, %v4234_v14, %v4238_v5  ;;  %v4248_v43 = vrot.slane %v4247_v44, 4  ;;  %v4542_v2 = vrot.slane %v4540_v32, 5  ;;  %12086 = vmatprep.subr.bf16.mxu1 %v12627_v33  ;;  %v15068_v21 = vpop.f32.mrb[84].mxu0  ;;  %v10614_v14 = vld [vmem:[%s12882_s7 + $0x4c] sm:$0x1] }
 0x21f   : > { %v4548_v49 = vrot.slane %v4546_v45, 5  ;;  %v4529_v10 = vor.u32 %v4528_v36, %v4525_v20  ;;  %v4378_v51 = vshll.u32 %v10627_v53, 16  ;;  %v4384_v0 = vshll.u32 %v10628_v19, 16  ;;  %v10613_v20 = vld [vmem:[%s12882_s7 + $0x48] sm:$0xf]  ;;  %v15075_v32 = vpop.f32.mrb[85].mxu0 }
 0x220   : > { %v4377_v26 = vrot.slane %v4375_v41, 4  ;;  %v4253_v54 = vsel %vm12893_vm2, %v4248_v43, %v4252_v22  ;;  %v4543_v4 = vor.u32 %v4542_v2, %v4539_v62  ;;  %v4389_v57 = vshrl.u32 %v10629_v29, 16  ;;  %v10652_v62 = vld [vmem:[%s12882_s7 + $0xe4] sm:$0x1]  ;;  %v10653_v43 = vld [vmem:[%s12882_s7 + $0xe8] sm:$0xf] }
 0x221   : > { %v4392_v7 = vshll.u32 %v10629_v29, 16  ;;  %v10617_v58 = vcombine.low %v4239_v42, %v4253_v54  ;;  %v4530_v59 = vrot.slane %v4529_v10, 4  ;;  %v4380_v60 = vrot.slane %v4378_v51, 5  ;;  %12094 = vmatpush3.bf16.msra.mxu1 %v12627_v33  ;;  %v10631_v51 = vld [vmem:[%s12882_s7 + $0x90] sm:$0xf] }
 0x222   : > { %v4386_v63 = vrot.slane %v4384_v0, 5  ;;  %v4544_v15 = vrot.slane %v4543_v4, 4  ;;  %v4391_v37 = vrot.slane %v4389_v57, 4  ;;  %v4398_v5 = vshll.u32 %v10630_v17, 16  ;;  %12087 = vmatprep.subr.bf16.mxu1 %v12629_v52  ;;  %v10632_v57 = vld [vmem:[%s12882_s7 + $0x94] sm:$0x1] }
 0x223   : > { %v4394_v34 = vrot.slane %v4392_v7, 5  ;;  %9492 = vmatprep.mubr.bf16.mxu0 %v10617_v58  ;;  %v4535_v6 = vsel %vm12893_vm2, %v4530_v59, %v4534_v39  ;;  %v4381_v8 = vor.u32 %v4380_v60, %v4377_v26  ;;  %v11503_v9 = vadd.f32 %v15018_v30, %v15004_v40  ;;  %v10651_v39 = vld [vmem:[%s12882_s7 + $0xe0] sm:$0xf]  ;;  %v10654_v26 = vld [vmem:[%s12882_s7 + $0xec] sm:$0x1]  ;;  %v12630_v7 = vld [vmem:[%s15253_s1 + $0xc38] sm:$0xff]  }
 0x224   : > { %v11543_v33 = vadd.f32 %v15028_v1, %v15012_v24  ;;  %v4549_v13 = vsel %vm12893_vm2, %v4544_v15, %v4548_v49  ;;  %9493 = vmatmul.mubr.bf16.gmra.mrb[184].mxu0 %v12625_v55  ;;  %v4400_v53 = vrot.slane %v4398_v5, 5  ;;  %v11506_v19 = vadd.f32 %v11505_v50, %v15040_v28  ;;  %v15071_v1 = vpop.f32.mrb[84].mxu1  ;;  %12071 = vmatprep.subr.bf16.mxu0 %v12630_v7 }
 0x225   : > { %v4395_v22 = vor.u32 %v4394_v34, %v4391_v37  ;;  %v10657_v35 = vcombine.low %v4535_v6, %v4549_v13  ;;  %v4382_v40 = vrot.slane %v4381_v8, 4  ;;  %v8699_v30 = vadd.f32 %v11503_v9, %v14845_v16  ;;  %12095 = vmatpush3.bf16.msra.mxu1 %v12629_v52  ;;  %v15090_v0 = vpop.f32.mrb[85].mxu1  ;;  %v10633_v52 = vld [vmem:[%s12882_s7 + $0x98] sm:$0xf]  ;;  %v11510_v6 = vpop.f32.mrb[86].mxu0  ;;  %12072 = vmatpush3.bf16.msra.mxu0 %v12630_v7 }
 0x226   : > { %v11546_v24 = vadd.f32 %v11545_v11, %v11544_v56  ;;  %v8702_v29 = vadd.f32 %v11506_v19, %v14860_v38  ;;  %v4255_v28 = vshrl.u32 %v10611_v46, 16  ;;  %v4258_v44 = vshll.u32 %v10611_v46, 16  ;;  %12088 = vmatprep.subr.bf16.mxu1 %v12630_v7  ;;  %v11550_v8 = vpop.f32.mrb[86].mxu1  ;;  %v11511_v13 = vpop.f32.mrb[87].mxu0 }
 0x227   : > { %v4396_v25 = vrot.slane %v4395_v22, 4  ;;  %9557 = vmatprep.mubr.bf16.mxu1 %v10657_v35  ;;  %v4387_v16 = vsel %vm12893_vm2, %v4382_v40, %v4386_v63  ;;  %v15079_v45 = vadd.f32 %v11543_v33, %v8699_v30  ;;  %v4264_v56 = vshll.u32 %v10612_v12, 16  ;;  %v11551_v22 = vpop.f32.mrb[87].mxu1 }
 0x228   : > { %v4269_v36 = vshrl.u32 %v10613_v20, 16  ;;  %v15085_v17 = vadd.f32 %v11546_v24, %v8702_v29  ;;  %v4257_v41 = vrot.slane %v4255_v28, 4  ;;  %v4260_v42 = vrot.slane %v4258_v44, 5  ;;  %v12628_v24 = vld [vmem:[%s12882_s7 + $0xe0] ss:$8 sps:$4 sm:$0xff]  }
 0x229   : > { %v4401_v38 = vsel %vm12893_vm2, %v4396_v25, %v4400_v53  ;;  %v4266_v49 = vrot.slane %v4264_v56, 5  ;;  %v4272_v10 = vshll.u32 %v10613_v20, 16  ;;  %v4278_v54 = vshll.u32 %v10614_v14, 16  ;;  %12096 = vmatpush3.bf16.msra.mxu1 %v12630_v7  ;;  %v15100_v14 = vpop.f32.mrb[88].mxu0  ;;  %v10667_v7 = vld [vmem:[%s12882_s7 + $0x30] sm:$0xe] }
 0x22a   : > { %v10637_v2 = vcombine.low %v4387_v16, %v4401_v38  ;;  %v4271_v50 = vrot.slane %v4269_v36, 4  ;;  %v4261_v11 = vor.u32 %v4260_v42, %v4257_v41  ;;  %v4551_v4 = vshrl.u32 %v10651_v39, 16  ;;  %v10634_v16 = vld [vmem:[%s12882_s7 + $0x9c] sm:$0x1]  ;;  %v10659_v42 = vld [vmem:[%s12882_s7 + $0x10] sm:$0xe] }
 0x22b   : > { %v4554_v55 = vshll.u32 %v10651_v39, 16  ;;  %v4274_v58 = vrot.slane %v4272_v10, 5  ;;  %v4560_v59 = vshll.u32 %v10652_v62, 16  ;;  %v4565_v60 = vshrl.u32 %v10653_v43, 16 }
 0x22c   : > { %9558 = vmatmul.mubr.bf16.gmra.mrb[184].mxu1 %v10637_v2  ;;  %v4568_v63 = vshll.u32 %v10653_v43, 16  ;;  %v4262_v15 = vrot.slane %v4261_v11, 4  ;;  %v4280_v37 = vrot.slane %v4278_v54, 5  ;;  %v4553_v34 = vrot.slane %v4551_v4, 4  ;;  %v15108_v43 = vpop.f32.mrb[88].mxu1 }
 0x22d   : > { %v4556_v5 = vrot.slane %v4554_v55, 5  ;;  %v4275_v9 = vor.u32 %v4274_v58, %v4271_v50  ;;  %v4562_v33 = vrot.slane %v4560_v59, 5  ;;  %v4567_v46 = vrot.slane %v4565_v60, 4  ;;  %v15120_v58 = vpop.f32.mrb[89].mxu0 }
 0x22e   : > { %v4570_v12 = vrot.slane %v4568_v63, 5  ;;  %v4267_v53 = vsel %vm12893_vm2, %v4262_v15, %v4266_v49  ;;  %v4574_v20 = vshll.u32 %v10654_v26, 16  ;;  %v4403_v35 = vshrl.u32 %v10631_v51, 16  ;;  %v10660_v26 = vld [vmem:[%s12882_s7 + $0x14] sm:$0x1] }
 0x22f   : > { %v4557_v19 = vor.u32 %v4556_v5, %v4553_v34  ;;  %v4276_v40 = vrot.slane %v4275_v9, 4  ;;  %v4406_v25 = vshll.u32 %v10631_v51, 16  ;;  %v4412_v29 = vshll.u32 %v10632_v57, 16  ;;  %v10661_v51 = vld [vmem:[%s12882_s7 + $0x18] sm:$0xe]  ;;  %v15126_v34 = vpop.f32.mrb[89].mxu1 }
 0x230   : > { %v4571_v30 = vor.u32 %v4570_v12, %v4567_v46  ;;  %v4576_v44 = vrot.slane %v4574_v20, 5  ;;  %v4405_v56 = vrot.slane %v4403_v35, 4  ;;  %v4417_v36 = vshrl.u32 %v10633_v52, 16  ;;  %v10662_v57 = vld [vmem:[%s12882_s7 + $0x1c] sm:$0x1] }
 0x231   : > { %v4558_v28 = vrot.slane %v4557_v19, 4  ;;  %v4281_v39 = vsel %vm12893_vm2, %v4276_v40, %v4280_v37  ;;  %v4408_v38 = vrot.slane %v4406_v25, 5  ;;  %v15105_v41 = vrot.slane %v4412_v29, 5  ;;  %v10668_v15 = vld [vmem:[%s12882_s7 + $0x34] sm:$0x1]  ;;  %v11516_v40 = vpop.f32.mrb[90].mxu0 }
 0x232   : > { %v4572_v62 = vrot.slane %v4571_v30, 4  ;;  %v10618_v2 = vcombine.low %v4267_v53, %v4281_v39  ;;  %v4419_v50 = vrot.slane %v4417_v36, 4  ;;  %v4420_v10 = vshll.u32 %v10633_v52, 16  ;;  %v10669_v37 = vld [vmem:[%s12882_s7 + $0x38] sm:$0xe]  ;;  %v11556_v30 = vpop.f32.mrb[90].mxu1 }
 0x233   : > { %v4563_v49 = vsel %vm12893_vm2, %v4558_v28, %v4562_v33  ;;  %v4409_v54 = vor.u32 %v4408_v38, %v4405_v56  ;;  %v4426_v4 = vshll.u32 %v10634_v16, 16  ;;  %v11509_v55 = vadd.f32 %v15075_v32, %v15068_v21  ;;  %v10670_v33 = vld [vmem:[%s12882_s7 + $0x3c] sm:$0x1]  ;;  %v10663_v46 = vld [vmem:[%s12882_s7 + $0x20] sm:$0xe]  ;;  %v11517_v16 = vpop.f32.mrb[91].mxu0 }
 0x234   : > { %v4577_v11 = vsel %vm12893_vm2, %v4572_v62, %v4576_v44  ;;  %9500 = vmatprep.mubr.bf16.mxu0 %v10618_v2  ;;  %v4422_v60 = vrot.slane %v4420_v10, 5  ;;  %v11549_v63 = vadd.f32 %v15090_v0, %v15071_v1  ;;  %v11512_v52 = vadd.f32 %v11511_v13, %v11510_v6  ;;  %v10664_v13 = vld [vmem:[%s12882_s7 + $0x24] sm:$0x1]  ;;  %v10665_v53 = vld [vmem:[%s12882_s7 + $0x28] sm:$0xe]  ;;  %v11557_v56 = vpop.f32.mrb[91].mxu1 }
 0x235   : > { %v10658_v59 = vcombine.low %v4563_v49, %v4577_v11  ;;  %9501 = vmatmul.mubr.bf16.gmra.mrb[188].mxu0 %v12628_v24  ;;  %v4410_v21 = vrot.slane %v4409_v54, 4  ;;  %v4428_v32 = vrot.slane %v4426_v4, 5  ;;  %v8707_v5 = vadd.f32 %v11509_v55, %v14896_v31  ;;  %v10671_v35 = vld [vmem:[%s12882_s7 + $0x40] sm:$0xe]  ;;  %v10672_v28 = vld [vmem:[%s12882_s7 + $0x44] sm:$0x1] }
 0x236   : > { %v11552_v9 = vadd.f32 %v11551_v22, %v11550_v8  ;;  %v4423_v12 = vor.u32 %v4422_v60, %v4419_v50  ;;  %v8710_v1 = vadd.f32 %v11512_v52, %v14909_v18  ;;  %v10675_v0 = vrot.slane %v10659_v42, 9  ;;  %v10666_v22 = vld [vmem:[%s12882_s7 + $0x2c] sm:$0x1]  ;;  %v10673_v44 = vld [vmem:[%s12882_s7 + $0x48] sm:$0xe]  ;;  %v11559_v42 = vpop.f32.mrb[92].mxu1 }
 0x237   : > { %9565 = vmatprep.mubr.bf16.mxu1 %v10658_v59  ;;  %v4632_v6 = vrot.slane %v10660_v26, 5  ;;  %v4415_v19 = vsel %vm12893_vm2, %v4410_v21, %v15105_v41  ;;  %v15137_v20 = vadd.f32 %v11549_v63, %v8707_v5  ;;  %v10676_v31 = vrot.slane %v10661_v51, 9  ;;  %v11519_v41 = vpop.f32.mrb[92].mxu0  ;;  %v10674_v26 = vld [vmem:[%s12882_s7 + $0x4c] sm:$0x1]  ;;  %v11560_v11 = vpop.f32.mrb[93].mxu1 }
 0x238   : > { %v4636_v8 = vrot.slane %v10662_v57, 5  ;;  %v4424_v24 = vrot.slane %v4423_v12, 4  ;;  %v15141_v18 = vadd.f32 %v11552_v9, %v8710_v1  ;;  %v10679_v29 = vrot.slane %v10667_v7, 9  ;;  %v11520_v51 = vpop.f32.mrb[93].mxu0  ;;  %v11562_v59 = vpop.f32.mrb[94].mxu1  ;;  %s148_s7 = sand.u32 1, %s12693_s10  }
 0x239   : > { %v4633_v25 = vsel %vm13051_vm5, %v10675_v0, %v4632_v6  ;;  %v4648_v39 = vrot.slane %v10668_v15, 5  ;;  %v10680_v62 = vrot.slane %v10669_v37, 9  ;;  %v4652_v38 = vrot.slane %v10670_v33, 5  ;;  %v11522_v7 = vpop.f32.mrb[94].mxu0  ;;  %v11563_v37 = vpop.f32.mrb[95].mxu1  ;;  %s9857_s26 = sshll.u32 %s148_s7, 6 }
 0x23a   : > { %v4637_v36 = vsel %vm13051_vm5, %v10676_v31, %v4636_v8  ;;  %v4429_v2 = vsel %vm12893_vm2, %v4424_v24, %v4428_v32  ;;  %v10677_v50 = vrot.slane %v10663_v46, 9  ;;  %v4640_v10 = vrot.slane %v10664_v13, 5  ;;  %v11523_v15 = vpop.f32.mrb[95].mxu0  ;;  %v11621_v46 = vpop.f32.mrb[96].mxu1  ;;  %s15185_s27 = scalar_lea.vmem [#allocation3], %s9857_s26  ;;  %s15206_s4 = scalar_lea.sflag [#allocation4], %s148_s7 }
 0x23b   : > { %v10683_v49 = vcombine.low %v4633_v25, %v4637_v36  ;;  %v10638_v54 = vcombine.low %v4415_v19, %v4429_v2  ;;  %v4649_v4 = vsel %vm13051_vm5, %v10679_v29, %v4648_v39  ;;  %v4653_v55 = vsel %vm13051_vm5, %v10680_v62, %v4652_v38  ;;  %v11581_v33 = vpop.f32.mrb[96].mxu0  ;;  %s9687_s29 = sshll.u32 %s15185_s27, 4  ;;  %s15199_s29 = int_to_ptr.vmem [resolvable:$true] %s9687_s29 }
 0x23c   : > { %v10678_v57 = vrot.slane %v10665_v53, 9  ;;  %v10685_v60 = vcombine.low %v4649_v4, %v4653_v55  ;;  %v4641_v47 = vsel %vm13051_vm5, %v10677_v50, %v4640_v10  ;;  %v4644_v63 = vrot.slane %v10666_v22, 5  ;;  %v11582_v13 = vpop.f32.mrb[97].mxu0  ;;  %v11622_v53 = vpop.f32.mrb[97].mxu1  ;;  %s12631_s5 = scalar_lea.vmem %s15199_s29, 1024  ;;  %p12638_p1 = scmp.lt.s32.totalorder %s15199_s29, %s12636_s8 }
 0x23d   : > { %12073 = vmatprep.mubr.bf16.mxu0 %v10683_v49  ;;  %v10681_v52 = vrot.slane %v10671_v35, 9  ;;  %9566 = vmatmul.mubr.bf16.gmra.mrb[188].mxu1 %v10638_v54  ;;  %v4656_v21 = vrot.slane %v10672_v28, 5  ;;  %v10682_v32 = vrot.slane %v10673_v44, 9  ;;  %v4660_v5 = vrot.slane %v10674_v26, 5  ;;  %v11584_v8 = vpop.f32.mrb[98].mxu0  ;;  %v11624_v22 = vpop.f32.mrb[98].mxu1  ;;  %p12632_p12 = scmp.ne.s32.totalorder %s15199_s29, %s12631_s5  ;;  %p12639_p2 = scmp.lt.s32.totalorder %s12637_s15, %s12631_s5 }
 0x23e   : > { %v11515_v9 = vadd.f32 %v15120_v58, %v15100_v14  ;;  %12077 = vmatprep.mubr.bf16.mxu1 %v10685_v60  ;;  %v4645_v12 = vsel %vm13051_vm5, %v10678_v57, %v4644_v63  ;;  %v11555_v1 = vadd.f32 %v15126_v34, %v15108_v43  ;;  %v11518_v0 = vadd.f32 %v11517_v16, %v11516_v40  ;;  %v11585_v34 = vpop.f32.mrb[99].mxu0  ;;  %v11625_v40 = vpop.f32.mrb[99].mxu1 }
 0x23f   : > { %v11558_v6 = vadd.f32 %v11557_v56, %v11556_v30  ;;  %v10684_v19 = vcombine.low %v4641_v47, %v4645_v12  ;;  %v4657_v31 = vsel %vm13051_vm5, %v10681_v52, %v4656_v21  ;;  %v4661_v14 = vsel %vm13051_vm5, %v10682_v32, %v4660_v5  ;;  %v11587_v16 = vpop.f32.mrb[100].mxu0  ;;  %v11627_v56 = vpop.f32.mrb[100].mxu1  ;;  %p12633_p13 = pnand %p12632_p12, %p12769_p4  ;;  %p12640_p3 = por %p12639_p2, %p12638_p1 }
 0x240   : > { %v8715_v58 = vadd.f32 %v11515_v9, %v14941_v3  ;;  %v10686_v35 = vcombine.low %v4657_v31, %v4661_v14  ;;  %v8718_v24 = vadd.f32 %v11518_v0, %v14960_v27  ;;  %v11521_v25 = vadd.f32 %v11520_v51, %v11519_v41  ;;  %v11588_v62 = vpop.f32.mrb[101].mxu0  ;;  %v11628_v38 = vpop.f32.mrb[101].mxu1 }
 0x241   : > { %v11561_v43 = vadd.f32 %v11560_v11, %v11559_v42  ;;  %12074 = vmatmul.mubr.bf16.vlgmr.msra.gmra.mrb[192].mxu0 %v10684_v19  ;;  %v11524_v29 = vadd.f32 %v11523_v15, %v11522_v7  ;;  %v11564_v28 = vadd.f32 %v11563_v37, %v11562_v59  ;;  %v11583_v44 = vadd.f32 %v11582_v13, %v11581_v33  ;;  %v11590_v49 = vpop.f32.mrb[102].mxu0  ;;  %v11630_v50 = vpop.f32.mrb[102].mxu1  ;;  %p12634_p0 = pneg %p12633_p13 }
 0x242   : > { %v8780_v30 = vadd.f32 %v11555_v1, %v8715_v58  ;;  %v8783_v23 = vadd.f32 %v11558_v6, %v8718_v24  ;;  %v8723_v36 = vadd.f32 %v11521_v25, %v15023_v48  ;;  %v11623_v3 = vadd.f32 %v11622_v53, %v11621_v46  ;;  %v11591_v11 = vpop.f32.mrb[103].mxu0  ;;  %v11631_v54 = vpop.f32.mrb[103].mxu1 }
 0x243   : > { %v11586_v39 = vadd.f32 %v11585_v34, %v11584_v8  ;;  %v8726_v27 = vadd.f32 %v11524_v29, %v15030_v61  ;;  %v8829_v41 = vadd.f32 %v11583_v44, %v15079_v45  ;;  %v11626_v42 = vadd.f32 %v11625_v40, %v11624_v22  ;;  %v11593_v7 = vpop.f32.mrb[104].mxu0  ;;  %v11633_v61 = vpop.f32.mrb[104].mxu1  ;;  %p12641_p5 = pnand %p12640_p3, %p12634_p0 }
 0x244   : > { %v11589_v2 = vadd.f32 %v11588_v62, %v11587_v16  ;;  %v8788_v10 = vadd.f32 %v11561_v43, %v8723_v36  ;;  %v11629_v51 = vadd.f32 %v11628_v38, %v11627_v56  ;;  %v11592_v57 = vadd.f32 %v11591_v11, %v11590_v49  ;;  %v11594_v60 = vpop.f32.mrb[105].mxu0  ;;  %v11634_v47 = vpop.f32.mrb[105].mxu1 }
 0x245   : > { %v8832_v26 = vadd.f32 %v11586_v39, %v15085_v17  ;;  %12078 = vmatmul.mubr.bf16.vlgmr.msra.gmra.mrb[192].mxu1 %v10686_v35  ;;  %v8791_v48 = vadd.f32 %v11564_v28, %v8726_v27  ;;  %v8894_v4 = vadd.f32 %v11623_v3, %v8829_v41  ;;  %v11632_v45 = vadd.f32 %v11631_v54, %v11630_v50  ;;  %v11596_v37 = vpop.f32.mrb[106].mxu0  ;;  %v11636_v21 = vpop.f32.mrb[106].mxu1 }
 0x246   : > { %v8837_v55 = vadd.f32 %v11589_v2, %v15137_v20  ;;  %v8840_v52 = vadd.f32 %v11592_v57, %v15141_v18  ;;  %v11595_v15 = vadd.f32 %v11594_v60, %v11593_v7  ;;  %v11635_v17 = vadd.f32 %v11634_v47, %v11633_v61  ;;  %v11597_v32 = vpop.f32.mrb[107].mxu0  ;;  %v11637_v5 = vpop.f32.mrb[107].mxu1 }
 0x247   : > { %v8897_v59 = vadd.f32 %v11626_v42, %v8832_v26  ;;  %v11598_v46 = vadd.f32 %v11597_v32, %v11596_v37  ;;  %v11638_v20 = vadd.f32 %v11637_v5, %v11636_v21  ;;  %v11599_v12 = vpop.f32.mrb[108].mxu0  ;;  %v11639_v1 = vpop.f32.mrb[108].mxu1 }
 0x248   : > { %v8902_v63 = vadd.f32 %v11629_v51, %v8837_v55  ;;  %v8905_v9 = vadd.f32 %v11632_v45, %v8840_v52  ;;  %v8845_v33 = vadd.f32 %v11595_v15, %v8780_v30  ;;  %v11600_v0 = vpop.f32.mrb[109].mxu0  ;;  %v11640_v6 = vpop.f32.mrb[109].mxu1 }
 0x249   : > { %v8848_v53 = vadd.f32 %v11598_v46, %v8783_v23  ;;  %v11601_v19 = vadd.f32 %v11600_v0, %v11599_v12  ;;  %v11641_v31 = vadd.f32 %v11640_v6, %v11639_v1  ;;  %v11602_v14 = vpop.f32.mrb[110].mxu0  ;;  %v11642_v18 = vpop.f32.mrb[110].mxu1 }
 0x24a   : > { %v8910_v13 = vadd.f32 %v11635_v17, %v8845_v33  ;;  %v11603_v58 = vpop.f32.mrb[111].mxu0  ;;  %v11643_v8 = vpop.f32.mrb[111].mxu1 }
 0x24b   : > { %v8913_v22 = vadd.f32 %v11638_v20, %v8848_v53  ;;  %v8853_v35 = vadd.f32 %v11601_v19, %v8788_v10  ;;  %v11604_v24 = vadd.f32 %v11603_v58, %v11602_v14  ;;  %v11644_v25 = vadd.f32 %v11643_v8, %v11642_v18  ;;  %v11661_v43 = vpop.f32.mrb[112].mxu0  ;;  %v11701_v34 = vpop.f32.mrb[112].mxu1 }
 0x24c   : > { %v11662_v40 = vpop.f32.mrb[113].mxu0  ;;  %v11702_v30 = vpop.f32.mrb[113].mxu1 }
 0x24d   : > { %v8918_v29 = vadd.f32 %v11641_v31, %v8853_v35  ;;  %v8856_v28 = vadd.f32 %v11604_v24, %v8791_v48  ;;  %v11663_v44 = vadd.f32 %v11662_v40, %v11661_v43  ;;  %v11703_v16 = vadd.f32 %v11702_v30, %v11701_v34  ;;  %v11664_v56 = vpop.f32.mrb[114].mxu0  ;;  %v11704_v23 = vpop.f32.mrb[114].mxu1 }
 0x24e   : > { %v11665_v36 = vpop.f32.mrb[115].mxu0  ;;  %v11705_v3 = vpop.f32.mrb[115].mxu1 }
 0x24f   : > { %v8921_v39 = vadd.f32 %v11644_v25, %v8856_v28  ;;  %v8959_v62 = vadd.f32 %v11663_v44, %v8894_v4  ;;  %v11666_v38 = vadd.f32 %v11665_v36, %v11664_v56  ;;  %v11706_v27 = vadd.f32 %v11705_v3, %v11704_v23  ;;  %v11667_v41 = vpop.f32.mrb[116].mxu0  ;;  %v11707_v42 = vpop.f32.mrb[116].mxu1 }
 0x250   : > { %v11668_v2 = vpop.f32.mrb[117].mxu0  ;;  %v11708_v49 = vpop.f32.mrb[117].mxu1 }
 0x251   : > { %v9024_v50 = vadd.f32 %v11703_v16, %v8959_v62  ;;  %v8962_v10 = vadd.f32 %v11666_v38, %v8897_v59  ;;  %v11669_v26 = vadd.f32 %v11668_v2, %v11667_v41  ;;  %v11709_v51 = vadd.f32 %v11708_v49, %v11707_v42  ;;  %v11670_v11 = vpop.f32.mrb[118].mxu0  ;;  %v11710_v54 = vpop.f32.mrb[118].mxu1 }
 0x252   : > { %v11671_v48 = vpop.f32.mrb[119].mxu0  ;;  %v11711_v55 = vpop.f32.mrb[119].mxu1 }
 0x253   : > { %v9027_v57 = vadd.f32 %v11706_v27, %v8962_v10  ;;  %v8967_v7 = vadd.f32 %v11669_v26, %v8902_v63  ;;  %v11672_v61 = vadd.f32 %v11671_v48, %v11670_v11  ;;  %v11712_v45 = vadd.f32 %v11711_v55, %v11710_v54  ;;  %v11673_v60 = vpop.f32.mrb[120].mxu0  ;;  %v11713_v4 = vpop.f32.mrb[120].mxu1 }
 0x254   : > { %v11674_v47 = vpop.f32.mrb[121].mxu0  ;;  %v11714_v52 = vpop.f32.mrb[121].mxu1 }
 0x255   : > { %v9032_v15 = vadd.f32 %v11709_v51, %v8967_v7  ;;  %v8970_v17 = vadd.f32 %v11672_v61, %v8905_v9  ;;  %v11675_v37 = vadd.f32 %v11674_v47, %v11673_v60  ;;  %v11715_v21 = vadd.f32 %v11714_v52, %v11713_v4  ;;  %v11676_v32 = vpop.f32.mrb[122].mxu0  ;;  %v11716_v59 = vpop.f32.mrb[122].mxu1 }
 0x256   : > { %v11677_v5 = vpop.f32.mrb[123].mxu0  ;;  %v11717_v33 = vpop.f32.mrb[123].mxu1 }
 0x257   : > { %v9035_v46 = vadd.f32 %v11712_v45, %v8970_v17  ;;  %v8975_v20 = vadd.f32 %v11675_v37, %v8910_v13  ;;  %v11678_v12 = vadd.f32 %v11677_v5, %v11676_v32  ;;  %v11718_v1 = vadd.f32 %v11717_v33, %v11716_v59  ;;  %v11679_v0 = vpop.f32.mrb[124].mxu0  ;;  %v11719_v63 = vpop.f32.mrb[124].mxu1 }
 0x258   : > { %v11680_v6 = vpop.f32.mrb[125].mxu0  ;;  %v11720_v53 = vpop.f32.mrb[125].mxu1 }
 0x259   : > { %v9040_v19 = vadd.f32 %v11715_v21, %v8975_v20  ;;  %v8978_v31 = vadd.f32 %v11678_v12, %v8913_v22  ;;  %v11681_v14 = vadd.f32 %v11680_v6, %v11679_v0  ;;  %v11721_v18 = vadd.f32 %v11720_v53, %v11719_v63  ;;  %v11682_v58 = vpop.f32.mrb[126].mxu0  ;;  %v11722_v9 = vpop.f32.mrb[126].mxu1 }
 0x25a   : > { %v11683_v8 = vpop.f32.mrb[127].mxu0  ;;  %v11723_v35 = vpop.f32.mrb[127].mxu1 }
 0x25b   : > { %v9043_v24 = vadd.f32 %v11718_v1, %v8978_v31  ;;  %v8983_v25 = vadd.f32 %v11681_v14, %v8918_v29  ;;  %v11684_v43 = vadd.f32 %v11683_v8, %v11682_v58  ;;  %v11724_v34 = vadd.f32 %v11723_v35, %v11722_v9  ;;  %v11741_v40 = vpop.f32.mrb[128].mxu0  ;;  %v11781_v13 = vpop.f32.mrb[128].mxu1 }
 0x25c   : > { %v11742_v30 = vpop.f32.mrb[129].mxu0  ;;  %v11782_v28 = vpop.f32.mrb[129].mxu1 }
 0x25d   : > { %v9048_v44 = vadd.f32 %v11721_v18, %v8983_v25  ;;  %v8986_v16 = vadd.f32 %v11684_v43, %v8921_v39  ;;  %v11743_v56 = vadd.f32 %v11742_v30, %v11741_v40  ;;  %v11783_v23 = vadd.f32 %v11782_v28, %v11781_v13  ;;  %v11744_v36 = vpop.f32.mrb[130].mxu0  ;;  %v11784_v22 = vpop.f32.mrb[130].mxu1 }
 0x25e   : > { %v11745_v3 = vpop.f32.mrb[131].mxu0  ;;  %v11785_v62 = vpop.f32.mrb[131].mxu1 }
 0x25f   : > { %v9051_v38 = vadd.f32 %v11724_v34, %v8986_v16  ;;  %v9089_v27 = vadd.f32 %v11743_v56, %v9024_v50  ;;  %v11746_v41 = vadd.f32 %v11745_v3, %v11744_v36  ;;  %v11786_v42 = vadd.f32 %v11785_v62, %v11784_v22  ;;  %v11787_v29 = vpop.f32.mrb[132].mxu1 }
 0x260   : > { %v11747_v2 = vpop.f32.mrb[132].mxu0  ;;  %v11788_v10 = vpop.f32.mrb[133].mxu1 }
 0x261   : > { %v11748_v49 = vpop.f32.mrb[133].mxu0  ;;  %v9154_v26 = vadd.f32 %v11783_v23, %v9089_v27  ;;  %v9092_v51 = vadd.f32 %v11746_v41, %v9027_v57  ;;  %v11789_v54 = vadd.f32 %v11788_v10, %v11787_v29  ;;  %v11790_v39 = vpop.f32.mrb[134].mxu1 }
 0x262   : > { %v11749_v11 = vadd.f32 %v11748_v49, %v11747_v2  ;;  %v11750_v48 = vpop.f32.mrb[134].mxu0  ;;  %v11791_v7 = vpop.f32.mrb[135].mxu1 }
 0x263   : > { %v11751_v55 = vpop.f32.mrb[135].mxu0  ;;  %v9157_v61 = vadd.f32 %v11786_v42, %v9092_v51  ;;  %v11792_v4 = vadd.f32 %v11791_v7, %v11790_v39 }
 0x264   : > { %v9097_v45 = vadd.f32 %v11749_v11, %v9032_v15  ;;  %v11752_v60 = vadd.f32 %v11751_v55, %v11750_v48 }
 0x266   : > { %v9162_v37 = vadd.f32 %v11789_v54, %v9097_v45  ;;  %v9100_v21 = vadd.f32 %v11752_v60, %v9035_v46 }
 0x268   : > { %v9165_v12 = vadd.f32 %v11792_v4, %v9100_v21 }
 0x26b   : > { %v11793_v50 = vpop.f32.mrb[136].mxu1 }
 0x26c   : > { %v11794_v17 = vpop.f32.mrb[137].mxu1 }
 0x26d   : > { %v11753_v47 = vpop.f32.mrb[136].mxu0  ;;  %v11795_v59 = vadd.f32 %v11794_v17, %v11793_v50  ;;  %v11796_v57 = vpop.f32.mrb[138].mxu1 }
 0x26e   : > { %v11754_v52 = vpop.f32.mrb[137].mxu0  ;;  %v11797_v20 = vpop.f32.mrb[139].mxu1 }
 0x26f   : > { %v11755_v32 = vadd.f32 %v11754_v52, %v11753_v47  ;;  %v11756_v5 = vpop.f32.mrb[138].mxu0  ;;  %v11798_v63 = vadd.f32 %v11797_v20, %v11796_v57 }
 0x270   : > { %v11757_v33 = vpop.f32.mrb[139].mxu0 }
 0x271   : > { %v9105_v1 = vadd.f32 %v11755_v32, %v9040_v19  ;;  %v11758_v0 = vadd.f32 %v11757_v33, %v11756_v5 }
 0x273   : > { %v9170_v14 = vadd.f32 %v11795_v59, %v9105_v1  ;;  %v9108_v18 = vadd.f32 %v11758_v0, %v9043_v24 }
 0x275   : > { %v9173_v43 = vadd.f32 %v11798_v63, %v9108_v18 }
 0x278   : > { %v11799_v15 = vpop.f32.mrb[140].mxu1 }
 0x279   : > { %v11800_v31 = vpop.f32.mrb[141].mxu1 }
 0x27a   : > { %v11759_v6 = vpop.f32.mrb[140].mxu0  ;;  %v11801_v9 = vadd.f32 %v11800_v31, %v11799_v15  ;;  %v11802_v46 = vpop.f32.mrb[142].mxu1 }
 0x27b   : > { %v11760_v53 = vpop.f32.mrb[141].mxu0  ;;  %v11803_v25 = vpop.f32.mrb[143].mxu1 }
 0x27c   : > { %v11761_v58 = vadd.f32 %v11760_v53, %v11759_v6  ;;  %v11762_v8 = vpop.f32.mrb[142].mxu0  ;;  %v11804_v13 = vadd.f32 %v11803_v25, %v11802_v46 }
 0x27d   : > { %v11763_v35 = vpop.f32.mrb[143].mxu0 }
 0x27e   : > { %v9113_v34 = vadd.f32 %v11761_v58, %v9048_v44  ;;  %v11764_v40 = vadd.f32 %v11763_v35, %v11762_v8 }
 0x280   : > { %v9178_v56 = vadd.f32 %v11801_v9, %v9113_v34  ;;  %v9116_v23 = vadd.f32 %v11764_v40, %v9051_v38 }
 0x282   : > { %v11821_v30 = vpop.f32.mrb[144].mxu0  ;;  %v9181_v41 = vadd.f32 %v11804_v13, %v9116_v23 }
 0x283   : > { %v11822_v28 = vpop.f32.mrb[145].mxu0 }
 0x284   : > { %v11823_v36 = vadd.f32 %v11822_v28, %v11821_v30  ;;  %v11824_v3 = vpop.f32.mrb[146].mxu0 }
 0x285   : > { %v11825_v62 = vpop.f32.mrb[147].mxu0 }
 0x286   : > { %v9219_v42 = vadd.f32 %v11823_v36, %v9154_v26  ;;  %v11826_v2 = vadd.f32 %v11825_v62, %v11824_v3 }
 0x287   : > { %v11861_v19 = vpop.f32.mrb[144].mxu1 }
 0x288   : > { %v11862_v16 = vpop.f32.mrb[145].mxu1  ;;  %v9222_v54 = vadd.f32 %v11826_v2, %v9157_v61 }
 0x289   : > { %v11863_v22 = vadd.f32 %v11862_v16, %v11861_v19  ;;  %v11864_v24 = vpop.f32.mrb[146].mxu1 }
 0x28a   : > { %v11865_v27 = vpop.f32.mrb[147].mxu1  ;;  %v11827_v49 = vpop.f32.mrb[148].mxu0 }
 0x28b   : > { %v11866_v29 = vadd.f32 %v11865_v27, %v11864_v24  ;;  %v11828_v10 = vpop.f32.mrb[149].mxu0  ;;  %v9284_v11 = vadd.f32 %v11863_v22, %v9219_v42 }
 0x28c   : > { %v11829_v48 = vadd.f32 %v11828_v10, %v11827_v49  ;;  %v11830_v55 = vpop.f32.mrb[150].mxu0 }
 0x28d   : > { %v11831_v7 = vpop.f32.mrb[151].mxu0  ;;  %v9287_v60 = vadd.f32 %v11866_v29, %v9222_v54 }
 0x28e   : > { %v9227_v4 = vadd.f32 %v11829_v48, %v9162_v37  ;;  %v11832_v47 = vadd.f32 %v11831_v7, %v11830_v55 }
 0x290   : > { %v9230_v21 = vadd.f32 %v11832_v47, %v9165_v12 }
 0x292   : > { %v11867_v44 = vpop.f32.mrb[148].mxu1  ;;  %v11833_v52 = vpop.f32.mrb[152].mxu0 }
 0x293   : > { %v11868_v51 = vpop.f32.mrb[149].mxu1  ;;  %v11834_v26 = vpop.f32.mrb[153].mxu0 }
 0x294   : > { %v11869_v39 = vadd.f32 %v11868_v51, %v11867_v44  ;;  %v11870_v38 = vpop.f32.mrb[150].mxu1  ;;  %v11835_v32 = vadd.f32 %v11834_v26, %v11833_v52  ;;  %v11836_v59 = vpop.f32.mrb[154].mxu0 }
 0x295   : > { %v11871_v45 = vpop.f32.mrb[151].mxu1  ;;  %v11837_v5 = vpop.f32.mrb[155].mxu0 }
 0x296   : > { %v11872_v50 = vadd.f32 %v11871_v45, %v11870_v38  ;;  %v9292_v17 = vadd.f32 %v11869_v39, %v9227_v4  ;;  %v9235_v61 = vadd.f32 %v11835_v32, %v9170_v14  ;;  %v11838_v20 = vadd.f32 %v11837_v5, %v11836_v59 }
 0x298   : > { %v9295_v57 = vadd.f32 %v11872_v50, %v9230_v21  ;;  %v9238_v6 = vadd.f32 %v11838_v20, %v9173_v43 }
 0x29a   : > { %v11839_v31 = vpop.f32.mrb[156].mxu0 }
 0x29b   : > { %v11840_v58 = vpop.f32.mrb[157].mxu0 }
 0x29c   : > { %v11841_v9 = vadd.f32 %v11840_v58, %v11839_v31  ;;  %v11842_v8 = vpop.f32.mrb[158].mxu0 }
 0x29d   : > { %v11843_v12 = vpop.f32.mrb[159].mxu0 }
 0x29e   : > { %v11873_v33 = vpop.f32.mrb[152].mxu1  ;;  %v9243_v46 = vadd.f32 %v11841_v9, %v9178_v56  ;;  %v11844_v35 = vadd.f32 %v11843_v12, %v11842_v8 }
 0x29f   : > { %v11874_v1 = vpop.f32.mrb[153].mxu1 }
 0x2a0   : > { %v11875_v0 = vadd.f32 %v11874_v1, %v11873_v33  ;;  %v11876_v63 = vpop.f32.mrb[154].mxu1  ;;  %v9246_v25 = vadd.f32 %v11844_v35, %v9181_v41 }
 0x2a1   : > { %v11877_v15 = vpop.f32.mrb[155].mxu1 }
 0x2a2   : > { %v9300_v53 = vadd.f32 %v11875_v0, %v9235_v61  ;;  %v11878_v37 = vadd.f32 %v11877_v15, %v11876_v63 }
 0x2a4   : > { %v9303_v18 = vadd.f32 %v11878_v37, %v9238_v6 }
 0x2a9   : > { %v11879_v34 = vpop.f32.mrb[156].mxu1 }
 0x2aa   : > { %v11880_v40 = vpop.f32.mrb[157].mxu1 }
 0x2ab   : > { %v11881_v14 = vadd.f32 %v11880_v40, %v11879_v34  ;;  %v11882_v13 = vpop.f32.mrb[158].mxu1 }
 0x2ac   : > { %v11883_v30 = vpop.f32.mrb[159].mxu1 }
 0x2ad   : > { %v9308_v19 = vadd.f32 %v11881_v14, %v9243_v46  ;;  %v11884_v28 = vadd.f32 %v11883_v30, %v11882_v13 }
 0x2af   : > { %v15176_v43 = vadd.f32 %v11884_v28, %v9246_v25 }
 0x2b1   : > { %v11941_v16 = vpop.f32.mrb[160].mxu1 }
 0x2b2   : > { %v11942_v23 = vpop.f32.mrb[161].mxu1 }
 0x2b3   : > { %v11943_v36 = vadd.f32 %v11942_v23, %v11941_v16  ;;  %v11944_v22 = vpop.f32.mrb[162].mxu1  ;;  %v11901_v62 = vpop.f32.mrb[160].mxu0 }
 0x2b4   : > { %v11945_v3 = vpop.f32.mrb[163].mxu1  ;;  %v11902_v27 = vpop.f32.mrb[161].mxu0 }
 0x2b5   : > { %v11946_v24 = vadd.f32 %v11945_v3, %v11944_v22  ;;  %v11903_v56 = vadd.f32 %v11902_v27, %v11901_v62  ;;  %v11904_v42 = vpop.f32.mrb[162].mxu0 }
 0x2b6   : > { %v11905_v41 = vpop.f32.mrb[163].mxu0 }
 0x2b7   : > { %v9349_v2 = vadd.f32 %v11903_v56, %v9284_v11  ;;  %v11906_v29 = vadd.f32 %v11905_v41, %v11904_v42 }
 0x2b9   : > { %v9414_v49 = vadd.f32 %v11943_v36, %v9349_v2  ;;  %v9352_v44 = vadd.f32 %v11906_v29, %v9287_v60  ;;  %v11947_v51 = vpop.f32.mrb[164].mxu1 }
 0x2ba   : > { %v11948_v54 = vpop.f32.mrb[165].mxu1 }
 0x2bb   : > { %v9417_v10 = vadd.f32 %v11946_v24, %v9352_v44  ;;  %v11949_v48 = vadd.f32 %v11948_v54, %v11947_v51  ;;  %v11950_v39 = vpop.f32.mrb[166].mxu1 }
 0x2bc   : > { %v11951_v55 = vpop.f32.mrb[167].mxu1 }
 0x2bd   : > { %v11952_v38 = vadd.f32 %v11951_v55, %v11950_v39  ;;  %v11907_v7 = vpop.f32.mrb[164].mxu0 }
 0x2be   : > { %v11908_v45 = vpop.f32.mrb[165].mxu0 }
 0x2bf   : > { %v11909_v4 = vadd.f32 %v11908_v45, %v11907_v7  ;;  %v11910_v47 = vpop.f32.mrb[166].mxu0 }
 0x2c0   : > { %v11911_v50 = vpop.f32.mrb[167].mxu0 }
 0x2c1   : > { %v9357_v52 = vadd.f32 %v11909_v4, %v9292_v17  ;;  %v11912_v26 = vadd.f32 %v11911_v50, %v11910_v47  ;;  %v11953_v59 = vpop.f32.mrb[168].mxu1 }
 0x2c2   : > { %v11954_v5 = vpop.f32.mrb[169].mxu1 }
 0x2c3   : > { %v9422_v21 = vadd.f32 %v11949_v48, %v9357_v52  ;;  %v9360_v32 = vadd.f32 %v11912_v26, %v9295_v57  ;;  %v11955_v60 = vadd.f32 %v11954_v5, %v11953_v59  ;;  %v11956_v33 = vpop.f32.mrb[170].mxu1 }
 0x2c4   : > { %v11957_v61 = vpop.f32.mrb[171].mxu1 }
 0x2c5   : > { %v9425_v11 = vadd.f32 %v11952_v38, %v9360_v32  ;;  %v11958_v20 = vadd.f32 %v11957_v61, %v11956_v33 }
 0x2c6   : > { %v11913_v1 = vpop.f32.mrb[168].mxu0 }
 0x2c7   : > { %v11914_v0 = vpop.f32.mrb[169].mxu0 }
 0x2c8   : > { %v11915_v63 = vadd.f32 %v11914_v0, %v11913_v1  ;;  %v11916_v6 = vpop.f32.mrb[170].mxu0 }
 0x2c9   : > { %v11917_v15 = vpop.f32.mrb[171].mxu0  ;;  %v11959_v8 = vpop.f32.mrb[172].mxu1 }
 0x2ca   : > { %v9365_v37 = vadd.f32 %v11915_v63, %v9300_v53  ;;  %v11918_v31 = vadd.f32 %v11917_v15, %v11916_v6  ;;  %v11960_v12 = vpop.f32.mrb[173].mxu1 }
 0x2cb   : > { %v11961_v57 = vadd.f32 %v11960_v12, %v11959_v8  ;;  %v11962_v46 = vpop.f32.mrb[174].mxu1 }
 0x2cc   : > { %v9430_v58 = vadd.f32 %v11955_v60, %v9365_v37  ;;  %v9368_v9 = vadd.f32 %v11918_v31, %v9303_v18  ;;  %v11963_v35 = vpop.f32.mrb[175].mxu1 }
 0x2cd   : > { %v11964_v25 = vadd.f32 %v11963_v35, %v11962_v46 }
 0x2ce   : > { %v9433_v17 = vadd.f32 %v11958_v20, %v9368_v9 }
 0x2cf   : > { %v11919_v34 = vpop.f32.mrb[172].mxu0 }
 0x2d0   : > { %v11920_v40 = vpop.f32.mrb[173].mxu0 }
 0x2d1   : > { %v11921_v14 = vadd.f32 %v11920_v40, %v11919_v34  ;;  %v11922_v13 = vpop.f32.mrb[174].mxu0 }
 0x2d2   : > { %v11923_v30 = vpop.f32.mrb[175].mxu0 }
 0x2d3   : > { %v9373_v28 = vadd.f32 %v11921_v14, %v9308_v19  ;;  %v11924_v16 = vadd.f32 %v11923_v30, %v11922_v13 }
 0x2d5   : > { %v9438_v23 = vadd.f32 %v11961_v57, %v9373_v28  ;;  %v9376_v53 = vadd.f32 %v11924_v16, %v15176_v43 }
 0x2d7   : > { %v9441_v36 = vadd.f32 %v11964_v25, %v9376_v53  ;;  %v11981_v22 = vpop.f32.mrb[176].mxu0 }
 0x2d8   : > { %v11982_v18 = vpop.f32.mrb[177].mxu0 }
 0x2d9   : > { %v11983_v3 = vadd.f32 %v11982_v18, %v11981_v22  ;;  %v11984_v24 = vpop.f32.mrb[178].mxu0 }
 0x2da   : > { %v11985_v62 = vpop.f32.mrb[179].mxu0 }
 0x2db   : > { %v9479_v27 = vadd.f32 %v11983_v3, %v9414_v49  ;;  %v11986_v56 = vadd.f32 %v11985_v62, %v11984_v24 }
 0x2dd   : > { %v9482_v42 = vadd.f32 %v11986_v56, %v9417_v10 }
 0x2df   : > { %v12021_v41 = vpop.f32.mrb[176].mxu1 }
 0x2e0   : > { %v12022_v2 = vpop.f32.mrb[177].mxu1 }
 0x2e1   : > { %v12023_v29 = vadd.f32 %v12022_v2, %v12021_v41  ;;  %v12024_v44 = vpop.f32.mrb[178].mxu1 }
 0x2e2   : > { %v12025_v51 = vpop.f32.mrb[179].mxu1 }
 0x2e3   : > { %v12026_v54 = vadd.f32 %v12025_v51, %v12024_v44  ;;  %v9544_v19 = vadd.f32 %v12023_v29, %v9479_v27 }
 0x2e5   : > { %v15179_v48 = vadd.f32 %v12026_v54, %v9482_v42 }
 0x2e6   : > { %v11987_v39 = vpop.f32.mrb[180].mxu0 }
 0x2e7   : > { %v11988_v43 = vpop.f32.mrb[181].mxu0 }
 0x2e8   : > { %v11989_v55 = vadd.f32 %v11988_v43, %v11987_v39  ;;  %v11990_v38 = vpop.f32.mrb[182].mxu0 }
 0x2e9   : > { %v11991_v7 = vpop.f32.mrb[183].mxu0 }
 0x2ea   : > { %v9487_v45 = vadd.f32 %v11989_v55, %v9422_v21  ;;  %v11992_v4 = vadd.f32 %v11991_v7, %v11990_v38 }
 0x2ec   : > { %v9490_v47 = vadd.f32 %v11992_v4, %v9425_v11 }
 0x2ef   : > { %v12027_v49 = vpop.f32.mrb[180].mxu1 }
 0x2f0   : > { %v12028_v50 = vpop.f32.mrb[181].mxu1 }
 0x2f1   : > { %v12029_v10 = vadd.f32 %v12028_v50, %v12027_v49  ;;  %v12030_v52 = vpop.f32.mrb[182].mxu1 }
 0x2f2   : > { %v12031_v26 = vpop.f32.mrb[183].mxu1 }
 0x2f3   : > { %v12032_v32 = vadd.f32 %v12031_v26, %v12030_v52  ;;  %v9552_v59 = vadd.f32 %v12029_v10, %v9487_v45 }
 0x2f5   : > { %v9555_v5 = vadd.f32 %v12032_v32, %v9490_v47 }
 0x2f7   : > { %v11993_v60 = vpop.f32.mrb[184].mxu0 }
 0x2f8   : > { %v11994_v33 = vpop.f32.mrb[185].mxu0 }
 0x2f9   : > { %v11995_v61 = vadd.f32 %v11994_v33, %v11993_v60  ;;  %v11996_v20 = vpop.f32.mrb[186].mxu0 }
 0x2fa   : > { %v11997_v1 = vpop.f32.mrb[187].mxu0 }
 0x2fb   : > { %v9495_v0 = vadd.f32 %v11995_v61, %v9430_v58  ;;  %v11998_v63 = vadd.f32 %v11997_v1, %v11996_v20 }
 0x2fd   : > { %v9498_v6 = vadd.f32 %v11998_v63, %v9433_v17 }
 0x2ff   : > { %v12033_v15 = vpop.f32.mrb[184].mxu1 }
 0x300   : > { %v12034_v21 = vpop.f32.mrb[185].mxu1 }
 0x301   : > { %v12035_v37 = vadd.f32 %v12034_v21, %v12033_v15  ;;  %v12036_v11 = vpop.f32.mrb[186].mxu1 }
 0x302   : > { %v12037_v31 = vpop.f32.mrb[187].mxu1 }
 0x303   : > { %v12038_v9 = vadd.f32 %v12037_v31, %v12036_v11  ;;  %v9560_v8 = vadd.f32 %v12035_v37, %v9495_v0 }
 0x305   : > { %v9563_v12 = vadd.f32 %v12038_v9, %v9498_v6 }
 0x308   : > { %v11999_v57 = vpop.f32.mrb[188].mxu0 }
 0x309   : > { %v12000_v46 = vpop.f32.mrb[189].mxu0 }
 0x30a   : > { %v12001_v35 = vadd.f32 %v12000_v46, %v11999_v57  ;;  %v12002_v25 = vpop.f32.mrb[190].mxu0 }
 0x30b   : > { %v12003_v34 = vpop.f32.mrb[191].mxu0 }
 0x30c   : > { %v9503_v40 = vadd.f32 %v12001_v35, %v9438_v23  ;;  %v12004_v14 = vadd.f32 %v12003_v34, %v12002_v25 }
 0x30e   : > { %v9506_v58 = vadd.f32 %v12004_v14, %v9441_v36 }
 0x310   : > { %v12039_v13 = vpop.f32.mrb[188].mxu1 }
 0x311   : > { %v12040_v17 = vpop.f32.mrb[189].mxu1 }
 0x312   : > { %v12041_v30 = vadd.f32 %v12040_v17, %v12039_v13  ;;  %v12042_v28 = vpop.f32.mrb[190].mxu1 }
 0x313   : > { %v12043_v16 = vpop.f32.mrb[191].mxu1 }
 0x314   : > { %v12044_v53 = vadd.f32 %v12043_v16, %v12042_v28  ;;  %v12075_v22 = vpop.f32.mrb[192].mxu0  ;;  %v9568_v18 = vadd.f32 %v12041_v30, %v9503_v40 }
 0x315   : > { %v9617_v3 = vadd.f32 %v12075_v22, %v9552_v59  ;;  %v9608_v24 = vpop.f32.mrb[193].mxu0 }
 0x316   : > { %v9609_v62 = vadd.f32 %v9608_v24, %v9544_v19  ;;  %v12076_v27 = vpop.f32.mrb[194].mxu0  ;;  %v9571_v56 = vadd.f32 %v12044_v53, %v9506_v58 }
 0x317   : > { %vm9641_vm6 = vcmp.gt.f32.partialorder %v9617_v3, 0.0  ;;  %v9649_v23 = vmul.f32 0.01, %v9617_v3  ;;  %v9620_v42 = vadd.f32 %v12076_v27, %v9555_v5  ;;  %v9611_v36 = vpop.f32.mrb[195].mxu0 }
 0x318   : > { %v12079_v41 = vpop.f32.mrb[192].mxu1  ;;  %vm9639_vm7 = vcmp.gt.f32.partialorder %v9609_v62, 0.0  ;;  %v9647_v2 = vmul.f32 0.01, %v9609_v62  ;;  %v9612_v29 = vadd.f32 %v9611_v36, %v15179_v48 }
 0x319   : > { %v9657_v44 = vsel %vm9641_vm6, %v9617_v3, %v9649_v23  ;;  %v9633_v51 = vadd.f32 %v12079_v41, %v9568_v18  ;;  %v9624_v54 = vpop.f32.mrb[193].mxu1  ;;  %vm9642_vm8 = vcmp.gt.f32.partialorder %v9620_v42, 0.0  ;;  %v9650_v39 = vmul.f32 0.01, %v9620_v42 }
 0x31a   : > { %9665 = vst [vmem:[%s15185_s27 + $0x10] sm:$0xff] %v9657_v44  ;;  %v9655_v19 = vsel %vm9639_vm7, %v9609_v62, %v9647_v2  ;;  %v9625_v43 = vadd.f32 %v9624_v54, %v9560_v8  ;;  %v12080_v55 = vpop.f32.mrb[194].mxu1  ;;  %vm9640_vm9 = vcmp.gt.f32.partialorder %v9612_v29, 0.0  ;;  %v9648_v38 = vmul.f32 0.01, %v9612_v29 }
 0x31b   : > { %vm9645_vm10 = vcmp.gt.f32.partialorder %v9633_v51, 0.0  ;;  %v9653_v48 = vmul.f32 0.01, %v9633_v51  ;;  %9663 = vst [vmem:[%s15185_s27] sm:$0xff] %v9655_v19  ;;  %v9658_v7 = vsel %vm9642_vm8, %v9620_v42, %v9650_v39  ;;  %v9636_v45 = vadd.f32 %v12080_v55, %v9571_v56  ;;  %v9627_v4 = vpop.f32.mrb[195].mxu1 }
 0x31c   : > { %vm9643_vm11 = vcmp.gt.f32.partialorder %v9625_v43, 0.0  ;;  %v9651_v47 = vmul.f32 0.01, %v9625_v43  ;;  %9666 = vst [vmem:[%s15185_s27 + $0x18] sm:$0xff] %v9658_v7  ;;  %v9656_v49 = vsel %vm9640_vm9, %v9612_v29, %v9648_v38  ;;  %v9628_v50 = vadd.f32 %v9627_v4, %v9563_v12 }
 0x31d   : > { %v9661_v10 = vsel %vm9645_vm10, %v9633_v51, %v9653_v48  ;;  %vm9646_vm12 = vcmp.gt.f32.partialorder %v9636_v45, 0.0  ;;  %v9654_v52 = vmul.f32 0.01, %v9636_v45  ;;  %9664 = vst [vmem:[%s15185_s27 + $0x8] sm:$0xff] %v9656_v49 }
 0x31e   : > { %9669 = vst [vmem:[%s15185_s27 + $0x30] sm:$0xff] %v9661_v10  ;;  %v9659_v26 = vsel %vm9643_vm11, %v9625_v43, %v9651_v47  ;;  %vm9644_vm13 = vcmp.gt.f32.partialorder %v9628_v50, 0.0  ;;  %v9652_v32 = vmul.f32 0.01, %v9628_v50 }
 0x31f   : > { %9667 = vst [vmem:[%s15185_s27 + $0x20] sm:$0xff] %v9659_v26  ;;  %v9662_v59 = vsel %vm9646_vm12, %v9636_v45, %v9654_v52 }
 0x320   : > { %9670 = vst [vmem:[%s15185_s27 + $0x38] sm:$0xff] %v9662_v59  ;;  %v9660_v5 = vsel %vm9644_vm13, %v9628_v50, %v9652_v32 }
 0x321   : > { %9668 = vst [vmem:[%s15185_s27 + $0x28] sm:$0xff] %v9660_v5 }
 0x322   : > { %12644 = shalt.err (!%p12641_p5)
}
 0x323   : > { %s12645_s16 = scalar_lea.hbm %s15197_s3, 1024  ;;  %s12649_s23 = scalar_lea.hbm %s15254_s2, 2048 }
 0x324   : > { %p12646_p6 = scmp.ne.s32.totalorder %s15197_s3, %s12645_s16  ;;  %p12650_p10 = scmp.lt.u32.totalorder %s15197_s3, %s15254_s2 }
 0x325   : > { %p12651_p11 = scmp.lt.u32.totalorder %s12649_s23, %s12645_s16  ;;  %p12653_p13 = scmp.lt.u32.totalorder %s12645_s16, %s15197_s3 }
 0x326   : > { %p12647_p7 = pnand %p12646_p6, %p12769_p4 }
 0x327   : > { %p12652_p12 = por %p12651_p11, %p12650_p10 }
 0x328   : > { %p12648_p9 = pneg %p12647_p7 }
 0x329   : > { %p12654_p0 = por %p12653_p13, %p12652_p12 }
 0x32b   : > { %p12655_p1 = pnand %p12654_p0, %p12648_p9 }
 0x32d   : > { %12658 = shalt.err (!%p12655_p1)
}
 0x32e   : > { %s12712_s7 = smov 128   ;;  %s12713_s26 = smov 8  }
 0x32f   : > { %12098 = dma.vmem_to_hbm [thread:$0]  (%p12769_p4), %s15199_s29, 1024, %s15197_s3, %s15206_s4, %s12712_s7, %s12712_s7, %s12713_s26  }
 0x330 PF: > { %p12104_p2 = scmp.ge.s32.totalorder %s12709_s14, 2  ;;  %s9702_s27 = sand.u32 1, %s12689_s9  }
 0x331   : > { %s9703_s28 = scalar_lea.sflag [#allocation4], %s9702_s27 }
 0x332   : > { %p12101_p3 = pnand %p12104_p2, %p12776_p8 }
 0x334   : > { %12684 = dma.done.wait (!%p12101_p3), %s9703_s28, 1024  }
 0x335   : > { %12686 = vsyncadd (!%p12101_p3), %s9703_s28, 4294966272  ;;  %s15_s14 = sadd.s32 1, %s12709_s14   ;;  %s15261_s9 = smov %s12693_s10 }
 0x336   : > { %p12_p5 = scmp.ge.s32.totalorder %s15_s14, 4   ;;  %s15262_s10 = smov %s12697_s11 }
 0x337   : > { %s15263_s11 = smov %s12782_s22  ;;  %s15264_s12 = smov %s12705_s13 }
 0x338   : > { %s15265_s13 = smov %s15267_s17  ;;  %14 = sbr.rel (!%p12_p5) target bundleno = 4 (0x4), region = 84 }
 0x33f   :  { %9708 = vsyncpa [#allocation4], 1 }
 0x340   :  { %9710 = vsyncpa [#allocation4 + $0x1], 1 }

</bundles_post_ra>
